<compile_context>
chip_gen: v6e
topology: v6e:2x2x1
jax: 0.10.0
libtpu: 0.0.40
codegen_flags: <defaults>
</compile_context>

<pallas_src>
import jax
import jax.numpy as jnp
from jax import lax
from jax.experimental import pallas as pl
from jax.experimental.pallas import tpu as pltpu

IMG = 9                        # input spatial size implied by fc1 in_features
C1_OUT, C2_OUT = 32, 64
H1, H2 = IMG - 2, IMG - 4      # 7, 5
D_IN = 1 * IMG * IMG           # 81
D1 = C1_OUT * H1 * H1          # 1568  (conv1 activation, NCHW-flat)
D2 = C2_OUT * H2 * H2          # 1600  (conv2 activation, torch .view order)
D_FC1 = 128
D_OUT = 10

# Lane-dense padded sizes (multiples of 128); padding is zeros folded into the
# prepared weights, so it is mathematically inert.
D_IN_PAD = 128
D1_PAD = 1664
D2_PAD = 1664
D_OUT_PAD = 128


# ----------------------------------------------------------------------------
# The single fused kernel: 4 bf16 MXU matmuls (f32 accumulation) + f32
# bias/ReLU on one batch tile.  Only the final padded logits hit HBM
# (lane-dense, unmasked vst).
# ----------------------------------------------------------------------------
def _fused_cnn_kernel(x_ref, w1_ref, b1_ref, w2_ref, b2_ref,
                      w3_ref, b3_ref, w4_ref, b4_ref, o_ref):
    bf16 = jnp.bfloat16
    h = jnp.dot(x_ref[...].astype(bf16), w1_ref[...],
                preferred_element_type=jnp.float32)
    h = jnp.maximum(h + b1_ref[...], 0.0)                 # conv1 + relu
    h = jnp.dot(h.astype(bf16), w2_ref[...],
                preferred_element_type=jnp.float32)
    h = jnp.maximum(h + b2_ref[...], 0.0)                 # conv2 + relu
    h = jnp.dot(h.astype(bf16), w3_ref[...],
                preferred_element_type=jnp.float32)
    h = jnp.maximum(h + b3_ref[...], 0.0)                 # fc1 + relu
    h = jnp.dot(h.astype(bf16), w4_ref[...],
                preferred_element_type=jnp.float32)
    o_ref[...] = (h + b4_ref[...]).astype(o_ref.dtype)    # fc2 (128-lane pad)


# ----------------------------------------------------------------------------
# One-time weight preprocessing (NOT in the forward hot path).
# Folds each valid 3x3 conv into a dense matrix acting on NCHW-flattened
# activations, folds the flatten order / fc transposes / zero lane-padding in,
# and casts the matmul weights to bf16.
# ----------------------------------------------------------------------------
def _conv_to_dense(w_oihw, hw):
    """Dense M s.t. (NCHW-flat x) @ M == NCHW-flat VALID conv(x, w)."""
    cout, cin, kh, kw = w_oihw.shape
    ho, wo = hw - kh + 1, hw - kw + 1
    co, ci, dy, dx, oi, oj = jnp.meshgrid(
        jnp.arange(cout), jnp.arange(cin), jnp.arange(kh), jnp.arange(kw),
        jnp.arange(ho), jnp.arange(wo), indexing="ij")
    rows = (ci * hw + (oi + dy)) * hw + (oj + dx)      # input index  (ci, y, x)
    cols = (co * ho + oi) * wo + oj                    # output index (co, oi, oj)
    vals = jnp.broadcast_to(w_oihw[:, :, :, :, None, None], co.shape)
    dense = jnp.zeros((cin * hw * hw, cout * ho * wo), jnp.float32)
    return dense.at[rows.ravel(), cols.ravel()].set(vals.ravel())


def prepare_params(p):
    # conv1 dense matrix, padded 81->128 rows and 1568->1664 cols with zeros.
    w1d = jnp.zeros((D_IN_PAD, D1_PAD), jnp.float32)
    w1d = w1d.at[:D_IN, :D1].set(_conv_to_dense(p["w1"], IMG))
    b1d = jnp.zeros((1, D1_PAD), jnp.float32)
    b1d = b1d.at[0, :D1].set(jnp.repeat(p["b1"], H1 * H1))

    # conv2 dense matrix, padded 1568->1664 rows and 1600->1664 cols.
    w2d = jnp.zeros((D1_PAD, D2_PAD), jnp.float32)
    w2d = w2d.at[:D1, :D2].set(_conv_to_dense(p["w2"], H1))
    b2d = jnp.zeros((1, D2_PAD), jnp.float32)
    b2d = b2d.at[0, :D2].set(jnp.repeat(p["b2"], H2 * H2))

    # fc1: torch y = x @ W.T + b, rows padded 1600->1664.
    wfc1 = jnp.zeros((D2_PAD, D_FC1), jnp.float32)
    wfc1 = wfc1.at[:D2, :].set(p["wfc1"].T)
    bfc1 = p["bfc1"].reshape(1, D_FC1).astype(jnp.float32)

    # fc2: columns padded 10->128 (lane-dense logits).
    wfc2 = jnp.zeros((D_FC1, D_OUT_PAD), jnp.float32)
    wfc2 = wfc2.at[:, :D_OUT].set(p["wfc2"].T)
    bfc2 = jnp.zeros((1, D_OUT_PAD), jnp.float32)
    bfc2 = bfc2.at[0, :D_OUT].set(p["bfc2"])

    bf16 = jnp.bfloat16
    return {
        "w1d": w1d.astype(bf16), "b1d": b1d,     # (128, 1664) bf16
        "w2d": w2d.astype(bf16), "b2d": b2d,     # (1664, 1664) bf16
        "wfc1": wfc1.astype(bf16), "bfc1": bfc1,  # (1664, 128) bf16
        "wfc2": wfc2.astype(bf16), "bfc2": bfc2,  # (128, 128) bf16
    }


# ----------------------------------------------------------------------------
# Forward pass: one fused pallas_call, grid over batch tiles.
# ----------------------------------------------------------------------------
def cnn_forward(x_nchw, prep, *, tile_b=512):
    N = x_nchw.shape[0]
    x_flat = x_nchw.reshape(N, D_IN).astype(jnp.float32)   # torch NCHW flatten
    # Lane-pad 81 -> 128 so each input row is a lane-dense, 512-byte DMA.
    x_flat = jnp.pad(x_flat, ((0, 0), (0, D_IN_PAD - D_IN)))

    # Batch tiling: rows padded to a multiple of 8; tile rebalanced so that
    # moderately sized batches still get >= 2 grid steps (keeps both v7x
    # TensorCores busy under "parallel" semantics) with minimal padding.
    n8 = ((N + 7) // 8) * 8
    min_steps = 2 if n8 >= 64 else 1
    steps = max(min_steps, pl.cdiv(n8, tile_b))
    tb = ((pl.cdiv(n8, steps) + 7) // 8) * 8
    n_pad = steps * tb
    if n_pad != N:
        x_flat = jnp.pad(x_flat, ((0, n_pad - N), (0, 0)))

    batch = lambda i: (i, 0)
    full = lambda i: (0, 0)
    const = pl.Buffered(1)   # constant blocks: DMA once, single-buffer

    flops = 2 * n_pad * (D_IN_PAD * D1_PAD + D1_PAD * D2_PAD
                         + D2_PAD * D_FC1 + D_FC1 * D_OUT_PAD)
    bytes_accessed = (
        4 * n_pad * (D_IN_PAD + D_OUT_PAD)                       # f32 act I/O
        + 2 * (D_IN_PAD * D1_PAD + D1_PAD * D2_PAD
               + D2_PAD * D_FC1 + D_FC1 * D_OUT_PAD)             # bf16 weights
        + 4 * (D1_PAD + D2_PAD + D_FC1 + D_OUT_PAD))             # f32 biases

    out = pl.pallas_call(
        _fused_cnn_kernel,
        out_shape=jax.ShapeDtypeStruct((n_pad, D_OUT_PAD), jnp.float32),
        grid=(steps,),
        in_specs=[
            pl.BlockSpec((tb, D_IN_PAD), batch),                  # input tile
            pl.BlockSpec((D_IN_PAD, D1_PAD), full, pipeline_mode=const),
            pl.BlockSpec((1, D1_PAD), full, pipeline_mode=const),
            pl.BlockSpec((D1_PAD, D2_PAD), full, pipeline_mode=const),
            pl.BlockSpec((1, D2_PAD), full, pipeline_mode=const),
            pl.BlockSpec((D2_PAD, D_FC1), full, pipeline_mode=const),
            pl.BlockSpec((1, D_FC1), full, pipeline_mode=const),
            pl.BlockSpec((D_FC1, D_OUT_PAD), full, pipeline_mode=const),
            pl.BlockSpec((1, D_OUT_PAD), full, pipeline_mode=const),
        ],
        out_specs=pl.BlockSpec((tb, D_OUT_PAD), batch),
        compiler_params=pltpu.CompilerParams(
            dimension_semantics=("parallel",),
            vmem_limit_bytes=48 * 1024 * 1024,   # fits v7x's 64 MiB VMEM
        ),
        cost_estimate=pl.CostEstimate(
            flops=flops, transcendentals=0, bytes_accessed=bytes_accessed),
    )(x_flat, prep["w1d"], prep["b1d"], prep["w2d"], prep["b2d"],
      prep["wfc1"], prep["bfc1"], prep["wfc2"], prep["bfc2"])

    return out[:N, :D_OUT]   # strip batch padding and lane padding


# ----------------------------------------------------------------------------
# Parameters (deterministic, PyTorch-default-style uniform init).
# ----------------------------------------------------------------------------
def init_params(key):
    ks = jax.random.split(key, 8)

    def u(k, shape, fan_in):
        bound = 1.0 / (fan_in ** 0.5)
        return jax.random.uniform(k, shape, jnp.float32, -bound, bound)

    return {
        "w1": u(ks[0], (32, 1, 3, 3), 1 * 3 * 3),
        "b1": u(ks[1], (32,), 1 * 3 * 3),
        "w2": u(ks[2], (64, 32, 3, 3), 32 * 3 * 3),
        "b2": u(ks[3], (64,), 32 * 3 * 3),
        "wfc1": u(ks[4], (128, 64 * 5 * 5), 64 * 5 * 5),
        "bfc1": u(ks[5], (128,), 64 * 5 * 5),
        "wfc2": u(ks[6], (10, 128), 128),
        "bfc2": u(ks[7], (10,), 128),
    }


# ----------------------------------------------------------------------------
# Pure-JAX f32 reference (correctness check only — not part of the kernel path).
# ----------------------------------------------------------------------------
def cnn_forward_ref(x_nchw, p):
    dn = ("NCHW", "OIHW", "NCHW")
    h = lax.conv_general_dilated(x_nchw, p["w1"], (1, 1), "VALID",
                                 dimension_numbers=dn)
    h = jax.nn.relu(h + p["b1"][None, :, None, None])
    h = lax.conv_general_dilated(h, p["w2"], (1, 1), "VALID",
                                 dimension_numbers=dn)
    h = jax.nn.relu(h + p["b2"][None, :, None, None])
    h = h.reshape(h.shape[0], -1)
    h = jax.nn.relu(h @ p["wfc1"].T + p["bfc1"])
    return h @ p["wfc2"].T + p["bfc2"]


if __name__ == "__main__":
    key = jax.random.PRNGKey(0)
    k_x, k_x2, k_p = jax.random.split(key, 3)

    params = init_params(k_p)
    prep = prepare_params(params)   # one-time weight preprocessing

    # 9x9 single-channel input is what the fc1 shape (64*5*5) implies.
    # Kernel uses bf16 MXU matmuls (f32 accumulation), so compare against the
    # f32 reference with a bf16-appropriate tolerance.
    x = jax.random.normal(k_x, (2, 1, IMG, IMG), dtype=jnp.float32)
    out = jax.block_until_ready(cnn_forward(x, prep))
    assert out.shape == (2, 10), out.shape
    ref = cnn_forward_ref(x, params)
    assert jnp.allclose(out, ref, rtol=5e-2, atol=5e-2), (
        "mismatch vs reference", float(jnp.max(jnp.abs(out - ref))))

    # Exercise the multi-step grid path (batch padding + 2 grid steps).
    x2 = jax.random.normal(k_x2, (70, 1, IMG, IMG), dtype=jnp.float32)
    out2 = jax.block_until_ready(cnn_forward(x2, prep))
    ref2 = cnn_forward_ref(x2, params)
    assert out2.shape == (70, 10), out2.shape
    assert jnp.allclose(out2, ref2, rtol=5e-2, atol=5e-2), (
        "mismatch vs reference (batched)", float(jnp.max(jnp.abs(out2 - ref2))))

    print("KERNEL_OK")
</pallas_src>

<mosaic_0001>
module attributes {stable_mosaic.version = 11 : i64} {
  func.func @_fused_cnn_kernel(%arg0: i32, %arg1: memref<8x128xf32, #tpu.memory_space<vmem>>, %arg2: memref<128x1664xbf16, #tpu.memory_space<vmem>>, %arg3: memref<1x1664xf32, #tpu.memory_space<vmem>>, %arg4: memref<1664x1664xbf16, #tpu.memory_space<vmem>>, %arg5: memref<1x1664xf32, #tpu.memory_space<vmem>>, %arg6: memref<1664x128xbf16, #tpu.memory_space<vmem>>, %arg7: memref<1x128xf32, #tpu.memory_space<vmem>>, %arg8: memref<128x128xbf16, #tpu.memory_space<vmem>>, %arg9: memref<1x128xf32, #tpu.memory_space<vmem>>, %arg10: memref<8x128xf32, #tpu.memory_space<vmem>>) attributes {dimension_semantics = [#tpu.dimension_semantics<parallel>], iteration_bounds = array<i64: 1>, scalar_prefetch = 0 : i64, scratch_operands = 0 : i64, tpu.core_type = #tpu.core_type<tc>, window_params = [{transform_indices = @transform_0, window_bounds = array<i64: 8, 128>}, {pipeline_mode = #tpu.pipeline_mode<synchronous>, transform_indices = @transform_1, window_bounds = array<i64: 128, 1664>}, {pipeline_mode = #tpu.pipeline_mode<synchronous>, transform_indices = @transform_2, window_bounds = array<i64: 1, 1664>}, {pipeline_mode = #tpu.pipeline_mode<synchronous>, transform_indices = @transform_3, window_bounds = array<i64: 1664, 1664>}, {pipeline_mode = #tpu.pipeline_mode<synchronous>, transform_indices = @transform_4, window_bounds = array<i64: 1, 1664>}, {pipeline_mode = #tpu.pipeline_mode<synchronous>, transform_indices = @transform_5, window_bounds = array<i64: 1664, 128>}, {pipeline_mode = #tpu.pipeline_mode<synchronous>, transform_indices = @transform_6, window_bounds = array<i64: 1, 128>}, {pipeline_mode = #tpu.pipeline_mode<synchronous>, transform_indices = @transform_7, window_bounds = array<i64: 128, 128>}, {pipeline_mode = #tpu.pipeline_mode<synchronous>, transform_indices = @transform_8, window_bounds = array<i64: 1, 128>}, {transform_indices = @transform_9, window_bounds = array<i64: 8, 128>}]} {
    %c0 = arith.constant 0 : index
    %c0_0 = arith.constant 0 : index
    %0 = vector.load %arg1[%c0, %c0_0] : memref<8x128xf32, #tpu.memory_space<vmem>>, vector<8x128xf32>
    %1 = arith.truncf %0 : vector<8x128xf32> to vector<8x128xbf16>
    %c0_1 = arith.constant 0 : index
    %c0_2 = arith.constant 0 : index
    %2 = vector.load %arg2[%c0_1, %c0_2] : memref<128x1664xbf16, #tpu.memory_space<vmem>>, vector<128x1664xbf16>
    %cst = arith.constant dense<0.000000e+00> : vector<8x1664xf32>
    %3 = tpu.matmul %1, %2, %cst {dimension_numbers = #tpu.dot_dimension_numbers<[1], [0], [0], [1], [0, 0, 1, 1], [], []>} : vector<8x128xbf16>, vector<128x1664xbf16>, vector<8x1664xf32> -> vector<8x1664xf32>
    %c0_3 = arith.constant 0 : index
    %c0_4 = arith.constant 0 : index
    %4 = vector.load %arg3[%c0_3, %c0_4] : memref<1x1664xf32, #tpu.memory_space<vmem>>, vector<1x1664xf32>
    %5 = vector.broadcast %4 : vector<1x1664xf32> to vector<8x1664xf32>
    %6 = arith.addf %3, %5 : vector<8x1664xf32>
    %cst_5 = arith.constant 0.000000e+00 : f32
    %7 = vector.broadcast %cst_5 : f32 to vector<8x1664xf32>
    %8 = arith.maximumf %6, %7 : vector<8x1664xf32>
    %9 = arith.truncf %8 : vector<8x1664xf32> to vector<8x1664xbf16>
    %c0_6 = arith.constant 0 : index
    %c0_7 = arith.constant 0 : index
    %10 = vector.load %arg4[%c0_6, %c0_7] : memref<1664x1664xbf16, #tpu.memory_space<vmem>>, vector<1664x1664xbf16>
    %cst_8 = arith.constant dense<0.000000e+00> : vector<8x1664xf32>
    %11 = tpu.matmul %9, %10, %cst_8 {dimension_numbers = #tpu.dot_dimension_numbers<[1], [0], [0], [1], [0, 0, 1, 1], [], []>} : vector<8x1664xbf16>, vector<1664x1664xbf16>, vector<8x1664xf32> -> vector<8x1664xf32>
    %c0_9 = arith.constant 0 : index
    %c0_10 = arith.constant 0 : index
    %12 = vector.load %arg5[%c0_9, %c0_10] : memref<1x1664xf32, #tpu.memory_space<vmem>>, vector<1x1664xf32>
    %13 = vector.broadcast %12 : vector<1x1664xf32> to vector<8x1664xf32>
    %14 = arith.addf %11, %13 : vector<8x1664xf32>
    %cst_11 = arith.constant 0.000000e+00 : f32
    %15 = vector.broadcast %cst_11 : f32 to vector<8x1664xf32>
    %16 = arith.maximumf %14, %15 : vector<8x1664xf32>
    %17 = arith.truncf %16 : vector<8x1664xf32> to vector<8x1664xbf16>
    %c0_12 = arith.constant 0 : index
    %c0_13 = arith.constant 0 : index
    %18 = vector.load %arg6[%c0_12, %c0_13] : memref<1664x128xbf16, #tpu.memory_space<vmem>>, vector<1664x128xbf16>
    %cst_14 = arith.constant dense<0.000000e+00> : vector<8x128xf32>
    %19 = tpu.matmul %17, %18, %cst_14 {dimension_numbers = #tpu.dot_dimension_numbers<[1], [0], [0], [1], [0, 0, 1, 1], [], []>} : vector<8x1664xbf16>, vector<1664x128xbf16>, vector<8x128xf32> -> vector<8x128xf32>
    %c0_15 = arith.constant 0 : index
    %c0_16 = arith.constant 0 : index
    %20 = vector.load %arg7[%c0_15, %c0_16] : memref<1x128xf32, #tpu.memory_space<vmem>>, vector<1x128xf32>
    %21 = vector.broadcast %20 : vector<1x128xf32> to vector<8x128xf32>
    %22 = arith.addf %19, %21 : vector<8x128xf32>
    %cst_17 = arith.constant 0.000000e+00 : f32
    %23 = vector.broadcast %cst_17 : f32 to vector<8x128xf32>
    %24 = arith.maximumf %22, %23 : vector<8x128xf32>
    %25 = arith.truncf %24 : vector<8x128xf32> to vector<8x128xbf16>
    %c0_18 = arith.constant 0 : index
    %c0_19 = arith.constant 0 : index
    %26 = vector.load %arg8[%c0_18, %c0_19] : memref<128x128xbf16, #tpu.memory_space<vmem>>, vector<128x128xbf16>
    %cst_20 = arith.constant dense<0.000000e+00> : vector<8x128xf32>
    %27 = tpu.matmul %25, %26, %cst_20 {dimension_numbers = #tpu.dot_dimension_numbers<[1], [0], [0], [1], [0, 0, 1, 1], [], []>} : vector<8x128xbf16>, vector<128x128xbf16>, vector<8x128xf32> -> vector<8x128xf32>
    %c0_21 = arith.constant 0 : index
    %c0_22 = arith.constant 0 : index
    %28 = vector.load %arg9[%c0_21, %c0_22] : memref<1x128xf32, #tpu.memory_space<vmem>>, vector<1x128xf32>
    %29 = vector.broadcast %28 : vector<1x128xf32> to vector<8x128xf32>
    %30 = arith.addf %27, %29 : vector<8x128xf32>
    %c0_23 = arith.constant 0 : index
    %c0_24 = arith.constant 0 : index
    %31 = vector.load %arg10[%c0_23, %c0_24] : memref<8x128xf32, #tpu.memory_space<vmem>>, vector<8x128xf32>
    tpu.vector_store %arg10[%c0_23, %c0_24], %30 {strides = array<i32>} : memref<8x128xf32, #tpu.memory_space<vmem>>, vector<8x128xf32>,
    return
  }
  func.func @transform_0(%arg0: i32) -> (i32, i32) {
    %c0_i32 = arith.constant 0 : i32
    %c0_i32_0 = arith.constant 0 : i32
    return %arg0, %c0_i32 : i32, i32
  }
  func.func @transform_1(%arg0: i32) -> (i32, i32) {
    %c0_i32 = arith.constant 0 : i32
    %c0_i32_0 = arith.constant 0 : i32
    %c0_i32_1 = arith.constant 0 : i32
    return %c0_i32, %c0_i32_0 : i32, i32
  }
  func.func @transform_2(%arg0: i32) -> (i32, i32) {
    %c0_i32 = arith.constant 0 : i32
    %c0_i32_0 = arith.constant 0 : i32
    %c0_i32_1 = arith.constant 0 : i32
    return %c0_i32, %c0_i32_0 : i32, i32
  }
  func.func @transform_3(%arg0: i32) -> (i32, i32) {
    %c0_i32 = arith.constant 0 : i32
    %c0_i32_0 = arith.constant 0 : i32
    %c0_i32_1 = arith.constant 0 : i32
    return %c0_i32, %c0_i32_0 : i32, i32
  }
  func.func @transform_4(%arg0: i32) -> (i32, i32) {
    %c0_i32 = arith.constant 0 : i32
    %c0_i32_0 = arith.constant 0 : i32
    %c0_i32_1 = arith.constant 0 : i32
    return %c0_i32, %c0_i32_0 : i32, i32
  }
  func.func @transform_5(%arg0: i32) -> (i32, i32) {
    %c0_i32 = arith.constant 0 : i32
    %c0_i32_0 = arith.constant 0 : i32
    %c0_i32_1 = arith.constant 0 : i32
    return %c0_i32, %c0_i32_0 : i32, i32
  }
  func.func @transform_6(%arg0: i32) -> (i32, i32) {
    %c0_i32 = arith.constant 0 : i32
    %c0_i32_0 = arith.constant 0 : i32
    %c0_i32_1 = arith.constant 0 : i32
    return %c0_i32, %c0_i32_0 : i32, i32
  }
  func.func @transform_7(%arg0: i32) -> (i32, i32) {
    %c0_i32 = arith.constant 0 : i32
    %c0_i32_0 = arith.constant 0 : i32
    %c0_i32_1 = arith.constant 0 : i32
    return %c0_i32, %c0_i32_0 : i32, i32
  }
  func.func @transform_8(%arg0: i32) -> (i32, i32) {
    %c0_i32 = arith.constant 0 : i32
    %c0_i32_0 = arith.constant 0 : i32
    %c0_i32_1 = arith.constant 0 : i32
    return %c0_i32, %c0_i32_0 : i32, i32
  }
  func.func @transform_9(%arg0: i32) -> (i32, i32) {
    %c0_i32 = arith.constant 0 : i32
    %c0_i32_0 = arith.constant 0 : i32
    return %arg0, %c0_i32 : i32, i32
  }
}

</mosaic_0001>

<bundles_post_ra>
// kernel: tpu_custom_call.1
= control target key start
LH: loop header
LB: loop body
LE: loop exit
PB: predicated region body
PF: predicated region fallthrough
CT: control target
= control target key end

     0   :  { %14 = vsyncpa [#allocation3], 0  ;;  %s17799_s0 = inlined_call_operand.hbm [shape: f32[8,128], index: 0, kind: input, shape index: {}]   ;;  %s17800_s1 = inlined_call_operand.hbm [shape: bf16[128,1664], index: 1, kind: input, shape index: {}]   ;;  %s17801_s2 = inlined_call_operand.hbm [shape: f32[1,1664], index: 2, kind: input, shape index: {}]   ;;  %s17802_s3 = inlined_call_operand.hbm [shape: bf16[1664,1664], index: 3, kind: input, shape index: {}]   ;;  %s17803_s4 = inlined_call_operand.hbm [shape: f32[1,1664], index: 4, kind: input, shape index: {}]   ;;  %s17804_s5 = inlined_call_operand.hbm [shape: bf16[1664,128], index: 5, kind: input, shape index: {}]   ;;  %s17805_s6 = inlined_call_operand.hbm [shape: f32[1,128], index: 6, kind: input, shape index: {}]   ;;  %s17806_s7 = inlined_call_operand.hbm [shape: bf16[128,128], index: 7, kind: input, shape index: {}]   ;;  %s17807_s8 = inlined_call_operand.hbm [shape: f32[1,128], index: 8, kind: input, shape index: {}]   ;;  %s17808_s9 = inlined_call_operand.hbm [shape: f32[8,128], index: 9, kind: output, shape index: {}]  }
   0x1   :  { %15 = vsyncpa [#allocation6], 0 }
   0x2   :  { %16 = vsyncpa [#allocation9], 0 }
   0x3   :  { %17 = vsyncpa [#allocation12], 0 }
   0x4   :  { %18 = vsyncpa [#allocation15], 0 }
   0x5   :  { %19 = vsyncpa [#allocation4], 0  ;;  %s17261_s30 = smov [#allocation5]  }
   0x6   :  { %s35_s10 = sshll.u32 %s17261_s30, 4  ;;  %s36_s10 = int_to_ptr.vmem [resolvable:$true] %s35_s10 }
   0x7   :  { %s17057_s11 = scalar_lea.vmem %s36_s10, 13312  ;;  %p17062_p1 = scmp.lt.s32.totalorder %s36_s10, %s36_s10 }
   0x8   :  { %p17058_p0 = scmp.ne.s32.totalorder %s36_s10, %s17057_s11  ;;  %p17063_p2 = scmp.lt.s32.totalorder %s17057_s11, %s17057_s11 }
   0xa   :  { %p17064_p3 = por %p17063_p2, %p17062_p1 }
   0xc   :  { %p17065_p4 = pnand %p17064_p3, %p17058_p0 }
   0xe   :  { %17068 = shalt.err (!%p17065_p4)
}
   0xf   :  { %s17262_s12 = smov 832   ;;  %s17263_s13 = smov 52  }
  0x10   :  { %41 = dma.hbm_to_vmem [thread:$0]  %s17800_s1, 13312, %s36_s10, [#allocation6], %s17262_s12, %s17262_s12, %s17263_s13  }
  0x11   :  { %s17264_s16 = smov [#allocation8]   ;;  %s17265_s18 = smov [#allocation11]  }
  0x12   :  { %s57_s17 = sshll.u32 %s17264_s16, 4  ;;  %s79_s19 = sshll.u32 %s17265_s18, 4  ;;  %s58_s17 = int_to_ptr.vmem [resolvable:$true] %s57_s17  ;;  %s80_s19 = int_to_ptr.vmem [resolvable:$true] %s79_s19 }
  0x13   :  { %s17077_s20 = scalar_lea.vmem %s58_s17, 173056  ;;  %p17082_p6 = scmp.lt.s32.totalorder %s58_s17, %s58_s17 }
  0x14   :  { %p17078_p5 = scmp.ne.s32.totalorder %s58_s17, %s17077_s20  ;;  %p17083_p7 = scmp.lt.s32.totalorder %s17077_s20, %s17077_s20 }
  0x16   :  { %p17084_p8 = por %p17083_p7, %p17082_p6 }
  0x18   :  { %p17085_p9 = pnand %p17084_p8, %p17078_p5 }
  0x1a   :  { %17088 = shalt.err (!%p17085_p9)
}
  0x1b   :  { %63 = dma.hbm_to_vmem [thread:$0]  %s17802_s3, 173056, %s58_s17, [#allocation9], %s17262_s12, %s17262_s12, %s17263_s13  }
  0x1c   :  { %s17097_s23 = scalar_lea.vmem %s80_s19, 13312  ;;  %p17102_p11 = scmp.lt.s32.totalorder %s80_s19, %s80_s19 }
  0x1d   :  { %p17098_p10 = scmp.ne.s32.totalorder %s80_s19, %s17097_s23  ;;  %p17103_p12 = scmp.lt.s32.totalorder %s17097_s23, %s17097_s23 }
  0x1f   :  { %p17104_p13 = por %p17103_p12, %p17102_p11 }
  0x21   :  { %p17105_p0 = pnand %p17104_p13, %p17098_p10 }
  0x23   :  { %17108 = shalt.err (!%p17105_p0)
}
  0x24   :  { %s17266_s1 = smov 64   ;;  %s17267_s24 = smov 4  }
  0x25   :  { %85 = dma.hbm_to_vmem [thread:$0]  %s17804_s5, 13312, %s80_s19, [#allocation12], %s17266_s1, %s17266_s1, %s17267_s24  }
  0x26   :  { %s17268_s27 = smov [#allocation14]   ;;  %s17269_s29 = smov [#allocation2]  }
  0x27   :  { %s101_s28 = sshll.u32 %s17268_s27, 4  ;;  %s26_s30 = sshll.u32 %s17269_s29, 4  ;;  %s102_s28 = int_to_ptr.vmem [resolvable:$true] %s101_s28  ;;  %s27_s30 = int_to_ptr.vmem [resolvable:$true] %s26_s30 }
  0x28   :  { %s17117_s3 = scalar_lea.vmem %s102_s28, 1024  ;;  %p17122_p2 = scmp.lt.s32.totalorder %s102_s28, %s102_s28 }
  0x29   :  { %p17118_p1 = scmp.ne.s32.totalorder %s102_s28, %s17117_s3  ;;  %p17123_p3 = scmp.lt.s32.totalorder %s17117_s3, %s17117_s3 }
  0x2b   :  { %p17124_p4 = por %p17123_p3, %p17122_p2 }
  0x2d   :  { %p17125_p5 = pnand %p17124_p4, %p17118_p1 }
  0x2f   :  { %17128 = shalt.err (!%p17125_p5)
}
  0x30   :  { %107 = dma.hbm_to_vmem [thread:$0]  %s17806_s7, 1024, %s102_s28, [#allocation15], %s17266_s1, %s17266_s1, %s17267_s24  }
  0x31   :  { %s17137_s12 = scalar_lea.vmem %s27_s30, 128  ;;  %p17142_p7 = scmp.lt.s32.totalorder %s27_s30, %s27_s30 }
  0x32   :  { %p17138_p6 = scmp.ne.s32.totalorder %s27_s30, %s17137_s12  ;;  %p17143_p8 = scmp.lt.s32.totalorder %s17137_s12, %s17137_s12 }
  0x34   :  { %p17144_p9 = por %p17143_p8, %p17142_p7 }
  0x36   :  { %p17145_p10 = pnand %p17144_p9, %p17138_p6 }
  0x38   :  { %17148 = shalt.err (!%p17145_p10)
}
  0x39   :  { %29 = dma.hbm_to_vmem [thread:$0]  %s17799_s0, 128, %s27_s30, [#allocation3]  }
  0x3a   :  { %s17270_s14 = smov [#allocation7]   ;;  %s17271_s16 = smov [#allocation10]  }
  0x3b   :  { %s48_s15 = sshll.u32 %s17270_s14, 4  ;;  %s70_s17 = sshll.u32 %s17271_s16, 4  ;;  %s49_s15 = int_to_ptr.vmem [resolvable:$true] %s48_s15  ;;  %s71_s17 = int_to_ptr.vmem [resolvable:$true] %s70_s17 }
  0x3c   :  { %s17157_s18 = scalar_lea.vmem %s49_s15, 208  ;;  %s17161_s7 = scalar_lea.vmem %s49_s15, 224 }
  0x3d   :  { %p17158_p11 = scmp.ne.s32.totalorder %s49_s15, %s17157_s18  ;;  %p17162_p12 = scmp.lt.s32.totalorder %s49_s15, %s49_s15 }
  0x3e   :  { %p17163_p13 = scmp.lt.s32.totalorder %s17161_s7, %s17157_s18 }
  0x40   :  { %p17164_p0 = por %p17163_p13, %p17162_p12 }
  0x42   :  { %p17165_p1 = pnand %p17164_p0, %p17158_p11 }
  0x44   :  { %17168 = shalt.err (!%p17165_p1)
}
  0x45   :  { %51 = dma.hbm_to_vmem [thread:$0]  %s17801_s2, 208, %s49_s15, [#allocation6]  }
  0x46   :  { %s17177_s21 = scalar_lea.vmem %s71_s17, 208  ;;  %s17181_s0 = scalar_lea.vmem %s71_s17, 224 }
  0x47   :  { %p17178_p2 = scmp.ne.s32.totalorder %s71_s17, %s17177_s21  ;;  %p17182_p3 = scmp.lt.s32.totalorder %s71_s17, %s71_s17 }
  0x48   :  { %p17183_p4 = scmp.lt.s32.totalorder %s17181_s0, %s17177_s21 }
  0x4a   :  { %p17184_p5 = por %p17183_p4, %p17182_p3 }
  0x4c   :  { %p17185_p6 = pnand %p17184_p5, %p17178_p2 }
  0x4e   :  { %17188 = shalt.err (!%p17185_p6)
}
  0x4f   :  { %73 = dma.hbm_to_vmem [thread:$0]  %s17803_s4, 208, %s71_s17, [#allocation9]  }
  0x50   :  { %s17272_s1 = smov [#allocation13]   ;;  %s17273_s25 = smov [#allocation16]  }
  0x51   :  { %s92_s24 = sshll.u32 %s17272_s1, 4  ;;  %s114_s26 = sshll.u32 %s17273_s25, 4  ;;  %s93_s24 = int_to_ptr.vmem [resolvable:$true] %s92_s24  ;;  %s115_s26 = int_to_ptr.vmem [resolvable:$true] %s114_s26 }
  0x52   :  { %s17197_s27 = scalar_lea.vmem %s93_s24, 16  ;;  %s17201_s2 = scalar_lea.vmem %s93_s24, 32 }
  0x53   :  { %p17198_p7 = scmp.ne.s32.totalorder %s93_s24, %s17197_s27  ;;  %p17202_p8 = scmp.lt.s32.totalorder %s93_s24, %s93_s24 }
  0x54   :  { %p17203_p9 = scmp.lt.s32.totalorder %s17201_s2, %s17197_s27 }
  0x56   :  { %p17204_p10 = por %p17203_p9, %p17202_p8 }
  0x58   :  { %p17205_p11 = pnand %p17204_p10, %p17198_p7 }
  0x5a   :  { %17208 = shalt.err (!%p17205_p11)
}
  0x5b   :  { %95 = dma.hbm_to_vmem [thread:$0]  %s17805_s6, 16, %s93_s24, [#allocation12]  }
  0x5c   :  { %s17217_s30 = scalar_lea.vmem %s115_s26, 16  ;;  %s17221_s4 = scalar_lea.vmem %s115_s26, 32 }
  0x5d   :  { %p17218_p12 = scmp.ne.s32.totalorder %s115_s26, %s17217_s30  ;;  %p17222_p13 = scmp.lt.s32.totalorder %s115_s26, %s115_s26 }
  0x5e   :  { %p17223_p0 = scmp.lt.s32.totalorder %s17221_s4, %s17217_s30 }
  0x60   :  { %p17224_p1 = por %p17223_p0, %p17222_p13 }
  0x62   :  { %p17225_p2 = pnand %p17224_p1, %p17218_p12 }
  0x64   :  { %17228 = shalt.err (!%p17225_p2)
}
  0x65   :  { %117 = dma.hbm_to_vmem [thread:$0]  %s17807_s8, 16, %s115_s26, [#allocation15]  }
  0x66   :  { %17249 = dma.done.wait [#allocation3], 128  }
  0x67   :  { %17250 = vsyncadd [#allocation3], 4294967168 }
  0x68   :  { %17251 = dma.done.wait [#allocation6], 13520  }
  0x69   :  { %17252 = vsyncadd [#allocation6], 4294953776 }
  0x6a   :  { %17253 = dma.done.wait [#allocation9], 173264  }
  0x6b   :  { %17254 = vsyncadd [#allocation9], 4294794032 }
  0x6c   :  { %17255 = dma.done.wait [#allocation12], 13328  }
  0x6d   :  { %17256 = vsyncadd [#allocation12], 4294953968 }
  0x6e   :  { %17257 = dma.done.wait [#allocation15], 1040  }
  0x6f   :  { %17258 = vsyncadd [#allocation15], 4294966256  ;;  %v17274_v0 = vmov 0   ;;  %v14805_v1 = vld [vmem:[#allocation5 + $0x2dc] ss:$52 sps:$4 sm:$0xff]   ;;  %vm17276_vm0 = vmmov 0  }
  0x70   :  { %889 = vmatprep.mubr.bf16.mxu0 %v17274_v0  ;;  %930 = vmatprep.mubr.bf16.mxu1 %v17274_v0  ;;  %v14807_v2 = vld [vmem:[#allocation5 + $0x2e4] ss:$52 sps:$4 sm:$0xff]   ;;  %v14810_v4 = vld [vmem:[#allocation5 + $0x2e0] ss:$52 sps:$4 sm:$0xff]   ;;  %v14813_v6 = vld [vmem:[#allocation5 + $0x27c] ss:$52 sps:$4 sm:$0xff]  }
  0x71   :  { %857 = vmatprep.subr.bf16.mxu0 %v14805_v1  ;;  %v14809_v3 = vld [vmem:[#allocation5 + $0x2d8] ss:$52 sps:$4 sm:$0xff]   ;;  %898 = vmatprep.subr.bf16.mxu1 %v14807_v2  ;;  %v14811_v5 = vld [vmem:[#allocation5 + $0x274] ss:$52 sps:$4 sm:$0xff]   ;;  %v14815_v7 = vld [vmem:[#allocation5 + $0x270] ss:$52 sps:$4 sm:$0xff]  }
  0x72   :  { %858 = vmatpush1.bf16.msra.mxu0 %v14809_v3  ;;  %899 = vmatpush1.bf16.msra.mxu1 %v14810_v4  ;;  %v14816_v8 = vld [vmem:[#allocation5 + $0x278] ss:$52 sps:$4 sm:$0xff]   ;;  %v14819_v10 = vld [vmem:[#allocation5 + $0x214] ss:$52 sps:$4 sm:$0xff]   ;;  %v14822_v12 = vld [vmem:[#allocation5 + $0x210] ss:$52 sps:$4 sm:$0xff]  }
  0x73   :  { %859 = vmatprep.subr.bf16.mxu0 %v14811_v5  ;;  %900 = vmatprep.subr.bf16.mxu1 %v14813_v6  ;;  %v14817_v9 = vld [vmem:[#allocation5 + $0x20c] ss:$52 sps:$4 sm:$0xff]   ;;  %v14821_v11 = vld [vmem:[#allocation5 + $0x208] ss:$52 sps:$4 sm:$0xff]   ;;  %v14823_v13 = vld [vmem:[#allocation5 + $0x1a4] ss:$52 sps:$4 sm:$0xff]  }
  0x74   :  { %v14825_v14 = vld [vmem:[#allocation5 + $0x1ac] ss:$52 sps:$4 sm:$0xff]   ;;  %v14828_v16 = vld [vmem:[#allocation5 + $0x1a8] ss:$52 sps:$4 sm:$0xff]   ;;  %v14831_v18 = vld [vmem:[#allocation5 + $0x144] ss:$52 sps:$4 sm:$0xff]  }
  0x75   :  { %v14827_v15 = vld [vmem:[#allocation5 + $0x1a0] ss:$52 sps:$4 sm:$0xff]   ;;  %v14829_v17 = vld [vmem:[#allocation5 + $0x13c] ss:$52 sps:$4 sm:$0xff]   ;;  %v14833_v19 = vld [vmem:[#allocation5 + $0x138] ss:$52 sps:$4 sm:$0xff]  }
  0x76   :  { %860 = vmatpush1.bf16.msra.mxu0 %v14815_v7  ;;  %901 = vmatpush1.bf16.msra.mxu1 %v14816_v8  ;;  %v14834_v20 = vld [vmem:[#allocation5 + $0x140] ss:$52 sps:$4 sm:$0xff]   ;;  %v14837_v22 = vld [vmem:[#allocation5 + $0xdc] ss:$52 sps:$4 sm:$0xff]   ;;  %v14840_v24 = vld [vmem:[#allocation5 + $0xd8] ss:$52 sps:$4 sm:$0xff]  }
  0x77   :  { %861 = vmatprep.subr.bf16.mxu0 %v14817_v9  ;;  %902 = vmatprep.subr.bf16.mxu1 %v14819_v10  ;;  %v14835_v21 = vld [vmem:[#allocation5 + $0xd4] ss:$52 sps:$4 sm:$0xff]   ;;  %v14839_v23 = vld [vmem:[#allocation5 + $0xd0] ss:$52 sps:$4 sm:$0xff]   ;;  %v14841_v25 = vld [vmem:[#allocation5 + $0x6c] ss:$52 sps:$4 sm:$0xff]  }
  0x78   :  { %v14843_v26 = vld [vmem:[#allocation5 + $0x74] ss:$52 sps:$4 sm:$0xff]   ;;  %v14846_v28 = vld [vmem:[#allocation5 + $0x70] ss:$52 sps:$4 sm:$0xff]   ;;  %v14849_v30 = vld [vmem:[#allocation5 + $0xc] ss:$52 sps:$4 sm:$0xff]  }
  0x79   :  { %v14845_v27 = vld [vmem:[#allocation5 + $0x68] ss:$52 sps:$4 sm:$0xff]   ;;  %v14847_v29 = vld [vmem:[#allocation5 + $0x4] ss:$52 sps:$4 sm:$0xff]   ;;  %v14851_v31 = vld [vmem:[#allocation5] ss:$52 sps:$4 sm:$0xff]  }
  0x7a   :  { %862 = vmatpush1.bf16.msra.mxu0 %v14821_v11  ;;  %903 = vmatpush1.bf16.msra.mxu1 %v14822_v12  ;;  %v14852_v32 = vld [vmem:[#allocation5 + $0x8] ss:$52 sps:$4 sm:$0xff]   ;;  %v14855_v34 = vld [vmem:[#allocation5 + $0x2ec] ss:$52 sps:$4 sm:$0xff]   ;;  %v14859_v38 = vld [vmem:[#allocation5 + $0x2f0] ss:$52 sps:$4 sm:$0xff]  }
  0x7b   :  { %863 = vmatprep.subr.bf16.mxu0 %v14823_v13  ;;  %904 = vmatprep.subr.bf16.mxu1 %v14825_v14  ;;  %v146_v33 = vld [vmem:[#allocation2] sm:$0xff]  ;;  %v14861_v35 = vld [vmem:[#allocation5 + $0x2f4] ss:$52 sps:$4 sm:$0xff]   ;;  %v14867_v40 = vld [vmem:[#allocation5 + $0x28c] ss:$52 sps:$4 sm:$0xff]   ;;  %s17277_s6 = smov [#allocation17]  }
  0x7c   :  { %v17357_v36 = vpack.c.bf16 %v146_v33, %v146_v33  ;;  %v14853_v37 = vld [vmem:[#allocation5 + $0x2e8] ss:$52 sps:$4 sm:$0xff]   ;;  %v14858_v39 = vld [vmem:[#allocation5 + $0x284] ss:$52 sps:$4 sm:$0xff]   ;;  %v14856_v41 = vld [vmem:[#allocation5 + $0x280] ss:$52 sps:$4 sm:$0xff]  }
  0x7d   :  { %v14865_v42 = vld [vmem:[#allocation5 + $0x288] ss:$52 sps:$4 sm:$0xff]   ;;  %v14873_v44 = vld [vmem:[#allocation5 + $0x224] ss:$52 sps:$4 sm:$0xff]   ;;  %v14871_v46 = vld [vmem:[#allocation5 + $0x220] ss:$52 sps:$4 sm:$0xff]  }
  0x7e   :  { %864 = vmatpush1.bf16.msra.mxu0 %v14827_v15  ;;  %905 = vmatpush1.bf16.msra.mxu1 %v14828_v16  ;;  %v14864_v43 = vld [vmem:[#allocation5 + $0x21c] ss:$52 sps:$4 sm:$0xff]   ;;  %v14862_v45 = vld [vmem:[#allocation5 + $0x218] ss:$52 sps:$4 sm:$0xff]   ;;  %v14870_v47 = vld [vmem:[#allocation5 + $0x1b4] ss:$52 sps:$4 sm:$0xff]  }
  0x7f   :  { %865 = vmatprep.subr.bf16.mxu0 %v14829_v17  ;;  %906 = vmatprep.subr.bf16.mxu1 %v14831_v18  ;;  %v14879_v48 = vld [vmem:[#allocation5 + $0x1bc] ss:$52 sps:$4 sm:$0xff]   ;;  %v14877_v50 = vld [vmem:[#allocation5 + $0x1b8] ss:$52 sps:$4 sm:$0xff]   ;;  %v14885_v52 = vld [vmem:[#allocation5 + $0x154] ss:$52 sps:$4 sm:$0xff]  }
  0x80   :  { %v14868_v49 = vld [vmem:[#allocation5 + $0x1b0] ss:$52 sps:$4 sm:$0xff]   ;;  %v14876_v51 = vld [vmem:[#allocation5 + $0x14c] ss:$52 sps:$4 sm:$0xff]   ;;  %v14874_v53 = vld [vmem:[#allocation5 + $0x148] ss:$52 sps:$4 sm:$0xff]  }
  0x81   :  { %v14883_v54 = vld [vmem:[#allocation5 + $0x150] ss:$52 sps:$4 sm:$0xff]   ;;  %v14891_v56 = vld [vmem:[#allocation5 + $0xec] ss:$52 sps:$4 sm:$0xff]   ;;  %v14889_v58 = vld [vmem:[#allocation5 + $0xe8] ss:$52 sps:$4 sm:$0xff]  }
  0x82   :  { %866 = vmatpush1.bf16.msra.mxu0 %v14833_v19  ;;  %907 = vmatpush1.bf16.msra.mxu1 %v14834_v20  ;;  %v14882_v55 = vld [vmem:[#allocation5 + $0xe4] ss:$52 sps:$4 sm:$0xff]   ;;  %v14880_v57 = vld [vmem:[#allocation5 + $0xe0] ss:$52 sps:$4 sm:$0xff]   ;;  %v14888_v59 = vld [vmem:[#allocation5 + $0x7c] ss:$52 sps:$4 sm:$0xff]  }
  0x83   :  { %867 = vmatprep.subr.bf16.mxu0 %v14835_v21  ;;  %908 = vmatprep.subr.bf16.mxu1 %v14837_v22  ;;  %v14897_v60 = vld [vmem:[#allocation5 + $0x84] ss:$52 sps:$4 sm:$0xff]   ;;  %v14895_v62 = vld [vmem:[#allocation5 + $0x80] ss:$52 sps:$4 sm:$0xff]   ;;  %v14900_v1 = vld [vmem:[#allocation5 + $0x1c] ss:$52 sps:$4 sm:$0xff]  }
  0x84   :  { %v14886_v61 = vld [vmem:[#allocation5 + $0x78] ss:$52 sps:$4 sm:$0xff]   ;;  %v14894_v63 = vld [vmem:[#allocation5 + $0x14] ss:$52 sps:$4 sm:$0xff]   ;;  %v14892_v2 = vld [vmem:[#allocation5 + $0x10] ss:$52 sps:$4 sm:$0xff]  }
  0x85   :  { %v14898_v3 = vld [vmem:[#allocation5 + $0x18] ss:$52 sps:$4 sm:$0xff]   ;;  %v14903_v4 = vld [vmem:[#allocation5 + $0x2fc] ss:$52 sps:$4 sm:$0xff]   ;;  %v14906_v7 = vld [vmem:[#allocation5 + $0x294] ss:$52 sps:$4 sm:$0xff]  }
  0x86   :  { %868 = vmatpush1.bf16.msra.mxu0 %v14839_v23  ;;  %909 = vmatpush1.bf16.msra.mxu1 %v14840_v24  ;;  %v14921_v5 = vld [vmem:[#allocation5 + $0x304] ss:$52 sps:$4 sm:$0xff]   ;;  %v14919_v8 = vld [vmem:[#allocation5 + $0x300] ss:$52 sps:$4 sm:$0xff]   ;;  %v14927_v9 = vld [vmem:[#allocation5 + $0x29c] ss:$52 sps:$4 sm:$0xff]  }
  0x87   :  { %869 = vmatprep.subr.bf16.mxu0 %v14841_v25  ;;  %910 = vmatprep.subr.bf16.mxu1 %v14843_v26  ;;  %v14901_v6 = vld [vmem:[#allocation5 + $0x2f8] ss:$52 sps:$4 sm:$0xff]   ;;  %v14904_v10 = vld [vmem:[#allocation5 + $0x290] ss:$52 sps:$4 sm:$0xff]   ;;  %v14933_v13 = vld [vmem:[#allocation5 + $0x234] ss:$52 sps:$4 sm:$0xff]  }
  0x88   :  { %v14909_v11 = vld [vmem:[#allocation5 + $0x22c] ss:$52 sps:$4 sm:$0xff]   ;;  %v14907_v14 = vld [vmem:[#allocation5 + $0x228] ss:$52 sps:$4 sm:$0xff]   ;;  %v14931_v15 = vld [vmem:[#allocation5 + $0x230] ss:$52 sps:$4 sm:$0xff]  }
  0x89   :  { %v14925_v12 = vld [vmem:[#allocation5 + $0x298] ss:$52 sps:$4 sm:$0xff]   ;;  %v14910_v18 = vld [vmem:[#allocation5 + $0x1c0] ss:$52 sps:$4 sm:$0xff]   ;;  %v14935_v19 = vld [vmem:[#allocation5 + $0x1c8] ss:$52 sps:$4 sm:$0xff]  }
  0x8a   :  { %870 = vmatpush1.bf16.msra.mxu0 %v14845_v27  ;;  %911 = vmatpush1.bf16.msra.mxu1 %v14846_v28  ;;  %v14912_v16 = vld [vmem:[#allocation5 + $0x1c4] ss:$52 sps:$4 sm:$0xff]   ;;  %v14937_v17 = vld [vmem:[#allocation5 + $0x1cc] ss:$52 sps:$4 sm:$0xff]   ;;  %v14915_v20 = vld [vmem:[#allocation5 + $0x15c] ss:$52 sps:$4 sm:$0xff]  }
  0x8b   :  { %871 = vmatprep.subr.bf16.mxu0 %v14847_v29  ;;  %912 = vmatprep.subr.bf16.mxu1 %v14849_v30  ;;  %v14941_v21 = vld [vmem:[#allocation5 + $0x164] ss:$52 sps:$4 sm:$0xff]   ;;  %v14939_v23 = vld [vmem:[#allocation5 + $0x160] ss:$52 sps:$4 sm:$0xff]   ;;  %v14945_v25 = vld [vmem:[#allocation5 + $0xfc] ss:$52 sps:$4 sm:$0xff]  }
  0x8c   :  { %v14913_v22 = vld [vmem:[#allocation5 + $0x158] ss:$52 sps:$4 sm:$0xff]   ;;  %v14918_v24 = vld [vmem:[#allocation5 + $0xf4] ss:$52 sps:$4 sm:$0xff]   ;;  %v14916_v26 = vld [vmem:[#allocation5 + $0xf0] ss:$52 sps:$4 sm:$0xff]  }
  0x8d   :  { %v14943_v27 = vld [vmem:[#allocation5 + $0xf8] ss:$52 sps:$4 sm:$0xff]   ;;  %v14949_v29 = vld [vmem:[#allocation5 + $0x94] ss:$52 sps:$4 sm:$0xff]   ;;  %s12825_s8 = sshll.u32 %s17277_s6, 4  ;;  %s12826_s8 = int_to_ptr.vmem [resolvable:$true] %s12825_s8 }
  0x8e   :  { %872 = vmatpush1.bf16.msra.mxu0 %v14851_v31  ;;  %913 = vmatpush1.bf16.msra.mxu1 %v14852_v32  ;;  %v14924_v28 = vld [vmem:[#allocation5 + $0x8c] ss:$52 sps:$4 sm:$0xff]   ;;  %v14922_v30 = vld [vmem:[#allocation5 + $0x88] ss:$52 sps:$4 sm:$0xff]   ;;  %v14947_v31 = vld [vmem:[#allocation5 + $0x90] ss:$52 sps:$4 sm:$0xff]   ;;  %p17234_p4 = scmp.lt.s32.totalorder %s12826_s8, %s12826_s8 }
  0x8f   :  { %939 = vmatprep.subr.bf16.mxu0 %v14855_v34  ;;  %980 = vmatprep.subr.bf16.mxu1 %v14861_v35  ;;  %v14930_v32 = vld [vmem:[#allocation5 + $0x24] ss:$52 sps:$4 sm:$0xff]   ;;  %v14953_v33 = vld [vmem:[#allocation5 + $0x2c] ss:$52 sps:$4 sm:$0xff]   ;;  %v14951_v35 = vld [vmem:[#allocation5 + $0x28] ss:$52 sps:$4 sm:$0xff]  }
  0x90   :  { %v14928_v34 = vld [vmem:[#allocation5 + $0x20] ss:$52 sps:$4 sm:$0xff]   ;;  %s17229_s11 = scalar_lea.vmem %s12826_s8, 128 }
  0x91   :  { %890 = vmatmul.mubr.bf16.vlgmr.msra.gmra.mxu0 %v17357_v36  ;;  %931 = vmatmul.mubr.bf16.vlgmr.msra.gmra.mxu1 %v17357_v36  ;;  %p17230_p3 = scmp.ne.s32.totalorder %s12826_s8, %s17229_s11  ;;  %p17235_p5 = scmp.lt.s32.totalorder %s17229_s11, %s17229_s11 }
  0x92   :  { %940 = vmatpush1.bf16.msra.mxu0 %v14853_v37  ;;  %981 = vmatpush1.bf16.msra.mxu1 %v14859_v38  ;;  %v14959_v37 = vld [vmem:[#allocation8 + $0x2dc] ss:$52 sps:$4 sm:$0xff]  }
  0x93   :  { %941 = vmatprep.subr.bf16.mxu0 %v14858_v39  ;;  %982 = vmatprep.subr.bf16.mxu1 %v14867_v40  ;;  %v14934_v38 = vld [vmem:[#allocation5 + $0x308] ss:$52 sps:$4 sm:$0xff]   ;;  %v17275_v39 = vmov 0.0   ;;  %p17236_p6 = por %p17235_p5, %p17234_p4 }
  0x94   :  { %971 = vmatprep.mubr.bf16.mxu0 %v17274_v0  ;;  %1012 = vmatprep.mubr.bf16.mxu1 %v17274_v0  ;;  %v14957_v40 = vld [vmem:[#allocation8 + $0x2d8] ss:$52 sps:$4 sm:$0xff]  }
  0x95   :  { %p17237_p7 = pnand %p17236_p6, %p17230_p3 }
  0x96   :  { %942 = vmatpush1.bf16.msra.mxu0 %v14856_v41  ;;  %983 = vmatpush1.bf16.msra.mxu1 %v14865_v42  ;;  %v14965_v41 = vld [vmem:[#allocation8 + $0x274] ss:$52 sps:$4 sm:$0xff]  }
  0x97   :  { %943 = vmatprep.subr.bf16.mxu0 %v14864_v43  ;;  %984 = vmatprep.subr.bf16.mxu1 %v14873_v44  ;;  %v14938_v42 = vld [vmem:[#allocation5 + $0x2a0] ss:$52 sps:$4 sm:$0xff]   ;;  %v14971_v44 = vld [vmem:[#allocation8 + $0x20c] ss:$52 sps:$4 sm:$0xff]  }
  0x98   :  { %v14963_v43 = vld [vmem:[#allocation8 + $0x270] ss:$52 sps:$4 sm:$0xff]  }
  0x9a   :  { %944 = vmatpush1.bf16.msra.mxu0 %v14862_v45  ;;  %985 = vmatpush1.bf16.msra.mxu1 %v14871_v46  ;;  %v14942_v45 = vld [vmem:[#allocation5 + $0x238] ss:$52 sps:$4 sm:$0xff]  }
  0x9b   :  { %945 = vmatprep.subr.bf16.mxu0 %v14870_v47  ;;  %986 = vmatprep.subr.bf16.mxu1 %v14879_v48  ;;  %v14969_v46 = vld [vmem:[#allocation8 + $0x208] ss:$52 sps:$4 sm:$0xff]   ;;  %v14977_v47 = vld [vmem:[#allocation8 + $0x1a4] ss:$52 sps:$4 sm:$0xff]  }
  0x9c   :  { %v14946_v48 = vld [vmem:[#allocation5 + $0x1d0] ss:$52 sps:$4 sm:$0xff]  }
  0x9e   :  { %946 = vmatpush1.bf16.msra.mxu0 %v14868_v49  ;;  %987 = vmatpush1.bf16.msra.mxu1 %v14877_v50  ;;  %v14975_v49 = vld [vmem:[#allocation8 + $0x1a0] ss:$52 sps:$4 sm:$0xff]   ;;  %v14983_v50 = vld [vmem:[#allocation8 + $0x13c] ss:$52 sps:$4 sm:$0xff]  }
  0x9f   :  { %947 = vmatprep.subr.bf16.mxu0 %v14876_v51  ;;  %988 = vmatprep.subr.bf16.mxu1 %v14885_v52  ;;  %v14950_v51 = vld [vmem:[#allocation5 + $0x168] ss:$52 sps:$4 sm:$0xff]  }
  0xa0   :  { %v14981_v52 = vld [vmem:[#allocation8 + $0x138] ss:$52 sps:$4 sm:$0xff]  }
  0xa2   :  { %948 = vmatpush1.bf16.msra.mxu0 %v14874_v53  ;;  %989 = vmatpush1.bf16.msra.mxu1 %v14883_v54  ;;  %v14989_v53 = vld [vmem:[#allocation8 + $0xd4] ss:$52 sps:$4 sm:$0xff]  }
  0xa3   :  { %949 = vmatprep.subr.bf16.mxu0 %v14882_v55  ;;  %990 = vmatprep.subr.bf16.mxu1 %v14891_v56  ;;  %v14954_v54 = vld [vmem:[#allocation5 + $0x100] ss:$52 sps:$4 sm:$0xff]   ;;  %v14995_v56 = vld [vmem:[#allocation8 + $0x6c] ss:$52 sps:$4 sm:$0xff]  }
  0xa4   :  { %v14987_v55 = vld [vmem:[#allocation8 + $0xd0] ss:$52 sps:$4 sm:$0xff]  }
  0xa6   :  { %950 = vmatpush1.bf16.msra.mxu0 %v14880_v57  ;;  %991 = vmatpush1.bf16.msra.mxu1 %v14889_v58  ;;  %v14955_v57 = vld [vmem:[#allocation5 + $0x98] ss:$52 sps:$4 sm:$0xff]  }
  0xa7   :  { %951 = vmatprep.subr.bf16.mxu0 %v14888_v59  ;;  %992 = vmatprep.subr.bf16.mxu1 %v14897_v60  ;;  %v14993_v58 = vld [vmem:[#allocation8 + $0x68] ss:$52 sps:$4 sm:$0xff]   ;;  %v15001_v59 = vld [vmem:[#allocation8 + $0x4] ss:$52 sps:$4 sm:$0xff]  }
  0xa8   :  { %v14956_v60 = vld [vmem:[#allocation5 + $0x30] ss:$52 sps:$4 sm:$0xff]  }
  0xaa   :  { %952 = vmatpush1.bf16.msra.mxu0 %v14886_v61  ;;  %993 = vmatpush1.bf16.msra.mxu1 %v14895_v62  ;;  %v14962_v61 = vld [vmem:[#allocation8 + $0x95c] ss:$52 sps:$4 sm:$0xff]   ;;  %v14999_v62 = vld [vmem:[#allocation8] ss:$52 sps:$4 sm:$0xff]  }
  0xab   :  { %953 = vmatprep.subr.bf16.mxu0 %v14894_v63  ;;  %994 = vmatprep.subr.bf16.mxu1 %v14900_v1  ;;  %v15007_v63 = vld [vmem:[#allocation8 + $0x61c] ss:$52 sps:$4 sm:$0xff]   ;;  %v14960_v1 = vld [vmem:[#allocation8 + $0x958] ss:$52 sps:$4 sm:$0xff]  }
  0xae   :  { %954 = vmatpush1.bf16.msra.mxu0 %v14892_v2  ;;  %995 = vmatpush1.bf16.msra.mxu1 %v14898_v3  ;;  %v14968_v2 = vld [vmem:[#allocation8 + $0x8f4] ss:$52 sps:$4 sm:$0xff]   ;;  %v15005_v3 = vld [vmem:[#allocation8 + $0x618] ss:$52 sps:$4 sm:$0xff]  }
  0xaf   :  { %1021 = vmatprep.subr.bf16.mxu0 %v14903_v4  ;;  %1062 = vmatprep.subr.bf16.mxu1 %v14921_v5  ;;  %v15013_v4 = vld [vmem:[#allocation8 + $0x5b4] ss:$52 sps:$4 sm:$0xff]   ;;  %v14966_v5 = vld [vmem:[#allocation8 + $0x8f0] ss:$52 sps:$4 sm:$0xff]  }
  0xb1   :  { %972 = vmatmul.mubr.bf16.vlgmr.msra.gmra.mxu0 %v17357_v36  ;;  %1013 = vmatmul.mubr.bf16.vlgmr.msra.gmra.mxu1 %v17357_v36 }
  0xb2   :  { %1022 = vmatpush1.bf16.msra.mxu0 %v14901_v6  ;;  %1063 = vmatpush1.bf16.msra.mxu1 %v14919_v8  ;;  %v14974_v6 = vld [vmem:[#allocation8 + $0x88c] ss:$52 sps:$4 sm:$0xff]  }
  0xb3   :  { %1023 = vmatprep.subr.bf16.mxu0 %v14906_v7  ;;  %1064 = vmatprep.subr.bf16.mxu1 %v14927_v9  ;;  %v15011_v7 = vld [vmem:[#allocation8 + $0x5b0] ss:$52 sps:$4 sm:$0xff]   ;;  %v15019_v8 = vld [vmem:[#allocation8 + $0x54c] ss:$52 sps:$4 sm:$0xff]   ;;  %v14972_v9 = vld [vmem:[#allocation8 + $0x888] ss:$52 sps:$4 sm:$0xff]  }
  0xb4   :  { %1053 = vmatprep.mubr.bf16.mxu0 %v17274_v0  ;;  %1094 = vmatprep.mubr.bf16.mxu1 %v17274_v0 }
  0xb6   :  { %1024 = vmatpush1.bf16.msra.mxu0 %v14904_v10  ;;  %1065 = vmatpush1.bf16.msra.mxu1 %v14925_v12  ;;  %v14980_v10 = vld [vmem:[#allocation8 + $0x824] ss:$52 sps:$4 sm:$0xff]   ;;  %v14978_v12 = vld [vmem:[#allocation8 + $0x820] ss:$52 sps:$4 sm:$0xff]  }
  0xb7   :  { %1025 = vmatprep.subr.bf16.mxu0 %v14909_v11  ;;  %1066 = vmatprep.subr.bf16.mxu1 %v14933_v13  ;;  %v15017_v11 = vld [vmem:[#allocation8 + $0x548] ss:$52 sps:$4 sm:$0xff]   ;;  %v15025_v13 = vld [vmem:[#allocation8 + $0x4e4] ss:$52 sps:$4 sm:$0xff]  }
  0xba   :  { %1026 = vmatpush1.bf16.msra.mxu0 %v14907_v14  ;;  %1067 = vmatpush1.bf16.msra.mxu1 %v14931_v15  ;;  %v14986_v14 = vld [vmem:[#allocation8 + $0x7bc] ss:$52 sps:$4 sm:$0xff]   ;;  %v15023_v15 = vld [vmem:[#allocation8 + $0x4e0] ss:$52 sps:$4 sm:$0xff]  }
  0xbb   :  { %1027 = vmatprep.subr.bf16.mxu0 %v14912_v16  ;;  %1068 = vmatprep.subr.bf16.mxu1 %v14937_v17  ;;  %v15031_v16 = vld [vmem:[#allocation8 + $0x47c] ss:$52 sps:$4 sm:$0xff]   ;;  %v14992_v17 = vld [vmem:[#allocation8 + $0x754] ss:$52 sps:$4 sm:$0xff]  }
  0xbe   :  { %1028 = vmatpush1.bf16.msra.mxu0 %v14910_v18  ;;  %1069 = vmatpush1.bf16.msra.mxu1 %v14935_v19  ;;  %v15029_v18 = vld [vmem:[#allocation8 + $0x478] ss:$52 sps:$4 sm:$0xff]   ;;  %v14990_v19 = vld [vmem:[#allocation8 + $0x750] ss:$52 sps:$4 sm:$0xff]  }
  0xbf   :  { %1029 = vmatprep.subr.bf16.mxu0 %v14915_v20  ;;  %1070 = vmatprep.subr.bf16.mxu1 %v14941_v21  ;;  %v15037_v20 = vld [vmem:[#allocation8 + $0x414] ss:$52 sps:$4 sm:$0xff]   ;;  %v14998_v21 = vld [vmem:[#allocation8 + $0x6ec] ss:$52 sps:$4 sm:$0xff]  }
  0xc2   :  { %1030 = vmatpush1.bf16.msra.mxu0 %v14913_v22  ;;  %1071 = vmatpush1.bf16.msra.mxu1 %v14939_v23  ;;  %v15035_v22 = vld [vmem:[#allocation8 + $0x410] ss:$52 sps:$4 sm:$0xff]   ;;  %v14996_v23 = vld [vmem:[#allocation8 + $0x6e8] ss:$52 sps:$4 sm:$0xff]  }
  0xc3   :  { %1031 = vmatprep.subr.bf16.mxu0 %v14918_v24  ;;  %1072 = vmatprep.subr.bf16.mxu1 %v14945_v25  ;;  %v15043_v24 = vld [vmem:[#allocation8 + $0x3ac] ss:$52 sps:$4 sm:$0xff]   ;;  %v15004_v25 = vld [vmem:[#allocation8 + $0x684] ss:$52 sps:$4 sm:$0xff]  }
  0xc6   :  { %1032 = vmatpush1.bf16.msra.mxu0 %v14916_v26  ;;  %1073 = vmatpush1.bf16.msra.mxu1 %v14943_v27  ;;  %v15041_v26 = vld [vmem:[#allocation8 + $0x3a8] ss:$52 sps:$4 sm:$0xff]   ;;  %v15002_v27 = vld [vmem:[#allocation8 + $0x680] ss:$52 sps:$4 sm:$0xff]  }
  0xc7   :  { %1033 = vmatprep.subr.bf16.mxu0 %v14924_v28  ;;  %1074 = vmatprep.subr.bf16.mxu1 %v14949_v29  ;;  %v15049_v28 = vld [vmem:[#allocation8 + $0x344] ss:$52 sps:$4 sm:$0xff]   ;;  %v15010_v29 = vld [vmem:[#allocation8 + $0xc9c] ss:$52 sps:$4 sm:$0xff]  }
  0xca   :  { %1034 = vmatpush1.bf16.msra.mxu0 %v14922_v30  ;;  %1075 = vmatpush1.bf16.msra.mxu1 %v14947_v31  ;;  %v15047_v30 = vld [vmem:[#allocation8 + $0x340] ss:$52 sps:$4 sm:$0xff]   ;;  %v15055_v31 = vld [vmem:[#allocation8 + $0xfdc] ss:$52 sps:$4 sm:$0xff]  }
  0xcb   :  { %1035 = vmatprep.subr.bf16.mxu0 %v14930_v32  ;;  %1076 = vmatprep.subr.bf16.mxu1 %v14953_v33  ;;  %v15008_v32 = vld [vmem:[#allocation8 + $0xc98] ss:$52 sps:$4 sm:$0xff]   ;;  %v15016_v33 = vld [vmem:[#allocation8 + $0xc34] ss:$52 sps:$4 sm:$0xff]  }
  0xce   :  { %1036 = vmatpush1.bf16.msra.mxu0 %v14928_v34  ;;  %1077 = vmatpush1.bf16.msra.mxu1 %v14951_v35  ;;  %v15014_v34 = vld [vmem:[#allocation8 + $0xc30] ss:$52 sps:$4 sm:$0xff]   ;;  %v15022_v35 = vld [vmem:[#allocation8 + $0xbcc] ss:$52 sps:$4 sm:$0xff]  }
  0xcf   :  { %14708 = vmatprep.subr.bf16.mxu0 %v17275_v39  ;;  %9558 = vmatprep.subr.bf16.mxu1 %v14959_v37  ;;  %v15020_v37 = vld [vmem:[#allocation8 + $0xbc8] ss:$52 sps:$4 sm:$0xff]  }
  0xd1   :  { %1054 = vmatmul.mubr.bf16.vlgmr.msra.gmra.mxu0 %v17357_v36  ;;  %1095 = vmatmul.mubr.bf16.vlgmr.msra.gmra.mxu1 %v17357_v36 }
  0xd2   :  { %14709 = vmatpush3.bf16.msra.mxu0 %v14934_v38  ;;  %14724 = vmatprep.mubr.msk.bf16.mxu0 %vm17276_vm0, %v17275_v39  ;;  %v15028_v38 = vld [vmem:[#allocation8 + $0xb64] ss:$52 sps:$4 sm:$0xff]  }
  0xd3   :  { %14710 = vmatprep.subr.bf16.mxu0 %v17275_v39  ;;  %9559 = vmatpush1.bf16.msra.mxu1 %v14957_v40  ;;  %v15026_v40 = vld [vmem:[#allocation8 + $0xb60] ss:$52 sps:$4 sm:$0xff]  }
  0xd4   :  { %9560 = vmatprep.subr.bf16.mxu1 %v14965_v41  ;;  %v15034_v41 = vld [vmem:[#allocation8 + $0xafc] ss:$52 sps:$4 sm:$0xff]  }
  0xd6   :  { %14711 = vmatpush3.bf16.msra.mxu0 %v14938_v42  ;;  %v15032_v42 = vld [vmem:[#allocation8 + $0xaf8] ss:$52 sps:$4 sm:$0xff]  }
  0xd7   :  { %14712 = vmatprep.subr.bf16.mxu0 %v17275_v39  ;;  %9561 = vmatpush1.bf16.msra.mxu1 %v14963_v43  ;;  %v15040_v43 = vld [vmem:[#allocation8 + $0xa94] ss:$52 sps:$4 sm:$0xff]  }
  0xd8   :  { %9562 = vmatprep.subr.bf16.mxu1 %v14971_v44  ;;  %v15038_v44 = vld [vmem:[#allocation8 + $0xa90] ss:$52 sps:$4 sm:$0xff]  }
  0xda   :  { %14713 = vmatpush3.bf16.msra.mxu0 %v14942_v45  ;;  %v15046_v45 = vld [vmem:[#allocation8 + $0xa2c] ss:$52 sps:$4 sm:$0xff]  }
  0xdb   :  { %14714 = vmatprep.subr.bf16.mxu0 %v17275_v39  ;;  %9563 = vmatpush1.bf16.msra.mxu1 %v14969_v46  ;;  %v15044_v46 = vld [vmem:[#allocation8 + $0xa28] ss:$52 sps:$4 sm:$0xff]  }
  0xdc   :  { %9564 = vmatprep.subr.bf16.mxu1 %v14977_v47  ;;  %v15052_v47 = vld [vmem:[#allocation8 + $0x9c4] ss:$52 sps:$4 sm:$0xff]  }
  0xde   :  { %14715 = vmatpush3.bf16.msra.mxu0 %v14946_v48  ;;  %v15050_v48 = vld [vmem:[#allocation8 + $0x9c0] ss:$52 sps:$4 sm:$0xff]  }
  0xdf   :  { %14716 = vmatprep.subr.bf16.mxu0 %v17275_v39  ;;  %9565 = vmatpush1.bf16.msra.mxu1 %v14975_v49  ;;  %v15058_v49 = vld [vmem:[#allocation8 + $0x165c] ss:$52 sps:$4 sm:$0xff]  }
  0xe0   :  { %9566 = vmatprep.subr.bf16.mxu1 %v14983_v50  ;;  %v264_v50 = vlaneseq }
  0xe2   :  { %14717 = vmatpush3.bf16.msra.mxu0 %v14950_v51  ;;  %v17380_v51 = vshrl.u32 %v264_v50, 7  ;;  %v15100_v50 = vld [vmem:[#allocation8 + $0x1384] ss:$52 sps:$4 sm:$0xff]  }
  0xe3   :  { %14718 = vmatprep.subr.bf16.mxu0 %v17275_v39  ;;  %9567 = vmatpush1.bf16.msra.mxu1 %v14981_v52  ;;  %v17382_v52 = vld [vmem:[#allocation7] sm:$0xff] }
  0xe4   :  { %9568 = vmatprep.subr.bf16.mxu1 %v14989_v53  ;;  %v17385_v53 = vsub.s32 0, %v17380_v51 }
  0xe6   :  { %14719 = vmatpush3.bf16.msra.mxu0 %v14954_v54  ;;  %v17388_v54 = vsub.s32 2, %v17380_v51 }
  0xe7   :  { %14720 = vmatprep.subr.bf16.mxu0 %v17275_v39  ;;  %9569 = vmatpush1.bf16.msra.mxu1 %v14987_v55  ;;  %v17391_v55 = vsub.s32 1, %v17380_v51 }
  0xe8   :  { %9570 = vmatprep.subr.bf16.mxu1 %v14995_v56  ;;  %v17394_v56 = vsub.s32 3, %v17380_v51 }
  0xea   :  { %14721 = vmatpush3.bf16.msra.mxu0 %v14955_v57  ;;  %v267_v57 = vrot.slane %v17382_v52, %v17385_v53 }
  0xeb   :  { %14722 = vmatprep.subr.bf16.mxu0 %v17275_v39  ;;  %9571 = vmatpush1.bf16.msra.mxu1 %v14993_v58  ;;  %v275_v58 = vrot.slane %v17382_v52, %v17388_v54 }
  0xec   :  { %9572 = vmatprep.subr.bf16.mxu1 %v15001_v59  ;;  %v271_v59 = vrot.slane %v17382_v52, %v17391_v55 }
  0xee   :  { %14723 = vmatpush3.bf16.msra.mxu0 %v14956_v60  ;;  %v279_v60 = vrot.slane %v17382_v52, %v17394_v56 }
  0xef   :  { %9599 = vmatprep.subr.bf16.mxu0 %v14962_v61  ;;  %9573 = vmatpush1.bf16.msra.mxu1 %v14999_v62 }
  0xf0   :  { %9574 = vmatprep.subr.bf16.mxu1 %v15007_v63 }
  0xf1   :  { %14725 = vmatmul.mubr.bf16.vlgmr.msra.gmra.mxu0 %v17357_v36  ;;  %v14984_v36 = vld [vmem:[#allocation8 + $0x7b8] ss:$52 sps:$4 sm:$0xff]  }
  0xf2   :  { %9600 = vmatpush1.bf16.msra.mxu0 %v14960_v1 }
  0xf3   :  { %9601 = vmatprep.subr.bf16.mxu0 %v14968_v2  ;;  %9575 = vmatpush2.bf16.msra.mxu1 %v15005_v3 }
  0xf4   :  { %9576 = vmatprep.subr.bf16.mxu1 %v15013_v4 }
  0xf6   :  { %9602 = vmatpush1.bf16.msra.mxu0 %v14966_v5 }
  0xf7   :  { %9603 = vmatprep.subr.bf16.mxu0 %v14974_v6  ;;  %9577 = vmatpush2.bf16.msra.mxu1 %v15011_v7 }
  0xf8   :  { %9578 = vmatprep.subr.bf16.mxu1 %v15019_v8 }
  0xfa   :  { %9604 = vmatpush1.bf16.msra.mxu0 %v14972_v9 }
  0xfb   :  { %9605 = vmatprep.subr.bf16.mxu0 %v14980_v10  ;;  %9579 = vmatpush2.bf16.msra.mxu1 %v15017_v11 }
  0xfc   :  { %9580 = vmatprep.subr.bf16.mxu1 %v15025_v13  ;;  %v15056_v13 = vld [vmem:[#allocation8 + $0x1658] ss:$52 sps:$4 sm:$0xff]  }
  0xfe   :  { %9606 = vmatpush1.bf16.msra.mxu0 %v14978_v12  ;;  %v15053_v12 = vld [vmem:[#allocation8 + $0xfd8] ss:$52 sps:$4 sm:$0xff]  }
  0xff   :  { %9607 = vmatprep.subr.bf16.mxu0 %v14986_v14  ;;  %9581 = vmatpush2.bf16.msra.mxu1 %v15023_v15 }
 0x100   :  { %9582 = vmatprep.subr.bf16.mxu1 %v15031_v16 }
 0x102   :  { %9608 = vmatpush1.bf16.msra.mxu0 %v14984_v36 }
 0x103   :  { %9609 = vmatprep.subr.bf16.mxu0 %v14992_v17  ;;  %9583 = vmatpush2.bf16.msra.mxu1 %v15029_v18 }
 0x104   :  { %9584 = vmatprep.subr.bf16.mxu1 %v15037_v20  ;;  %v15064_v20 = vld [vmem:[#allocation8 + $0x15f4] ss:$52 sps:$4 sm:$0xff]  }
 0x106   :  { %9610 = vmatpush1.bf16.msra.mxu0 %v14990_v19  ;;  %v15061_v19 = vld [vmem:[#allocation8 + $0xf74] ss:$52 sps:$4 sm:$0xff]  }
 0x107   :  { %9611 = vmatprep.subr.bf16.mxu0 %v14998_v21  ;;  %9585 = vmatpush2.bf16.msra.mxu1 %v15035_v22  ;;  %v15059_v21 = vld [vmem:[#allocation8 + $0xf70] ss:$52 sps:$4 sm:$0xff]  }
 0x108   :  { %9586 = vmatprep.subr.bf16.mxu1 %v15043_v24  ;;  %v15062_v22 = vld [vmem:[#allocation8 + $0x15f0] ss:$52 sps:$4 sm:$0xff]   ;;  %v15070_v24 = vld [vmem:[#allocation8 + $0x158c] ss:$52 sps:$4 sm:$0xff]  }
 0x10a   :  { %9612 = vmatpush1.bf16.msra.mxu0 %v14996_v23  ;;  %v15067_v23 = vld [vmem:[#allocation8 + $0xf0c] ss:$52 sps:$4 sm:$0xff]  }
 0x10b   :  { %9613 = vmatprep.subr.bf16.mxu0 %v15004_v25  ;;  %9587 = vmatpush2.bf16.msra.mxu1 %v15041_v26  ;;  %v15065_v25 = vld [vmem:[#allocation8 + $0xf08] ss:$52 sps:$4 sm:$0xff]  }
 0x10c   :  { %9588 = vmatprep.subr.bf16.mxu1 %v15049_v28  ;;  %v15068_v26 = vld [vmem:[#allocation8 + $0x1588] ss:$52 sps:$4 sm:$0xff]   ;;  %v15076_v28 = vld [vmem:[#allocation8 + $0x1524] ss:$52 sps:$4 sm:$0xff]  }
 0x10e   :  { %9614 = vmatpush1.bf16.msra.mxu0 %v15002_v27  ;;  %v15073_v27 = vld [vmem:[#allocation8 + $0xea4] ss:$52 sps:$4 sm:$0xff]  }
 0x10f   :  { %9615 = vmatprep.subr.bf16.mxu0 %v15010_v29  ;;  %9589 = vmatpush2.bf16.msra.mxu1 %v15047_v30  ;;  %v15071_v29 = vld [vmem:[#allocation8 + $0xea0] ss:$52 sps:$4 sm:$0xff]  }
 0x110   :  { %9640 = vmatprep.subr.bf16.mxu1 %v15055_v31  ;;  %v15074_v30 = vld [vmem:[#allocation8 + $0x1520] ss:$52 sps:$4 sm:$0xff]   ;;  %v15079_v31 = vld [vmem:[#allocation8 + $0xe3c] ss:$52 sps:$4 sm:$0xff]  }
 0x112   :  { %9616 = vmatpush2.bf16.msra.mxu0 %v15008_v32  ;;  %v15082_v32 = vld [vmem:[#allocation8 + $0x14bc] ss:$52 sps:$4 sm:$0xff]  }
 0x113   :  { %9617 = vmatprep.subr.bf16.mxu0 %v15016_v33  ;;  %v15077_v33 = vld [vmem:[#allocation8 + $0xe38] ss:$52 sps:$4 sm:$0xff]  }
 0x116   :  { %9618 = vmatpush2.bf16.msra.mxu0 %v15014_v34  ;;  %v15080_v34 = vld [vmem:[#allocation8 + $0x14b8] ss:$52 sps:$4 sm:$0xff]  }
 0x117   :  { %9619 = vmatprep.subr.bf16.mxu0 %v15022_v35  ;;  %v15085_v35 = vld [vmem:[#allocation8 + $0xdd4] ss:$52 sps:$4 sm:$0xff]  }
 0x11a   :  { %9620 = vmatpush2.bf16.msra.mxu0 %v15020_v37  ;;  %v15088_v37 = vld [vmem:[#allocation8 + $0x1454] ss:$52 sps:$4 sm:$0xff]  }
 0x11b   :  { %9621 = vmatprep.subr.bf16.mxu0 %v15028_v38  ;;  %v15083_v38 = vld [vmem:[#allocation8 + $0xdd0] ss:$52 sps:$4 sm:$0xff]  }
 0x11e   :  { %9622 = vmatpush2.bf16.msra.mxu0 %v15026_v40  ;;  %v15086_v40 = vld [vmem:[#allocation8 + $0x1450] ss:$52 sps:$4 sm:$0xff]  }
 0x11f   :  { %9623 = vmatprep.subr.bf16.mxu0 %v15034_v41  ;;  %v286_v41 = vsub.s32 5, %v17380_v51 }
 0x122   :  { %9624 = vmatpush2.bf16.msra.mxu0 %v15032_v42  ;;  %v294_v42 = vsub.s32 7, %v17380_v51 }
 0x123   :  { %9625 = vmatprep.subr.bf16.mxu0 %v15040_v43  ;;  %v15091_v43 = vld [vmem:[#allocation8 + $0xd6c] ss:$52 sps:$4 sm:$0xff]  }
 0x126   :  { %9626 = vmatpush2.bf16.msra.mxu0 %v15038_v44  ;;  %v15094_v44 = vld [vmem:[#allocation8 + $0x13ec] ss:$52 sps:$4 sm:$0xff]  }
 0x127   :  { %9627 = vmatprep.subr.bf16.mxu0 %v15046_v45  ;;  %v15089_v45 = vld [vmem:[#allocation8 + $0xd68] ss:$52 sps:$4 sm:$0xff]  }
 0x12a   :  { %9628 = vmatpush2.bf16.msra.mxu0 %v15044_v46  ;;  %v15092_v46 = vld [vmem:[#allocation8 + $0x13e8] ss:$52 sps:$4 sm:$0xff]  }
 0x12b   :  { %9629 = vmatprep.subr.bf16.mxu0 %v15052_v47  ;;  %v287_v47 = vrot.slane %v17382_v52, %v286_v41 }
 0x12e   :  { %9630 = vmatpush2.bf16.msra.mxu0 %v15050_v48  ;;  %v295_v48 = vrot.slane %v17382_v52, %v294_v42 }
 0x12f   :  { %9681 = vmatprep.subr.bf16.mxu0 %v15058_v49  ;;  %v15097_v49 = vld [vmem:[#allocation8 + $0xd04] ss:$52 sps:$4 sm:$0xff]  }
 0x151   :  { %v891_v61 = vpop.f32.mrf.mxu0  ;;  %v932_v62 = vpop.f32.mrf.mxu1 }
 0x152   :  { %v892_v63 = vadd.f32 %v891_v61, %v267_v57  ;;  %v933_v1 = vadd.f32 %v932_v62, %v275_v58  ;;  %v15095_v61 = vld [vmem:[#allocation8 + $0xd00] ss:$52 sps:$4 sm:$0xff]  }
 0x153   :  { %v893_v2 = vpop.f32.mrf.mxu0  ;;  %v934_v3 = vpop.f32.mrf.mxu1  ;;  %v15098_v62 = vld [vmem:[#allocation8 + $0x1380] ss:$52 sps:$4 sm:$0xff]  }
 0x154   :  { %v1145_v4 = vmax.f32 %v933_v1, 0.0  ;;  %v894_v5 = vadd.f32 %v893_v2, %v271_v59  ;;  %v935_v6 = vadd.f32 %v934_v3, %v279_v60  ;;  %v1143_v7 = vmax.f32 %v892_v63, 0.0  ;;  %v15103_v2 = vld [vmem:[#allocation8 + $0x131c] ss:$52 sps:$4 sm:$0xff]  }
 0x155   :  { %v895_v8 = vpop.f32.mrf.mxu0  ;;  %v936_v9 = vpop.f32.mrf.mxu1  ;;  %v15106_v3 = vld [vmem:[#allocation8 + $0x199c] ss:$52 sps:$4 sm:$0xff]  }
 0x156   :  { %v1144_v10 = vmax.f32 %v894_v5, 0.0  ;;  %v1146_v11 = vmax.f32 %v935_v6, 0.0  ;;  %v17404_v14 = vpack.c.bf16 %v1145_v4, %v1145_v4  ;;  %v17410_v18 = vpack.c.bf16 %v1143_v7, %v1143_v7  ;;  %v15101_v6 = vld [vmem:[#allocation8 + $0x1318] ss:$52 sps:$4 sm:$0xff]  }
 0x157   :  { %v896_v15 = vpop.f32.mrf.mxu0  ;;  %v937_v36 = vpop.f32.mrf.mxu1  ;;  %v15104_v7 = vld [vmem:[#allocation8 + $0x1998] ss:$52 sps:$4 sm:$0xff]  }
 0x158   :  { %v17406_v16 = vpack.c.bf16 %v1144_v10, %v1144_v10  ;;  %v17408_v17 = vpack.c.bf16 %v1146_v11, %v1146_v11  ;;  %v15109_v10 = vld [vmem:[#allocation8 + $0x12b4] ss:$52 sps:$4 sm:$0xff]  }
 0x159   :  { %v15112_v11 = vld [vmem:[#allocation8 + $0x1934] ss:$52 sps:$4 sm:$0xff]  }
 0x15a   :  { %9590 = vmatprep.mubr.bf16.mxu1 %v17406_v16  ;;  %9631 = vmatprep.mubr.bf16.mxu0 %v17408_v17 }
 0x15b   :  { %9591 = vmatmul.mubr.bf16.vlgmr.msra.gmra.mxu1 %v17410_v18  ;;  %9632 = vmatmul.mubr.bf16.vlgmr.msra.gmra.mxu0 %v17404_v14 }
 0x15c   :  { %9641 = vmatpush1.bf16.msra.mxu1 %v15053_v12  ;;  %9682 = vmatpush1.bf16.msra.mxu0 %v15056_v13 }
 0x15d   :  { %9642 = vmatprep.subr.bf16.mxu1 %v15061_v19  ;;  %9683 = vmatprep.subr.bf16.mxu0 %v15064_v20  ;;  %v15107_v19 = vld [vmem:[#allocation8 + $0x12b0] ss:$52 sps:$4 sm:$0xff]  }
 0x15e   :  { %v15110_v20 = vld [vmem:[#allocation8 + $0x1930] ss:$52 sps:$4 sm:$0xff]  }
 0x160   :  { %9643 = vmatpush1.bf16.msra.mxu1 %v15059_v21  ;;  %9684 = vmatpush1.bf16.msra.mxu0 %v15062_v22  ;;  %v15115_v21 = vld [vmem:[#allocation8 + $0x124c] ss:$52 sps:$4 sm:$0xff]  }
 0x161   :  { %9644 = vmatprep.subr.bf16.mxu1 %v15067_v23  ;;  %9685 = vmatprep.subr.bf16.mxu0 %v15070_v24  ;;  %v15118_v22 = vld [vmem:[#allocation8 + $0x18cc] ss:$52 sps:$4 sm:$0xff]   ;;  %v15113_v23 = vld [vmem:[#allocation8 + $0x1248] ss:$52 sps:$4 sm:$0xff]  }
 0x162   :  { %v15116_v24 = vld [vmem:[#allocation8 + $0x18c8] ss:$52 sps:$4 sm:$0xff]  }
 0x164   :  { %9645 = vmatpush1.bf16.msra.mxu1 %v15065_v25  ;;  %9686 = vmatpush1.bf16.msra.mxu0 %v15068_v26  ;;  %v15121_v25 = vld [vmem:[#allocation8 + $0x11e4] ss:$52 sps:$4 sm:$0xff]  }
 0x165   :  { %9646 = vmatprep.subr.bf16.mxu1 %v15073_v27  ;;  %9687 = vmatprep.subr.bf16.mxu0 %v15076_v28  ;;  %v15124_v26 = vld [vmem:[#allocation8 + $0x1864] ss:$52 sps:$4 sm:$0xff]   ;;  %v15119_v27 = vld [vmem:[#allocation8 + $0x11e0] ss:$52 sps:$4 sm:$0xff]  }
 0x166   :  { %v15122_v28 = vld [vmem:[#allocation8 + $0x1860] ss:$52 sps:$4 sm:$0xff]  }
 0x168   :  { %9647 = vmatpush1.bf16.msra.mxu1 %v15071_v29  ;;  %9688 = vmatpush1.bf16.msra.mxu0 %v15074_v30  ;;  %v15127_v29 = vld [vmem:[#allocation8 + $0x117c] ss:$52 sps:$4 sm:$0xff]  }
 0x169   :  { %9648 = vmatprep.subr.bf16.mxu1 %v15079_v31  ;;  %9689 = vmatprep.subr.bf16.mxu0 %v15082_v32  ;;  %v15130_v30 = vld [vmem:[#allocation8 + $0x17fc] ss:$52 sps:$4 sm:$0xff]   ;;  %v290_v31 = vsub.s32 6, %v17380_v51  ;;  %v15125_v32 = vld [vmem:[#allocation8 + $0x1178] ss:$52 sps:$4 sm:$0xff]  }
 0x16c   :  { %9649 = vmatpush1.bf16.msra.mxu1 %v15077_v33  ;;  %9690 = vmatpush1.bf16.msra.mxu0 %v15080_v34  ;;  %v15128_v33 = vld [vmem:[#allocation8 + $0x17f8] ss:$52 sps:$4 sm:$0xff]   ;;  %v17436_v34 = vsub.s32 4, %v17380_v51  ;;  %v16307_v51 = vld [vmem:[#allocation8 + $0xf90] ss:$52 sps:$4 sm:$0xff]  }
 0x16d   :  { %9650 = vmatprep.subr.bf16.mxu1 %v15085_v35  ;;  %9691 = vmatprep.subr.bf16.mxu0 %v15088_v37  ;;  %v15133_v35 = vld [vmem:[#allocation8 + $0x1114] ss:$52 sps:$4 sm:$0xff]  }
 0x16e   :  { %v15136_v37 = vld [vmem:[#allocation8 + $0x1794] ss:$52 sps:$4 sm:$0xff]  }
 0x170   :  { %9651 = vmatpush1.bf16.msra.mxu1 %v15083_v38  ;;  %9692 = vmatpush1.bf16.msra.mxu0 %v15086_v40  ;;  %v15131_v38 = vld [vmem:[#allocation8 + $0x1110] ss:$52 sps:$4 sm:$0xff]   ;;  %v291_v40 = vrot.slane %v17382_v52, %v290_v31 }
 0x171   :  { %9652 = vmatprep.subr.bf16.mxu1 %v15091_v43  ;;  %9693 = vmatprep.subr.bf16.mxu0 %v15094_v44  ;;  %v17424_v57 = vpop.f32.mrf.mxu0  ;;  %v17426_v58 = vpop.f32.mrf.mxu1  ;;  %v15134_v43 = vld [vmem:[#allocation8 + $0x1790] ss:$52 sps:$4 sm:$0xff]   ;;  %v15139_v44 = vld [vmem:[#allocation8 + $0x10ac] ss:$52 sps:$4 sm:$0xff]  }
 0x173   :  { %v975_v59 = vpop.f32.mrf.mxu0  ;;  %v1016_v60 = vpop.f32.mrf.mxu1 }
 0x174   :  { %9653 = vmatpush1.bf16.msra.mxu1 %v15089_v45  ;;  %9694 = vmatpush1.bf16.msra.mxu0 %v15092_v46  ;;  %v976_v63 = vadd.f32 %v975_v59, %v287_v47  ;;  %v1017_v1 = vadd.f32 %v1016_v60, %v295_v48  ;;  %v283_v45 = vrot.slane %v17382_v52, %v17436_v34  ;;  %v15142_v46 = vld [vmem:[#allocation8 + $0x172c] ss:$52 sps:$4 sm:$0xff]   ;;  %v17443_v47 = vld [vmem:[#allocation7 + $0x8] sm:$0x1f] }
 0x175   :  { %9654 = vmatprep.subr.bf16.mxu1 %v15097_v49  ;;  %9695 = vmatprep.subr.bf16.mxu0 %v15100_v50  ;;  %v977_v4 = vpop.f32.mrf.mxu0  ;;  %v1018_v5 = vpop.f32.mrf.mxu1  ;;  %v1015_v48 = vadd.f32 %v17426_v58, %v291_v40  ;;  %v15137_v49 = vld [vmem:[#allocation8 + $0x10a8] ss:$52 sps:$4 sm:$0xff]   ;;  %v303_v59 = vrot.slane %v17443_v47, %v17391_v55  ;;  %v311_v60 = vrot.slane %v17443_v47, %v17394_v56  ;;  %v15145_v52 = vld [vmem:[#allocation8 + $0x1044] ss:$52 sps:$4 sm:$0xff]  }
 0x176   :  { %v1148_v8 = vmax.f32 %v976_v63, 0.0  ;;  %v1150_v9 = vmax.f32 %v1017_v1, 0.0  ;;  %v15140_v50 = vld [vmem:[#allocation8 + $0x1728] ss:$52 sps:$4 sm:$0xff]   ;;  %v15143_v4 = vld [vmem:[#allocation8 + $0x1040] ss:$52 sps:$4 sm:$0xff]  }
 0x177   :  { %v978_v12 = vpop.f32.mrf.mxu0  ;;  %v1019_v13 = vpop.f32.mrf.mxu1  ;;  %v1149_v58 = vmax.f32 %v1015_v48, 0.0  ;;  %v15146_v5 = vld [vmem:[#allocation8 + $0x16c0] ss:$52 sps:$4 sm:$0xff]   ;;  %v15172_v40 = vld [vmem:[#allocation8 + $0x2224] ss:$52 sps:$4 sm:$0xff]  }
 0x178   :  { %9655 = vmatpush1.bf16.msra.mxu1 %v15095_v61  ;;  %9696 = vmatpush1.bf16.msra.mxu0 %v15098_v62  ;;  %v17428_v15 = vpack.c.bf16 %v1148_v8, %v1148_v8  ;;  %v17430_v36 = vpack.c.bf16 %v1150_v9, %v1150_v9  ;;  %v974_v61 = vadd.f32 %v17424_v57, %v283_v45  ;;  %v15148_v62 = vld [vmem:[#allocation8 + $0x16c4] ss:$52 sps:$4 sm:$0xff]   ;;  %v15151_v57 = vld [vmem:[#allocation8 + $0x1cdc] ss:$52 sps:$4 sm:$0xff]  }
 0x179   :  { %9656 = vmatprep.subr.bf16.mxu1 %v15103_v2  ;;  %9697 = vmatprep.subr.bf16.mxu0 %v15106_v3  ;;  %v15154_v9 = vld [vmem:[#allocation8 + $0x235c] ss:$52 sps:$4 sm:$0xff]   ;;  %v15149_v12 = vld [vmem:[#allocation8 + $0x1cd8] ss:$52 sps:$4 sm:$0xff]  }
 0x17a   :  { %9672 = vmatprep.mubr.bf16.mxu1 %v17428_v15  ;;  %9713 = vmatprep.mubr.bf16.mxu0 %v17430_v36  ;;  %v1147_v8 = vmax.f32 %v974_v61, 0.0  ;;  %v15152_v13 = vld [vmem:[#allocation8 + $0x2358] ss:$52 sps:$4 sm:$0xff]   ;;  %v15175_v45 = vld [vmem:[#allocation8 + $0x1b3c] ss:$52 sps:$4 sm:$0xff]  }
 0x17b   :  { %v15173_v48 = vld [vmem:[#allocation8 + $0x1b38] ss:$52 sps:$4 sm:$0xff]   ;;  %v15182_v61 = vld [vmem:[#allocation8 + $0x2150] ss:$52 sps:$4 sm:$0xff]  }
 0x17c   :  { %9657 = vmatpush2.bf16.msra.mxu1 %v15101_v6  ;;  %9698 = vmatpush2.bf16.msra.mxu0 %v15104_v7 }
 0x17d   :  { %9658 = vmatprep.subr.bf16.mxu1 %v15109_v10  ;;  %9699 = vmatprep.subr.bf16.mxu0 %v15112_v11 }
 0x180   :  { %9659 = vmatpush2.bf16.msra.mxu1 %v15107_v19  ;;  %9700 = vmatpush2.bf16.msra.mxu0 %v15110_v20 }
 0x181   :  { %9660 = vmatprep.subr.bf16.mxu1 %v15115_v21  ;;  %9701 = vmatprep.subr.bf16.mxu0 %v15118_v22  ;;  %v17455_v21 = vpack.c.bf16 %v1149_v58, %v1149_v58  ;;  %v15157_v22 = vld [vmem:[#allocation8 + $0x1c74] ss:$52 sps:$4 sm:$0xff]   ;;  %v315_v58 = vrot.slane %v17443_v47, %v17436_v34 }
 0x184   :  { %9661 = vmatpush2.bf16.msra.mxu1 %v15113_v23  ;;  %9702 = vmatpush2.bf16.msra.mxu0 %v15116_v24  ;;  %v15160_v23 = vld [vmem:[#allocation8 + $0x22f4] ss:$52 sps:$4 sm:$0xff]  }
 0x185   :  { %9662 = vmatprep.subr.bf16.mxu1 %v15121_v25  ;;  %9703 = vmatprep.subr.bf16.mxu0 %v15124_v26  ;;  %v17457_v26 = vpack.c.bf16 %v1147_v8, %v1147_v8 }
 0x188   :  { %9663 = vmatpush2.bf16.msra.mxu1 %v15119_v27  ;;  %9704 = vmatpush2.bf16.msra.mxu0 %v15122_v28  ;;  %v15155_v27 = vld [vmem:[#allocation8 + $0x1c70] ss:$52 sps:$4 sm:$0xff]  }
 0x189   :  { %9664 = vmatprep.subr.bf16.mxu1 %v15127_v29  ;;  %9705 = vmatprep.subr.bf16.mxu0 %v15130_v30  ;;  %v15158_v30 = vld [vmem:[#allocation8 + $0x22f0] ss:$52 sps:$4 sm:$0xff]  }
 0x18c   :  { %9665 = vmatpush2.bf16.msra.mxu1 %v15125_v32  ;;  %9706 = vmatpush2.bf16.msra.mxu0 %v15128_v33  ;;  %v15163_v32 = vld [vmem:[#allocation8 + $0x1c0c] ss:$52 sps:$4 sm:$0xff]  }
 0x18d   :  { %9666 = vmatprep.subr.bf16.mxu1 %v15133_v35  ;;  %9707 = vmatprep.subr.bf16.mxu0 %v15136_v37  ;;  %v15166_v33 = vld [vmem:[#allocation8 + $0x228c] ss:$52 sps:$4 sm:$0xff]   ;;  %v15161_v35 = vld [vmem:[#allocation8 + $0x1c08] ss:$52 sps:$4 sm:$0xff]  }
 0x18e   :  { %v15164_v37 = vld [vmem:[#allocation8 + $0x2288] ss:$52 sps:$4 sm:$0xff]  }
 0x190   :  { %9667 = vmatpush2.bf16.msra.mxu1 %v15131_v38  ;;  %9708 = vmatpush2.bf16.msra.mxu0 %v15134_v43  ;;  %v15169_v38 = vld [vmem:[#allocation8 + $0x1ba4] ss:$52 sps:$4 sm:$0xff]   ;;  %v15167_v43 = vld [vmem:[#allocation8 + $0x1ba0] ss:$52 sps:$4 sm:$0xff]  }
 0x191   :  { %9668 = vmatprep.subr.bf16.mxu1 %v15139_v44  ;;  %9709 = vmatprep.subr.bf16.mxu0 %v15142_v46  ;;  %v17451_v63 = vpop.f32.mrf.mxu0  ;;  %v17453_v1 = vpop.f32.mrf.mxu1  ;;  %v15170_v44 = vld [vmem:[#allocation8 + $0x2220] ss:$52 sps:$4 sm:$0xff]   ;;  %v15178_v46 = vld [vmem:[#allocation8 + $0x21bc] ss:$52 sps:$4 sm:$0xff]  }
 0x193   :  { %v1057_v2 = vpop.f32.mrf.mxu0  ;;  %v1098_v3 = vpop.f32.mrf.mxu1 }
 0x194   :  { %9669 = vmatpush2.bf16.msra.mxu1 %v15137_v49  ;;  %9710 = vmatpush2.bf16.msra.mxu0 %v15140_v50  ;;  %v1058_v6 = vadd.f32 %v1057_v2, %v303_v59  ;;  %v1099_v7 = vadd.f32 %v1098_v3, %v311_v60  ;;  %v15176_v49 = vld [vmem:[#allocation8 + $0x21b8] ss:$52 sps:$4 sm:$0xff]   ;;  %v15181_v50 = vld [vmem:[#allocation8 + $0x1ad4] ss:$52 sps:$4 sm:$0xff]   ;;  %v15179_v60 = vld [vmem:[#allocation8 + $0x1ad0] ss:$52 sps:$4 sm:$0xff]  }
 0x195   :  { %9670 = vmatprep.subr.bf16.mxu1 %v15145_v52  ;;  %9711 = vmatprep.subr.bf16.mxu0 %v15148_v62  ;;  %v1059_v10 = vpop.f32.mrf.mxu0  ;;  %v1100_v11 = vpop.f32.mrf.mxu1  ;;  %v15184_v59 = vld [vmem:[#allocation8 + $0x2154] ss:$52 sps:$4 sm:$0xff]   ;;  %v15187_v52 = vld [vmem:[#allocation8 + $0x1a6c] ss:$52 sps:$4 sm:$0xff]  }
 0x196   :  { %v1152_v19 = vmax.f32 %v1058_v6, 0.0  ;;  %v1154_v20 = vmax.f32 %v1099_v7, 0.0  ;;  %v15190_v62 = vld [vmem:[#allocation8 + $0x20ec] ss:$52 sps:$4 sm:$0xff]   ;;  %v15185_v2 = vld [vmem:[#allocation8 + $0x1a68] ss:$52 sps:$4 sm:$0xff]  }
 0x197   :  { %v1060_v24 = vpop.f32.mrf.mxu0  ;;  %v1101_v25 = vpop.f32.mrf.mxu1  ;;  %v15188_v3 = vld [vmem:[#allocation8 + $0x20e8] ss:$52 sps:$4 sm:$0xff]  }
 0x198   :  { %9671 = vmatpush2.bf16.msra.mxu1 %v15143_v4  ;;  %9712 = vmatpush2.bf16.msra.mxu0 %v15146_v5  ;;  %v17459_v28 = vpack.c.bf16 %v1152_v19, %v1152_v19  ;;  %v17461_v29 = vpack.c.bf16 %v1154_v20, %v1154_v20  ;;  %v15193_v4 = vld [vmem:[#allocation8 + $0x1a04] ss:$52 sps:$4 sm:$0xff]   ;;  %v15199_v10 = vld [vmem:[#allocation8 + $0x201c] ss:$52 sps:$4 sm:$0xff]   ;;  %v15205_v20 = vld [vmem:[#allocation8 + $0x1fb4] ss:$52 sps:$4 sm:$0xff]  }
 0x199   :  { %9722 = vmatprep.subr.bf16.mxu1 %v15151_v57  ;;  %9763 = vmatprep.subr.bf16.mxu0 %v15154_v9  ;;  %v15196_v5 = vld [vmem:[#allocation8 + $0x2084] ss:$52 sps:$4 sm:$0xff]   ;;  %v15191_v57 = vld [vmem:[#allocation8 + $0x1a00] ss:$52 sps:$4 sm:$0xff]   ;;  %v15202_v11 = vld [vmem:[#allocation8 + $0x269c] ss:$52 sps:$4 sm:$0xff]  }
 0x19a   :  { %v15194_v9 = vld [vmem:[#allocation8 + $0x2080] ss:$52 sps:$4 sm:$0xff]   ;;  %v15200_v19 = vld [vmem:[#allocation8 + $0x2698] ss:$52 sps:$4 sm:$0xff]   ;;  %v15203_v24 = vld [vmem:[#allocation8 + $0x1fb0] ss:$52 sps:$4 sm:$0xff]  }
 0x19b   :  { %9673 = vmatmul.mubr.bf16.vlgmr.msra.gmra.mxu1 %v17457_v26  ;;  %9714 = vmatmul.mubr.bf16.vlgmr.msra.gmra.mxu0 %v17455_v21  ;;  %v15206_v25 = vld [vmem:[#allocation8 + $0x2630] ss:$52 sps:$4 sm:$0xff]  }
 0x19c   :  { %9723 = vmatpush1.bf16.msra.mxu1 %v15149_v12  ;;  %9764 = vmatpush1.bf16.msra.mxu0 %v15152_v13  ;;  %v15197_v13 = vld [vmem:[#allocation8 + $0x2018] ss:$52 sps:$4 sm:$0xff]  }
 0x19d   :  { %9724 = vmatprep.subr.bf16.mxu1 %v15157_v22  ;;  %9765 = vmatprep.subr.bf16.mxu0 %v15160_v23  ;;  %v15208_v22 = vld [vmem:[#allocation8 + $0x2634] ss:$52 sps:$4 sm:$0xff]  }
 0x19e   :  { %9754 = vmatprep.mubr.bf16.mxu1 %v17459_v28  ;;  %9795 = vmatprep.mubr.bf16.mxu0 %v17461_v29 }
 0x1a0   :  { %9725 = vmatpush1.bf16.msra.mxu1 %v15155_v27  ;;  %9766 = vmatpush1.bf16.msra.mxu0 %v15158_v30  ;;  %v15211_v27 = vld [vmem:[#allocation8 + $0x1f4c] ss:$52 sps:$4 sm:$0xff]  }
 0x1a1   :  { %9726 = vmatprep.subr.bf16.mxu1 %v15163_v32  ;;  %9767 = vmatprep.subr.bf16.mxu0 %v15166_v33  ;;  %v15214_v30 = vld [vmem:[#allocation8 + $0x25cc] ss:$52 sps:$4 sm:$0xff]   ;;  %v15209_v32 = vld [vmem:[#allocation8 + $0x1f48] ss:$52 sps:$4 sm:$0xff]  }
 0x1a2   :  { %v15212_v33 = vld [vmem:[#allocation8 + $0x25c8] ss:$52 sps:$4 sm:$0xff]  }
 0x1a4   :  { %9727 = vmatpush1.bf16.msra.mxu1 %v15161_v35  ;;  %9768 = vmatpush1.bf16.msra.mxu0 %v15164_v37  ;;  %v15217_v35 = vld [vmem:[#allocation8 + $0x1ee4] ss:$52 sps:$4 sm:$0xff]  }
 0x1a5   :  { %9728 = vmatprep.subr.bf16.mxu1 %v15169_v38  ;;  %9769 = vmatprep.subr.bf16.mxu0 %v15172_v40  ;;  %v15220_v37 = vld [vmem:[#allocation8 + $0x2564] ss:$52 sps:$4 sm:$0xff]   ;;  %v15215_v38 = vld [vmem:[#allocation8 + $0x1ee0] ss:$52 sps:$4 sm:$0xff]  }
 0x1a6   :  { %v15218_v40 = vld [vmem:[#allocation8 + $0x2560] ss:$52 sps:$4 sm:$0xff]  }
 0x1a8   :  { %9729 = vmatpush1.bf16.msra.mxu1 %v15167_v43  ;;  %9770 = vmatpush1.bf16.msra.mxu0 %v15170_v44  ;;  %v15223_v43 = vld [vmem:[#allocation8 + $0x1e7c] ss:$52 sps:$4 sm:$0xff]  }
 0x1a9   :  { %9730 = vmatprep.subr.bf16.mxu1 %v15175_v45  ;;  %9771 = vmatprep.subr.bf16.mxu0 %v15178_v46  ;;  %v15226_v44 = vld [vmem:[#allocation8 + $0x24fc] ss:$52 sps:$4 sm:$0xff]   ;;  %v15221_v45 = vld [vmem:[#allocation8 + $0x1e78] ss:$52 sps:$4 sm:$0xff]  }
 0x1aa   :  { %v15224_v46 = vld [vmem:[#allocation8 + $0x24f8] ss:$52 sps:$4 sm:$0xff]  }
 0x1ac   :  { %9731 = vmatpush1.bf16.msra.mxu1 %v15173_v48  ;;  %9772 = vmatpush1.bf16.msra.mxu0 %v15176_v49  ;;  %v15229_v48 = vld [vmem:[#allocation8 + $0x1e14] ss:$52 sps:$4 sm:$0xff]  }
 0x1ad   :  { %9732 = vmatprep.subr.bf16.mxu1 %v15181_v50  ;;  %9773 = vmatprep.subr.bf16.mxu0 %v15184_v59  ;;  %v15232_v49 = vld [vmem:[#allocation8 + $0x2494] ss:$52 sps:$4 sm:$0xff]   ;;  %v307_v50 = vrot.slane %v17443_v47, %v17388_v54  ;;  %v15227_v59 = vld [vmem:[#allocation8 + $0x1e10] ss:$52 sps:$4 sm:$0xff]  }
 0x1b0   :  { %9733 = vmatpush1.bf16.msra.mxu1 %v15179_v60  ;;  %9774 = vmatpush1.bf16.msra.mxu0 %v15182_v61  ;;  %v15230_v60 = vld [vmem:[#allocation8 + $0x2490] ss:$52 sps:$4 sm:$0xff]   ;;  %v299_v61 = vrot.slane %v17443_v47, %v17385_v53  ;;  %v15239_v47 = vld [vmem:[#allocation8 + $0x1d40] ss:$52 sps:$4 sm:$0xff]  }
 0x1b1   :  { %9734 = vmatprep.subr.bf16.mxu1 %v15187_v52  ;;  %9775 = vmatprep.subr.bf16.mxu0 %v15190_v62  ;;  %v1137_v6 = vpop.f32.mrf.mxu0  ;;  %v15235_v52 = vld [vmem:[#allocation8 + $0x1dac] ss:$52 sps:$4 sm:$0xff]  }
 0x1b2   :  { %v17469_v7 = vadd.f32 %v1137_v6, %v315_v58  ;;  %v15238_v62 = vld [vmem:[#allocation8 + $0x242c] ss:$52 sps:$4 sm:$0xff]   ;;  %v1097_v58 = vadd.f32 %v17453_v1, %v307_v50  ;;  %v15244_v6 = vld [vmem:[#allocation8 + $0x23c4] ss:$52 sps:$4 sm:$0xff]  }
 0x1b3   :  { %v14726_v8 = vpop.f32.mrf.mxu0  ;;  %v15250_v1 = vld [vmem:[#allocation8 + $0x2e4] ss:$52 sps:$4 sm:$0xff]   ;;  %v15283_v50 = vld [vmem:[#allocation8 + $0x276c] ss:$52 sps:$4 sm:$0xff]  }
 0x1b4   :  { %9735 = vmatpush1.bf16.msra.mxu1 %v15185_v2  ;;  %9776 = vmatpush1.bf16.msra.mxu0 %v15188_v3  ;;  %v15233_v2 = vld [vmem:[#allocation8 + $0x1da8] ss:$52 sps:$4 sm:$0xff]   ;;  %v1153_v8 = vmax.f32 %v1097_v58, 0.0  ;;  %v1155_v58 = vmax.f32 %v17469_v7, 0.0  ;;  %v15299_v7 = vld [vmem:[#allocation8 + $0x5b8] ss:$52 sps:$4 sm:$0xff]  }
 0x1b5   :  { %9736 = vmatprep.subr.bf16.mxu1 %v15193_v4  ;;  %9777 = vmatprep.subr.bf16.mxu0 %v15196_v5  ;;  %v1140_v12 = vpop.f32.mrf.mxu0  ;;  %v15236_v3 = vld [vmem:[#allocation8 + $0x2428] ss:$52 sps:$4 sm:$0xff]   ;;  %v1056_v4 = vadd.f32 %v17451_v63, %v299_v61  ;;  %v15241_v5 = vld [vmem:[#allocation8 + $0x1d44] ss:$52 sps:$4 sm:$0xff]  }
 0x1b6   :  { %v15248_v12 = vld [vmem:[#allocation8 + $0x2e0] ss:$52 sps:$4 sm:$0xff]   ;;  %v15284_v61 = vld [vmem:[#allocation8 + $0x70] ss:$52 sps:$4 sm:$0xff]  }
 0x1b7   :  { %v14727_v23 = vpop.f32.mrf.mxu0 }
 0x1b8   :  { %9737 = vmatpush1.bf16.msra.mxu1 %v15191_v57  ;;  %9778 = vmatpush1.bf16.msra.mxu0 %v15194_v9  ;;  %v15242_v57 = vld [vmem:[#allocation8 + $0x23c0] ss:$52 sps:$4 sm:$0xff]   ;;  %v1151_v9 = vmax.f32 %v1056_v4, 0.0  ;;  %v15256_v23 = vld [vmem:[#allocation8 + $0x27c] ss:$52 sps:$4 sm:$0xff]  }
 0x1b9   :  { %9738 = vmatprep.subr.bf16.mxu1 %v15199_v10  ;;  %9779 = vmatprep.subr.bf16.mxu0 %v15202_v11  ;;  %v15247_v10 = vld [vmem:[#allocation8 + $0x29dc] ss:$52 sps:$4 sm:$0xff]   ;;  %v15245_v11 = vld [vmem:[#allocation8 + $0x29d8] ss:$52 sps:$4 sm:$0xff]  }
 0x1ba   :  { %v17479_v63 = vpack.c.bf16 %v1151_v9, %v1151_v9  ;;  %v15295_v4 = vld [vmem:[#allocation8 + $0x624] ss:$52 sps:$4 sm:$0xff]   ;;  %v15304_v9 = vld [vmem:[#allocation8 + $0x8fc] ss:$52 sps:$4 sm:$0xff]  }
 0x1bc   :  { %9739 = vmatpush2.bf16.msra.mxu1 %v15197_v13  ;;  %9780 = vmatpush2.bf16.msra.mxu0 %v15200_v19  ;;  %v17477_v13 = vpack.c.bf16 %v1153_v8, %v1153_v8  ;;  %v15253_v19 = vld [vmem:[#allocation8 + $0x2974] ss:$52 sps:$4 sm:$0xff]  }
 0x1bd   :  { %9740 = vmatprep.subr.bf16.mxu1 %v15205_v20  ;;  %9781 = vmatprep.subr.bf16.mxu0 %v15208_v22  ;;  %v15251_v20 = vld [vmem:[#allocation8 + $0x2970] ss:$52 sps:$4 sm:$0xff]   ;;  %v15254_v22 = vld [vmem:[#allocation8 + $0x278] ss:$52 sps:$4 sm:$0xff]   ;;  %v15296_v8 = vld [vmem:[#allocation8 + $0x960] ss:$52 sps:$4 sm:$0xff]  }
 0x1c0   :  { %9741 = vmatpush2.bf16.msra.mxu1 %v15203_v24  ;;  %9782 = vmatpush2.bf16.msra.mxu0 %v15206_v25  ;;  %v15259_v24 = vld [vmem:[#allocation8 + $0x290c] ss:$52 sps:$4 sm:$0xff]   ;;  %v15262_v25 = vld [vmem:[#allocation8 + $0x214] ss:$52 sps:$4 sm:$0xff]  }
 0x1c1   :  { %9742 = vmatprep.subr.bf16.mxu1 %v15211_v27  ;;  %9783 = vmatprep.subr.bf16.mxu0 %v15214_v30  ;;  %v15257_v27 = vld [vmem:[#allocation8 + $0x2908] ss:$52 sps:$4 sm:$0xff]   ;;  %v15260_v30 = vld [vmem:[#allocation8 + $0x210] ss:$52 sps:$4 sm:$0xff]  }
 0x1c4   :  { %9743 = vmatpush2.bf16.msra.mxu1 %v15209_v32  ;;  %9784 = vmatpush2.bf16.msra.mxu0 %v15212_v33  ;;  %v15265_v32 = vld [vmem:[#allocation8 + $0x28a4] ss:$52 sps:$4 sm:$0xff]   ;;  %v15268_v33 = vld [vmem:[#allocation8 + $0x1ac] ss:$52 sps:$4 sm:$0xff]  }
 0x1c5   :  { %9744 = vmatprep.subr.bf16.mxu1 %v15217_v35  ;;  %9785 = vmatprep.subr.bf16.mxu0 %v15220_v37  ;;  %v15263_v35 = vld [vmem:[#allocation8 + $0x28a0] ss:$52 sps:$4 sm:$0xff]   ;;  %v15266_v37 = vld [vmem:[#allocation8 + $0x1a8] ss:$52 sps:$4 sm:$0xff]  }
 0x1c8   :  { %9745 = vmatpush2.bf16.msra.mxu1 %v15215_v38  ;;  %9786 = vmatpush2.bf16.msra.mxu0 %v15218_v40  ;;  %v15271_v38 = vld [vmem:[#allocation8 + $0x283c] ss:$52 sps:$4 sm:$0xff]   ;;  %v15274_v40 = vld [vmem:[#allocation8 + $0x144] ss:$52 sps:$4 sm:$0xff]  }
 0x1c9   :  { %9746 = vmatprep.subr.bf16.mxu1 %v15223_v43  ;;  %9787 = vmatprep.subr.bf16.mxu0 %v15226_v44  ;;  %v15269_v43 = vld [vmem:[#allocation8 + $0x2838] ss:$52 sps:$4 sm:$0xff]   ;;  %v15272_v44 = vld [vmem:[#allocation8 + $0x140] ss:$52 sps:$4 sm:$0xff]  }
 0x1cc   :  { %9747 = vmatpush2.bf16.msra.mxu1 %v15221_v45  ;;  %9788 = vmatpush2.bf16.msra.mxu0 %v15224_v46  ;;  %v15277_v45 = vld [vmem:[#allocation8 + $0x27d4] ss:$52 sps:$4 sm:$0xff]   ;;  %v15280_v46 = vld [vmem:[#allocation8 + $0xdc] ss:$52 sps:$4 sm:$0xff]  }
 0x1cd   :  { %9748 = vmatprep.subr.bf16.mxu1 %v15229_v48  ;;  %9789 = vmatprep.subr.bf16.mxu0 %v15232_v49  ;;  %v15275_v48 = vld [vmem:[#allocation8 + $0x27d0] ss:$52 sps:$4 sm:$0xff]   ;;  %v15278_v49 = vld [vmem:[#allocation8 + $0xd8] ss:$52 sps:$4 sm:$0xff]  }
 0x1d0   :  { %9749 = vmatpush2.bf16.msra.mxu1 %v15227_v59  ;;  %9790 = vmatpush2.bf16.msra.mxu0 %v15230_v60  ;;  %v15286_v59 = vld [vmem:[#allocation8 + $0x74] ss:$52 sps:$4 sm:$0xff]  }
 0x1d1   :  { %9750 = vmatprep.subr.bf16.mxu1 %v15235_v52  ;;  %9791 = vmatprep.subr.bf16.mxu0 %v15238_v62  ;;  %v15281_v60 = vld [vmem:[#allocation8 + $0x2768] ss:$52 sps:$4 sm:$0xff]   ;;  %v15289_v52 = vld [vmem:[#allocation8 + $0x2704] ss:$52 sps:$4 sm:$0xff]   ;;  %v15292_v62 = vld [vmem:[#allocation8 + $0xc] ss:$52 sps:$4 sm:$0xff]  }
 0x1d4   :  { %9751 = vmatpush2.bf16.msra.mxu1 %v15233_v2  ;;  %9792 = vmatpush2.bf16.msra.mxu0 %v15236_v3  ;;  %v15287_v2 = vld [vmem:[#allocation8 + $0x2700] ss:$52 sps:$4 sm:$0xff]   ;;  %v15290_v3 = vld [vmem:[#allocation8 + $0x8] ss:$52 sps:$4 sm:$0xff]  }
 0x1d5   :  { %9752 = vmatprep.subr.bf16.mxu1 %v15241_v5  ;;  %9793 = vmatprep.subr.bf16.mxu0 %v15244_v6  ;;  %v15298_v5 = vld [vmem:[#allocation8 + $0x964] ss:$52 sps:$4 sm:$0xff]   ;;  %v15293_v6 = vld [vmem:[#allocation8 + $0x620] ss:$52 sps:$4 sm:$0xff]  }
 0x1d8   :  { %9753 = vmatpush2.bf16.msra.mxu1 %v15239_v47  ;;  %9794 = vmatpush2.bf16.msra.mxu0 %v15242_v57  ;;  %v17486_v47 = vpack.c.bf16 %v1155_v58, %v1155_v58  ;;  %v15301_v57 = vld [vmem:[#allocation8 + $0x5bc] ss:$52 sps:$4 sm:$0xff]  }
 0x1d9   :  { %9804 = vmatprep.subr.bf16.mxu1 %v15247_v10  ;;  %9845 = vmatprep.subr.bf16.mxu0 %v15250_v1  ;;  %v15302_v10 = vld [vmem:[#allocation8 + $0x8f8] ss:$52 sps:$4 sm:$0xff]   ;;  %v15307_v1 = vld [vmem:[#allocation8 + $0x554] ss:$52 sps:$4 sm:$0xff]   ;;  %v15349_v58 = vld [vmem:[#allocation8 + $0xc3c] ss:$52 sps:$4 sm:$0xff]  }
 0x1db   :  { %9755 = vmatmul.mubr.bf16.vlgmr.msra.gmra.mxu1 %v17479_v63  ;;  %9796 = vmatmul.mubr.bf16.vlgmr.msra.gmra.mxu0 %v17477_v13 }
 0x1dc   :  { %9805 = vmatpush1.bf16.msra.mxu1 %v15245_v11  ;;  %9846 = vmatpush1.bf16.msra.mxu0 %v15248_v12  ;;  %v15310_v11 = vld [vmem:[#allocation8 + $0x894] ss:$52 sps:$4 sm:$0xff]   ;;  %v15305_v12 = vld [vmem:[#allocation8 + $0x550] ss:$52 sps:$4 sm:$0xff]  }
 0x1dd   :  { %9877 = vmatprep.mubr.bf16.mxu0 %v17406_v16  ;;  %9806 = vmatprep.subr.bf16.mxu1 %v15253_v19  ;;  %v15308_v19 = vld [vmem:[#allocation8 + $0x890] ss:$52 sps:$4 sm:$0xff]  }
 0x1de   :  { %9847 = vmatprep.subr.bf16.mxu0 %v15256_v23  ;;  %9836 = vmatprep.mubr.bf16.mxu1 %v17274_v0  ;;  %v15311_v23 = vld [vmem:[#allocation8 + $0x4e8] ss:$52 sps:$4 sm:$0xff]  }
 0x1e0   :  { %9807 = vmatpush1.bf16.msra.mxu1 %v15251_v20  ;;  %9848 = vmatpush1.bf16.msra.mxu0 %v15254_v22  ;;  %v15313_v20 = vld [vmem:[#allocation8 + $0x4ec] ss:$52 sps:$4 sm:$0xff]  }
 0x1e1   :  { %9808 = vmatprep.subr.bf16.mxu1 %v15259_v24  ;;  %9849 = vmatprep.subr.bf16.mxu0 %v15262_v25  ;;  %v15316_v22 = vld [vmem:[#allocation8 + $0x82c] ss:$52 sps:$4 sm:$0xff]   ;;  %v15314_v24 = vld [vmem:[#allocation8 + $0x828] ss:$52 sps:$4 sm:$0xff]   ;;  %v15319_v25 = vld [vmem:[#allocation8 + $0x484] ss:$52 sps:$4 sm:$0xff]  }
 0x1e4   :  { %9809 = vmatpush1.bf16.msra.mxu1 %v15257_v27  ;;  %9850 = vmatpush1.bf16.msra.mxu0 %v15260_v30  ;;  %v15322_v27 = vld [vmem:[#allocation8 + $0x7c4] ss:$52 sps:$4 sm:$0xff]   ;;  %v15317_v30 = vld [vmem:[#allocation8 + $0x480] ss:$52 sps:$4 sm:$0xff]  }
 0x1e5   :  { %9810 = vmatprep.subr.bf16.mxu1 %v15265_v32  ;;  %9851 = vmatprep.subr.bf16.mxu0 %v15268_v33  ;;  %v15320_v32 = vld [vmem:[#allocation8 + $0x7c0] ss:$52 sps:$4 sm:$0xff]   ;;  %v15325_v33 = vld [vmem:[#allocation8 + $0x41c] ss:$52 sps:$4 sm:$0xff]  }
 0x1e8   :  { %9811 = vmatpush1.bf16.msra.mxu1 %v15263_v35  ;;  %9852 = vmatpush1.bf16.msra.mxu0 %v15266_v37  ;;  %v15328_v35 = vld [vmem:[#allocation8 + $0x75c] ss:$52 sps:$4 sm:$0xff]   ;;  %v15323_v37 = vld [vmem:[#allocation8 + $0x418] ss:$52 sps:$4 sm:$0xff]  }
 0x1e9   :  { %9812 = vmatprep.subr.bf16.mxu1 %v15271_v38  ;;  %9853 = vmatprep.subr.bf16.mxu0 %v15274_v40  ;;  %v15326_v38 = vld [vmem:[#allocation8 + $0x758] ss:$52 sps:$4 sm:$0xff]   ;;  %v15331_v40 = vld [vmem:[#allocation8 + $0x3b4] ss:$52 sps:$4 sm:$0xff]  }
 0x1ec   :  { %9813 = vmatpush1.bf16.msra.mxu1 %v15269_v43  ;;  %9854 = vmatpush1.bf16.msra.mxu0 %v15272_v44  ;;  %v15334_v43 = vld [vmem:[#allocation8 + $0x6f4] ss:$52 sps:$4 sm:$0xff]   ;;  %v15329_v44 = vld [vmem:[#allocation8 + $0x3b0] ss:$52 sps:$4 sm:$0xff]  }
 0x1ed   :  { %9814 = vmatprep.subr.bf16.mxu1 %v15277_v45  ;;  %9855 = vmatprep.subr.bf16.mxu0 %v15280_v46  ;;  %v15332_v45 = vld [vmem:[#allocation8 + $0x6f0] ss:$52 sps:$4 sm:$0xff]   ;;  %v15337_v46 = vld [vmem:[#allocation8 + $0x34c] ss:$52 sps:$4 sm:$0xff]  }
 0x1f0   :  { %9815 = vmatpush1.bf16.msra.mxu1 %v15275_v48  ;;  %9856 = vmatpush1.bf16.msra.mxu0 %v15278_v49  ;;  %v15340_v48 = vld [vmem:[#allocation8 + $0x68c] ss:$52 sps:$4 sm:$0xff]   ;;  %v15335_v49 = vld [vmem:[#allocation8 + $0x348] ss:$52 sps:$4 sm:$0xff]  }
 0x1f1   :  { %9816 = vmatprep.subr.bf16.mxu1 %v15283_v50  ;;  %9857 = vmatprep.subr.bf16.mxu0 %v15286_v59  ;;  %v15338_v50 = vld [vmem:[#allocation8 + $0x688] ss:$52 sps:$4 sm:$0xff]   ;;  %v15343_v59 = vld [vmem:[#allocation8 + $0xca4] ss:$52 sps:$4 sm:$0xff]  }
 0x1f4   :  { %9817 = vmatpush1.bf16.msra.mxu1 %v15281_v60  ;;  %9858 = vmatpush1.bf16.msra.mxu0 %v15284_v61  ;;  %v15346_v60 = vld [vmem:[#allocation8 + $0xfe4] ss:$52 sps:$4 sm:$0xff]  }
 0x1f5   :  { %9818 = vmatprep.subr.bf16.mxu1 %v15289_v52  ;;  %9859 = vmatprep.subr.bf16.mxu0 %v15292_v62  ;;  %v2625_v61 = vld [vmem:[#allocation10] sm:$0xff] }
 0x1f6   :  { %v15341_v52 = vld [vmem:[#allocation8 + $0xca0] ss:$52 sps:$4 sm:$0xff]  }
 0x1f7   :  { %v15344_v62 = vld [vmem:[#allocation8 + $0xfe0] ss:$52 sps:$4 sm:$0xff]  }
 0x1f8   :  { %9819 = vmatpush1.bf16.msra.mxu1 %v15287_v2  ;;  %9860 = vmatpush1.bf16.msra.mxu0 %v15290_v3  ;;  %v2632_v2 = vrot.slane %v2625_v61, %v17385_v53  ;;  %v2636_v3 = vrot.slane %v2625_v61, %v17391_v55  ;;  %v15380_v61 = vld [vmem:[#allocation8 + $0xd70] ss:$52 sps:$4 sm:$0xff]  }
 0x1f9   :  { %9861 = vmatprep.subr.bf16.mxu0 %v15295_v4  ;;  %9886 = vmatprep.subr.bf16.mxu1 %v15298_v5  ;;  %v15347_v4 = vld [vmem:[#allocation8 + $0xc38] ss:$52 sps:$4 sm:$0xff]  }
 0x1fa   :  { %v15350_v5 = vld [vmem:[#allocation8 + $0xf78] ss:$52 sps:$4 sm:$0xff]  }
 0x1fb   :  { %9837 = vmatmul.mubr.bf16.vlgmr.msra.gmra.mxu1 %v17486_v47 }
 0x1fc   :  { %9862 = vmatpush2.bf16.msra.mxu0 %v15293_v6  ;;  %9887 = vmatpush1.bf16.msra.mxu1 %v15296_v8  ;;  %v15352_v6 = vld [vmem:[#allocation8 + $0xf7c] ss:$52 sps:$4 sm:$0xff]  }
 0x1fd   :  { %9918 = vmatprep.mubr.bf16.mxu1 %v17408_v17  ;;  %9863 = vmatprep.subr.bf16.mxu0 %v15301_v57 }
 0x1fe   :  { %9888 = vmatprep.subr.bf16.mxu1 %v15304_v9  ;;  %v15355_v9 = vld [vmem:[#allocation8 + $0xbd4] ss:$52 sps:$4 sm:$0xff]  }
 0x200   :  { %9864 = vmatpush2.bf16.msra.mxu0 %v15299_v7  ;;  %9889 = vmatpush1.bf16.msra.mxu1 %v15302_v10  ;;  %v15358_v7 = vld [vmem:[#allocation8 + $0xf14] ss:$52 sps:$4 sm:$0xff]  }
 0x201   :  { %9865 = vmatprep.subr.bf16.mxu0 %v15307_v1  ;;  %9890 = vmatprep.subr.bf16.mxu1 %v15310_v11 }
 0x204   :  { %9866 = vmatpush2.bf16.msra.mxu0 %v15305_v12  ;;  %9891 = vmatpush1.bf16.msra.mxu1 %v15308_v19 }
 0x205   :  { %9867 = vmatprep.subr.bf16.mxu0 %v15313_v20  ;;  %9892 = vmatprep.subr.bf16.mxu1 %v15316_v22  ;;  %v15353_v22 = vld [vmem:[#allocation8 + $0xbd0] ss:$52 sps:$4 sm:$0xff]  }
 0x208   :  { %9868 = vmatpush2.bf16.msra.mxu0 %v15311_v23  ;;  %9893 = vmatpush1.bf16.msra.mxu1 %v15314_v24  ;;  %v15356_v23 = vld [vmem:[#allocation8 + $0xf10] ss:$52 sps:$4 sm:$0xff]  }
 0x209   :  { %9869 = vmatprep.subr.bf16.mxu0 %v15319_v25  ;;  %9894 = vmatprep.subr.bf16.mxu1 %v15322_v27 }
 0x20c   :  { %9870 = vmatpush2.bf16.msra.mxu0 %v15317_v30  ;;  %9895 = vmatpush1.bf16.msra.mxu1 %v15320_v32  ;;  %v15361_v30 = vld [vmem:[#allocation8 + $0xb6c] ss:$52 sps:$4 sm:$0xff]  }
 0x20d   :  { %9871 = vmatprep.subr.bf16.mxu0 %v15325_v33  ;;  %9896 = vmatprep.subr.bf16.mxu1 %v15328_v35  ;;  %v15364_v32 = vld [vmem:[#allocation8 + $0xeac] ss:$52 sps:$4 sm:$0xff]   ;;  %v15359_v35 = vld [vmem:[#allocation8 + $0xb68] ss:$52 sps:$4 sm:$0xff]  }
 0x210   :  { %9872 = vmatpush2.bf16.msra.mxu0 %v15323_v37  ;;  %9897 = vmatpush1.bf16.msra.mxu1 %v15326_v38  ;;  %v15362_v37 = vld [vmem:[#allocation8 + $0xea8] ss:$52 sps:$4 sm:$0xff]   ;;  %v15367_v38 = vld [vmem:[#allocation8 + $0xb04] ss:$52 sps:$4 sm:$0xff]  }
 0x211   :  { %9873 = vmatprep.subr.bf16.mxu0 %v15331_v40  ;;  %9898 = vmatprep.subr.bf16.mxu1 %v15334_v43  ;;  %v15370_v40 = vld [vmem:[#allocation8 + $0xe44] ss:$52 sps:$4 sm:$0xff]   ;;  %v15365_v43 = vld [vmem:[#allocation8 + $0xb00] ss:$52 sps:$4 sm:$0xff]  }
 0x214   :  { %9874 = vmatpush2.bf16.msra.mxu0 %v15329_v44  ;;  %9899 = vmatpush1.bf16.msra.mxu1 %v15332_v45  ;;  %v15368_v44 = vld [vmem:[#allocation8 + $0xe40] ss:$52 sps:$4 sm:$0xff]   ;;  %v15373_v45 = vld [vmem:[#allocation8 + $0xa9c] ss:$52 sps:$4 sm:$0xff]  }
 0x215   :  { %9875 = vmatprep.subr.bf16.mxu0 %v15337_v46  ;;  %9900 = vmatprep.subr.bf16.mxu1 %v15340_v48  ;;  %v15376_v46 = vld [vmem:[#allocation8 + $0xddc] ss:$52 sps:$4 sm:$0xff]   ;;  %v15371_v48 = vld [vmem:[#allocation8 + $0xa98] ss:$52 sps:$4 sm:$0xff]  }
 0x218   :  { %9876 = vmatpush2.bf16.msra.mxu0 %v15335_v49  ;;  %9901 = vmatpush1.bf16.msra.mxu1 %v15338_v50  ;;  %v15374_v49 = vld [vmem:[#allocation8 + $0xdd8] ss:$52 sps:$4 sm:$0xff]   ;;  %v15379_v50 = vld [vmem:[#allocation8 + $0xa34] ss:$52 sps:$4 sm:$0xff]  }
 0x219   :  { %9902 = vmatprep.subr.bf16.mxu1 %v15343_v59  ;;  %9927 = vmatprep.subr.bf16.mxu0 %v15346_v60  ;;  %v15382_v59 = vld [vmem:[#allocation8 + $0xd74] ss:$52 sps:$4 sm:$0xff]   ;;  %v15377_v60 = vld [vmem:[#allocation8 + $0xa30] ss:$52 sps:$4 sm:$0xff]  }
 0x21b   :  { %9878 = vmatmul.mubr.bf16.vlgmr.msra.gmra.mxu0 %v17410_v18  ;;  %v9592_v8 = vpop.f32.mrf.mxu1  ;;  %v9633_v57 = vpop.f32.mrf.mxu0 }
 0x21c   :  { %v9593_v10 = vadd.f32 %v9592_v8, %v2632_v2  ;;  %9903 = vmatpush2.bf16.msra.mxu1 %v15341_v52  ;;  %9928 = vmatpush1.bf16.msra.mxu0 %v15344_v62  ;;  %v15385_v52 = vld [vmem:[#allocation8 + $0x9cc] ss:$52 sps:$4 sm:$0xff]   ;;  %v15386_v2 = vld [vmem:[#allocation8 + $0xd08] ss:$52 sps:$4 sm:$0xff]  }
 0x21d   :  { %9959 = vmatprep.mubr.bf16.mxu0 %v17428_v15  ;;  %v9594_v1 = vpop.f32.mrf.mxu1  ;;  %9904 = vmatprep.subr.bf16.mxu1 %v15349_v58  ;;  %v9635_v11 = vpop.f32.mrf.mxu0  ;;  %v15388_v62 = vld [vmem:[#allocation8 + $0xd0c] ss:$52 sps:$4 sm:$0xff]   ;;  %v15383_v58 = vld [vmem:[#allocation8 + $0x9c8] ss:$52 sps:$4 sm:$0xff]  }
 0x21e   :  { %v9595_v12 = vadd.f32 %v9594_v1, %v2636_v3  ;;  %v17494_v19 = vadd.f32 %v9633_v57, %v9593_v10  ;;  %9929 = vmatprep.subr.bf16.mxu0 %v15352_v6  ;;  %v15391_v3 = vld [vmem:[#allocation8 + $0x1324] ss:$52 sps:$4 sm:$0xff]   ;;  %v15392_v6 = vld [vmem:[#allocation8 + $0x1660] ss:$52 sps:$4 sm:$0xff]   ;;  %v15397_v8 = vld [vmem:[#allocation8 + $0x12bc] ss:$52 sps:$4 sm:$0xff]  }
 0x21f   :  { %v9596_v20 = vpop.f32.mrf.mxu1  ;;  %v9637_v24 = vpop.f32.mrf.mxu0  ;;  %v15395_v57 = vld [vmem:[#allocation8 + $0x12b8] ss:$52 sps:$4 sm:$0xff]   ;;  %v15403_v10 = vld [vmem:[#allocation8 + $0x1254] ss:$52 sps:$4 sm:$0xff]  }
 0x220   :  { %v17496_v25 = vadd.f32 %v9635_v11, %v9595_v12  ;;  %9905 = vmatpush2.bf16.msra.mxu1 %v15347_v4  ;;  %9930 = vmatpush1.bf16.msra.mxu0 %v15350_v5  ;;  %v15394_v4 = vld [vmem:[#allocation8 + $0x1664] ss:$52 sps:$4 sm:$0xff]   ;;  %v15389_v5 = vld [vmem:[#allocation8 + $0x1320] ss:$52 sps:$4 sm:$0xff]   ;;  %v15410_v24 = vld [vmem:[#allocation8 + $0x1528] ss:$52 sps:$4 sm:$0xff]  }
 0x221   :  { %v9597_v27 = vpop.f32.mrf.mxu1  ;;  %9906 = vmatprep.subr.bf16.mxu1 %v15355_v9  ;;  %9931 = vmatprep.subr.bf16.mxu0 %v15358_v7  ;;  %v9638_v33 = vpop.f32.mrf.mxu0  ;;  %v15398_v9 = vld [vmem:[#allocation8 + $0x15f8] ss:$52 sps:$4 sm:$0xff]   ;;  %v15400_v7 = vld [vmem:[#allocation8 + $0x15fc] ss:$52 sps:$4 sm:$0xff]   ;;  %v15406_v1 = vld [vmem:[#allocation8 + $0x1594] ss:$52 sps:$4 sm:$0xff]  }
 0x222   :  { %v15401_v11 = vld [vmem:[#allocation8 + $0x1250] ss:$52 sps:$4 sm:$0xff]   ;;  %v15409_v20 = vld [vmem:[#allocation8 + $0x11ec] ss:$52 sps:$4 sm:$0xff]  }
 0x223   :  { %v15404_v12 = vld [vmem:[#allocation8 + $0x1590] ss:$52 sps:$4 sm:$0xff]   ;;  %v15416_v33 = vld [vmem:[#allocation8 + $0x14c0] ss:$52 sps:$4 sm:$0xff]  }
 0x224   :  { %9907 = vmatpush2.bf16.msra.mxu1 %v15353_v22  ;;  %9932 = vmatpush1.bf16.msra.mxu0 %v15356_v23  ;;  %v15412_v22 = vld [vmem:[#allocation8 + $0x152c] ss:$52 sps:$4 sm:$0xff]   ;;  %v15407_v23 = vld [vmem:[#allocation8 + $0x11e8] ss:$52 sps:$4 sm:$0xff]   ;;  %v15415_v27 = vld [vmem:[#allocation8 + $0x1184] ss:$52 sps:$4 sm:$0xff]  }
 0x225   :  { %9908 = vmatprep.subr.bf16.mxu1 %v15361_v30  ;;  %9933 = vmatprep.subr.bf16.mxu0 %v15364_v32  ;;  %v15418_v30 = vld [vmem:[#allocation8 + $0x14c4] ss:$52 sps:$4 sm:$0xff]   ;;  %v15413_v32 = vld [vmem:[#allocation8 + $0x1180] ss:$52 sps:$4 sm:$0xff]  }
 0x228   :  { %9909 = vmatpush2.bf16.msra.mxu1 %v15359_v35  ;;  %9934 = vmatpush1.bf16.msra.mxu0 %v15362_v37  ;;  %v15421_v35 = vld [vmem:[#allocation8 + $0x111c] ss:$52 sps:$4 sm:$0xff]  }
 0x229   :  { %9910 = vmatprep.subr.bf16.mxu1 %v15367_v38  ;;  %9935 = vmatprep.subr.bf16.mxu0 %v15370_v40  ;;  %v15424_v37 = vld [vmem:[#allocation8 + $0x145c] ss:$52 sps:$4 sm:$0xff]   ;;  %v15419_v38 = vld [vmem:[#allocation8 + $0x1118] ss:$52 sps:$4 sm:$0xff]  }
 0x22a   :  { %v15422_v40 = vld [vmem:[#allocation8 + $0x1458] ss:$52 sps:$4 sm:$0xff]  }
 0x22c   :  { %9911 = vmatpush2.bf16.msra.mxu1 %v15365_v43  ;;  %9936 = vmatpush1.bf16.msra.mxu0 %v15368_v44  ;;  %v15427_v43 = vld [vmem:[#allocation8 + $0x10b4] ss:$52 sps:$4 sm:$0xff]  }
 0x22d   :  { %9912 = vmatprep.subr.bf16.mxu1 %v15373_v45  ;;  %9937 = vmatprep.subr.bf16.mxu0 %v15376_v46  ;;  %v15430_v44 = vld [vmem:[#allocation8 + $0x13f4] ss:$52 sps:$4 sm:$0xff]   ;;  %v15425_v45 = vld [vmem:[#allocation8 + $0x10b0] ss:$52 sps:$4 sm:$0xff]  }
 0x22e   :  { %v15428_v46 = vld [vmem:[#allocation8 + $0x13f0] ss:$52 sps:$4 sm:$0xff]  }
 0x230   :  { %9913 = vmatpush2.bf16.msra.mxu1 %v15371_v48  ;;  %9938 = vmatpush1.bf16.msra.mxu0 %v15374_v49  ;;  %v15433_v48 = vld [vmem:[#allocation8 + $0x104c] ss:$52 sps:$4 sm:$0xff]  }
 0x231   :  { %9914 = vmatprep.subr.bf16.mxu1 %v15379_v50  ;;  %9939 = vmatprep.subr.bf16.mxu0 %v15382_v59  ;;  %v15436_v49 = vld [vmem:[#allocation8 + $0x138c] ss:$52 sps:$4 sm:$0xff]   ;;  %v15431_v50 = vld [vmem:[#allocation8 + $0x1048] ss:$52 sps:$4 sm:$0xff]  }
 0x232   :  { %v15434_v59 = vld [vmem:[#allocation8 + $0x1388] ss:$52 sps:$4 sm:$0xff]  }
 0x234   :  { %9915 = vmatpush2.bf16.msra.mxu1 %v15377_v60  ;;  %9940 = vmatpush1.bf16.msra.mxu0 %v15380_v61  ;;  %v15439_v60 = vld [vmem:[#allocation8 + $0x19a4] ss:$52 sps:$4 sm:$0xff]  }
 0x235   :  { %9916 = vmatprep.subr.bf16.mxu1 %v15385_v52  ;;  %9941 = vmatprep.subr.bf16.mxu0 %v15388_v62  ;;  %v15442_v61 = vld [vmem:[#allocation8 + $0x1ce4] ss:$52 sps:$4 sm:$0xff]   ;;  %v15437_v52 = vld [vmem:[#allocation8 + $0x19a0] ss:$52 sps:$4 sm:$0xff]  }
 0x236   :  { %v15440_v62 = vld [vmem:[#allocation8 + $0x1ce0] ss:$52 sps:$4 sm:$0xff]  }
 0x238   :  { %9917 = vmatpush2.bf16.msra.mxu1 %v15383_v58  ;;  %9942 = vmatpush1.bf16.msra.mxu0 %v15386_v2  ;;  %v15445_v58 = vld [vmem:[#allocation8 + $0x193c] ss:$52 sps:$4 sm:$0xff]  }
 0x239   :  { %9943 = vmatprep.subr.bf16.mxu0 %v15391_v3  ;;  %9968 = vmatprep.subr.bf16.mxu1 %v15394_v4  ;;  %v15448_v2 = vld [vmem:[#allocation8 + $0x1c7c] ss:$52 sps:$4 sm:$0xff]   ;;  %v15443_v3 = vld [vmem:[#allocation8 + $0x1938] ss:$52 sps:$4 sm:$0xff]  }
 0x23a   :  { %v15446_v4 = vld [vmem:[#allocation8 + $0x1c78] ss:$52 sps:$4 sm:$0xff]  }
 0x23b   :  { %9919 = vmatmul.mubr.bf16.vlgmr.msra.gmra.mxu1 %v17404_v14 }
 0x23c   :  { %9944 = vmatpush2.bf16.msra.mxu0 %v15389_v5  ;;  %9969 = vmatpush1.bf16.msra.mxu1 %v15392_v6 }
 0x23d   :  { %10000 = vmatprep.mubr.bf16.mxu1 %v17430_v36  ;;  %9945 = vmatprep.subr.bf16.mxu0 %v15397_v8  ;;  %v15451_v8 = vld [vmem:[#allocation8 + $0x18d4] ss:$52 sps:$4 sm:$0xff]  }
 0x23e   :  { %9970 = vmatprep.subr.bf16.mxu1 %v15400_v7 }
 0x240   :  { %9946 = vmatpush2.bf16.msra.mxu0 %v15395_v57  ;;  %9971 = vmatpush1.bf16.msra.mxu1 %v15398_v9  ;;  %v15454_v57 = vld [vmem:[#allocation8 + $0x1c14] ss:$52 sps:$4 sm:$0xff]  }
 0x241   :  { %9947 = vmatprep.subr.bf16.mxu0 %v15403_v10  ;;  %9972 = vmatprep.subr.bf16.mxu1 %v15406_v1 }
 0x244   :  { %9948 = vmatpush2.bf16.msra.mxu0 %v15401_v11  ;;  %9973 = vmatpush1.bf16.msra.mxu1 %v15404_v12 }
 0x245   :  { %9949 = vmatprep.subr.bf16.mxu0 %v15409_v20  ;;  %9974 = vmatprep.subr.bf16.mxu1 %v15412_v22  ;;  %v15449_v20 = vld [vmem:[#allocation8 + $0x18d0] ss:$52 sps:$4 sm:$0xff]  }
 0x246   :  { %v15452_v22 = vld [vmem:[#allocation8 + $0x1c10] ss:$52 sps:$4 sm:$0xff]  }
 0x248   :  { %9950 = vmatpush2.bf16.msra.mxu0 %v15407_v23  ;;  %9975 = vmatpush1.bf16.msra.mxu1 %v15410_v24 }
 0x249   :  { %9951 = vmatprep.subr.bf16.mxu0 %v15415_v27  ;;  %9976 = vmatprep.subr.bf16.mxu1 %v15418_v30  ;;  %v15457_v27 = vld [vmem:[#allocation8 + $0x186c] ss:$52 sps:$4 sm:$0xff]  }
 0x24a   :  { %v15460_v30 = vld [vmem:[#allocation8 + $0x1bac] ss:$52 sps:$4 sm:$0xff]  }
 0x24c   :  { %9952 = vmatpush2.bf16.msra.mxu0 %v15413_v32  ;;  %9977 = vmatpush1.bf16.msra.mxu1 %v15416_v33  ;;  %v15455_v33 = vld [vmem:[#allocation8 + $0x1868] ss:$52 sps:$4 sm:$0xff]  }
 0x24d   :  { %9953 = vmatprep.subr.bf16.mxu0 %v15421_v35  ;;  %9978 = vmatprep.subr.bf16.mxu1 %v15424_v37  ;;  %v15458_v35 = vld [vmem:[#allocation8 + $0x1ba8] ss:$52 sps:$4 sm:$0xff]   ;;  %v15466_v37 = vld [vmem:[#allocation8 + $0x1b44] ss:$52 sps:$4 sm:$0xff]  }
 0x250   :  { %9954 = vmatpush2.bf16.msra.mxu0 %v15419_v38  ;;  %9979 = vmatpush1.bf16.msra.mxu1 %v15422_v40  ;;  %v15461_v38 = vld [vmem:[#allocation8 + $0x1800] ss:$52 sps:$4 sm:$0xff]  }
 0x251   :  { %9955 = vmatprep.subr.bf16.mxu0 %v15427_v43  ;;  %9980 = vmatprep.subr.bf16.mxu1 %v15430_v44  ;;  %v15464_v40 = vld [vmem:[#allocation8 + $0x1b40] ss:$52 sps:$4 sm:$0xff]   ;;  %v15469_v43 = vld [vmem:[#allocation8 + $0x179c] ss:$52 sps:$4 sm:$0xff]  }
 0x252   :  { %v15472_v44 = vld [vmem:[#allocation8 + $0x1adc] ss:$52 sps:$4 sm:$0xff]  }
 0x254   :  { %9956 = vmatpush2.bf16.msra.mxu0 %v15425_v45  ;;  %9981 = vmatpush1.bf16.msra.mxu1 %v15428_v46  ;;  %v15467_v45 = vld [vmem:[#allocation8 + $0x1798] ss:$52 sps:$4 sm:$0xff]  }
 0x255   :  { %9957 = vmatprep.subr.bf16.mxu0 %v15433_v48  ;;  %9982 = vmatprep.subr.bf16.mxu1 %v15436_v49  ;;  %v15470_v46 = vld [vmem:[#allocation8 + $0x1ad8] ss:$52 sps:$4 sm:$0xff]   ;;  %v15475_v48 = vld [vmem:[#allocation8 + $0x1734] ss:$52 sps:$4 sm:$0xff]  }
 0x256   :  { %v15478_v49 = vld [vmem:[#allocation8 + $0x1a74] ss:$52 sps:$4 sm:$0xff]  }
 0x258   :  { %9958 = vmatpush2.bf16.msra.mxu0 %v15431_v50  ;;  %9983 = vmatpush1.bf16.msra.mxu1 %v15434_v59  ;;  %v15473_v50 = vld [vmem:[#allocation8 + $0x1730] ss:$52 sps:$4 sm:$0xff]  }
 0x259   :  { %9984 = vmatprep.subr.bf16.mxu1 %v15439_v60  ;;  %10009 = vmatprep.subr.bf16.mxu0 %v15442_v61  ;;  %v15476_v59 = vld [vmem:[#allocation8 + $0x1a70] ss:$52 sps:$4 sm:$0xff]   ;;  %v15481_v60 = vld [vmem:[#allocation8 + $0x16cc] ss:$52 sps:$4 sm:$0xff]  }
 0x25a   :  { %v15484_v61 = vld [vmem:[#allocation8 + $0x1a0c] ss:$52 sps:$4 sm:$0xff]  }
 0x25b   :  { %v9674_v5 = vpop.f32.mrf.mxu1  ;;  %9960 = vmatmul.mubr.bf16.vlgmr.msra.gmra.mxu0 %v17457_v26  ;;  %v9715_v6 = vpop.f32.mrf.mxu0 }
 0x25c   :  { %v9675_v9 = vadd.f32 %v9674_v5, %v17494_v19  ;;  %9985 = vmatpush2.bf16.msra.mxu1 %v15437_v52  ;;  %10010 = vmatpush1.bf16.msra.mxu0 %v15440_v62  ;;  %v15479_v52 = vld [vmem:[#allocation8 + $0x16c8] ss:$52 sps:$4 sm:$0xff]  }
 0x25d   :  { %10041 = vmatprep.mubr.bf16.mxu0 %v17459_v28  ;;  %v9676_v7 = vpop.f32.mrf.mxu1  ;;  %v9717_v10 = vpop.f32.mrf.mxu0  ;;  %9986 = vmatprep.subr.bf16.mxu1 %v15445_v58  ;;  %v15482_v62 = vld [vmem:[#allocation8 + $0x1a08] ss:$52 sps:$4 sm:$0xff]   ;;  %v15487_v58 = vld [vmem:[#allocation8 + $0x2024] ss:$52 sps:$4 sm:$0xff]  }
 0x25e   :  { %v9677_v1 = vadd.f32 %v9676_v7, %v17496_v25  ;;  %v17504_v11 = vadd.f32 %v9715_v6, %v9675_v9  ;;  %10011 = vmatprep.subr.bf16.mxu0 %v15448_v2  ;;  %v15463_v25 = vld [vmem:[#allocation8 + $0x1804] ss:$52 sps:$4 sm:$0xff]   ;;  %v15493_v5 = vld [vmem:[#allocation8 + $0x1fbc] ss:$52 sps:$4 sm:$0xff]   ;;  %v15499_v9 = vld [vmem:[#allocation8 + $0x1f54] ss:$52 sps:$4 sm:$0xff]  }
 0x25f   :  { %v9678_v12 = vpop.f32.mrf.mxu1  ;;  %v9719_v23 = vpop.f32.mrf.mxu0  ;;  %v15490_v2 = vld [vmem:[#allocation8 + $0x2364] ss:$52 sps:$4 sm:$0xff]   ;;  %v15502_v7 = vld [vmem:[#allocation8 + $0x2294] ss:$52 sps:$4 sm:$0xff]  }
 0x260   :  { %v17506_v24 = vadd.f32 %v9717_v10, %v9677_v1  ;;  %9987 = vmatpush2.bf16.msra.mxu1 %v15443_v3  ;;  %10012 = vmatpush1.bf16.msra.mxu0 %v15446_v4  ;;  %v15485_v3 = vld [vmem:[#allocation8 + $0x2020] ss:$52 sps:$4 sm:$0xff]   ;;  %v15491_v6 = vld [vmem:[#allocation8 + $0x1fb8] ss:$52 sps:$4 sm:$0xff]   ;;  %v15497_v10 = vld [vmem:[#allocation8 + $0x1f50] ss:$52 sps:$4 sm:$0xff]  }
 0x261   :  { %v9679_v19 = vpop.f32.mrf.mxu1  ;;  %9988 = vmatprep.subr.bf16.mxu1 %v15451_v8  ;;  %10013 = vmatprep.subr.bf16.mxu0 %v15454_v57  ;;  %v9720_v32 = vpop.f32.mrf.mxu0  ;;  %v15488_v4 = vld [vmem:[#allocation8 + $0x2360] ss:$52 sps:$4 sm:$0xff]   ;;  %v15494_v8 = vld [vmem:[#allocation8 + $0x22f8] ss:$52 sps:$4 sm:$0xff]   ;;  %v15496_v57 = vld [vmem:[#allocation8 + $0x22fc] ss:$52 sps:$4 sm:$0xff]  }
 0x262   :  { %v15500_v1 = vld [vmem:[#allocation8 + $0x2290] ss:$52 sps:$4 sm:$0xff]   ;;  %v15505_v12 = vld [vmem:[#allocation8 + $0x1eec] ss:$52 sps:$4 sm:$0xff]   ;;  %v15506_v23 = vld [vmem:[#allocation8 + $0x2228] ss:$52 sps:$4 sm:$0xff]  }
 0x263   :  { %v15511_v19 = vld [vmem:[#allocation8 + $0x1e84] ss:$52 sps:$4 sm:$0xff]   ;;  %v15512_v32 = vld [vmem:[#allocation8 + $0x21c0] ss:$52 sps:$4 sm:$0xff]  }
 0x264   :  { %9989 = vmatpush2.bf16.msra.mxu1 %v15449_v20  ;;  %10014 = vmatpush1.bf16.msra.mxu0 %v15452_v22  ;;  %v15508_v20 = vld [vmem:[#allocation8 + $0x222c] ss:$52 sps:$4 sm:$0xff]   ;;  %v15503_v22 = vld [vmem:[#allocation8 + $0x1ee8] ss:$52 sps:$4 sm:$0xff]  }
 0x265   :  { %9990 = vmatprep.subr.bf16.mxu1 %v15457_v27  ;;  %10015 = vmatprep.subr.bf16.mxu0 %v15460_v30  ;;  %v15514_v27 = vld [vmem:[#allocation8 + $0x21c4] ss:$52 sps:$4 sm:$0xff]   ;;  %v15509_v30 = vld [vmem:[#allocation8 + $0x1e80] ss:$52 sps:$4 sm:$0xff]  }
 0x268   :  { %9991 = vmatpush2.bf16.msra.mxu1 %v15455_v33  ;;  %10016 = vmatpush1.bf16.msra.mxu0 %v15458_v35  ;;  %v15517_v33 = vld [vmem:[#allocation8 + $0x1e1c] ss:$52 sps:$4 sm:$0xff]  }
 0x269   :  { %9992 = vmatprep.subr.bf16.mxu1 %v15463_v25  ;;  %10017 = vmatprep.subr.bf16.mxu0 %v15466_v37  ;;  %v15520_v35 = vld [vmem:[#allocation8 + $0x215c] ss:$52 sps:$4 sm:$0xff]   ;;  %v15515_v25 = vld [vmem:[#allocation8 + $0x1e18] ss:$52 sps:$4 sm:$0xff]  }
 0x26a   :  { %v15518_v37 = vld [vmem:[#allocation8 + $0x2158] ss:$52 sps:$4 sm:$0xff]  }
 0x26c   :  { %9993 = vmatpush2.bf16.msra.mxu1 %v15461_v38  ;;  %10018 = vmatpush1.bf16.msra.mxu0 %v15464_v40  ;;  %v15523_v38 = vld [vmem:[#allocation8 + $0x1db4] ss:$52 sps:$4 sm:$0xff]  }
 0x26d   :  { %9994 = vmatprep.subr.bf16.mxu1 %v15469_v43  ;;  %10019 = vmatprep.subr.bf16.mxu0 %v15472_v44  ;;  %v15526_v40 = vld [vmem:[#allocation8 + $0x20f4] ss:$52 sps:$4 sm:$0xff]   ;;  %v15521_v43 = vld [vmem:[#allocation8 + $0x1db0] ss:$52 sps:$4 sm:$0xff]  }
 0x26e   :  { %v15524_v44 = vld [vmem:[#allocation8 + $0x20f0] ss:$52 sps:$4 sm:$0xff]  }
 0x270   :  { %9995 = vmatpush2.bf16.msra.mxu1 %v15467_v45  ;;  %10020 = vmatpush1.bf16.msra.mxu0 %v15470_v46  ;;  %v15529_v45 = vld [vmem:[#allocation8 + $0x1d4c] ss:$52 sps:$4 sm:$0xff]  }
 0x271   :  { %9996 = vmatprep.subr.bf16.mxu1 %v15475_v48  ;;  %10021 = vmatprep.subr.bf16.mxu0 %v15478_v49  ;;  %v15532_v46 = vld [vmem:[#allocation8 + $0x208c] ss:$52 sps:$4 sm:$0xff]   ;;  %v15527_v48 = vld [vmem:[#allocation8 + $0x1d48] ss:$52 sps:$4 sm:$0xff]  }
 0x272   :  { %v15530_v49 = vld [vmem:[#allocation8 + $0x2088] ss:$52 sps:$4 sm:$0xff]  }
 0x274   :  { %9997 = vmatpush2.bf16.msra.mxu1 %v15473_v50  ;;  %10022 = vmatpush1.bf16.msra.mxu0 %v15476_v59  ;;  %v15535_v50 = vld [vmem:[#allocation8 + $0x26a4] ss:$52 sps:$4 sm:$0xff]  }
 0x275   :  { %9998 = vmatprep.subr.bf16.mxu1 %v15481_v60  ;;  %10023 = vmatprep.subr.bf16.mxu0 %v15484_v61  ;;  %v15538_v59 = vld [vmem:[#allocation8 + $0x29e4] ss:$52 sps:$4 sm:$0xff]   ;;  %v15533_v60 = vld [vmem:[#allocation8 + $0x26a0] ss:$52 sps:$4 sm:$0xff]  }
 0x276   :  { %v15536_v61 = vld [vmem:[#allocation8 + $0x29e0] ss:$52 sps:$4 sm:$0xff]  }
 0x278   :  { %9999 = vmatpush2.bf16.msra.mxu1 %v15479_v52  ;;  %10024 = vmatpush1.bf16.msra.mxu0 %v15482_v62  ;;  %v15541_v52 = vld [vmem:[#allocation8 + $0x263c] ss:$52 sps:$4 sm:$0xff]  }
 0x279   :  { %10025 = vmatprep.subr.bf16.mxu0 %v15487_v58  ;;  %10050 = vmatprep.subr.bf16.mxu1 %v15490_v2  ;;  %v15544_v62 = vld [vmem:[#allocation8 + $0x297c] ss:$52 sps:$4 sm:$0xff]  }
 0x27b   :  { %10001 = vmatmul.mubr.bf16.vlgmr.msra.gmra.mxu1 %v17455_v21 }
 0x27c   :  { %10026 = vmatpush2.bf16.msra.mxu0 %v15485_v3  ;;  %10051 = vmatpush1.bf16.msra.mxu1 %v15488_v4  ;;  %v15539_v3 = vld [vmem:[#allocation8 + $0x2638] ss:$52 sps:$4 sm:$0xff]  }
 0x27d   :  { %10082 = vmatprep.mubr.bf16.mxu1 %v17461_v29  ;;  %10027 = vmatprep.subr.bf16.mxu0 %v15493_v5  ;;  %v15542_v4 = vld [vmem:[#allocation8 + $0x2978] ss:$52 sps:$4 sm:$0xff]  }
 0x27e   :  { %10052 = vmatprep.subr.bf16.mxu1 %v15496_v57 }
 0x280   :  { %10028 = vmatpush2.bf16.msra.mxu0 %v15491_v6  ;;  %10053 = vmatpush1.bf16.msra.mxu1 %v15494_v8  ;;  %v15547_v6 = vld [vmem:[#allocation8 + $0x25d4] ss:$52 sps:$4 sm:$0xff]  }
 0x281   :  { %10029 = vmatprep.subr.bf16.mxu0 %v15499_v9  ;;  %10054 = vmatprep.subr.bf16.mxu1 %v15502_v7  ;;  %v15550_v8 = vld [vmem:[#allocation8 + $0x2914] ss:$52 sps:$4 sm:$0xff]  }
 0x284   :  { %10030 = vmatpush2.bf16.msra.mxu0 %v15497_v10  ;;  %10055 = vmatpush1.bf16.msra.mxu1 %v15500_v1 }
 0x285   :  { %10031 = vmatprep.subr.bf16.mxu0 %v15505_v12  ;;  %10056 = vmatprep.subr.bf16.mxu1 %v15508_v20  ;;  %v15545_v20 = vld [vmem:[#allocation8 + $0x25d0] ss:$52 sps:$4 sm:$0xff]  }
 0x288   :  { %10032 = vmatpush2.bf16.msra.mxu0 %v15503_v22  ;;  %10057 = vmatpush1.bf16.msra.mxu1 %v15506_v23 }
 0x289   :  { %10033 = vmatprep.subr.bf16.mxu0 %v15511_v19  ;;  %10058 = vmatprep.subr.bf16.mxu1 %v15514_v27  ;;  %v15553_v27 = vld [vmem:[#allocation8 + $0x256c] ss:$52 sps:$4 sm:$0xff]  }
 0x28c   :  { %10034 = vmatpush2.bf16.msra.mxu0 %v15509_v30  ;;  %10059 = vmatpush1.bf16.msra.mxu1 %v15512_v32  ;;  %v15556_v30 = vld [vmem:[#allocation8 + $0x28ac] ss:$52 sps:$4 sm:$0xff]   ;;  %v15551_v32 = vld [vmem:[#allocation8 + $0x2568] ss:$52 sps:$4 sm:$0xff]  }
 0x28d   :  { %10035 = vmatprep.subr.bf16.mxu0 %v15517_v33  ;;  %10060 = vmatprep.subr.bf16.mxu1 %v15520_v35  ;;  %v15559_v33 = vld [vmem:[#allocation8 + $0x2504] ss:$52 sps:$4 sm:$0xff]  }
 0x28e   :  { %v15562_v35 = vld [vmem:[#allocation8 + $0x2844] ss:$52 sps:$4 sm:$0xff]  }
 0x290   :  { %10036 = vmatpush2.bf16.msra.mxu0 %v15515_v25  ;;  %10061 = vmatpush1.bf16.msra.mxu1 %v15518_v37  ;;  %v15557_v25 = vld [vmem:[#allocation8 + $0x2500] ss:$52 sps:$4 sm:$0xff]  }
 0x291   :  { %10037 = vmatprep.subr.bf16.mxu0 %v15523_v38  ;;  %10062 = vmatprep.subr.bf16.mxu1 %v15526_v40  ;;  %v15560_v37 = vld [vmem:[#allocation8 + $0x2840] ss:$52 sps:$4 sm:$0xff]   ;;  %v15565_v38 = vld [vmem:[#allocation8 + $0x249c] ss:$52 sps:$4 sm:$0xff]  }
 0x292   :  { %v15568_v40 = vld [vmem:[#allocation8 + $0x27dc] ss:$52 sps:$4 sm:$0xff]  }
 0x294   :  { %10038 = vmatpush2.bf16.msra.mxu0 %v15521_v43  ;;  %10063 = vmatpush1.bf16.msra.mxu1 %v15524_v44  ;;  %v15563_v43 = vld [vmem:[#allocation8 + $0x2498] ss:$52 sps:$4 sm:$0xff]  }
 0x295   :  { %10039 = vmatprep.subr.bf16.mxu0 %v15529_v45  ;;  %10064 = vmatprep.subr.bf16.mxu1 %v15532_v46  ;;  %v15566_v44 = vld [vmem:[#allocation8 + $0x27d8] ss:$52 sps:$4 sm:$0xff]   ;;  %v15571_v45 = vld [vmem:[#allocation8 + $0x2434] ss:$52 sps:$4 sm:$0xff]  }
 0x296   :  { %v15574_v46 = vld [vmem:[#allocation8 + $0x2774] ss:$52 sps:$4 sm:$0xff]  }
 0x298   :  { %10040 = vmatpush2.bf16.msra.mxu0 %v15527_v48  ;;  %10065 = vmatpush1.bf16.msra.mxu1 %v15530_v49  ;;  %v15569_v48 = vld [vmem:[#allocation8 + $0x2430] ss:$52 sps:$4 sm:$0xff]  }
 0x299   :  { %10066 = vmatprep.subr.bf16.mxu1 %v15535_v50  ;;  %10091 = vmatprep.subr.bf16.mxu0 %v15538_v59  ;;  %v15572_v49 = vld [vmem:[#allocation8 + $0x2770] ss:$52 sps:$4 sm:$0xff]   ;;  %v15577_v50 = vld [vmem:[#allocation8 + $0x23cc] ss:$52 sps:$4 sm:$0xff]  }
 0x29a   :  { %v15580_v59 = vld [vmem:[#allocation8 + $0x270c] ss:$52 sps:$4 sm:$0xff]  }
 0x29b   :  { %v9756_v58 = vpop.f32.mrf.mxu1  ;;  %10042 = vmatmul.mubr.bf16.vlgmr.msra.gmra.mxu0 %v17479_v63  ;;  %v9797_v2 = vpop.f32.mrf.mxu0 }
 0x29c   :  { %v9757_v5 = vadd.f32 %v9756_v58, %v17504_v11  ;;  %10067 = vmatpush2.bf16.msra.mxu1 %v15533_v60  ;;  %10092 = vmatpush1.bf16.msra.mxu0 %v15536_v61  ;;  %v15548_v11 = vld [vmem:[#allocation8 + $0x2910] ss:$52 sps:$4 sm:$0xff]   ;;  %v15575_v60 = vld [vmem:[#allocation8 + $0x23c8] ss:$52 sps:$4 sm:$0xff]  }
 0x29d   :  { %v9758_v57 = vpop.f32.mrf.mxu1  ;;  %v9799_v9 = vpop.f32.mrf.mxu0  ;;  %10068 = vmatprep.subr.bf16.mxu1 %v15541_v52  ;;  %10093 = vmatprep.subr.bf16.mxu0 %v15544_v62  ;;  %v15578_v61 = vld [vmem:[#allocation8 + $0x2708] ss:$52 sps:$4 sm:$0xff]   ;;  %v15583_v52 = vld [vmem:[#allocation8 + $0x2ec] ss:$52 sps:$4 sm:$0xff]  }
 0x29e   :  { %v9759_v7 = vadd.f32 %v9758_v57, %v17506_v24  ;;  %v17513_v10 = vadd.f32 %v9797_v2, %v9757_v5  ;;  %10123 = vmatprep.mubr.bf16.mxu0 %v17274_v0  ;;  %v15554_v24 = vld [vmem:[#allocation8 + $0x28a8] ss:$52 sps:$4 sm:$0xff]   ;;  %v15586_v62 = vld [vmem:[#allocation8 + $0x96c] ss:$52 sps:$4 sm:$0xff]  }
 0x29f   :  { %v9760_v1 = vpop.f32.mrf.mxu1  ;;  %v9801_v12 = vpop.f32.mrf.mxu0  ;;  %v15581_v58 = vld [vmem:[#allocation8 + $0x2e8] ss:$52 sps:$4 sm:$0xff]  }
 0x2a0   :  { %v17516_v22 = vadd.f32 %v9799_v9, %v9759_v7  ;;  %10069 = vmatpush2.bf16.msra.mxu1 %v15539_v3  ;;  %10094 = vmatpush1.bf16.msra.mxu0 %v15542_v4  ;;  %v15584_v2 = vld [vmem:[#allocation8 + $0x968] ss:$52 sps:$4 sm:$0xff]   ;;  %v15589_v3 = vld [vmem:[#allocation8 + $0x284] ss:$52 sps:$4 sm:$0xff]  }
 0x2a1   :  { %v9761_v23 = vpop.f32.mrf.mxu1  ;;  %v9802_v19 = vpop.f32.mrf.mxu0  ;;  %10070 = vmatprep.subr.bf16.mxu1 %v15547_v6  ;;  %10095 = vmatprep.subr.bf16.mxu0 %v15550_v8  ;;  %v15592_v4 = vld [vmem:[#allocation8 + $0x904] ss:$52 sps:$4 sm:$0xff]   ;;  %v15587_v6 = vld [vmem:[#allocation8 + $0x280] ss:$52 sps:$4 sm:$0xff]   ;;  %v15595_v9 = vld [vmem:[#allocation8 + $0x21c] ss:$52 sps:$4 sm:$0xff]  }
 0x2a2   :  { %v15590_v8 = vld [vmem:[#allocation8 + $0x900] ss:$52 sps:$4 sm:$0xff]   ;;  %v15598_v7 = vld [vmem:[#allocation8 + $0x89c] ss:$52 sps:$4 sm:$0xff]   ;;  %v15596_v23 = vld [vmem:[#allocation8 + $0x898] ss:$52 sps:$4 sm:$0xff]  }
 0x2a3   :  { %v15601_v19 = vld [vmem:[#allocation8 + $0x1b4] ss:$52 sps:$4 sm:$0xff]  }
 0x2a4   :  { %10071 = vmatpush2.bf16.msra.mxu1 %v15545_v20  ;;  %10096 = vmatpush1.bf16.msra.mxu0 %v15548_v11  ;;  %v15593_v11 = vld [vmem:[#allocation8 + $0x218] ss:$52 sps:$4 sm:$0xff]  }
 0x2a5   :  { %10072 = vmatprep.subr.bf16.mxu1 %v15553_v27  ;;  %10097 = vmatprep.subr.bf16.mxu0 %v15556_v30  ;;  %v15599_v27 = vld [vmem:[#allocation8 + $0x1b0] ss:$52 sps:$4 sm:$0xff]   ;;  %v15604_v30 = vld [vmem:[#allocation8 + $0x834] ss:$52 sps:$4 sm:$0xff]  }
 0x2a8   :  { %10073 = vmatpush2.bf16.msra.mxu1 %v15551_v32  ;;  %10098 = vmatpush1.bf16.msra.mxu0 %v15554_v24  ;;  %v15602_v32 = vld [vmem:[#allocation8 + $0x830] ss:$52 sps:$4 sm:$0xff]   ;;  %v15607_v24 = vld [vmem:[#allocation8 + $0x14c] ss:$52 sps:$4 sm:$0xff]  }
 0x2a9   :  { %10074 = vmatprep.subr.bf16.mxu1 %v15559_v33  ;;  %10099 = vmatprep.subr.bf16.mxu0 %v15562_v35  ;;  %v15610_v33 = vld [vmem:[#allocation8 + $0x7cc] ss:$52 sps:$4 sm:$0xff]   ;;  %v15608_v35 = vld [vmem:[#allocation8 + $0x7c8] ss:$52 sps:$4 sm:$0xff]  }
 0x2ac   :  { %10075 = vmatpush2.bf16.msra.mxu1 %v15557_v25  ;;  %10100 = vmatpush1.bf16.msra.mxu0 %v15560_v37  ;;  %v15613_v25 = vld [vmem:[#allocation8 + $0xe4] ss:$52 sps:$4 sm:$0xff]   ;;  %v15611_v37 = vld [vmem:[#allocation8 + $0xe0] ss:$52 sps:$4 sm:$0xff]  }
 0x2ad   :  { %10076 = vmatprep.subr.bf16.mxu1 %v15565_v38  ;;  %10101 = vmatprep.subr.bf16.mxu0 %v15568_v40  ;;  %v15616_v38 = vld [vmem:[#allocation8 + $0x764] ss:$52 sps:$4 sm:$0xff]   ;;  %v15614_v40 = vld [vmem:[#allocation8 + $0x760] ss:$52 sps:$4 sm:$0xff]  }
 0x2b0   :  { %10077 = vmatpush2.bf16.msra.mxu1 %v15563_v43  ;;  %10102 = vmatpush1.bf16.msra.mxu0 %v15566_v44  ;;  %v15619_v43 = vld [vmem:[#allocation8 + $0x7c] ss:$52 sps:$4 sm:$0xff]   ;;  %v15617_v44 = vld [vmem:[#allocation8 + $0x78] ss:$52 sps:$4 sm:$0xff]  }
 0x2b1   :  { %10078 = vmatprep.subr.bf16.mxu1 %v15571_v45  ;;  %10103 = vmatprep.subr.bf16.mxu0 %v15574_v46  ;;  %v15622_v45 = vld [vmem:[#allocation8 + $0x6fc] ss:$52 sps:$4 sm:$0xff]   ;;  %v15620_v46 = vld [vmem:[#allocation8 + $0x6f8] ss:$52 sps:$4 sm:$0xff]  }
 0x2b4   :  { %10079 = vmatpush2.bf16.msra.mxu1 %v15569_v48  ;;  %10104 = vmatpush1.bf16.msra.mxu0 %v15572_v49  ;;  %v15625_v48 = vld [vmem:[#allocation8 + $0x14] ss:$52 sps:$4 sm:$0xff]   ;;  %v15623_v49 = vld [vmem:[#allocation8 + $0x10] ss:$52 sps:$4 sm:$0xff]  }
 0x2b5   :  { %10080 = vmatprep.subr.bf16.mxu1 %v15577_v50  ;;  %10105 = vmatprep.subr.bf16.mxu0 %v15580_v59  ;;  %v15628_v50 = vld [vmem:[#allocation8 + $0x694] ss:$52 sps:$4 sm:$0xff]   ;;  %v15626_v59 = vld [vmem:[#allocation8 + $0x690] ss:$52 sps:$4 sm:$0xff]  }
 0x2b8   :  { %10081 = vmatpush2.bf16.msra.mxu1 %v15575_v60  ;;  %10106 = vmatpush1.bf16.msra.mxu0 %v15578_v61  ;;  %v15631_v60 = vld [vmem:[#allocation8 + $0x62c] ss:$52 sps:$4 sm:$0xff]  }
 0x2b9   :  { %10132 = vmatprep.subr.bf16.mxu1 %v15583_v52  ;;  %10173 = vmatprep.subr.bf16.mxu0 %v15586_v62  ;;  %v15634_v61 = vld [vmem:[#allocation8 + $0xcac] ss:$52 sps:$4 sm:$0xff]   ;;  %v15629_v52 = vld [vmem:[#allocation8 + $0x628] ss:$52 sps:$4 sm:$0xff]  }
 0x2ba   :  { %v15632_v62 = vld [vmem:[#allocation8 + $0xca8] ss:$52 sps:$4 sm:$0xff]  }
 0x2bb   :  { %v9838_v5 = vpop.f32.mrf.mxu1  ;;  %10083 = vmatmul.mubr.bf16.vlgmr.msra.gmra.mxu1 %v17477_v13  ;;  %10124 = vmatmul.mubr.bf16.vlgmr.msra.gmra.mxu0 %v17486_v47 }
 0x2bc   :  { %v17521_v57 = vadd.f32 %v9838_v5, %v17513_v10  ;;  %10133 = vmatpush1.bf16.msra.mxu1 %v15581_v58  ;;  %10164 = vmatprep.mubr.bf16.mxu1 %v17406_v16  ;;  %v15637_v58 = vld [vmem:[#allocation8 + $0x5c4] ss:$52 sps:$4 sm:$0xff]   ;;  %v15638_v5 = vld [vmem:[#allocation8 + $0xc40] ss:$52 sps:$4 sm:$0xff]  }
 0x2bd   :  { %10174 = vmatpush1.bf16.msra.mxu0 %v15584_v2  ;;  %10205 = vmatprep.mubr.bf16.mxu0 %v17408_v17  ;;  %v9840_v1 = vpop.f32.mrf.mxu1  ;;  %v15640_v2 = vld [vmem:[#allocation8 + $0xc44] ss:$52 sps:$4 sm:$0xff]  }
 0x2be   :  { %v17526_v12 = vadd.f32 %v9840_v1, %v17516_v22  ;;  %10134 = vmatprep.subr.bf16.mxu1 %v15589_v3  ;;  %10175 = vmatprep.subr.bf16.mxu0 %v15592_v4  ;;  %v15605_v22 = vld [vmem:[#allocation8 + $0x148] ss:$52 sps:$4 sm:$0xff]   ;;  %v15635_v4 = vld [vmem:[#allocation8 + $0x5c0] ss:$52 sps:$4 sm:$0xff]   ;;  %v15641_v1 = vld [vmem:[#allocation8 + $0x558] ss:$52 sps:$4 sm:$0xff]  }
 0x2bf   :  { %v9842_v20 = vpop.f32.mrf.mxu1 }
 0x2c0   :  { %10135 = vmatpush1.bf16.msra.mxu1 %v15587_v6  ;;  %v15643_v6 = vld [vmem:[#allocation8 + $0x55c] ss:$52 sps:$4 sm:$0xff]  }
 0x2c1   :  { %10176 = vmatpush1.bf16.msra.mxu0 %v15590_v8  ;;  %v9843_v10 = vpop.f32.mrf.mxu1  ;;  %10136 = vmatprep.subr.bf16.mxu1 %v15595_v9  ;;  %v15646_v8 = vld [vmem:[#allocation8 + $0xbdc] ss:$52 sps:$4 sm:$0xff]  }
 0x2c2   :  { %10177 = vmatprep.subr.bf16.mxu0 %v15598_v7  ;;  %v15649_v10 = vld [vmem:[#allocation8 + $0x4f4] ss:$52 sps:$4 sm:$0xff]  }
 0x2c4   :  { %10137 = vmatpush1.bf16.msra.mxu1 %v15593_v11  ;;  %v15644_v11 = vld [vmem:[#allocation8 + $0xbd8] ss:$52 sps:$4 sm:$0xff]  }
 0x2c5   :  { %10178 = vmatpush1.bf16.msra.mxu0 %v15596_v23  ;;  %10138 = vmatprep.subr.bf16.mxu1 %v15601_v19  ;;  %v15647_v23 = vld [vmem:[#allocation8 + $0x4f0] ss:$52 sps:$4 sm:$0xff]   ;;  %v15652_v19 = vld [vmem:[#allocation8 + $0xb74] ss:$52 sps:$4 sm:$0xff]  }
 0x2c6   :  { %10179 = vmatprep.subr.bf16.mxu0 %v15604_v30  ;;  %v15655_v30 = vld [vmem:[#allocation8 + $0x48c] ss:$52 sps:$4 sm:$0xff]  }
 0x2c8   :  { %10139 = vmatpush1.bf16.msra.mxu1 %v15599_v27  ;;  %v15650_v27 = vld [vmem:[#allocation8 + $0xb70] ss:$52 sps:$4 sm:$0xff]  }
 0x2c9   :  { %10180 = vmatpush1.bf16.msra.mxu0 %v15602_v32  ;;  %10140 = vmatprep.subr.bf16.mxu1 %v15607_v24  ;;  %v15653_v32 = vld [vmem:[#allocation8 + $0x488] ss:$52 sps:$4 sm:$0xff]   ;;  %v15658_v24 = vld [vmem:[#allocation8 + $0xb0c] ss:$52 sps:$4 sm:$0xff]  }
 0x2ca   :  { %10181 = vmatprep.subr.bf16.mxu0 %v15610_v33  ;;  %v15661_v33 = vld [vmem:[#allocation8 + $0x424] ss:$52 sps:$4 sm:$0xff]  }
 0x2cc   :  { %10141 = vmatpush1.bf16.msra.mxu1 %v15605_v22  ;;  %v15656_v22 = vld [vmem:[#allocation8 + $0xb08] ss:$52 sps:$4 sm:$0xff]  }
 0x2cd   :  { %10182 = vmatpush1.bf16.msra.mxu0 %v15608_v35  ;;  %10142 = vmatprep.subr.bf16.mxu1 %v15613_v25  ;;  %v15659_v35 = vld [vmem:[#allocation8 + $0x420] ss:$52 sps:$4 sm:$0xff]   ;;  %v15664_v25 = vld [vmem:[#allocation8 + $0xaa4] ss:$52 sps:$4 sm:$0xff]  }
 0x2ce   :  { %10183 = vmatprep.subr.bf16.mxu0 %v15616_v38  ;;  %v15667_v38 = vld [vmem:[#allocation8 + $0x3bc] ss:$52 sps:$4 sm:$0xff]  }
 0x2d0   :  { %10143 = vmatpush1.bf16.msra.mxu1 %v15611_v37  ;;  %v15662_v37 = vld [vmem:[#allocation8 + $0xaa0] ss:$52 sps:$4 sm:$0xff]  }
 0x2d1   :  { %10184 = vmatpush1.bf16.msra.mxu0 %v15614_v40  ;;  %10144 = vmatprep.subr.bf16.mxu1 %v15619_v43  ;;  %v15665_v40 = vld [vmem:[#allocation8 + $0x3b8] ss:$52 sps:$4 sm:$0xff]   ;;  %v15670_v43 = vld [vmem:[#allocation8 + $0xa3c] ss:$52 sps:$4 sm:$0xff]  }
 0x2d2   :  { %10185 = vmatprep.subr.bf16.mxu0 %v15622_v45  ;;  %v15673_v45 = vld [vmem:[#allocation8 + $0x354] ss:$52 sps:$4 sm:$0xff]  }
 0x2d4   :  { %10145 = vmatpush1.bf16.msra.mxu1 %v15617_v44  ;;  %v15668_v44 = vld [vmem:[#allocation8 + $0xa38] ss:$52 sps:$4 sm:$0xff]  }
 0x2d5   :  { %10186 = vmatpush1.bf16.msra.mxu0 %v15620_v46  ;;  %10146 = vmatprep.subr.bf16.mxu1 %v15625_v48  ;;  %v15671_v46 = vld [vmem:[#allocation8 + $0x350] ss:$52 sps:$4 sm:$0xff]   ;;  %v15676_v48 = vld [vmem:[#allocation8 + $0x9d4] ss:$52 sps:$4 sm:$0xff]  }
 0x2d6   :  { %10187 = vmatprep.subr.bf16.mxu0 %v15628_v50  ;;  %v15679_v50 = vld [vmem:[#allocation8 + $0xfec] ss:$52 sps:$4 sm:$0xff]  }
 0x2d8   :  { %10147 = vmatpush1.bf16.msra.mxu1 %v15623_v49  ;;  %v15674_v49 = vld [vmem:[#allocation8 + $0x9d0] ss:$52 sps:$4 sm:$0xff]  }
 0x2d9   :  { %10188 = vmatpush1.bf16.msra.mxu0 %v15626_v59  ;;  %10148 = vmatprep.subr.bf16.mxu1 %v15631_v60  ;;  %v15682_v59 = vld [vmem:[#allocation8 + $0x166c] ss:$52 sps:$4 sm:$0xff]  }
 0x2da   :  { %10189 = vmatprep.subr.bf16.mxu0 %v15634_v61  ;;  %v17045_v60 = vld [vmem:[#allocation10] sm:$0xff] }
 0x2db   :  { %v17528_v3 = vpop.f32.mrf.mxu0  ;;  %v2640_v61 = vrot.slane %v17045_v60, %v17388_v54 }
 0x2dc   :  { %10149 = vmatpush2.bf16.msra.mxu1 %v15629_v52  ;;  %v15677_v52 = vld [vmem:[#allocation8 + $0xfe8] ss:$52 sps:$4 sm:$0xff]  }
 0x2dd   :  { %10190 = vmatpush2.bf16.msra.mxu0 %v15632_v62  ;;  %v17530_v9 = vpop.f32.mrf.mxu0  ;;  %10150 = vmatprep.subr.bf16.mxu1 %v15637_v58  ;;  %v15680_v62 = vld [vmem:[#allocation8 + $0x1668] ss:$52 sps:$4 sm:$0xff]   ;;  %v2644_v58 = vrot.slane %v17045_v60, %v17394_v56  ;;  %v15719_v60 = vld [vmem:[#allocation8 + $0xd10] ss:$52 sps:$4 sm:$0xff]  }
 0x2de   :  { %10191 = vmatprep.subr.bf16.mxu0 %v15640_v2  ;;  %v15685_v2 = vld [vmem:[#allocation8 + $0xf84] ss:$52 sps:$4 sm:$0xff]  }
 0x2df   :  { %v9883_v7 = vpop.f32.mrf.mxu0 }
 0x2e0   :  { %10151 = vmatpush2.bf16.msra.mxu1 %v15635_v4  ;;  %v9880_v4 = vadd.f32 %v17528_v3, %v2640_v61  ;;  %v15688_v7 = vld [vmem:[#allocation8 + $0x1604] ss:$52 sps:$4 sm:$0xff]   ;;  %v15724_v61 = vld [vmem:[#allocation8 + $0x1394] ss:$52 sps:$4 sm:$0xff]  }
 0x2e1   :  { %10192 = vmatpush2.bf16.msra.mxu0 %v15638_v5  ;;  %v9884_v20 = vpop.f32.mrf.mxu0  ;;  %10152 = vmatprep.subr.bf16.mxu1 %v15643_v6  ;;  %v15683_v5 = vld [vmem:[#allocation8 + $0xf80] ss:$52 sps:$4 sm:$0xff]  }
 0x2e2   :  { %10193 = vmatprep.subr.bf16.mxu0 %v15646_v8  ;;  %v15686_v8 = vld [vmem:[#allocation8 + $0x1600] ss:$52 sps:$4 sm:$0xff]  }
 0x2e4   :  { %10153 = vmatpush2.bf16.msra.mxu1 %v15641_v1  ;;  %v9882_v1 = vadd.f32 %v17530_v9, %v2644_v58  ;;  %v15692_v9 = vld [vmem:[#allocation8 + $0x1598] ss:$52 sps:$4 sm:$0xff]  }
 0x2e5   :  { %10194 = vmatpush2.bf16.msra.mxu0 %v15644_v11  ;;  %10154 = vmatprep.subr.bf16.mxu1 %v15649_v10  ;;  %v15691_v11 = vld [vmem:[#allocation8 + $0xf1c] ss:$52 sps:$4 sm:$0xff]   ;;  %v15730_v58 = vld [vmem:[#allocation8 + $0x19ac] ss:$52 sps:$4 sm:$0xff]  }
 0x2e6   :  { %10195 = vmatprep.subr.bf16.mxu0 %v15652_v19  ;;  %v15694_v10 = vld [vmem:[#allocation8 + $0x159c] ss:$52 sps:$4 sm:$0xff]  }
 0x2e8   :  { %10155 = vmatpush2.bf16.msra.mxu1 %v15647_v23 }
 0x2e9   :  { %10196 = vmatpush2.bf16.msra.mxu0 %v15650_v27  ;;  %10156 = vmatprep.subr.bf16.mxu1 %v15655_v30  ;;  %v15689_v27 = vld [vmem:[#allocation8 + $0xf18] ss:$52 sps:$4 sm:$0xff]   ;;  %v15697_v30 = vld [vmem:[#allocation8 + $0xeb4] ss:$52 sps:$4 sm:$0xff]  }
 0x2ea   :  { %10197 = vmatprep.subr.bf16.mxu0 %v15658_v24 }
 0x2ec   :  { %10157 = vmatpush2.bf16.msra.mxu1 %v15653_v32  ;;  %v15700_v32 = vld [vmem:[#allocation8 + $0x1534] ss:$52 sps:$4 sm:$0xff]  }
 0x2ed   :  { %10198 = vmatpush2.bf16.msra.mxu0 %v15656_v22  ;;  %10158 = vmatprep.subr.bf16.mxu1 %v15661_v33  ;;  %v15695_v22 = vld [vmem:[#allocation8 + $0xeb0] ss:$52 sps:$4 sm:$0xff]  }
 0x2ee   :  { %10199 = vmatprep.subr.bf16.mxu0 %v15664_v25  ;;  %v15698_v33 = vld [vmem:[#allocation8 + $0x1530] ss:$52 sps:$4 sm:$0xff]   ;;  %v15701_v25 = vld [vmem:[#allocation8 + $0xe48] ss:$52 sps:$4 sm:$0xff]  }
 0x2f0   :  { %10159 = vmatpush2.bf16.msra.mxu1 %v15659_v35  ;;  %v15703_v35 = vld [vmem:[#allocation8 + $0xe4c] ss:$52 sps:$4 sm:$0xff]  }
 0x2f1   :  { %10200 = vmatpush2.bf16.msra.mxu0 %v15662_v37  ;;  %10160 = vmatprep.subr.bf16.mxu1 %v15667_v38  ;;  %v15706_v37 = vld [vmem:[#allocation8 + $0x14cc] ss:$52 sps:$4 sm:$0xff]   ;;  %v15704_v38 = vld [vmem:[#allocation8 + $0x14c8] ss:$52 sps:$4 sm:$0xff]  }
 0x2f2   :  { %10201 = vmatprep.subr.bf16.mxu0 %v15670_v43  ;;  %v15707_v43 = vld [vmem:[#allocation8 + $0xde0] ss:$52 sps:$4 sm:$0xff]  }
 0x2f4   :  { %10161 = vmatpush2.bf16.msra.mxu1 %v15665_v40  ;;  %v15709_v40 = vld [vmem:[#allocation8 + $0xde4] ss:$52 sps:$4 sm:$0xff]  }
 0x2f5   :  { %10202 = vmatpush2.bf16.msra.mxu0 %v15668_v44  ;;  %10162 = vmatprep.subr.bf16.mxu1 %v15673_v45  ;;  %v15712_v44 = vld [vmem:[#allocation8 + $0x1464] ss:$52 sps:$4 sm:$0xff]   ;;  %v15710_v45 = vld [vmem:[#allocation8 + $0x1460] ss:$52 sps:$4 sm:$0xff]  }
 0x2f6   :  { %10203 = vmatprep.subr.bf16.mxu0 %v15676_v48  ;;  %v15713_v48 = vld [vmem:[#allocation8 + $0xd78] ss:$52 sps:$4 sm:$0xff]  }
 0x2f8   :  { %10163 = vmatpush2.bf16.msra.mxu1 %v15671_v46  ;;  %v15715_v46 = vld [vmem:[#allocation8 + $0xd7c] ss:$52 sps:$4 sm:$0xff]  }
 0x2f9   :  { %10204 = vmatpush2.bf16.msra.mxu0 %v15674_v49  ;;  %10214 = vmatprep.subr.bf16.mxu1 %v15679_v50  ;;  %v15718_v49 = vld [vmem:[#allocation8 + $0x13fc] ss:$52 sps:$4 sm:$0xff]   ;;  %v15716_v50 = vld [vmem:[#allocation8 + $0x13f8] ss:$52 sps:$4 sm:$0xff]  }
 0x2fa   :  { %10255 = vmatprep.subr.bf16.mxu0 %v15682_v59  ;;  %v15721_v59 = vld [vmem:[#allocation8 + $0xd14] ss:$52 sps:$4 sm:$0xff]  }
 0x2fb   :  { %v9920_v6 = vpop.f32.mrf.mxu1  ;;  %10165 = vmatmul.mubr.bf16.vlgmr.msra.gmra.mxu1 %v17410_v18 }
 0x2fc   :  { %v17537_v20 = vadd.f32 %v9920_v6, %v9880_v4  ;;  %10206 = vmatmul.mubr.bf16.vlgmr.msra.gmra.mxu0 %v17404_v14  ;;  %10215 = vmatpush1.bf16.msra.mxu1 %v15677_v52  ;;  %v15722_v52 = vld [vmem:[#allocation8 + $0x1390] ss:$52 sps:$4 sm:$0xff]   ;;  %v15728_v4 = vld [vmem:[#allocation8 + $0x19a8] ss:$52 sps:$4 sm:$0xff]  }
 0x2fd   :  { %10246 = vmatprep.mubr.bf16.mxu1 %v17428_v15  ;;  %10256 = vmatpush1.bf16.msra.mxu0 %v15680_v62  ;;  %v9922_v3 = vpop.f32.mrf.mxu1  ;;  %v15727_v62 = vld [vmem:[#allocation8 + $0x132c] ss:$52 sps:$4 sm:$0xff]   ;;  %v15736_v6 = vld [vmem:[#allocation8 + $0x1944] ss:$52 sps:$4 sm:$0xff]  }
 0x2fe   :  { %10287 = vmatprep.mubr.bf16.mxu0 %v17430_v36  ;;  %v17542_v23 = vadd.f32 %v9922_v3, %v9882_v1  ;;  %10216 = vmatprep.subr.bf16.mxu1 %v15685_v2  ;;  %v15725_v2 = vld [vmem:[#allocation8 + $0x1328] ss:$52 sps:$4 sm:$0xff]   ;;  %v15731_v1 = vld [vmem:[#allocation8 + $0x12c0] ss:$52 sps:$4 sm:$0xff]  }
 0x2ff   :  { %v9924_v19 = vpop.f32.mrf.mxu1  ;;  %10257 = vmatprep.subr.bf16.mxu0 %v15688_v7  ;;  %v15739_v3 = vld [vmem:[#allocation8 + $0x125c] ss:$52 sps:$4 sm:$0xff]  }
 0x300   :  { %10217 = vmatpush1.bf16.msra.mxu1 %v15683_v5  ;;  %v15733_v5 = vld [vmem:[#allocation8 + $0x12c4] ss:$52 sps:$4 sm:$0xff]  }
 0x301   :  { %10258 = vmatpush1.bf16.msra.mxu0 %v15686_v8  ;;  %v9925_v24 = vpop.f32.mrf.mxu1  ;;  %10218 = vmatprep.subr.bf16.mxu1 %v15691_v11 }
 0x302   :  { %10259 = vmatprep.subr.bf16.mxu0 %v15694_v10  ;;  %v15734_v10 = vld [vmem:[#allocation8 + $0x1940] ss:$52 sps:$4 sm:$0xff]  }
 0x303   :  { %v15745_v24 = vld [vmem:[#allocation8 + $0x11f4] ss:$52 sps:$4 sm:$0xff]  }
 0x304   :  { %10219 = vmatpush1.bf16.msra.mxu1 %v15689_v27  ;;  %v15737_v27 = vld [vmem:[#allocation8 + $0x1258] ss:$52 sps:$4 sm:$0xff]  }
 0x305   :  { %10260 = vmatpush1.bf16.msra.mxu0 %v15692_v9  ;;  %10220 = vmatprep.subr.bf16.mxu1 %v15697_v30  ;;  %v15742_v9 = vld [vmem:[#allocation8 + $0x18dc] ss:$52 sps:$4 sm:$0xff]  }
 0x306   :  { %10261 = vmatprep.subr.bf16.mxu0 %v15700_v32 }
 0x308   :  { %10221 = vmatpush1.bf16.msra.mxu1 %v15695_v22  ;;  %v15743_v22 = vld [vmem:[#allocation8 + $0x11f0] ss:$52 sps:$4 sm:$0xff]  }
 0x309   :  { %10262 = vmatpush1.bf16.msra.mxu0 %v15698_v33  ;;  %10222 = vmatprep.subr.bf16.mxu1 %v15703_v35  ;;  %v15748_v33 = vld [vmem:[#allocation8 + $0x1874] ss:$52 sps:$4 sm:$0xff]   ;;  %v15746_v35 = vld [vmem:[#allocation8 + $0x1870] ss:$52 sps:$4 sm:$0xff]  }
 0x30a   :  { %10263 = vmatprep.subr.bf16.mxu0 %v15706_v37  ;;  %v15754_v37 = vld [vmem:[#allocation8 + $0x180c] ss:$52 sps:$4 sm:$0xff]  }
 0x30c   :  { %10223 = vmatpush1.bf16.msra.mxu1 %v15701_v25  ;;  %v15751_v25 = vld [vmem:[#allocation8 + $0x118c] ss:$52 sps:$4 sm:$0xff]  }
 0x30d   :  { %10264 = vmatpush1.bf16.msra.mxu0 %v15704_v38  ;;  %10224 = vmatprep.subr.bf16.mxu1 %v15709_v40  ;;  %v15752_v38 = vld [vmem:[#allocation8 + $0x1808] ss:$52 sps:$4 sm:$0xff]   ;;  %v15757_v40 = vld [vmem:[#allocation8 + $0x1124] ss:$52 sps:$4 sm:$0xff]  }
 0x30e   :  { %10265 = vmatprep.subr.bf16.mxu0 %v15712_v44  ;;  %v15760_v44 = vld [vmem:[#allocation8 + $0x17a4] ss:$52 sps:$4 sm:$0xff]  }
 0x310   :  { %10225 = vmatpush1.bf16.msra.mxu1 %v15707_v43  ;;  %v15755_v43 = vld [vmem:[#allocation8 + $0x1120] ss:$52 sps:$4 sm:$0xff]  }
 0x311   :  { %10266 = vmatpush1.bf16.msra.mxu0 %v15710_v45  ;;  %10226 = vmatprep.subr.bf16.mxu1 %v15715_v46  ;;  %v15758_v45 = vld [vmem:[#allocation8 + $0x17a0] ss:$52 sps:$4 sm:$0xff]   ;;  %v15763_v46 = vld [vmem:[#allocation8 + $0x10bc] ss:$52 sps:$4 sm:$0xff]  }
 0x312   :  { %10267 = vmatprep.subr.bf16.mxu0 %v15718_v49  ;;  %v15766_v49 = vld [vmem:[#allocation8 + $0x173c] ss:$52 sps:$4 sm:$0xff]  }
 0x314   :  { %10227 = vmatpush1.bf16.msra.mxu1 %v15713_v48  ;;  %v15761_v48 = vld [vmem:[#allocation8 + $0x10b8] ss:$52 sps:$4 sm:$0xff]  }
 0x315   :  { %10268 = vmatpush1.bf16.msra.mxu0 %v15716_v50  ;;  %10228 = vmatprep.subr.bf16.mxu1 %v15721_v59  ;;  %v15764_v50 = vld [vmem:[#allocation8 + $0x1738] ss:$52 sps:$4 sm:$0xff]   ;;  %v15769_v59 = vld [vmem:[#allocation8 + $0x1054] ss:$52 sps:$4 sm:$0xff]  }
 0x316   :  { %10269 = vmatprep.subr.bf16.mxu0 %v15724_v61  ;;  %v15772_v61 = vld [vmem:[#allocation8 + $0x16d4] ss:$52 sps:$4 sm:$0xff]  }
 0x318   :  { %10229 = vmatpush1.bf16.msra.mxu1 %v15719_v60  ;;  %v15767_v60 = vld [vmem:[#allocation8 + $0x1050] ss:$52 sps:$4 sm:$0xff]  }
 0x319   :  { %10270 = vmatpush1.bf16.msra.mxu0 %v15722_v52  ;;  %10230 = vmatprep.subr.bf16.mxu1 %v15727_v62  ;;  %v15770_v52 = vld [vmem:[#allocation8 + $0x16d0] ss:$52 sps:$4 sm:$0xff]   ;;  %v15775_v62 = vld [vmem:[#allocation8 + $0x1cec] ss:$52 sps:$4 sm:$0xff]  }
 0x31a   :  { %10271 = vmatprep.subr.bf16.mxu0 %v15730_v58  ;;  %v15773_v58 = vld [vmem:[#allocation8 + $0x1ce8] ss:$52 sps:$4 sm:$0xff]  }
 0x31b   :  { %v9961_v8 = vpop.f32.mrf.mxu0 }
 0x31c   :  { %v17545_v7 = vadd.f32 %v9961_v8, %v17537_v20  ;;  %10231 = vmatpush2.bf16.msra.mxu1 %v15725_v2  ;;  %v15740_v20 = vld [vmem:[#allocation8 + $0x18d8] ss:$52 sps:$4 sm:$0xff]  }
 0x31d   :  { %10272 = vmatpush2.bf16.msra.mxu0 %v15728_v4  ;;  %v9963_v11 = vpop.f32.mrf.mxu0  ;;  %10232 = vmatprep.subr.bf16.mxu1 %v15733_v5  ;;  %v15778_v2 = vld [vmem:[#allocation8 + $0x236c] ss:$52 sps:$4 sm:$0xff]   ;;  %v15776_v4 = vld [vmem:[#allocation8 + $0x2368] ss:$52 sps:$4 sm:$0xff]   ;;  %v15781_v5 = vld [vmem:[#allocation8 + $0x1c84] ss:$52 sps:$4 sm:$0xff]  }
 0x31e   :  { %v17548_v19 = vadd.f32 %v9963_v11, %v17542_v23  ;;  %10273 = vmatprep.subr.bf16.mxu0 %v15736_v6  ;;  %v15749_v23 = vld [vmem:[#allocation8 + $0x1188] ss:$52 sps:$4 sm:$0xff]   ;;  %v15779_v6 = vld [vmem:[#allocation8 + $0x1c80] ss:$52 sps:$4 sm:$0xff]   ;;  %v15784_v11 = vld [vmem:[#allocation8 + $0x2304] ss:$52 sps:$4 sm:$0xff]  }
 0x31f   :  { %v9965_v30 = vpop.f32.mrf.mxu0 }
 0x320   :  { %10233 = vmatpush2.bf16.msra.mxu1 %v15731_v1  ;;  %v15782_v1 = vld [vmem:[#allocation8 + $0x2300] ss:$52 sps:$4 sm:$0xff]  }
 0x321   :  { %10274 = vmatpush2.bf16.msra.mxu0 %v15734_v10  ;;  %v9966_v32 = vpop.f32.mrf.mxu0  ;;  %10234 = vmatprep.subr.bf16.mxu1 %v15739_v3  ;;  %v15787_v3 = vld [vmem:[#allocation8 + $0x1c1c] ss:$52 sps:$4 sm:$0xff]  }
 0x322   :  { %10275 = vmatprep.subr.bf16.mxu0 %v15742_v9 }
 0x324   :  { %10235 = vmatpush2.bf16.msra.mxu1 %v15737_v27  ;;  %v15790_v27 = vld [vmem:[#allocation8 + $0x229c] ss:$52 sps:$4 sm:$0xff]  }
 0x325   :  { %10276 = vmatpush2.bf16.msra.mxu0 %v15740_v20  ;;  %10236 = vmatprep.subr.bf16.mxu1 %v15745_v24  ;;  %v15785_v20 = vld [vmem:[#allocation8 + $0x1c18] ss:$52 sps:$4 sm:$0xff]   ;;  %v15793_v24 = vld [vmem:[#allocation8 + $0x1bb4] ss:$52 sps:$4 sm:$0xff]  }
 0x326   :  { %10277 = vmatprep.subr.bf16.mxu0 %v15748_v33  ;;  %v15796_v33 = vld [vmem:[#allocation8 + $0x2234] ss:$52 sps:$4 sm:$0xff]  }
 0x328   :  { %10237 = vmatpush2.bf16.msra.mxu1 %v15743_v22 }
 0x329   :  { %10278 = vmatpush2.bf16.msra.mxu0 %v15746_v35  ;;  %10238 = vmatprep.subr.bf16.mxu1 %v15751_v25  ;;  %v15791_v35 = vld [vmem:[#allocation8 + $0x1bb0] ss:$52 sps:$4 sm:$0xff]  }
 0x32a   :  { %10279 = vmatprep.subr.bf16.mxu0 %v15754_v37  ;;  %v15794_v25 = vld [vmem:[#allocation8 + $0x2230] ss:$52 sps:$4 sm:$0xff]   ;;  %v15802_v37 = vld [vmem:[#allocation8 + $0x21cc] ss:$52 sps:$4 sm:$0xff]  }
 0x32c   :  { %10239 = vmatpush2.bf16.msra.mxu1 %v15749_v23  ;;  %v15799_v23 = vld [vmem:[#allocation8 + $0x1b4c] ss:$52 sps:$4 sm:$0xff]  }
 0x32d   :  { %10280 = vmatpush2.bf16.msra.mxu0 %v15752_v38  ;;  %10240 = vmatprep.subr.bf16.mxu1 %v15757_v40  ;;  %v15800_v38 = vld [vmem:[#allocation8 + $0x21c8] ss:$52 sps:$4 sm:$0xff]   ;;  %v15805_v40 = vld [vmem:[#allocation8 + $0x1ae4] ss:$52 sps:$4 sm:$0xff]  }
 0x32e   :  { %10281 = vmatprep.subr.bf16.mxu0 %v15760_v44  ;;  %v15808_v44 = vld [vmem:[#allocation8 + $0x2164] ss:$52 sps:$4 sm:$0xff]  }
 0x330   :  { %10241 = vmatpush2.bf16.msra.mxu1 %v15755_v43  ;;  %v15803_v43 = vld [vmem:[#allocation8 + $0x1ae0] ss:$52 sps:$4 sm:$0xff]  }
 0x331   :  { %10282 = vmatpush2.bf16.msra.mxu0 %v15758_v45  ;;  %10242 = vmatprep.subr.bf16.mxu1 %v15763_v46  ;;  %v15806_v45 = vld [vmem:[#allocation8 + $0x2160] ss:$52 sps:$4 sm:$0xff]   ;;  %v15811_v46 = vld [vmem:[#allocation8 + $0x1a7c] ss:$52 sps:$4 sm:$0xff]  }
 0x332   :  { %10283 = vmatprep.subr.bf16.mxu0 %v15766_v49  ;;  %v15814_v49 = vld [vmem:[#allocation8 + $0x20fc] ss:$52 sps:$4 sm:$0xff]  }
 0x334   :  { %10243 = vmatpush2.bf16.msra.mxu1 %v15761_v48  ;;  %v15809_v48 = vld [vmem:[#allocation8 + $0x1a78] ss:$52 sps:$4 sm:$0xff]  }
 0x335   :  { %10284 = vmatpush2.bf16.msra.mxu0 %v15764_v50  ;;  %10244 = vmatprep.subr.bf16.mxu1 %v15769_v59  ;;  %v15812_v50 = vld [vmem:[#allocation8 + $0x20f8] ss:$52 sps:$4 sm:$0xff]   ;;  %v15817_v59 = vld [vmem:[#allocation8 + $0x1a14] ss:$52 sps:$4 sm:$0xff]  }
 0x336   :  { %10285 = vmatprep.subr.bf16.mxu0 %v15772_v61  ;;  %v15820_v61 = vld [vmem:[#allocation8 + $0x2094] ss:$52 sps:$4 sm:$0xff]  }
 0x338   :  { %10245 = vmatpush2.bf16.msra.mxu1 %v15767_v60  ;;  %v15815_v60 = vld [vmem:[#allocation8 + $0x1a10] ss:$52 sps:$4 sm:$0xff]  }
 0x339   :  { %10286 = vmatpush2.bf16.msra.mxu0 %v15770_v52  ;;  %10296 = vmatprep.subr.bf16.mxu1 %v15775_v62  ;;  %v15818_v52 = vld [vmem:[#allocation8 + $0x2090] ss:$52 sps:$4 sm:$0xff]   ;;  %v15823_v62 = vld [vmem:[#allocation8 + $0x202c] ss:$52 sps:$4 sm:$0xff]  }
 0x33a   :  { %10337 = vmatprep.subr.bf16.mxu0 %v15778_v2  ;;  %v15821_v2 = vld [vmem:[#allocation8 + $0x2028] ss:$52 sps:$4 sm:$0xff]  }
 0x33b   :  { %v10002_v8 = vpop.f32.mrf.mxu1  ;;  %10247 = vmatmul.mubr.bf16.vlgmr.msra.gmra.mxu1 %v17457_v26 }
 0x33c   :  { %v17552_v10 = vadd.f32 %v10002_v8, %v17545_v7  ;;  %10288 = vmatmul.mubr.bf16.vlgmr.msra.gmra.mxu0 %v17455_v21  ;;  %10297 = vmatpush1.bf16.msra.mxu1 %v15773_v58  ;;  %v15788_v7 = vld [vmem:[#allocation8 + $0x2298] ss:$52 sps:$4 sm:$0xff]  }
 0x33d   :  { %10328 = vmatprep.mubr.bf16.mxu1 %v17459_v28  ;;  %10338 = vmatpush1.bf16.msra.mxu0 %v15776_v4  ;;  %v10004_v9 = vpop.f32.mrf.mxu1  ;;  %v15826_v58 = vld [vmem:[#allocation8 + $0x26ac] ss:$52 sps:$4 sm:$0xff]   ;;  %v15824_v4 = vld [vmem:[#allocation8 + $0x26a8] ss:$52 sps:$4 sm:$0xff]  }
 0x33e   :  { %10369 = vmatprep.mubr.bf16.mxu0 %v17461_v29  ;;  %v17558_v30 = vadd.f32 %v10004_v9, %v17548_v19  ;;  %10298 = vmatprep.subr.bf16.mxu1 %v15781_v5  ;;  %v15797_v19 = vld [vmem:[#allocation8 + $0x1b48] ss:$52 sps:$4 sm:$0xff]   ;;  %v15829_v5 = vld [vmem:[#allocation8 + $0x1fc4] ss:$52 sps:$4 sm:$0xff]  }
 0x33f   :  { %v10006_v32 = vpop.f32.mrf.mxu1  ;;  %10339 = vmatprep.subr.bf16.mxu0 %v15784_v11  ;;  %v15827_v11 = vld [vmem:[#allocation8 + $0x1fc0] ss:$52 sps:$4 sm:$0xff]   ;;  %v15835_v9 = vld [vmem:[#allocation8 + $0x1f5c] ss:$52 sps:$4 sm:$0xff]  }
 0x340   :  { %10299 = vmatpush1.bf16.msra.mxu1 %v15779_v6  ;;  %v15832_v6 = vld [vmem:[#allocation8 + $0x2644] ss:$52 sps:$4 sm:$0xff]  }
 0x341   :  { %10340 = vmatpush1.bf16.msra.mxu0 %v15782_v1  ;;  %v10007_v22 = vpop.f32.mrf.mxu1  ;;  %10300 = vmatprep.subr.bf16.mxu1 %v15787_v3 }
 0x342   :  { %10341 = vmatprep.subr.bf16.mxu0 %v15790_v27  ;;  %v15830_v27 = vld [vmem:[#allocation8 + $0x2640] ss:$52 sps:$4 sm:$0xff]  }
 0x344   :  { %10301 = vmatpush1.bf16.msra.mxu1 %v15785_v20  ;;  %v15833_v20 = vld [vmem:[#allocation8 + $0x1f58] ss:$52 sps:$4 sm:$0xff]  }
 0x345   :  { %10342 = vmatpush1.bf16.msra.mxu0 %v15788_v7  ;;  %10302 = vmatprep.subr.bf16.mxu1 %v15793_v24  ;;  %v15838_v7 = vld [vmem:[#allocation8 + $0x25dc] ss:$52 sps:$4 sm:$0xff]  }
 0x346   :  { %10343 = vmatprep.subr.bf16.mxu0 %v15796_v33  ;;  %v15841_v33 = vld [vmem:[#allocation8 + $0x1ef4] ss:$52 sps:$4 sm:$0xff]  }
 0x348   :  { %10303 = vmatpush1.bf16.msra.mxu1 %v15791_v35  ;;  %v15839_v35 = vld [vmem:[#allocation8 + $0x1ef0] ss:$52 sps:$4 sm:$0xff]  }
 0x349   :  { %10344 = vmatpush1.bf16.msra.mxu0 %v15794_v25  ;;  %10304 = vmatprep.subr.bf16.mxu1 %v15799_v23  ;;  %v15844_v25 = vld [vmem:[#allocation8 + $0x2574] ss:$52 sps:$4 sm:$0xff]   ;;  %v15842_v23 = vld [vmem:[#allocation8 + $0x2570] ss:$52 sps:$4 sm:$0xff]  }
 0x34a   :  { %10345 = vmatprep.subr.bf16.mxu0 %v15802_v37  ;;  %v15850_v37 = vld [vmem:[#allocation8 + $0x250c] ss:$52 sps:$4 sm:$0xff]  }
 0x34c   :  { %10305 = vmatpush1.bf16.msra.mxu1 %v15797_v19  ;;  %v15847_v19 = vld [vmem:[#allocation8 + $0x1e8c] ss:$52 sps:$4 sm:$0xff]  }
 0x34d   :  { %10346 = vmatpush1.bf16.msra.mxu0 %v15800_v38  ;;  %10306 = vmatprep.subr.bf16.mxu1 %v15805_v40  ;;  %v15848_v38 = vld [vmem:[#allocation8 + $0x2508] ss:$52 sps:$4 sm:$0xff]   ;;  %v15853_v40 = vld [vmem:[#allocation8 + $0x1e24] ss:$52 sps:$4 sm:$0xff]  }
 0x34e   :  { %10347 = vmatprep.subr.bf16.mxu0 %v15808_v44  ;;  %v15856_v44 = vld [vmem:[#allocation8 + $0x24a4] ss:$52 sps:$4 sm:$0xff]  }
 0x350   :  { %10307 = vmatpush1.bf16.msra.mxu1 %v15803_v43  ;;  %v15851_v43 = vld [vmem:[#allocation8 + $0x1e20] ss:$52 sps:$4 sm:$0xff]  }
 0x351   :  { %10348 = vmatpush1.bf16.msra.mxu0 %v15806_v45  ;;  %10308 = vmatprep.subr.bf16.mxu1 %v15811_v46  ;;  %v15854_v45 = vld [vmem:[#allocation8 + $0x24a0] ss:$52 sps:$4 sm:$0xff]   ;;  %v15859_v46 = vld [vmem:[#allocation8 + $0x1dbc] ss:$52 sps:$4 sm:$0xff]  }
 0x352   :  { %10349 = vmatprep.subr.bf16.mxu0 %v15814_v49  ;;  %v15862_v49 = vld [vmem:[#allocation8 + $0x243c] ss:$52 sps:$4 sm:$0xff]  }
 0x354   :  { %10309 = vmatpush1.bf16.msra.mxu1 %v15809_v48  ;;  %v15857_v48 = vld [vmem:[#allocation8 + $0x1db8] ss:$52 sps:$4 sm:$0xff]  }
 0x355   :  { %10350 = vmatpush1.bf16.msra.mxu0 %v15812_v50  ;;  %10310 = vmatprep.subr.bf16.mxu1 %v15817_v59  ;;  %v15860_v50 = vld [vmem:[#allocation8 + $0x2438] ss:$52 sps:$4 sm:$0xff]   ;;  %v15865_v59 = vld [vmem:[#allocation8 + $0x1d54] ss:$52 sps:$4 sm:$0xff]  }
 0x356   :  { %10351 = vmatprep.subr.bf16.mxu0 %v15820_v61  ;;  %v15868_v61 = vld [vmem:[#allocation8 + $0x23d4] ss:$52 sps:$4 sm:$0xff]  }
 0x358   :  { %10311 = vmatpush1.bf16.msra.mxu1 %v15815_v60  ;;  %v15863_v60 = vld [vmem:[#allocation8 + $0x1d50] ss:$52 sps:$4 sm:$0xff]  }
 0x359   :  { %10352 = vmatpush1.bf16.msra.mxu0 %v15818_v52  ;;  %10312 = vmatprep.subr.bf16.mxu1 %v15823_v62  ;;  %v15866_v52 = vld [vmem:[#allocation8 + $0x23d0] ss:$52 sps:$4 sm:$0xff]   ;;  %v15871_v62 = vld [vmem:[#allocation8 + $0x29ec] ss:$52 sps:$4 sm:$0xff]  }
 0x35a   :  { %10353 = vmatprep.subr.bf16.mxu0 %v15826_v58  ;;  %v15869_v58 = vld [vmem:[#allocation8 + $0x29e8] ss:$52 sps:$4 sm:$0xff]  }
 0x35b   :  { %v10043_v8 = vpop.f32.mrf.mxu0 }
 0x35c   :  { %v17561_v1 = vadd.f32 %v10043_v8, %v17552_v10  ;;  %10313 = vmatpush2.bf16.msra.mxu1 %v15821_v2  ;;  %v15836_v10 = vld [vmem:[#allocation8 + $0x25d8] ss:$52 sps:$4 sm:$0xff]   ;;  %v15874_v2 = vld [vmem:[#allocation8 + $0x2f4] ss:$52 sps:$4 sm:$0xff]  }
 0x35d   :  { %10354 = vmatpush2.bf16.msra.mxu0 %v15824_v4  ;;  %v10045_v3 = vpop.f32.mrf.mxu0  ;;  %10314 = vmatprep.subr.bf16.mxu1 %v15829_v5  ;;  %v15872_v4 = vld [vmem:[#allocation8 + $0x2f0] ss:$52 sps:$4 sm:$0xff]  }
 0x35e   :  { %v17564_v32 = vadd.f32 %v10045_v3, %v17558_v30  ;;  %10355 = vmatprep.subr.bf16.mxu0 %v15832_v6  ;;  %v15845_v30 = vld [vmem:[#allocation8 + $0x1e88] ss:$52 sps:$4 sm:$0xff]   ;;  %v15877_v5 = vld [vmem:[#allocation8 + $0x2984] ss:$52 sps:$4 sm:$0xff]   ;;  %v15880_v6 = vld [vmem:[#allocation8 + $0x28c] ss:$52 sps:$4 sm:$0xff]  }
 0x35f   :  { %v10047_v24 = vpop.f32.mrf.mxu0  ;;  %v15875_v3 = vld [vmem:[#allocation8 + $0x2980] ss:$52 sps:$4 sm:$0xff]  }
 0x360   :  { %10315 = vmatpush2.bf16.msra.mxu1 %v15827_v11 }
 0x361   :  { %10356 = vmatpush2.bf16.msra.mxu0 %v15830_v27  ;;  %v10048_v22 = vpop.f32.mrf.mxu0  ;;  %10316 = vmatprep.subr.bf16.mxu1 %v15835_v9  ;;  %v15878_v27 = vld [vmem:[#allocation8 + $0x288] ss:$52 sps:$4 sm:$0xff]  }
 0x362   :  { %10357 = vmatprep.subr.bf16.mxu0 %v15838_v7  ;;  %v15886_v7 = vld [vmem:[#allocation8 + $0x224] ss:$52 sps:$4 sm:$0xff]  }
 0x364   :  { %10317 = vmatpush2.bf16.msra.mxu1 %v15833_v20  ;;  %v15883_v20 = vld [vmem:[#allocation8 + $0x291c] ss:$52 sps:$4 sm:$0xff]  }
 0x365   :  { %10358 = vmatpush2.bf16.msra.mxu0 %v15836_v10  ;;  %10318 = vmatprep.subr.bf16.mxu1 %v15841_v33 }
 0x366   :  { %10359 = vmatprep.subr.bf16.mxu0 %v15844_v25 }
 0x368   :  { %10319 = vmatpush2.bf16.msra.mxu1 %v15839_v35 }
 0x369   :  { %10360 = vmatpush2.bf16.msra.mxu0 %v15842_v23  ;;  %10320 = vmatprep.subr.bf16.mxu1 %v15847_v19  ;;  %v15881_v23 = vld [vmem:[#allocation8 + $0x2918] ss:$52 sps:$4 sm:$0xff]   ;;  %v15884_v19 = vld [vmem:[#allocation8 + $0x220] ss:$52 sps:$4 sm:$0xff]  }
 0x36a   :  { %10361 = vmatprep.subr.bf16.mxu0 %v15850_v37 }
 0x36c   :  { %10321 = vmatpush2.bf16.msra.mxu1 %v15845_v30  ;;  %v15889_v30 = vld [vmem:[#allocation8 + $0x28b4] ss:$52 sps:$4 sm:$0xff]  }
 0x36d   :  { %10362 = vmatpush2.bf16.msra.mxu0 %v15848_v38  ;;  %10322 = vmatprep.subr.bf16.mxu1 %v15853_v40  ;;  %v15892_v40 = vld [vmem:[#allocation8 + $0x1bc] ss:$52 sps:$4 sm:$0xff]  }
 0x36e   :  { %10363 = vmatprep.subr.bf16.mxu0 %v15856_v44  ;;  %v15895_v44 = vld [vmem:[#allocation8 + $0x284c] ss:$52 sps:$4 sm:$0xff]  }
 0x370   :  { %10323 = vmatpush2.bf16.msra.mxu1 %v15851_v43  ;;  %v15887_v43 = vld [vmem:[#allocation8 + $0x28b0] ss:$52 sps:$4 sm:$0xff]  }
 0x371   :  { %10364 = vmatpush2.bf16.msra.mxu0 %v15854_v45  ;;  %10324 = vmatprep.subr.bf16.mxu1 %v15859_v46  ;;  %v15893_v45 = vld [vmem:[#allocation8 + $0x2848] ss:$52 sps:$4 sm:$0xff]  }
 0x372   :  { %10365 = vmatprep.subr.bf16.mxu0 %v15862_v49  ;;  %v15898_v46 = vld [vmem:[#allocation8 + $0x154] ss:$52 sps:$4 sm:$0xff]   ;;  %v15901_v49 = vld [vmem:[#allocation8 + $0x27e4] ss:$52 sps:$4 sm:$0xff]  }
 0x374   :  { %10325 = vmatpush2.bf16.msra.mxu1 %v15857_v48  ;;  %v15896_v48 = vld [vmem:[#allocation8 + $0x150] ss:$52 sps:$4 sm:$0xff]  }
 0x375   :  { %10366 = vmatpush2.bf16.msra.mxu0 %v15860_v50  ;;  %10326 = vmatprep.subr.bf16.mxu1 %v15865_v59  ;;  %v15899_v50 = vld [vmem:[#allocation8 + $0x27e0] ss:$52 sps:$4 sm:$0xff]  }
 0x376   :  { %10367 = vmatprep.subr.bf16.mxu0 %v15868_v61  ;;  %v15904_v59 = vld [vmem:[#allocation8 + $0xec] ss:$52 sps:$4 sm:$0xff]   ;;  %v15907_v61 = vld [vmem:[#allocation8 + $0x277c] ss:$52 sps:$4 sm:$0xff]  }
 0x378   :  { %10327 = vmatpush2.bf16.msra.mxu1 %v15863_v60  ;;  %v15902_v60 = vld [vmem:[#allocation8 + $0xe8] ss:$52 sps:$4 sm:$0xff]  }
 0x379   :  { %10368 = vmatpush2.bf16.msra.mxu0 %v15866_v52  ;;  %10378 = vmatprep.subr.bf16.mxu1 %v15871_v62  ;;  %v15905_v52 = vld [vmem:[#allocation8 + $0x2778] ss:$52 sps:$4 sm:$0xff]  }
 0x37a   :  { %10419 = vmatprep.subr.bf16.mxu0 %v15874_v2  ;;  %v15910_v62 = vld [vmem:[#allocation8 + $0x84] ss:$52 sps:$4 sm:$0xff]   ;;  %v15913_v2 = vld [vmem:[#allocation8 + $0x2714] ss:$52 sps:$4 sm:$0xff]  }
 0x37b   :  { %v10084_v8 = vpop.f32.mrf.mxu1  ;;  %v10125_v11 = vpop.f32.mrf.mxu0  ;;  %10329 = vmatmul.mubr.bf16.vlgmr.msra.gmra.mxu1 %v17479_v63 }
 0x37c   :  { %v10085_v9 = vadd.f32 %v10084_v8, %v17561_v1  ;;  %10370 = vmatmul.mubr.bf16.vlgmr.msra.gmra.mxu0 %v17477_v13  ;;  %10379 = vmatpush1.bf16.msra.mxu1 %v15869_v58  ;;  %v15908_v58 = vld [vmem:[#allocation8 + $0x80] ss:$52 sps:$4 sm:$0xff]  }
 0x37d   :  { %10420 = vmatpush1.bf16.msra.mxu0 %v15872_v4  ;;  %10451 = vmatprep.mubr.bf16.mxu0 %v17406_v16  ;;  %v10086_v24 = vpop.f32.mrf.mxu1  ;;  %v10127_v22 = vpop.f32.mrf.mxu0  ;;  %v15911_v4 = vld [vmem:[#allocation8 + $0x2710] ss:$52 sps:$4 sm:$0xff]   ;;  %v15919_v8 = vld [vmem:[#allocation8 + $0x634] ss:$52 sps:$4 sm:$0xff]  }
 0x37e   :  { %v17570_v10 = vadd.f32 %v10125_v11, %v10085_v9  ;;  %v10087_v33 = vadd.f32 %v10086_v24, %v17564_v32  ;;  %10380 = vmatprep.subr.bf16.mxu1 %v15877_v5  ;;  %10421 = vmatprep.subr.bf16.mxu0 %v15880_v6  ;;  %v15890_v32 = vld [vmem:[#allocation8 + $0x1b8] ss:$52 sps:$4 sm:$0xff]   ;;  %v15916_v5 = vld [vmem:[#allocation8 + $0x1c] ss:$52 sps:$4 sm:$0xff]   ;;  %v15922_v11 = vld [vmem:[#allocation8 + $0x974] ss:$52 sps:$4 sm:$0xff]  }
 0x37f   :  { %v10088_v35 = vpop.f32.mrf.mxu1  ;;  %v10129_v25 = vpop.f32.mrf.mxu0  ;;  %10410 = vmatprep.mubr.bf16.mxu1 %v17274_v0  ;;  %v15914_v6 = vld [vmem:[#allocation8 + $0x18] ss:$52 sps:$4 sm:$0xff]   ;;  %v15923_v24 = vld [vmem:[#allocation8 + $0x5c8] ss:$52 sps:$4 sm:$0xff]  }
 0x380   :  { %v17574_v1 = vadd.f32 %v10127_v22, %v10087_v33  ;;  %10381 = vmatpush1.bf16.msra.mxu1 %v15875_v3  ;;  %v15920_v3 = vld [vmem:[#allocation8 + $0x970] ss:$52 sps:$4 sm:$0xff]   ;;  %v15928_v9 = vld [vmem:[#allocation8 + $0x90c] ss:$52 sps:$4 sm:$0xff]  }
 0x381   :  { %10422 = vmatpush1.bf16.msra.mxu0 %v15878_v27  ;;  %v10089_v37 = vpop.f32.mrf.mxu1  ;;  %v10130_v38 = vpop.f32.mrf.mxu0  ;;  %10382 = vmatprep.subr.bf16.mxu1 %v15883_v20  ;;  %v15917_v27 = vld [vmem:[#allocation8 + $0x630] ss:$52 sps:$4 sm:$0xff]   ;;  %v15925_v20 = vld [vmem:[#allocation8 + $0x5cc] ss:$52 sps:$4 sm:$0xff]  }
 0x382   :  { %10423 = vmatprep.subr.bf16.mxu0 %v15886_v7  ;;  %v15926_v7 = vld [vmem:[#allocation8 + $0x908] ss:$52 sps:$4 sm:$0xff]   ;;  %v15934_v22 = vld [vmem:[#allocation8 + $0x8a4] ss:$52 sps:$4 sm:$0xff]   ;;  %v15932_v35 = vld [vmem:[#allocation8 + $0x8a0] ss:$52 sps:$4 sm:$0xff]  }
 0x383   :  { %v15931_v33 = vld [vmem:[#allocation8 + $0x564] ss:$52 sps:$4 sm:$0xff]   ;;  %v15929_v25 = vld [vmem:[#allocation8 + $0x560] ss:$52 sps:$4 sm:$0xff]  }
 0x384   :  { %10383 = vmatpush1.bf16.msra.mxu1 %v15881_v23  ;;  %v15940_v23 = vld [vmem:[#allocation8 + $0x83c] ss:$52 sps:$4 sm:$0xff]   ;;  %v15935_v37 = vld [vmem:[#allocation8 + $0x4f8] ss:$52 sps:$4 sm:$0xff]   ;;  %v15946_v38 = vld [vmem:[#allocation8 + $0x7d4] ss:$52 sps:$4 sm:$0xff]  }
 0x385   :  { %10424 = vmatpush1.bf16.msra.mxu0 %v15884_v19  ;;  %10384 = vmatprep.subr.bf16.mxu1 %v15889_v30  ;;  %v15937_v19 = vld [vmem:[#allocation8 + $0x4fc] ss:$52 sps:$4 sm:$0xff]   ;;  %v15938_v30 = vld [vmem:[#allocation8 + $0x838] ss:$52 sps:$4 sm:$0xff]  }
 0x386   :  { %10425 = vmatprep.subr.bf16.mxu0 %v15892_v40  ;;  %v15943_v40 = vld [vmem:[#allocation8 + $0x494] ss:$52 sps:$4 sm:$0xff]  }
 0x388   :  { %10385 = vmatpush1.bf16.msra.mxu1 %v15887_v43  ;;  %v15944_v43 = vld [vmem:[#allocation8 + $0x7d0] ss:$52 sps:$4 sm:$0xff]  }
 0x389   :  { %10426 = vmatpush1.bf16.msra.mxu0 %v15890_v32  ;;  %10386 = vmatprep.subr.bf16.mxu1 %v15895_v44  ;;  %v15941_v32 = vld [vmem:[#allocation8 + $0x490] ss:$52 sps:$4 sm:$0xff]   ;;  %v15952_v44 = vld [vmem:[#allocation8 + $0x76c] ss:$52 sps:$4 sm:$0xff]  }
 0x38a   :  { %10427 = vmatprep.subr.bf16.mxu0 %v15898_v46  ;;  %v15950_v46 = vld [vmem:[#allocation8 + $0x768] ss:$52 sps:$4 sm:$0xff]  }
 0x38c   :  { %10387 = vmatpush1.bf16.msra.mxu1 %v15893_v45  ;;  %v15949_v45 = vld [vmem:[#allocation8 + $0x42c] ss:$52 sps:$4 sm:$0xff]  }
 0x38d   :  { %10428 = vmatpush1.bf16.msra.mxu0 %v15896_v48  ;;  %10388 = vmatprep.subr.bf16.mxu1 %v15901_v49  ;;  %v15947_v48 = vld [vmem:[#allocation8 + $0x428] ss:$52 sps:$4 sm:$0xff]   ;;  %v15958_v49 = vld [vmem:[#allocation8 + $0x704] ss:$52 sps:$4 sm:$0xff]  }
 0x38e   :  { %10429 = vmatprep.subr.bf16.mxu0 %v15904_v59  ;;  %v15956_v59 = vld [vmem:[#allocation8 + $0x700] ss:$52 sps:$4 sm:$0xff]  }
 0x390   :  { %10389 = vmatpush1.bf16.msra.mxu1 %v15899_v50  ;;  %v15955_v50 = vld [vmem:[#allocation8 + $0x3c4] ss:$52 sps:$4 sm:$0xff]  }
 0x391   :  { %10430 = vmatpush1.bf16.msra.mxu0 %v15902_v60  ;;  %10390 = vmatprep.subr.bf16.mxu1 %v15907_v61  ;;  %v15953_v60 = vld [vmem:[#allocation8 + $0x3c0] ss:$52 sps:$4 sm:$0xff]   ;;  %v15964_v61 = vld [vmem:[#allocation8 + $0x69c] ss:$52 sps:$4 sm:$0xff]  }
 0x392   :  { %10431 = vmatprep.subr.bf16.mxu0 %v15910_v62  ;;  %v15962_v62 = vld [vmem:[#allocation8 + $0x698] ss:$52 sps:$4 sm:$0xff]  }
 0x394   :  { %10391 = vmatpush1.bf16.msra.mxu1 %v15905_v52  ;;  %v15961_v52 = vld [vmem:[#allocation8 + $0x35c] ss:$52 sps:$4 sm:$0xff]  }
 0x395   :  { %10432 = vmatpush1.bf16.msra.mxu0 %v15908_v58  ;;  %10392 = vmatprep.subr.bf16.mxu1 %v15913_v2  ;;  %v15959_v58 = vld [vmem:[#allocation8 + $0x358] ss:$52 sps:$4 sm:$0xff]   ;;  %v15967_v2 = vld [vmem:[#allocation8 + $0xcb4] ss:$52 sps:$4 sm:$0xff]  }
 0x396   :  { %10433 = vmatprep.subr.bf16.mxu0 %v15916_v5  ;;  %v15970_v5 = vld [vmem:[#allocation8 + $0xff4] ss:$52 sps:$4 sm:$0xff]  }
 0x398   :  { %10393 = vmatpush1.bf16.msra.mxu1 %v15911_v4  ;;  %v15965_v4 = vld [vmem:[#allocation8 + $0xcb0] ss:$52 sps:$4 sm:$0xff]  }
 0x399   :  { %10434 = vmatpush1.bf16.msra.mxu0 %v15914_v6  ;;  %10460 = vmatprep.subr.bf16.mxu1 %v15922_v11  ;;  %v15968_v6 = vld [vmem:[#allocation8 + $0xff0] ss:$52 sps:$4 sm:$0xff]  }
 0x39a   :  { %10435 = vmatprep.subr.bf16.mxu0 %v15919_v8  ;;  %v17046_v8 = vld [vmem:[#allocation10] sm:$0xff] }
 0x39b   :  { %10411 = vmatmul.mubr.bf16.vlgmr.msra.gmra.mxu1 %v17486_v47  ;;  %v2648_v11 = vrot.slane %v17046_v8, %v17436_v34 }
 0x39c   :  { %10461 = vmatpush1.bf16.msra.mxu1 %v15920_v3  ;;  %10492 = vmatprep.mubr.bf16.mxu1 %v17408_v17  ;;  %v15973_v3 = vld [vmem:[#allocation8 + $0xc4c] ss:$52 sps:$4 sm:$0xff]  }
 0x39d   :  { %10436 = vmatpush2.bf16.msra.mxu0 %v15917_v27  ;;  %10462 = vmatprep.subr.bf16.mxu1 %v15928_v9  ;;  %v15976_v27 = vld [vmem:[#allocation8 + $0xf8c] ss:$52 sps:$4 sm:$0xff]   ;;  %v2652_v9 = vrot.slane %v17046_v8, %v286_v41  ;;  %v16006_v8 = vld [vmem:[#allocation8 + $0xd84] ss:$52 sps:$4 sm:$0xff]  }
 0x39e   :  { %10437 = vmatprep.subr.bf16.mxu0 %v15925_v20 }
 0x3a0   :  { %10463 = vmatpush1.bf16.msra.mxu1 %v15926_v7  ;;  %v15971_v7 = vld [vmem:[#allocation8 + $0xc48] ss:$52 sps:$4 sm:$0xff]  }
 0x3a1   :  { %10438 = vmatpush2.bf16.msra.mxu0 %v15923_v24  ;;  %10464 = vmatprep.subr.bf16.mxu1 %v15934_v22  ;;  %v15974_v24 = vld [vmem:[#allocation8 + $0xf88] ss:$52 sps:$4 sm:$0xff]  }
 0x3a2   :  { %10439 = vmatprep.subr.bf16.mxu0 %v15931_v33 }
 0x3a4   :  { %10465 = vmatpush1.bf16.msra.mxu1 %v15932_v35  ;;  %v15979_v35 = vld [vmem:[#allocation8 + $0xbe4] ss:$52 sps:$4 sm:$0xff]  }
 0x3a5   :  { %10440 = vmatpush2.bf16.msra.mxu0 %v15929_v25  ;;  %10466 = vmatprep.subr.bf16.mxu1 %v15940_v23  ;;  %v15982_v25 = vld [vmem:[#allocation8 + $0xf24] ss:$52 sps:$4 sm:$0xff]  }
 0x3a6   :  { %10441 = vmatprep.subr.bf16.mxu0 %v15937_v19 }
 0x3a8   :  { %10467 = vmatpush1.bf16.msra.mxu1 %v15938_v30 }
 0x3a9   :  { %10442 = vmatpush2.bf16.msra.mxu0 %v15935_v37  ;;  %10468 = vmatprep.subr.bf16.mxu1 %v15946_v38  ;;  %v15977_v38 = vld [vmem:[#allocation8 + $0xbe0] ss:$52 sps:$4 sm:$0xff]  }
 0x3aa   :  { %10443 = vmatprep.subr.bf16.mxu0 %v15943_v40 }
 0x3ac   :  { %10469 = vmatpush1.bf16.msra.mxu1 %v15944_v43 }
 0x3ad   :  { %10444 = vmatpush2.bf16.msra.mxu0 %v15941_v32  ;;  %10470 = vmatprep.subr.bf16.mxu1 %v15952_v44  ;;  %v15980_v32 = vld [vmem:[#allocation8 + $0xf20] ss:$52 sps:$4 sm:$0xff]   ;;  %v15985_v44 = vld [vmem:[#allocation8 + $0xb7c] ss:$52 sps:$4 sm:$0xff]  }
 0x3ae   :  { %10445 = vmatprep.subr.bf16.mxu0 %v15949_v45 }
 0x3b0   :  { %10471 = vmatpush1.bf16.msra.mxu1 %v15950_v46 }
 0x3b1   :  { %10446 = vmatpush2.bf16.msra.mxu0 %v15947_v48  ;;  %10472 = vmatprep.subr.bf16.mxu1 %v15958_v49  ;;  %v15988_v48 = vld [vmem:[#allocation8 + $0xebc] ss:$52 sps:$4 sm:$0xff]   ;;  %v15983_v49 = vld [vmem:[#allocation8 + $0xb78] ss:$52 sps:$4 sm:$0xff]  }
 0x3b2   :  { %10447 = vmatprep.subr.bf16.mxu0 %v15955_v50  ;;  %v15986_v50 = vld [vmem:[#allocation8 + $0xeb8] ss:$52 sps:$4 sm:$0xff]  }
 0x3b4   :  { %10473 = vmatpush1.bf16.msra.mxu1 %v15956_v59  ;;  %v15991_v59 = vld [vmem:[#allocation8 + $0xb14] ss:$52 sps:$4 sm:$0xff]  }
 0x3b5   :  { %10448 = vmatpush2.bf16.msra.mxu0 %v15953_v60  ;;  %10474 = vmatprep.subr.bf16.mxu1 %v15964_v61  ;;  %v15989_v60 = vld [vmem:[#allocation8 + $0xb10] ss:$52 sps:$4 sm:$0xff]   ;;  %v15994_v61 = vld [vmem:[#allocation8 + $0xe54] ss:$52 sps:$4 sm:$0xff]  }
 0x3b6   :  { %10449 = vmatprep.subr.bf16.mxu0 %v15961_v52  ;;  %v15992_v52 = vld [vmem:[#allocation8 + $0xe50] ss:$52 sps:$4 sm:$0xff]  }
 0x3b8   :  { %10475 = vmatpush1.bf16.msra.mxu1 %v15962_v62  ;;  %v15997_v62 = vld [vmem:[#allocation8 + $0xaac] ss:$52 sps:$4 sm:$0xff]  }
 0x3b9   :  { %10450 = vmatpush2.bf16.msra.mxu0 %v15959_v58  ;;  %10476 = vmatprep.subr.bf16.mxu1 %v15967_v2  ;;  %v15995_v58 = vld [vmem:[#allocation8 + $0xaa8] ss:$52 sps:$4 sm:$0xff]   ;;  %v16000_v2 = vld [vmem:[#allocation8 + $0xdec] ss:$52 sps:$4 sm:$0xff]  }
 0x3ba   :  { %10501 = vmatprep.subr.bf16.mxu0 %v15970_v5  ;;  %v16003_v5 = vld [vmem:[#allocation8 + $0xa44] ss:$52 sps:$4 sm:$0xff]  }
 0x3bb   :  { %v10166_v20 = vpop.f32.mrf.mxu1 }
 0x3bc   :  { %v10167_v22 = vadd.f32 %v10166_v20, %v2648_v11  ;;  %v10207_v33 = vpop.f32.mrf.mxu0  ;;  %10452 = vmatmul.mubr.bf16.vlgmr.msra.gmra.mxu0 %v17410_v18  ;;  %10477 = vmatpush2.bf16.msra.mxu1 %v15965_v4  ;;  %v15998_v4 = vld [vmem:[#allocation8 + $0xde8] ss:$52 sps:$4 sm:$0xff]   ;;  %v16004_v11 = vld [vmem:[#allocation8 + $0xd80] ss:$52 sps:$4 sm:$0xff]   ;;  %v16010_v20 = vld [vmem:[#allocation8 + $0xd18] ss:$52 sps:$4 sm:$0xff]  }
 0x3bd   :  { %10502 = vmatpush1.bf16.msra.mxu0 %v15968_v6  ;;  %10533 = vmatprep.mubr.bf16.mxu0 %v17428_v15  ;;  %v10168_v23 = vpop.f32.mrf.mxu1  ;;  %v16001_v6 = vld [vmem:[#allocation8 + $0xa40] ss:$52 sps:$4 sm:$0xff]  }
 0x3be   :  { %v17583_v19 = vadd.f32 %v10207_v33, %v10167_v22  ;;  %v10169_v30 = vadd.f32 %v10168_v23, %v2652_v9  ;;  %v10209_v37 = vpop.f32.mrf.mxu0  ;;  %10478 = vmatprep.subr.bf16.mxu1 %v15973_v3  ;;  %10503 = vmatprep.subr.bf16.mxu0 %v15976_v27  ;;  %v16009_v3 = vld [vmem:[#allocation8 + $0x9dc] ss:$52 sps:$4 sm:$0xff]   ;;  %v16007_v27 = vld [vmem:[#allocation8 + $0x9d8] ss:$52 sps:$4 sm:$0xff]  }
 0x3bf   :  { %v10170_v41 = vpop.f32.mrf.mxu1  ;;  %v16012_v9 = vld [vmem:[#allocation8 + $0xd1c] ss:$52 sps:$4 sm:$0xff]  }
 0x3c0   :  { %v17585_v40 = vadd.f32 %v10209_v37, %v10169_v30  ;;  %v10211_v43 = vpop.f32.mrf.mxu0  ;;  %10479 = vmatpush2.bf16.msra.mxu1 %v15971_v7  ;;  %v16015_v7 = vld [vmem:[#allocation8 + $0x1334] ss:$52 sps:$4 sm:$0xff]   ;;  %v16016_v22 = vld [vmem:[#allocation8 + $0x1670] ss:$52 sps:$4 sm:$0xff]  }
 0x3c1   :  { %10504 = vmatpush1.bf16.msra.mxu0 %v15974_v24  ;;  %v10171_v45 = vpop.f32.mrf.mxu1  ;;  %10480 = vmatprep.subr.bf16.mxu1 %v15979_v35  ;;  %v16018_v24 = vld [vmem:[#allocation8 + $0x1674] ss:$52 sps:$4 sm:$0xff]   ;;  %v16013_v33 = vld [vmem:[#allocation8 + $0x1330] ss:$52 sps:$4 sm:$0xff]   ;;  %v16024_v35 = vld [vmem:[#allocation8 + $0x160c] ss:$52 sps:$4 sm:$0xff]  }
 0x3c2   :  { %v10212_v46 = vpop.f32.mrf.mxu0  ;;  %10505 = vmatprep.subr.bf16.mxu0 %v15982_v25  ;;  %v16021_v25 = vld [vmem:[#allocation8 + $0x12cc] ss:$52 sps:$4 sm:$0xff]   ;;  %v16019_v23 = vld [vmem:[#allocation8 + $0x12c8] ss:$52 sps:$4 sm:$0xff]   ;;  %v16027_v37 = vld [vmem:[#allocation8 + $0x1264] ss:$52 sps:$4 sm:$0xff]  }
 0x3c3   :  { %v16022_v30 = vld [vmem:[#allocation8 + $0x1608] ss:$52 sps:$4 sm:$0xff]   ;;  %v16030_v41 = vld [vmem:[#allocation8 + $0x15a4] ss:$52 sps:$4 sm:$0xff]   ;;  %v16028_v43 = vld [vmem:[#allocation8 + $0x15a0] ss:$52 sps:$4 sm:$0xff]  }
 0x3c4   :  { %10481 = vmatpush2.bf16.msra.mxu1 %v15977_v38  ;;  %v16025_v38 = vld [vmem:[#allocation8 + $0x1260] ss:$52 sps:$4 sm:$0xff]   ;;  %v16034_v45 = vld [vmem:[#allocation8 + $0x1538] ss:$52 sps:$4 sm:$0xff]  }
 0x3c5   :  { %10506 = vmatpush1.bf16.msra.mxu0 %v15980_v32  ;;  %10482 = vmatprep.subr.bf16.mxu1 %v15985_v44  ;;  %v16036_v32 = vld [vmem:[#allocation8 + $0x153c] ss:$52 sps:$4 sm:$0xff]   ;;  %v16031_v46 = vld [vmem:[#allocation8 + $0x11f8] ss:$52 sps:$4 sm:$0xff]  }
 0x3c6   :  { %10507 = vmatprep.subr.bf16.mxu0 %v15988_v48  ;;  %v16033_v44 = vld [vmem:[#allocation8 + $0x11fc] ss:$52 sps:$4 sm:$0xff]   ;;  %v16039_v48 = vld [vmem:[#allocation8 + $0x1194] ss:$52 sps:$4 sm:$0xff]  }
 0x3c8   :  { %10483 = vmatpush2.bf16.msra.mxu1 %v15983_v49  ;;  %v16042_v49 = vld [vmem:[#allocation8 + $0x14d4] ss:$52 sps:$4 sm:$0xff]  }
 0x3c9   :  { %10508 = vmatpush1.bf16.msra.mxu0 %v15986_v50  ;;  %10484 = vmatprep.subr.bf16.mxu1 %v15991_v59  ;;  %v16040_v50 = vld [vmem:[#allocation8 + $0x14d0] ss:$52 sps:$4 sm:$0xff]  }
 0x3ca   :  { %10509 = vmatprep.subr.bf16.mxu0 %v15994_v61  ;;  %v16037_v59 = vld [vmem:[#allocation8 + $0x1190] ss:$52 sps:$4 sm:$0xff]   ;;  %v16048_v61 = vld [vmem:[#allocation8 + $0x146c] ss:$52 sps:$4 sm:$0xff]  }
 0x3cc   :  { %10485 = vmatpush2.bf16.msra.mxu1 %v15989_v60  ;;  %v16045_v60 = vld [vmem:[#allocation8 + $0x112c] ss:$52 sps:$4 sm:$0xff]  }
 0x3cd   :  { %10510 = vmatpush1.bf16.msra.mxu0 %v15992_v52  ;;  %10486 = vmatprep.subr.bf16.mxu1 %v15997_v62  ;;  %v16046_v52 = vld [vmem:[#allocation8 + $0x1468] ss:$52 sps:$4 sm:$0xff]  }
 0x3ce   :  { %10511 = vmatprep.subr.bf16.mxu0 %v16000_v2  ;;  %v16043_v62 = vld [vmem:[#allocation8 + $0x1128] ss:$52 sps:$4 sm:$0xff]   ;;  %v16054_v2 = vld [vmem:[#allocation8 + $0x1404] ss:$52 sps:$4 sm:$0xff]  }
 0x3d0   :  { %10487 = vmatpush2.bf16.msra.mxu1 %v15995_v58  ;;  %v16051_v58 = vld [vmem:[#allocation8 + $0x10c4] ss:$52 sps:$4 sm:$0xff]  }
 0x3d1   :  { %10512 = vmatpush1.bf16.msra.mxu0 %v15998_v4  ;;  %10488 = vmatprep.subr.bf16.mxu1 %v16003_v5  ;;  %v16052_v4 = vld [vmem:[#allocation8 + $0x1400] ss:$52 sps:$4 sm:$0xff]  }
 0x3d2   :  { %10513 = vmatprep.subr.bf16.mxu0 %v16006_v8  ;;  %v16049_v5 = vld [vmem:[#allocation8 + $0x10c0] ss:$52 sps:$4 sm:$0xff]   ;;  %v16060_v8 = vld [vmem:[#allocation8 + $0x139c] ss:$52 sps:$4 sm:$0xff]  }
 0x3d4   :  { %10489 = vmatpush2.bf16.msra.mxu1 %v16001_v6  ;;  %v16057_v6 = vld [vmem:[#allocation8 + $0x105c] ss:$52 sps:$4 sm:$0xff]  }
 0x3d5   :  { %10514 = vmatpush1.bf16.msra.mxu0 %v16004_v11  ;;  %10490 = vmatprep.subr.bf16.mxu1 %v16009_v3  ;;  %v16058_v11 = vld [vmem:[#allocation8 + $0x1398] ss:$52 sps:$4 sm:$0xff]  }
 0x3d6   :  { %10515 = vmatprep.subr.bf16.mxu0 %v16012_v9  ;;  %v16055_v3 = vld [vmem:[#allocation8 + $0x1058] ss:$52 sps:$4 sm:$0xff]   ;;  %v16066_v9 = vld [vmem:[#allocation8 + $0x1cf4] ss:$52 sps:$4 sm:$0xff]  }
 0x3d8   :  { %10491 = vmatpush2.bf16.msra.mxu1 %v16007_v27  ;;  %v16063_v27 = vld [vmem:[#allocation8 + $0x19b4] ss:$52 sps:$4 sm:$0xff]  }
 0x3d9   :  { %10516 = vmatpush1.bf16.msra.mxu0 %v16010_v20  ;;  %10542 = vmatprep.subr.bf16.mxu1 %v16018_v24  ;;  %v16061_v20 = vld [vmem:[#allocation8 + $0x19b0] ss:$52 sps:$4 sm:$0xff]   ;;  %v16069_v24 = vld [vmem:[#allocation8 + $0x194c] ss:$52 sps:$4 sm:$0xff]  }
 0x3da   :  { %10517 = vmatprep.subr.bf16.mxu0 %v16015_v7  ;;  %v16064_v7 = vld [vmem:[#allocation8 + $0x1cf0] ss:$52 sps:$4 sm:$0xff]  }
 0x3db   :  { %10493 = vmatmul.mubr.bf16.vlgmr.msra.gmra.mxu1 %v17404_v14 }
 0x3dc   :  { %10543 = vmatpush1.bf16.msra.mxu1 %v16016_v22  ;;  %10574 = vmatprep.mubr.bf16.mxu1 %v17430_v36  ;;  %v16072_v22 = vld [vmem:[#allocation8 + $0x1c8c] ss:$52 sps:$4 sm:$0xff]  }
 0x3dd   :  { %10518 = vmatpush2.bf16.msra.mxu0 %v16013_v33  ;;  %10544 = vmatprep.subr.bf16.mxu1 %v16024_v35  ;;  %v16067_v35 = vld [vmem:[#allocation8 + $0x1948] ss:$52 sps:$4 sm:$0xff]  }
 0x3de   :  { %10519 = vmatprep.subr.bf16.mxu0 %v16021_v25  ;;  %v16070_v25 = vld [vmem:[#allocation8 + $0x1c88] ss:$52 sps:$4 sm:$0xff]  }
 0x3e0   :  { %10545 = vmatpush1.bf16.msra.mxu1 %v16022_v30 }
 0x3e1   :  { %10520 = vmatpush2.bf16.msra.mxu0 %v16019_v23  ;;  %10546 = vmatprep.subr.bf16.mxu1 %v16030_v41  ;;  %v16078_v41 = vld [vmem:[#allocation8 + $0x1c24] ss:$52 sps:$4 sm:$0xff]  }
 0x3e2   :  { %10521 = vmatprep.subr.bf16.mxu0 %v16027_v37  ;;  %v16075_v37 = vld [vmem:[#allocation8 + $0x18e4] ss:$52 sps:$4 sm:$0xff]  }
 0x3e4   :  { %10547 = vmatpush1.bf16.msra.mxu1 %v16028_v43 }
 0x3e5   :  { %10522 = vmatpush2.bf16.msra.mxu0 %v16025_v38  ;;  %10548 = vmatprep.subr.bf16.mxu1 %v16036_v32 }
 0x3e6   :  { %10523 = vmatprep.subr.bf16.mxu0 %v16033_v44 }
 0x3e8   :  { %10549 = vmatpush1.bf16.msra.mxu1 %v16034_v45 }
 0x3e9   :  { %10524 = vmatpush2.bf16.msra.mxu0 %v16031_v46  ;;  %10550 = vmatprep.subr.bf16.mxu1 %v16042_v49  ;;  %v16073_v46 = vld [vmem:[#allocation8 + $0x18e0] ss:$52 sps:$4 sm:$0xff]  }
 0x3ea   :  { %10525 = vmatprep.subr.bf16.mxu0 %v16039_v48  ;;  %v16076_v49 = vld [vmem:[#allocation8 + $0x1c20] ss:$52 sps:$4 sm:$0xff]  }
 0x3ec   :  { %10551 = vmatpush1.bf16.msra.mxu1 %v16040_v50  ;;  %v16081_v50 = vld [vmem:[#allocation8 + $0x187c] ss:$52 sps:$4 sm:$0xff]  }
 0x3ed   :  { %10526 = vmatpush2.bf16.msra.mxu0 %v16037_v59  ;;  %10552 = vmatprep.subr.bf16.mxu1 %v16048_v61  ;;  %v16084_v61 = vld [vmem:[#allocation8 + $0x1bbc] ss:$52 sps:$4 sm:$0xff]  }
 0x3ee   :  { %10527 = vmatprep.subr.bf16.mxu0 %v16045_v60 }
 0x3f0   :  { %10553 = vmatpush1.bf16.msra.mxu1 %v16046_v52  ;;  %v16079_v52 = vld [vmem:[#allocation8 + $0x1878] ss:$52 sps:$4 sm:$0xff]  }
 0x3f1   :  { %10528 = vmatpush2.bf16.msra.mxu0 %v16043_v62  ;;  %10554 = vmatprep.subr.bf16.mxu1 %v16054_v2  ;;  %v16087_v62 = vld [vmem:[#allocation8 + $0x1814] ss:$52 sps:$4 sm:$0xff]  }
 0x3f2   :  { %10529 = vmatprep.subr.bf16.mxu0 %v16051_v58  ;;  %v16085_v58 = vld [vmem:[#allocation8 + $0x1810] ss:$52 sps:$4 sm:$0xff]   ;;  %v16090_v2 = vld [vmem:[#allocation8 + $0x1b54] ss:$52 sps:$4 sm:$0xff]  }
 0x3f4   :  { %10555 = vmatpush1.bf16.msra.mxu1 %v16052_v4  ;;  %v16088_v4 = vld [vmem:[#allocation8 + $0x1b50] ss:$52 sps:$4 sm:$0xff]  }
 0x3f5   :  { %10530 = vmatpush2.bf16.msra.mxu0 %v16049_v5  ;;  %10556 = vmatprep.subr.bf16.mxu1 %v16060_v8  ;;  %v16093_v5 = vld [vmem:[#allocation8 + $0x17ac] ss:$52 sps:$4 sm:$0xff]  }
 0x3f6   :  { %10531 = vmatprep.subr.bf16.mxu0 %v16057_v6  ;;  %v16091_v6 = vld [vmem:[#allocation8 + $0x17a8] ss:$52 sps:$4 sm:$0xff]   ;;  %v16096_v8 = vld [vmem:[#allocation8 + $0x1aec] ss:$52 sps:$4 sm:$0xff]  }
 0x3f8   :  { %10557 = vmatpush1.bf16.msra.mxu1 %v16058_v11  ;;  %v16094_v11 = vld [vmem:[#allocation8 + $0x1ae8] ss:$52 sps:$4 sm:$0xff]  }
 0x3f9   :  { %10532 = vmatpush2.bf16.msra.mxu0 %v16055_v3  ;;  %10558 = vmatprep.subr.bf16.mxu1 %v16063_v27  ;;  %v16099_v3 = vld [vmem:[#allocation8 + $0x1744] ss:$52 sps:$4 sm:$0xff]   ;;  %v16097_v27 = vld [vmem:[#allocation8 + $0x1740] ss:$52 sps:$4 sm:$0xff]  }
 0x3fa   :  { %10583 = vmatprep.subr.bf16.mxu0 %v16066_v9  ;;  %v16102_v9 = vld [vmem:[#allocation8 + $0x1a84] ss:$52 sps:$4 sm:$0xff]  }
 0x3fb   :  { %v10248_v33 = vpop.f32.mrf.mxu1 }
 0x3fc   :  { %v10249_v23 = vadd.f32 %v10248_v33, %v17583_v19  ;;  %v10289_v30 = vpop.f32.mrf.mxu0  ;;  %10534 = vmatmul.mubr.bf16.vlgmr.msra.gmra.mxu0 %v17457_v26  ;;  %10559 = vmatpush2.bf16.msra.mxu1 %v16061_v20  ;;  %v16100_v20 = vld [vmem:[#allocation8 + $0x1a80] ss:$52 sps:$4 sm:$0xff]   ;;  %v16106_v33 = vld [vmem:[#allocation8 + $0x1a18] ss:$52 sps:$4 sm:$0xff]  }
 0x3fd   :  { %10584 = vmatpush1.bf16.msra.mxu0 %v16064_v7  ;;  %10615 = vmatprep.mubr.bf16.mxu0 %v17459_v28  ;;  %v10250_v38 = vpop.f32.mrf.mxu1  ;;  %v16105_v7 = vld [vmem:[#allocation8 + $0x16dc] ss:$52 sps:$4 sm:$0xff]  }
 0x3fe   :  { %v17592_v43 = vadd.f32 %v10289_v30, %v10249_v23  ;;  %v10251_v32 = vadd.f32 %v10250_v38, %v17585_v40  ;;  %v10291_v44 = vpop.f32.mrf.mxu0  ;;  %10560 = vmatprep.subr.bf16.mxu1 %v16069_v24  ;;  %10585 = vmatprep.subr.bf16.mxu0 %v16072_v22  ;;  %v16082_v40 = vld [vmem:[#allocation8 + $0x1bb8] ss:$52 sps:$4 sm:$0xff]   ;;  %v16108_v24 = vld [vmem:[#allocation8 + $0x1a1c] ss:$52 sps:$4 sm:$0xff]  }
 0x3ff   :  { %v10252_v45 = vpop.f32.mrf.mxu1  ;;  %v16103_v22 = vld [vmem:[#allocation8 + $0x16d8] ss:$52 sps:$4 sm:$0xff]   ;;  %v16112_v23 = vld [vmem:[#allocation8 + $0x2370] ss:$52 sps:$4 sm:$0xff]   ;;  %v16118_v38 = vld [vmem:[#allocation8 + $0x2308] ss:$52 sps:$4 sm:$0xff]  }
 0x400   :  { %v17595_v19 = vadd.f32 %v10291_v44, %v10251_v32  ;;  %v10293_v48 = vpop.f32.mrf.mxu0  ;;  %10561 = vmatpush2.bf16.msra.mxu1 %v16067_v35  ;;  %v16114_v35 = vld [vmem:[#allocation8 + $0x2374] ss:$52 sps:$4 sm:$0xff]   ;;  %v16109_v30 = vld [vmem:[#allocation8 + $0x2030] ss:$52 sps:$4 sm:$0xff]  }
 0x401   :  { %10586 = vmatpush1.bf16.msra.mxu0 %v16070_v25  ;;  %v10253_v59 = vpop.f32.mrf.mxu1  ;;  %10562 = vmatprep.subr.bf16.mxu1 %v16075_v37  ;;  %v16111_v25 = vld [vmem:[#allocation8 + $0x2034] ss:$52 sps:$4 sm:$0xff]   ;;  %v16120_v37 = vld [vmem:[#allocation8 + $0x230c] ss:$52 sps:$4 sm:$0xff]   ;;  %v16126_v44 = vld [vmem:[#allocation8 + $0x22a4] ss:$52 sps:$4 sm:$0xff]  }
 0x402   :  { %v10294_v60 = vpop.f32.mrf.mxu0  ;;  %10587 = vmatprep.subr.bf16.mxu0 %v16078_v41  ;;  %v16117_v41 = vld [vmem:[#allocation8 + $0x1fcc] ss:$52 sps:$4 sm:$0xff]   ;;  %v16115_v32 = vld [vmem:[#allocation8 + $0x1fc8] ss:$52 sps:$4 sm:$0xff]   ;;  %v16123_v45 = vld [vmem:[#allocation8 + $0x1f64] ss:$52 sps:$4 sm:$0xff]  }
 0x403   :  { %v16121_v48 = vld [vmem:[#allocation8 + $0x1f60] ss:$52 sps:$4 sm:$0xff]   ;;  %v16130_v59 = vld [vmem:[#allocation8 + $0x2238] ss:$52 sps:$4 sm:$0xff]  }
 0x404   :  { %10563 = vmatpush2.bf16.msra.mxu1 %v16073_v46  ;;  %v16124_v46 = vld [vmem:[#allocation8 + $0x22a0] ss:$52 sps:$4 sm:$0xff]   ;;  %v16127_v60 = vld [vmem:[#allocation8 + $0x1ef8] ss:$52 sps:$4 sm:$0xff]  }
 0x405   :  { %10588 = vmatpush1.bf16.msra.mxu0 %v16076_v49  ;;  %10564 = vmatprep.subr.bf16.mxu1 %v16081_v50  ;;  %v16132_v49 = vld [vmem:[#allocation8 + $0x223c] ss:$52 sps:$4 sm:$0xff]  }
 0x406   :  { %10589 = vmatprep.subr.bf16.mxu0 %v16084_v61  ;;  %v16129_v50 = vld [vmem:[#allocation8 + $0x1efc] ss:$52 sps:$4 sm:$0xff]   ;;  %v16138_v61 = vld [vmem:[#allocation8 + $0x21d4] ss:$52 sps:$4 sm:$0xff]  }
 0x408   :  { %10565 = vmatpush2.bf16.msra.mxu1 %v16079_v52  ;;  %v16135_v52 = vld [vmem:[#allocation8 + $0x1e94] ss:$52 sps:$4 sm:$0xff]  }
 0x409   :  { %10590 = vmatpush1.bf16.msra.mxu0 %v16082_v40  ;;  %10566 = vmatprep.subr.bf16.mxu1 %v16087_v62  ;;  %v16136_v40 = vld [vmem:[#allocation8 + $0x21d0] ss:$52 sps:$4 sm:$0xff]  }
 0x40a   :  { %10591 = vmatprep.subr.bf16.mxu0 %v16090_v2  ;;  %v16133_v62 = vld [vmem:[#allocation8 + $0x1e90] ss:$52 sps:$4 sm:$0xff]   ;;  %v16141_v2 = vld [vmem:[#allocation8 + $0x1e2c] ss:$52 sps:$4 sm:$0xff]  }
 0x40c   :  { %10567 = vmatpush2.bf16.msra.mxu1 %v16085_v58  ;;  %v16144_v58 = vld [vmem:[#allocation8 + $0x216c] ss:$52 sps:$4 sm:$0xff]  }
 0x40d   :  { %10592 = vmatpush1.bf16.msra.mxu0 %v16088_v4  ;;  %10568 = vmatprep.subr.bf16.mxu1 %v16093_v5  ;;  %v16142_v4 = vld [vmem:[#allocation8 + $0x2168] ss:$52 sps:$4 sm:$0xff]  }
 0x40e   :  { %10593 = vmatprep.subr.bf16.mxu0 %v16096_v8  ;;  %v16139_v5 = vld [vmem:[#allocation8 + $0x1e28] ss:$52 sps:$4 sm:$0xff]   ;;  %v16147_v8 = vld [vmem:[#allocation8 + $0x1dc4] ss:$52 sps:$4 sm:$0xff]  }
 0x410   :  { %10569 = vmatpush2.bf16.msra.mxu1 %v16091_v6  ;;  %v16150_v6 = vld [vmem:[#allocation8 + $0x2104] ss:$52 sps:$4 sm:$0xff]  }
 0x411   :  { %10594 = vmatpush1.bf16.msra.mxu0 %v16094_v11  ;;  %10570 = vmatprep.subr.bf16.mxu1 %v16099_v3  ;;  %v16148_v11 = vld [vmem:[#allocation8 + $0x2100] ss:$52 sps:$4 sm:$0xff]  }
 0x412   :  { %10595 = vmatprep.subr.bf16.mxu0 %v16102_v9  ;;  %v16145_v3 = vld [vmem:[#allocation8 + $0x1dc0] ss:$52 sps:$4 sm:$0xff]   ;;  %v16153_v9 = vld [vmem:[#allocation8 + $0x1d5c] ss:$52 sps:$4 sm:$0xff]  }
 0x414   :  { %10571 = vmatpush2.bf16.msra.mxu1 %v16097_v27  ;;  %v16156_v27 = vld [vmem:[#allocation8 + $0x209c] ss:$52 sps:$4 sm:$0xff]  }
 0x415   :  { %10596 = vmatpush1.bf16.msra.mxu0 %v16100_v20  ;;  %10572 = vmatprep.subr.bf16.mxu1 %v16105_v7  ;;  %v16154_v20 = vld [vmem:[#allocation8 + $0x2098] ss:$52 sps:$4 sm:$0xff]  }
 0x416   :  { %10597 = vmatprep.subr.bf16.mxu0 %v16108_v24  ;;  %v16151_v7 = vld [vmem:[#allocation8 + $0x1d58] ss:$52 sps:$4 sm:$0xff]   ;;  %v16159_v24 = vld [vmem:[#allocation8 + $0x26b4] ss:$52 sps:$4 sm:$0xff]  }
 0x418   :  { %10573 = vmatpush2.bf16.msra.mxu1 %v16103_v22  ;;  %v16162_v22 = vld [vmem:[#allocation8 + $0x29f4] ss:$52 sps:$4 sm:$0xff]  }
 0x419   :  { %10598 = vmatpush1.bf16.msra.mxu0 %v16106_v33  ;;  %10624 = vmatprep.subr.bf16.mxu1 %v16114_v35  ;;  %v16157_v33 = vld [vmem:[#allocation8 + $0x26b0] ss:$52 sps:$4 sm:$0xff]  }
 0x41a   :  { %10599 = vmatprep.subr.bf16.mxu0 %v16111_v25  ;;  %v16160_v35 = vld [vmem:[#allocation8 + $0x29f0] ss:$52 sps:$4 sm:$0xff]   ;;  %v16165_v25 = vld [vmem:[#allocation8 + $0x264c] ss:$52 sps:$4 sm:$0xff]  }
 0x41b   :  { %10575 = vmatmul.mubr.bf16.vlgmr.msra.gmra.mxu1 %v17455_v21 }
 0x41c   :  { %10625 = vmatpush1.bf16.msra.mxu1 %v16112_v23  ;;  %10656 = vmatprep.mubr.bf16.mxu1 %v17461_v29  ;;  %v16168_v23 = vld [vmem:[#allocation8 + $0x298c] ss:$52 sps:$4 sm:$0xff]  }
 0x41d   :  { %10600 = vmatpush2.bf16.msra.mxu0 %v16109_v30  ;;  %10626 = vmatprep.subr.bf16.mxu1 %v16120_v37 }
 0x41e   :  { %10601 = vmatprep.subr.bf16.mxu0 %v16117_v41 }
 0x420   :  { %10627 = vmatpush1.bf16.msra.mxu1 %v16118_v38  ;;  %v16163_v38 = vld [vmem:[#allocation8 + $0x2648] ss:$52 sps:$4 sm:$0xff]  }
 0x421   :  { %10602 = vmatpush2.bf16.msra.mxu0 %v16115_v32  ;;  %10628 = vmatprep.subr.bf16.mxu1 %v16126_v44  ;;  %v16166_v44 = vld [vmem:[#allocation8 + $0x2988] ss:$52 sps:$4 sm:$0xff]  }
 0x422   :  { %10603 = vmatprep.subr.bf16.mxu0 %v16123_v45  ;;  %v16171_v45 = vld [vmem:[#allocation8 + $0x25e4] ss:$52 sps:$4 sm:$0xff]  }
 0x424   :  { %10629 = vmatpush1.bf16.msra.mxu1 %v16124_v46 }
 0x425   :  { %10604 = vmatpush2.bf16.msra.mxu0 %v16121_v48  ;;  %10630 = vmatprep.subr.bf16.mxu1 %v16132_v49 }
 0x426   :  { %10605 = vmatprep.subr.bf16.mxu0 %v16129_v50  ;;  %v16174_v50 = vld [vmem:[#allocation8 + $0x2924] ss:$52 sps:$4 sm:$0xff]  }
 0x428   :  { %10631 = vmatpush1.bf16.msra.mxu1 %v16130_v59 }
 0x429   :  { %10606 = vmatpush2.bf16.msra.mxu0 %v16127_v60  ;;  %10632 = vmatprep.subr.bf16.mxu1 %v16138_v61  ;;  %v16169_v61 = vld [vmem:[#allocation8 + $0x25e0] ss:$52 sps:$4 sm:$0xff]  }
 0x42a   :  { %10607 = vmatprep.subr.bf16.mxu0 %v16135_v52 }
 0x42c   :  { %10633 = vmatpush1.bf16.msra.mxu1 %v16136_v40  ;;  %v16172_v40 = vld [vmem:[#allocation8 + $0x2920] ss:$52 sps:$4 sm:$0xff]  }
 0x42d   :  { %10608 = vmatpush2.bf16.msra.mxu0 %v16133_v62  ;;  %10634 = vmatprep.subr.bf16.mxu1 %v16144_v58  ;;  %v16177_v62 = vld [vmem:[#allocation8 + $0x257c] ss:$52 sps:$4 sm:$0xff]  }
 0x42e   :  { %10609 = vmatprep.subr.bf16.mxu0 %v16141_v2  ;;  %v16180_v2 = vld [vmem:[#allocation8 + $0x28bc] ss:$52 sps:$4 sm:$0xff]  }
 0x430   :  { %10635 = vmatpush1.bf16.msra.mxu1 %v16142_v4  ;;  %v16178_v4 = vld [vmem:[#allocation8 + $0x28b8] ss:$52 sps:$4 sm:$0xff]  }
 0x431   :  { %10610 = vmatpush2.bf16.msra.mxu0 %v16139_v5  ;;  %10636 = vmatprep.subr.bf16.mxu1 %v16150_v6  ;;  %v16183_v5 = vld [vmem:[#allocation8 + $0x2514] ss:$52 sps:$4 sm:$0xff]  }
 0x432   :  { %10611 = vmatprep.subr.bf16.mxu0 %v16147_v8  ;;  %v16186_v6 = vld [vmem:[#allocation8 + $0x2854] ss:$52 sps:$4 sm:$0xff]   ;;  %v16181_v8 = vld [vmem:[#allocation8 + $0x2510] ss:$52 sps:$4 sm:$0xff]  }
 0x434   :  { %10637 = vmatpush1.bf16.msra.mxu1 %v16148_v11  ;;  %v16184_v11 = vld [vmem:[#allocation8 + $0x2850] ss:$52 sps:$4 sm:$0xff]  }
 0x435   :  { %10612 = vmatpush2.bf16.msra.mxu0 %v16145_v3  ;;  %10638 = vmatprep.subr.bf16.mxu1 %v16156_v27  ;;  %v16189_v3 = vld [vmem:[#allocation8 + $0x24ac] ss:$52 sps:$4 sm:$0xff]  }
 0x436   :  { %10613 = vmatprep.subr.bf16.mxu0 %v16153_v9  ;;  %v16192_v27 = vld [vmem:[#allocation8 + $0x27ec] ss:$52 sps:$4 sm:$0xff]   ;;  %v16187_v9 = vld [vmem:[#allocation8 + $0x24a8] ss:$52 sps:$4 sm:$0xff]  }
 0x438   :  { %10639 = vmatpush1.bf16.msra.mxu1 %v16154_v20  ;;  %v16190_v20 = vld [vmem:[#allocation8 + $0x27e8] ss:$52 sps:$4 sm:$0xff]  }
 0x439   :  { %10614 = vmatpush2.bf16.msra.mxu0 %v16151_v7  ;;  %10640 = vmatprep.subr.bf16.mxu1 %v16159_v24  ;;  %v16195_v7 = vld [vmem:[#allocation8 + $0x2444] ss:$52 sps:$4 sm:$0xff]  }
 0x43a   :  { %10665 = vmatprep.subr.bf16.mxu0 %v16162_v22  ;;  %v16198_v24 = vld [vmem:[#allocation8 + $0x2784] ss:$52 sps:$4 sm:$0xff]   ;;  %v16193_v22 = vld [vmem:[#allocation8 + $0x2440] ss:$52 sps:$4 sm:$0xff]  }
 0x43b   :  { %v10330_v30 = vpop.f32.mrf.mxu1 }
 0x43c   :  { %v10331_v37 = vadd.f32 %v10330_v30, %v17592_v43  ;;  %v10371_v41 = vpop.f32.mrf.mxu0  ;;  %10616 = vmatmul.mubr.bf16.vlgmr.msra.gmra.mxu0 %v17479_v63  ;;  %10641 = vmatpush2.bf16.msra.mxu1 %v16157_v33  ;;  %v16196_v33 = vld [vmem:[#allocation8 + $0x2780] ss:$52 sps:$4 sm:$0xff]   ;;  %v16202_v30 = vld [vmem:[#allocation8 + $0x2718] ss:$52 sps:$4 sm:$0xff]  }
 0x43d   :  { %10666 = vmatpush1.bf16.msra.mxu0 %v16160_v35  ;;  %v10332_v32 = vpop.f32.mrf.mxu1  ;;  %10642 = vmatprep.subr.bf16.mxu1 %v16165_v25  ;;  %v16201_v35 = vld [vmem:[#allocation8 + $0x23dc] ss:$52 sps:$4 sm:$0xff]  }
 0x43e   :  { %v17601_v46 = vadd.f32 %v10371_v41, %v10331_v37  ;;  %v10333_v48 = vadd.f32 %v10332_v32, %v17595_v19  ;;  %v10373_v49 = vpop.f32.mrf.mxu0  ;;  %10667 = vmatprep.subr.bf16.mxu0 %v16168_v23  ;;  %10697 = vmatprep.mubr.bf16.mxu0 %v17274_v0  ;;  %v16175_v19 = vld [vmem:[#allocation8 + $0x2578] ss:$52 sps:$4 sm:$0xff]   ;;  %v16204_v25 = vld [vmem:[#allocation8 + $0x271c] ss:$52 sps:$4 sm:$0xff]  }
 0x43f   :  { %v10334_v43 = vpop.f32.mrf.mxu1  ;;  %v16199_v23 = vld [vmem:[#allocation8 + $0x23d8] ss:$52 sps:$4 sm:$0xff]   ;;  %v16207_v37 = vld [vmem:[#allocation8 + $0x2fc] ss:$52 sps:$4 sm:$0xff]  }
 0x440   :  { %v17605_v59 = vadd.f32 %v10373_v49, %v10333_v48  ;;  %v10375_v60 = vpop.f32.mrf.mxu0  ;;  %10643 = vmatpush2.bf16.msra.mxu1 %v16163_v38  ;;  %v16210_v41 = vld [vmem:[#allocation8 + $0x97c] ss:$52 sps:$4 sm:$0xff]   ;;  %v16205_v38 = vld [vmem:[#allocation8 + $0x2f8] ss:$52 sps:$4 sm:$0xff]   ;;  %v16216_v48 = vld [vmem:[#allocation8 + $0x914] ss:$52 sps:$4 sm:$0xff]  }
 0x441   :  { %10668 = vmatpush1.bf16.msra.mxu0 %v16166_v44  ;;  %v10335_v52 = vpop.f32.mrf.mxu1  ;;  %10644 = vmatprep.subr.bf16.mxu1 %v16171_v45  ;;  %v16208_v32 = vld [vmem:[#allocation8 + $0x978] ss:$52 sps:$4 sm:$0xff]   ;;  %v16213_v44 = vld [vmem:[#allocation8 + $0x294] ss:$52 sps:$4 sm:$0xff]   ;;  %v16214_v60 = vld [vmem:[#allocation8 + $0x910] ss:$52 sps:$4 sm:$0xff]  }
 0x442   :  { %v10376_v58 = vpop.f32.mrf.mxu0  ;;  %10669 = vmatprep.subr.bf16.mxu0 %v16174_v50  ;;  %v16211_v50 = vld [vmem:[#allocation8 + $0x290] ss:$52 sps:$4 sm:$0xff]  }
 0x444   :  { %10645 = vmatpush2.bf16.msra.mxu1 %v16169_v61  ;;  %v16219_v61 = vld [vmem:[#allocation8 + $0x22c] ss:$52 sps:$4 sm:$0xff]  }
 0x445   :  { %10670 = vmatpush1.bf16.msra.mxu0 %v16172_v40  ;;  %10646 = vmatprep.subr.bf16.mxu1 %v16177_v62  ;;  %v16222_v40 = vld [vmem:[#allocation8 + $0x8ac] ss:$52 sps:$4 sm:$0xff]  }
 0x446   :  { %10671 = vmatprep.subr.bf16.mxu0 %v16180_v2  ;;  %v16220_v2 = vld [vmem:[#allocation8 + $0x8a8] ss:$52 sps:$4 sm:$0xff]  }
 0x448   :  { %10647 = vmatpush2.bf16.msra.mxu1 %v16175_v19  ;;  %v16225_v19 = vld [vmem:[#allocation8 + $0x1c4] ss:$52 sps:$4 sm:$0xff]  }
 0x449   :  { %10672 = vmatpush1.bf16.msra.mxu0 %v16178_v4  ;;  %10648 = vmatprep.subr.bf16.mxu1 %v16183_v5  ;;  %v16228_v4 = vld [vmem:[#allocation8 + $0x844] ss:$52 sps:$4 sm:$0xff]   ;;  %v16223_v5 = vld [vmem:[#allocation8 + $0x1c0] ss:$52 sps:$4 sm:$0xff]  }
 0x44a   :  { %10673 = vmatprep.subr.bf16.mxu0 %v16186_v6  ;;  %v16226_v6 = vld [vmem:[#allocation8 + $0x840] ss:$52 sps:$4 sm:$0xff]  }
 0x44c   :  { %10649 = vmatpush2.bf16.msra.mxu1 %v16181_v8  ;;  %v16234_v8 = vld [vmem:[#allocation8 + $0x7dc] ss:$52 sps:$4 sm:$0xff]  }
 0x44d   :  { %10674 = vmatpush1.bf16.msra.mxu0 %v16184_v11  ;;  %10650 = vmatprep.subr.bf16.mxu1 %v16189_v3  ;;  %v16229_v11 = vld [vmem:[#allocation8 + $0x158] ss:$52 sps:$4 sm:$0xff]  }
 0x44e   :  { %10675 = vmatprep.subr.bf16.mxu0 %v16192_v27  ;;  %v16232_v3 = vld [vmem:[#allocation8 + $0x7d8] ss:$52 sps:$4 sm:$0xff]   ;;  %v16237_v27 = vld [vmem:[#allocation8 + $0xf4] ss:$52 sps:$4 sm:$0xff]  }
 0x450   :  { %10651 = vmatpush2.bf16.msra.mxu1 %v16187_v9  ;;  %v16240_v9 = vld [vmem:[#allocation8 + $0x774] ss:$52 sps:$4 sm:$0xff]  }
 0x451   :  { %10676 = vmatpush1.bf16.msra.mxu0 %v16190_v20  ;;  %10652 = vmatprep.subr.bf16.mxu1 %v16195_v7  ;;  %v16235_v20 = vld [vmem:[#allocation8 + $0xf0] ss:$52 sps:$4 sm:$0xff]  }
 0x452   :  { %10677 = vmatprep.subr.bf16.mxu0 %v16198_v24  ;;  %v16238_v7 = vld [vmem:[#allocation8 + $0x770] ss:$52 sps:$4 sm:$0xff]   ;;  %v16243_v24 = vld [vmem:[#allocation8 + $0x8c] ss:$52 sps:$4 sm:$0xff]  }
 0x454   :  { %10653 = vmatpush2.bf16.msra.mxu1 %v16193_v22  ;;  %v16246_v22 = vld [vmem:[#allocation8 + $0x70c] ss:$52 sps:$4 sm:$0xff]  }
 0x455   :  { %10678 = vmatpush1.bf16.msra.mxu0 %v16196_v33  ;;  %10654 = vmatprep.subr.bf16.mxu1 %v16201_v35  ;;  %v16241_v33 = vld [vmem:[#allocation8 + $0x88] ss:$52 sps:$4 sm:$0xff]  }
 0x456   :  { %10679 = vmatprep.subr.bf16.mxu0 %v16204_v25  ;;  %v16244_v35 = vld [vmem:[#allocation8 + $0x708] ss:$52 sps:$4 sm:$0xff]   ;;  %v16249_v25 = vld [vmem:[#allocation8 + $0x24] ss:$52 sps:$4 sm:$0xff]  }
 0x458   :  { %10655 = vmatpush2.bf16.msra.mxu1 %v16199_v23  ;;  %v16252_v23 = vld [vmem:[#allocation8 + $0x6a4] ss:$52 sps:$4 sm:$0xff]  }
 0x459   :  { %10680 = vmatpush1.bf16.msra.mxu0 %v16202_v30  ;;  %10706 = vmatprep.subr.bf16.mxu1 %v16207_v37  ;;  %v16247_v30 = vld [vmem:[#allocation8 + $0x20] ss:$52 sps:$4 sm:$0xff]  }
 0x45a   :  { %10747 = vmatprep.subr.bf16.mxu0 %v16210_v41  ;;  %v16250_v37 = vld [vmem:[#allocation8 + $0x6a0] ss:$52 sps:$4 sm:$0xff]   ;;  %v16255_v41 = vld [vmem:[#allocation8 + $0x63c] ss:$52 sps:$4 sm:$0xff]  }
 0x45b   :  { %v10412_v45 = vpop.f32.mrf.mxu1  ;;  %10657 = vmatmul.mubr.bf16.vlgmr.msra.gmra.mxu1 %v17477_v13 }
 0x45c   :  { %v17609_v49 = vadd.f32 %v10412_v45, %v17601_v46  ;;  %10698 = vmatmul.mubr.bf16.vlgmr.msra.gmra.mxu0 %v17486_v47  ;;  %10707 = vmatpush1.bf16.msra.mxu1 %v16205_v38  ;;  %v16217_v46 = vld [vmem:[#allocation8 + $0x228] ss:$52 sps:$4 sm:$0xff]  }
 0x45d   :  { %10738 = vmatprep.mubr.bf16.mxu1 %v17406_v16  ;;  %10748 = vmatpush1.bf16.msra.mxu0 %v16208_v32  ;;  %v10414_v43 = vpop.f32.mrf.mxu1  ;;  %v16258_v38 = vld [vmem:[#allocation8 + $0xcbc] ss:$52 sps:$4 sm:$0xff]   ;;  %v16253_v32 = vld [vmem:[#allocation8 + $0x638] ss:$52 sps:$4 sm:$0xff]   ;;  %v16261_v45 = vld [vmem:[#allocation8 + $0x5d4] ss:$52 sps:$4 sm:$0xff]  }
 0x45e   :  { %10779 = vmatprep.mubr.bf16.mxu0 %v17408_v17  ;;  %v17615_v52 = vadd.f32 %v10414_v43, %v17605_v59  ;;  %10708 = vmatprep.subr.bf16.mxu1 %v16213_v44  ;;  %v16231_v59 = vld [vmem:[#allocation8 + $0x15c] ss:$52 sps:$4 sm:$0xff]   ;;  %v16256_v44 = vld [vmem:[#allocation8 + $0xcb8] ss:$52 sps:$4 sm:$0xff]  }
 0x45f   :  { %v10416_v62 = vpop.f32.mrf.mxu1  ;;  %10749 = vmatprep.subr.bf16.mxu0 %v16216_v48  ;;  %v16264_v48 = vld [vmem:[#allocation8 + $0xc54] ss:$52 sps:$4 sm:$0xff]   ;;  %v16259_v43 = vld [vmem:[#allocation8 + $0x5d0] ss:$52 sps:$4 sm:$0xff]  }
 0x460   :  { %10709 = vmatpush1.bf16.msra.mxu1 %v16211_v50  ;;  %v16270_v62 = vld [vmem:[#allocation8 + $0xbec] ss:$52 sps:$4 sm:$0xff]  }
 0x461   :  { %10750 = vmatpush1.bf16.msra.mxu0 %v16214_v60  ;;  %v10417_v58 = vpop.f32.mrf.mxu1  ;;  %10710 = vmatprep.subr.bf16.mxu1 %v16219_v61  ;;  %v16262_v60 = vld [vmem:[#allocation8 + $0xc50] ss:$52 sps:$4 sm:$0xff]   ;;  %v16267_v61 = vld [vmem:[#allocation8 + $0x56c] ss:$52 sps:$4 sm:$0xff]  }
 0x462   :  { %10751 = vmatprep.subr.bf16.mxu0 %v16222_v40  ;;  %v16265_v58 = vld [vmem:[#allocation8 + $0x568] ss:$52 sps:$4 sm:$0xff]  }
 0x464   :  { %10711 = vmatpush1.bf16.msra.mxu1 %v16217_v46 }
 0x465   :  { %10752 = vmatpush1.bf16.msra.mxu0 %v16220_v2  ;;  %10712 = vmatprep.subr.bf16.mxu1 %v16225_v19  ;;  %v16268_v2 = vld [vmem:[#allocation8 + $0xbe8] ss:$52 sps:$4 sm:$0xff]   ;;  %v16273_v19 = vld [vmem:[#allocation8 + $0x504] ss:$52 sps:$4 sm:$0xff]  }
 0x466   :  { %10753 = vmatprep.subr.bf16.mxu0 %v16228_v4 }
 0x468   :  { %10713 = vmatpush1.bf16.msra.mxu1 %v16223_v5  ;;  %v16276_v5 = vld [vmem:[#allocation8 + $0xb84] ss:$52 sps:$4 sm:$0xff]  }
 0x469   :  { %10754 = vmatpush1.bf16.msra.mxu0 %v16226_v6  ;;  %10714 = vmatprep.subr.bf16.mxu1 %v16231_v59  ;;  %v16271_v6 = vld [vmem:[#allocation8 + $0x500] ss:$52 sps:$4 sm:$0xff]  }
 0x46a   :  { %10755 = vmatprep.subr.bf16.mxu0 %v16234_v8  ;;  %v16274_v59 = vld [vmem:[#allocation8 + $0xb80] ss:$52 sps:$4 sm:$0xff]   ;;  %v16279_v8 = vld [vmem:[#allocation8 + $0x49c] ss:$52 sps:$4 sm:$0xff]  }
 0x46c   :  { %10715 = vmatpush1.bf16.msra.mxu1 %v16229_v11  ;;  %v16282_v11 = vld [vmem:[#allocation8 + $0xb1c] ss:$52 sps:$4 sm:$0xff]  }
 0x46d   :  { %10756 = vmatpush1.bf16.msra.mxu0 %v16232_v3  ;;  %10716 = vmatprep.subr.bf16.mxu1 %v16237_v27  ;;  %v16277_v3 = vld [vmem:[#allocation8 + $0x498] ss:$52 sps:$4 sm:$0xff]  }
 0x46e   :  { %10757 = vmatprep.subr.bf16.mxu0 %v16240_v9  ;;  %v16280_v27 = vld [vmem:[#allocation8 + $0xb18] ss:$52 sps:$4 sm:$0xff]   ;;  %v16285_v9 = vld [vmem:[#allocation8 + $0x434] ss:$52 sps:$4 sm:$0xff]  }
 0x470   :  { %10717 = vmatpush1.bf16.msra.mxu1 %v16235_v20  ;;  %v16288_v20 = vld [vmem:[#allocation8 + $0xab4] ss:$52 sps:$4 sm:$0xff]  }
 0x471   :  { %10758 = vmatpush1.bf16.msra.mxu0 %v16238_v7  ;;  %10718 = vmatprep.subr.bf16.mxu1 %v16243_v24  ;;  %v16283_v7 = vld [vmem:[#allocation8 + $0x430] ss:$52 sps:$4 sm:$0xff]  }
 0x472   :  { %10759 = vmatprep.subr.bf16.mxu0 %v16246_v22  ;;  %v16286_v24 = vld [vmem:[#allocation8 + $0xab0] ss:$52 sps:$4 sm:$0xff]   ;;  %v16291_v22 = vld [vmem:[#allocation8 + $0x3cc] ss:$52 sps:$4 sm:$0xff]  }
 0x474   :  { %10719 = vmatpush1.bf16.msra.mxu1 %v16241_v33  ;;  %v16294_v33 = vld [vmem:[#allocation8 + $0xa4c] ss:$52 sps:$4 sm:$0xff]  }
 0x475   :  { %10760 = vmatpush1.bf16.msra.mxu0 %v16244_v35  ;;  %10720 = vmatprep.subr.bf16.mxu1 %v16249_v25  ;;  %v16289_v35 = vld [vmem:[#allocation8 + $0x3c8] ss:$52 sps:$4 sm:$0xff]  }
 0x476   :  { %10761 = vmatprep.subr.bf16.mxu0 %v16252_v23  ;;  %v16292_v25 = vld [vmem:[#allocation8 + $0xa48] ss:$52 sps:$4 sm:$0xff]   ;;  %v16297_v23 = vld [vmem:[#allocation8 + $0x364] ss:$52 sps:$4 sm:$0xff]  }
 0x478   :  { %10721 = vmatpush1.bf16.msra.mxu1 %v16247_v30  ;;  %v16300_v30 = vld [vmem:[#allocation8 + $0x9e4] ss:$52 sps:$4 sm:$0xff]  }
 0x479   :  { %10762 = vmatpush1.bf16.msra.mxu0 %v16250_v37  ;;  %10722 = vmatprep.subr.bf16.mxu1 %v16255_v41  ;;  %v16295_v37 = vld [vmem:[#allocation8 + $0x360] ss:$52 sps:$4 sm:$0xff]  }
 0x47a   :  { %10763 = vmatprep.subr.bf16.mxu0 %v16258_v38  ;;  %v16298_v41 = vld [vmem:[#allocation8 + $0x9e0] ss:$52 sps:$4 sm:$0xff]   ;;  %v16303_v38 = vld [vmem:[#allocation8 + $0xffc] ss:$52 sps:$4 sm:$0xff]  }
 0x47c   :  { %v17617_v50 = vpop.f32.mrf.mxu0  ;;  %10723 = vmatpush2.bf16.msra.mxu1 %v16253_v32  ;;  %v17047_v32 = vld [vmem:[#allocation10] sm:$0xff] }
 0x47d   :  { %10764 = vmatpush2.bf16.msra.mxu0 %v16256_v44  ;;  %10724 = vmatprep.subr.bf16.mxu1 %v16261_v45  ;;  %v2656_v44 = vrot.slane %v17047_v32, %v290_v31  ;;  %v16306_v45 = vld [vmem:[#allocation8 + $0x167c] ss:$52 sps:$4 sm:$0xff]  }
 0x47e   :  { %v17619_v40 = vpop.f32.mrf.mxu0  ;;  %10765 = vmatprep.subr.bf16.mxu0 %v16264_v48  ;;  %v2660_v48 = vrot.slane %v17047_v32, %v294_v42  ;;  %v16345_v32 = vld [vmem:[#allocation8 + $0xd24] ss:$52 sps:$4 sm:$0xff]  }
 0x480   :  { %v10457_v46 = vpop.f32.mrf.mxu0  ;;  %10725 = vmatpush2.bf16.msra.mxu1 %v16259_v43  ;;  %v16301_v43 = vld [vmem:[#allocation8 + $0xff8] ss:$52 sps:$4 sm:$0xff]   ;;  %v10456_v31 = vadd.f32 %v17619_v40, %v2660_v48  ;;  %v16313_v40 = vld [vmem:[#allocation8 + $0xf28] ss:$52 sps:$4 sm:$0xff]   ;;  %v16346_v48 = vld [vmem:[#allocation8 + $0x13a0] ss:$52 sps:$4 sm:$0xff]  }
 0x481   :  { %10766 = vmatpush2.bf16.msra.mxu0 %v16262_v60  ;;  %10726 = vmatprep.subr.bf16.mxu1 %v16267_v61  ;;  %v16304_v60 = vld [vmem:[#allocation8 + $0x1678] ss:$52 sps:$4 sm:$0xff]   ;;  %v10454_v61 = vadd.f32 %v17617_v50, %v2656_v44 }
 0x482   :  { %v10458_v4 = vpop.f32.mrf.mxu0  ;;  %10767 = vmatprep.subr.bf16.mxu0 %v16270_v62  ;;  %v16309_v62 = vld [vmem:[#allocation8 + $0xf94] ss:$52 sps:$4 sm:$0xff]   ;;  %v16315_v50 = vld [vmem:[#allocation8 + $0xf2c] ss:$52 sps:$4 sm:$0xff]   ;;  %v16348_v44 = vld [vmem:[#allocation8 + $0x13a4] ss:$52 sps:$4 sm:$0xff]  }
 0x484   :  { %10727 = vmatpush2.bf16.msra.mxu1 %v16265_v58  ;;  %v16312_v58 = vld [vmem:[#allocation8 + $0x1614] ss:$52 sps:$4 sm:$0xff]  }
 0x485   :  { %10768 = vmatpush2.bf16.msra.mxu0 %v16268_v2  ;;  %10728 = vmatprep.subr.bf16.mxu1 %v16273_v19  ;;  %v16310_v19 = vld [vmem:[#allocation8 + $0x1610] ss:$52 sps:$4 sm:$0xff]  }
 0x486   :  { %10769 = vmatprep.subr.bf16.mxu0 %v16276_v5  ;;  %v16318_v5 = vld [vmem:[#allocation8 + $0x15ac] ss:$52 sps:$4 sm:$0xff]  }
 0x488   :  { %10729 = vmatpush2.bf16.msra.mxu1 %v16271_v6 }
 0x489   :  { %10770 = vmatpush2.bf16.msra.mxu0 %v16274_v59  ;;  %10730 = vmatprep.subr.bf16.mxu1 %v16279_v8  ;;  %v16316_v8 = vld [vmem:[#allocation8 + $0x15a8] ss:$52 sps:$4 sm:$0xff]  }
 0x48a   :  { %10771 = vmatprep.subr.bf16.mxu0 %v16282_v11  ;;  %v16321_v11 = vld [vmem:[#allocation8 + $0xec4] ss:$52 sps:$4 sm:$0xff]  }
 0x48c   :  { %10731 = vmatpush2.bf16.msra.mxu1 %v16277_v3  ;;  %v16324_v3 = vld [vmem:[#allocation8 + $0x1544] ss:$52 sps:$4 sm:$0xff]  }
 0x48d   :  { %10772 = vmatpush2.bf16.msra.mxu0 %v16280_v27  ;;  %10732 = vmatprep.subr.bf16.mxu1 %v16285_v9  ;;  %v16319_v27 = vld [vmem:[#allocation8 + $0xec0] ss:$52 sps:$4 sm:$0xff]  }
 0x48e   :  { %10773 = vmatprep.subr.bf16.mxu0 %v16288_v20  ;;  %v16322_v9 = vld [vmem:[#allocation8 + $0x1540] ss:$52 sps:$4 sm:$0xff]   ;;  %v16327_v20 = vld [vmem:[#allocation8 + $0xe5c] ss:$52 sps:$4 sm:$0xff]  }
 0x490   :  { %10733 = vmatpush2.bf16.msra.mxu1 %v16283_v7  ;;  %v16330_v7 = vld [vmem:[#allocation8 + $0x14dc] ss:$52 sps:$4 sm:$0xff]  }
 0x491   :  { %10774 = vmatpush2.bf16.msra.mxu0 %v16286_v24  ;;  %10734 = vmatprep.subr.bf16.mxu1 %v16291_v22  ;;  %v16325_v24 = vld [vmem:[#allocation8 + $0xe58] ss:$52 sps:$4 sm:$0xff]  }
 0x492   :  { %10775 = vmatprep.subr.bf16.mxu0 %v16294_v33  ;;  %v16328_v22 = vld [vmem:[#allocation8 + $0x14d8] ss:$52 sps:$4 sm:$0xff]   ;;  %v16333_v33 = vld [vmem:[#allocation8 + $0xdf4] ss:$52 sps:$4 sm:$0xff]  }
 0x494   :  { %10735 = vmatpush2.bf16.msra.mxu1 %v16289_v35  ;;  %v16336_v35 = vld [vmem:[#allocation8 + $0x1474] ss:$52 sps:$4 sm:$0xff]  }
 0x495   :  { %10776 = vmatpush2.bf16.msra.mxu0 %v16292_v25  ;;  %10736 = vmatprep.subr.bf16.mxu1 %v16297_v23  ;;  %v16331_v25 = vld [vmem:[#allocation8 + $0xdf0] ss:$52 sps:$4 sm:$0xff]  }
 0x496   :  { %10777 = vmatprep.subr.bf16.mxu0 %v16300_v30  ;;  %v16334_v23 = vld [vmem:[#allocation8 + $0x1470] ss:$52 sps:$4 sm:$0xff]   ;;  %v16339_v30 = vld [vmem:[#allocation8 + $0xd8c] ss:$52 sps:$4 sm:$0xff]  }
 0x498   :  { %10737 = vmatpush2.bf16.msra.mxu1 %v16295_v37  ;;  %v16342_v37 = vld [vmem:[#allocation8 + $0x140c] ss:$52 sps:$4 sm:$0xff]  }
 0x499   :  { %10778 = vmatpush2.bf16.msra.mxu0 %v16298_v41  ;;  %10788 = vmatprep.subr.bf16.mxu1 %v16303_v38  ;;  %v16337_v41 = vld [vmem:[#allocation8 + $0xd88] ss:$52 sps:$4 sm:$0xff]  }
 0x49a   :  { %10829 = vmatprep.subr.bf16.mxu0 %v16306_v45  ;;  %v16340_v38 = vld [vmem:[#allocation8 + $0x1408] ss:$52 sps:$4 sm:$0xff]   ;;  %v16343_v45 = vld [vmem:[#allocation8 + $0xd20] ss:$52 sps:$4 sm:$0xff]  }
 0x49b   :  { %v10494_v46 = vpop.f32.mrf.mxu1  ;;  %10739 = vmatmul.mubr.bf16.vlgmr.msra.gmra.mxu1 %v17410_v18 }
 0x49c   :  { %v17628_v2 = vadd.f32 %v10494_v46, %v10454_v61  ;;  %10780 = vmatmul.mubr.bf16.vlgmr.msra.gmra.mxu0 %v17404_v14  ;;  %10789 = vmatpush1.bf16.msra.mxu1 %v16301_v43  ;;  %v16351_v43 = vld [vmem:[#allocation8 + $0x133c] ss:$52 sps:$4 sm:$0xff]   ;;  %v16349_v61 = vld [vmem:[#allocation8 + $0x1338] ss:$52 sps:$4 sm:$0xff]   ;;  %v16357_v46 = vld [vmem:[#allocation8 + $0x12d4] ss:$52 sps:$4 sm:$0xff]  }
 0x49d   :  { %10820 = vmatprep.mubr.bf16.mxu1 %v17428_v15  ;;  %10830 = vmatpush1.bf16.msra.mxu0 %v16304_v60  ;;  %v10496_v42 = vpop.f32.mrf.mxu1  ;;  %v16354_v60 = vld [vmem:[#allocation8 + $0x19bc] ss:$52 sps:$4 sm:$0xff]  }
 0x49e   :  { %10861 = vmatprep.mubr.bf16.mxu0 %v17430_v36  ;;  %v17633_v4 = vadd.f32 %v10496_v42, %v10456_v31  ;;  %10790 = vmatprep.subr.bf16.mxu1 %v16309_v62  ;;  %v16352_v62 = vld [vmem:[#allocation8 + $0x19b8] ss:$52 sps:$4 sm:$0xff]  }
 0x49f   :  { %v10498_v6 = vpop.f32.mrf.mxu1  ;;  %10831 = vmatprep.subr.bf16.mxu0 %v16312_v58  ;;  %v16360_v58 = vld [vmem:[#allocation8 + $0x1954] ss:$52 sps:$4 sm:$0xff]  }
 0x4a0   :  { %10791 = vmatpush1.bf16.msra.mxu1 %v16307_v51  ;;  %v16355_v51 = vld [vmem:[#allocation8 + $0x12d0] ss:$52 sps:$4 sm:$0xff]   ;;  %v16366_v6 = vld [vmem:[#allocation8 + $0x18ec] ss:$52 sps:$4 sm:$0xff]  }
 0x4a1   :  { %10832 = vmatpush1.bf16.msra.mxu0 %v16310_v19  ;;  %v10499_v59 = vpop.f32.mrf.mxu1  ;;  %10792 = vmatprep.subr.bf16.mxu1 %v16315_v50  ;;  %v16358_v19 = vld [vmem:[#allocation8 + $0x1950] ss:$52 sps:$4 sm:$0xff]   ;;  %v16363_v50 = vld [vmem:[#allocation8 + $0x126c] ss:$52 sps:$4 sm:$0xff]  }
 0x4a2   :  { %10833 = vmatprep.subr.bf16.mxu0 %v16318_v5 }
 0x4a4   :  { %10793 = vmatpush1.bf16.msra.mxu1 %v16313_v40 }
 0x4a5   :  { %10834 = vmatpush1.bf16.msra.mxu0 %v16316_v8  ;;  %10794 = vmatprep.subr.bf16.mxu1 %v16321_v11  ;;  %v16361_v8 = vld [vmem:[#allocation8 + $0x1268] ss:$52 sps:$4 sm:$0xff]  }
 0x4a6   :  { %10835 = vmatprep.subr.bf16.mxu0 %v16324_v3  ;;  %v16364_v11 = vld [vmem:[#allocation8 + $0x18e8] ss:$52 sps:$4 sm:$0xff]   ;;  %v16369_v3 = vld [vmem:[#allocation8 + $0x1204] ss:$52 sps:$4 sm:$0xff]  }
 0x4a8   :  { %10795 = vmatpush1.bf16.msra.mxu1 %v16319_v27 }
 0x4a9   :  { %10836 = vmatpush1.bf16.msra.mxu0 %v16322_v9  ;;  %10796 = vmatprep.subr.bf16.mxu1 %v16327_v20  ;;  %v16367_v9 = vld [vmem:[#allocation8 + $0x1200] ss:$52 sps:$4 sm:$0xff]  }
 0x4aa   :  { %10837 = vmatprep.subr.bf16.mxu0 %v16330_v7  ;;  %v16370_v20 = vld [vmem:[#allocation8 + $0x1880] ss:$52 sps:$4 sm:$0xff]   ;;  %v16375_v7 = vld [vmem:[#allocation8 + $0x119c] ss:$52 sps:$4 sm:$0xff]  }
 0x4ac   :  { %10797 = vmatpush1.bf16.msra.mxu1 %v16325_v24  ;;  %v16378_v24 = vld [vmem:[#allocation8 + $0x181c] ss:$52 sps:$4 sm:$0xff]  }
 0x4ad   :  { %10838 = vmatpush1.bf16.msra.mxu0 %v16328_v22  ;;  %10798 = vmatprep.subr.bf16.mxu1 %v16333_v33  ;;  %v16376_v22 = vld [vmem:[#allocation8 + $0x1818] ss:$52 sps:$4 sm:$0xff]   ;;  %v16381_v33 = vld [vmem:[#allocation8 + $0x1134] ss:$52 sps:$4 sm:$0xff]  }
 0x4ae   :  { %10839 = vmatprep.subr.bf16.mxu0 %v16336_v35  ;;  %v16384_v35 = vld [vmem:[#allocation8 + $0x17b4] ss:$52 sps:$4 sm:$0xff]  }
 0x4b0   :  { %10799 = vmatpush1.bf16.msra.mxu1 %v16331_v25  ;;  %v16379_v25 = vld [vmem:[#allocation8 + $0x1130] ss:$52 sps:$4 sm:$0xff]  }
 0x4b1   :  { %10840 = vmatpush1.bf16.msra.mxu0 %v16334_v23  ;;  %10800 = vmatprep.subr.bf16.mxu1 %v16339_v30  ;;  %v16382_v23 = vld [vmem:[#allocation8 + $0x17b0] ss:$52 sps:$4 sm:$0xff]   ;;  %v16387_v30 = vld [vmem:[#allocation8 + $0x10cc] ss:$52 sps:$4 sm:$0xff]  }
 0x4b2   :  { %10841 = vmatprep.subr.bf16.mxu0 %v16342_v37  ;;  %v16390_v37 = vld [vmem:[#allocation8 + $0x174c] ss:$52 sps:$4 sm:$0xff]  }
 0x4b4   :  { %10801 = vmatpush1.bf16.msra.mxu1 %v16337_v41  ;;  %v16385_v41 = vld [vmem:[#allocation8 + $0x10c8] ss:$52 sps:$4 sm:$0xff]  }
 0x4b5   :  { %10842 = vmatpush1.bf16.msra.mxu0 %v16340_v38  ;;  %10802 = vmatprep.subr.bf16.mxu1 %v16345_v32  ;;  %v16388_v38 = vld [vmem:[#allocation8 + $0x1748] ss:$52 sps:$4 sm:$0xff]   ;;  %v16393_v32 = vld [vmem:[#allocation8 + $0x1064] ss:$52 sps:$4 sm:$0xff]  }
 0x4b6   :  { %10843 = vmatprep.subr.bf16.mxu0 %v16348_v44  ;;  %v16396_v44 = vld [vmem:[#allocation8 + $0x16e4] ss:$52 sps:$4 sm:$0xff]  }
 0x4b8   :  { %10803 = vmatpush1.bf16.msra.mxu1 %v16343_v45  ;;  %v16391_v45 = vld [vmem:[#allocation8 + $0x1060] ss:$52 sps:$4 sm:$0xff]  }
 0x4b9   :  { %10844 = vmatpush1.bf16.msra.mxu0 %v16346_v48  ;;  %10804 = vmatprep.subr.bf16.mxu1 %v16351_v43  ;;  %v16394_v48 = vld [vmem:[#allocation8 + $0x16e0] ss:$52 sps:$4 sm:$0xff]   ;;  %v16399_v43 = vld [vmem:[#allocation8 + $0x1cfc] ss:$52 sps:$4 sm:$0xff]  }
 0x4ba   :  { %10845 = vmatprep.subr.bf16.mxu0 %v16354_v60  ;;  %v16402_v60 = vld [vmem:[#allocation8 + $0x237c] ss:$52 sps:$4 sm:$0xff]  }
 0x4bc   :  { %v10535_v31 = vpop.f32.mrf.mxu0  ;;  %10805 = vmatpush2.bf16.msra.mxu1 %v16349_v61  ;;  %v16397_v61 = vld [vmem:[#allocation8 + $0x1cf8] ss:$52 sps:$4 sm:$0xff]  }
 0x4bd   :  { %v17636_v42 = vadd.f32 %v10535_v31, %v17628_v2  ;;  %10846 = vmatpush2.bf16.msra.mxu0 %v16352_v62  ;;  %10806 = vmatprep.subr.bf16.mxu1 %v16357_v46  ;;  %v16372_v2 = vld [vmem:[#allocation8 + $0x1884] ss:$52 sps:$4 sm:$0xff]   ;;  %v16405_v46 = vld [vmem:[#allocation8 + $0x1c94] ss:$52 sps:$4 sm:$0xff]  }
 0x4be   :  { %v10537_v5 = vpop.f32.mrf.mxu0  ;;  %10847 = vmatprep.subr.bf16.mxu0 %v16360_v58  ;;  %v16400_v62 = vld [vmem:[#allocation8 + $0x2378] ss:$52 sps:$4 sm:$0xff]   ;;  %v16408_v31 = vld [vmem:[#allocation8 + $0x2314] ss:$52 sps:$4 sm:$0xff]  }
 0x4bf   :  { %v17639_v40 = vadd.f32 %v10537_v5, %v17633_v4  ;;  %v16373_v4 = vld [vmem:[#allocation8 + $0x1198] ss:$52 sps:$4 sm:$0xff]   ;;  %v16406_v5 = vld [vmem:[#allocation8 + $0x2310] ss:$52 sps:$4 sm:$0xff]  }
 0x4c0   :  { %v10539_v59 = vpop.f32.mrf.mxu0  ;;  %10807 = vmatpush2.bf16.msra.mxu1 %v16355_v51 }
 0x4c1   :  { %10848 = vmatpush2.bf16.msra.mxu0 %v16358_v19  ;;  %10808 = vmatprep.subr.bf16.mxu1 %v16363_v50  ;;  %v16403_v19 = vld [vmem:[#allocation8 + $0x1c90] ss:$52 sps:$4 sm:$0xff]  }
 0x4c2   :  { %v10540_v27 = vpop.f32.mrf.mxu0  ;;  %10849 = vmatprep.subr.bf16.mxu0 %v16366_v6  ;;  %v16411_v6 = vld [vmem:[#allocation8 + $0x1c2c] ss:$52 sps:$4 sm:$0xff]  }
 0x4c3   :  { %v16412_v27 = vld [vmem:[#allocation8 + $0x22a8] ss:$52 sps:$4 sm:$0xff]  }
 0x4c4   :  { %10809 = vmatpush2.bf16.msra.mxu1 %v16361_v8  ;;  %v16414_v8 = vld [vmem:[#allocation8 + $0x22ac] ss:$52 sps:$4 sm:$0xff]  }
 0x4c5   :  { %10850 = vmatpush2.bf16.msra.mxu0 %v16364_v11  ;;  %10810 = vmatprep.subr.bf16.mxu1 %v16369_v3 }
 0x4c6   :  { %10851 = vmatprep.subr.bf16.mxu0 %v16372_v2  ;;  %v16417_v2 = vld [vmem:[#allocation8 + $0x1bc4] ss:$52 sps:$4 sm:$0xff]  }
 0x4c8   :  { %10811 = vmatpush2.bf16.msra.mxu1 %v16367_v9  ;;  %v16420_v9 = vld [vmem:[#allocation8 + $0x2244] ss:$52 sps:$4 sm:$0xff]  }
 0x4c9   :  { %10852 = vmatpush2.bf16.msra.mxu0 %v16370_v20  ;;  %10812 = vmatprep.subr.bf16.mxu1 %v16375_v7  ;;  %v16415_v20 = vld [vmem:[#allocation8 + $0x1bc0] ss:$52 sps:$4 sm:$0xff]  }
 0x4ca   :  { %10853 = vmatprep.subr.bf16.mxu0 %v16378_v24  ;;  %v16418_v7 = vld [vmem:[#allocation8 + $0x2240] ss:$52 sps:$4 sm:$0xff]   ;;  %v16426_v24 = vld [vmem:[#allocation8 + $0x21dc] ss:$52 sps:$4 sm:$0xff]  }
 0x4cc   :  { %10813 = vmatpush2.bf16.msra.mxu1 %v16373_v4  ;;  %v16421_v4 = vld [vmem:[#allocation8 + $0x1b58] ss:$52 sps:$4 sm:$0xff]  }
 0x4cd   :  { %10854 = vmatpush2.bf16.msra.mxu0 %v16376_v22  ;;  %10814 = vmatprep.subr.bf16.mxu1 %v16381_v33  ;;  %v16424_v22 = vld [vmem:[#allocation8 + $0x21d8] ss:$52 sps:$4 sm:$0xff]   ;;  %v16429_v33 = vld [vmem:[#allocation8 + $0x1af4] ss:$52 sps:$4 sm:$0xff]  }
 0x4ce   :  { %10855 = vmatprep.subr.bf16.mxu0 %v16384_v35  ;;  %v16432_v35 = vld [vmem:[#allocation8 + $0x2174] ss:$52 sps:$4 sm:$0xff]  }
 0x4d0   :  { %10815 = vmatpush2.bf16.msra.mxu1 %v16379_v25  ;;  %v16427_v25 = vld [vmem:[#allocation8 + $0x1af0] ss:$52 sps:$4 sm:$0xff]  }
 0x4d1   :  { %10856 = vmatpush2.bf16.msra.mxu0 %v16382_v23  ;;  %10816 = vmatprep.subr.bf16.mxu1 %v16387_v30  ;;  %v16430_v23 = vld [vmem:[#allocation8 + $0x2170] ss:$52 sps:$4 sm:$0xff]   ;;  %v16435_v30 = vld [vmem:[#allocation8 + $0x1a8c] ss:$52 sps:$4 sm:$0xff]  }
 0x4d2   :  { %10857 = vmatprep.subr.bf16.mxu0 %v16390_v37  ;;  %v16438_v37 = vld [vmem:[#allocation8 + $0x210c] ss:$52 sps:$4 sm:$0xff]  }
 0x4d4   :  { %10817 = vmatpush2.bf16.msra.mxu1 %v16385_v41  ;;  %v16433_v41 = vld [vmem:[#allocation8 + $0x1a88] ss:$52 sps:$4 sm:$0xff]  }
 0x4d5   :  { %10858 = vmatpush2.bf16.msra.mxu0 %v16388_v38  ;;  %10818 = vmatprep.subr.bf16.mxu1 %v16393_v32  ;;  %v16436_v38 = vld [vmem:[#allocation8 + $0x2108] ss:$52 sps:$4 sm:$0xff]   ;;  %v16441_v32 = vld [vmem:[#allocation8 + $0x1a24] ss:$52 sps:$4 sm:$0xff]  }
 0x4d6   :  { %10859 = vmatprep.subr.bf16.mxu0 %v16396_v44  ;;  %v16444_v44 = vld [vmem:[#allocation8 + $0x20a4] ss:$52 sps:$4 sm:$0xff]  }
 0x4d8   :  { %10819 = vmatpush2.bf16.msra.mxu1 %v16391_v45  ;;  %v16439_v45 = vld [vmem:[#allocation8 + $0x1a20] ss:$52 sps:$4 sm:$0xff]  }
 0x4d9   :  { %10860 = vmatpush2.bf16.msra.mxu0 %v16394_v48  ;;  %10870 = vmatprep.subr.bf16.mxu1 %v16399_v43  ;;  %v16442_v48 = vld [vmem:[#allocation8 + $0x20a0] ss:$52 sps:$4 sm:$0xff]   ;;  %v16447_v43 = vld [vmem:[#allocation8 + $0x203c] ss:$52 sps:$4 sm:$0xff]  }
 0x4da   :  { %10911 = vmatprep.subr.bf16.mxu0 %v16402_v60  ;;  %v16450_v60 = vld [vmem:[#allocation8 + $0x26bc] ss:$52 sps:$4 sm:$0xff]  }
 0x4db   :  { %v10576_v58 = vpop.f32.mrf.mxu1  ;;  %10821 = vmatmul.mubr.bf16.vlgmr.msra.gmra.mxu1 %v17457_v26 }
 0x4dc   :  { %v17643_v51 = vadd.f32 %v10576_v58, %v17636_v42  ;;  %10862 = vmatmul.mubr.bf16.vlgmr.msra.gmra.mxu0 %v17455_v21  ;;  %10871 = vmatpush1.bf16.msra.mxu1 %v16397_v61  ;;  %v16409_v42 = vld [vmem:[#allocation8 + $0x1c28] ss:$52 sps:$4 sm:$0xff]   ;;  %v16445_v61 = vld [vmem:[#allocation8 + $0x2038] ss:$52 sps:$4 sm:$0xff]  }
 0x4dd   :  { %10902 = vmatprep.mubr.bf16.mxu1 %v17459_v28  ;;  %10912 = vmatpush1.bf16.msra.mxu0 %v16400_v62  ;;  %v10578_v50 = vpop.f32.mrf.mxu1  ;;  %v16448_v62 = vld [vmem:[#allocation8 + $0x26b8] ss:$52 sps:$4 sm:$0xff]   ;;  %v16456_v58 = vld [vmem:[#allocation8 + $0x2654] ss:$52 sps:$4 sm:$0xff]  }
 0x4de   :  { %10943 = vmatprep.mubr.bf16.mxu0 %v17461_v29  ;;  %v17649_v59 = vadd.f32 %v10578_v50, %v17639_v40  ;;  %10872 = vmatprep.subr.bf16.mxu1 %v16405_v46  ;;  %v16423_v40 = vld [vmem:[#allocation8 + $0x1b5c] ss:$52 sps:$4 sm:$0xff]   ;;  %v16453_v46 = vld [vmem:[#allocation8 + $0x1fd4] ss:$52 sps:$4 sm:$0xff]  }
 0x4df   :  { %v10580_v11 = vpop.f32.mrf.mxu1  ;;  %10913 = vmatprep.subr.bf16.mxu0 %v16408_v31 }
 0x4e0   :  { %10873 = vmatpush1.bf16.msra.mxu1 %v16403_v19  ;;  %v16451_v19 = vld [vmem:[#allocation8 + $0x1fd0] ss:$52 sps:$4 sm:$0xff]   ;;  %v16462_v11 = vld [vmem:[#allocation8 + $0x25ec] ss:$52 sps:$4 sm:$0xff]  }
 0x4e1   :  { %10914 = vmatpush1.bf16.msra.mxu0 %v16406_v5  ;;  %v10581_v3 = vpop.f32.mrf.mxu1  ;;  %10874 = vmatprep.subr.bf16.mxu1 %v16411_v6  ;;  %v16454_v5 = vld [vmem:[#allocation8 + $0x2650] ss:$52 sps:$4 sm:$0xff]   ;;  %v16459_v6 = vld [vmem:[#allocation8 + $0x1f6c] ss:$52 sps:$4 sm:$0xff]  }
 0x4e2   :  { %10915 = vmatprep.subr.bf16.mxu0 %v16414_v8 }
 0x4e4   :  { %10875 = vmatpush1.bf16.msra.mxu1 %v16409_v42 }
 0x4e5   :  { %10916 = vmatpush1.bf16.msra.mxu0 %v16412_v27  ;;  %10876 = vmatprep.subr.bf16.mxu1 %v16417_v2  ;;  %v16457_v27 = vld [vmem:[#allocation8 + $0x1f68] ss:$52 sps:$4 sm:$0xff]  }
 0x4e6   :  { %10917 = vmatprep.subr.bf16.mxu0 %v16420_v9  ;;  %v16460_v2 = vld [vmem:[#allocation8 + $0x25e8] ss:$52 sps:$4 sm:$0xff]   ;;  %v16465_v9 = vld [vmem:[#allocation8 + $0x1f04] ss:$52 sps:$4 sm:$0xff]  }
 0x4e8   :  { %10877 = vmatpush1.bf16.msra.mxu1 %v16415_v20 }
 0x4e9   :  { %10918 = vmatpush1.bf16.msra.mxu0 %v16418_v7  ;;  %10878 = vmatprep.subr.bf16.mxu1 %v16423_v40  ;;  %v16463_v7 = vld [vmem:[#allocation8 + $0x1f00] ss:$52 sps:$4 sm:$0xff]  }
 0x4ea   :  { %10919 = vmatprep.subr.bf16.mxu0 %v16426_v24  ;;  %v16466_v40 = vld [vmem:[#allocation8 + $0x2580] ss:$52 sps:$4 sm:$0xff]   ;;  %v16471_v24 = vld [vmem:[#allocation8 + $0x1e9c] ss:$52 sps:$4 sm:$0xff]  }
 0x4ec   :  { %10879 = vmatpush1.bf16.msra.mxu1 %v16421_v4  ;;  %v16474_v4 = vld [vmem:[#allocation8 + $0x251c] ss:$52 sps:$4 sm:$0xff]  }
 0x4ed   :  { %10920 = vmatpush1.bf16.msra.mxu0 %v16424_v22  ;;  %10880 = vmatprep.subr.bf16.mxu1 %v16429_v33  ;;  %v16472_v22 = vld [vmem:[#allocation8 + $0x2518] ss:$52 sps:$4 sm:$0xff]   ;;  %v16477_v33 = vld [vmem:[#allocation8 + $0x1e34] ss:$52 sps:$4 sm:$0xff]  }
 0x4ee   :  { %10921 = vmatprep.subr.bf16.mxu0 %v16432_v35  ;;  %v16480_v35 = vld [vmem:[#allocation8 + $0x24b4] ss:$52 sps:$4 sm:$0xff]  }
 0x4f0   :  { %10881 = vmatpush1.bf16.msra.mxu1 %v16427_v25  ;;  %v16475_v25 = vld [vmem:[#allocation8 + $0x1e30] ss:$52 sps:$4 sm:$0xff]  }
 0x4f1   :  { %10922 = vmatpush1.bf16.msra.mxu0 %v16430_v23  ;;  %10882 = vmatprep.subr.bf16.mxu1 %v16435_v30  ;;  %v16478_v23 = vld [vmem:[#allocation8 + $0x24b0] ss:$52 sps:$4 sm:$0xff]   ;;  %v16483_v30 = vld [vmem:[#allocation8 + $0x1dcc] ss:$52 sps:$4 sm:$0xff]  }
 0x4f2   :  { %10923 = vmatprep.subr.bf16.mxu0 %v16438_v37  ;;  %v16486_v37 = vld [vmem:[#allocation8 + $0x244c] ss:$52 sps:$4 sm:$0xff]  }
 0x4f4   :  { %10883 = vmatpush1.bf16.msra.mxu1 %v16433_v41  ;;  %v16481_v41 = vld [vmem:[#allocation8 + $0x1dc8] ss:$52 sps:$4 sm:$0xff]  }
 0x4f5   :  { %10924 = vmatpush1.bf16.msra.mxu0 %v16436_v38  ;;  %10884 = vmatprep.subr.bf16.mxu1 %v16441_v32  ;;  %v16484_v38 = vld [vmem:[#allocation8 + $0x2448] ss:$52 sps:$4 sm:$0xff]   ;;  %v16489_v32 = vld [vmem:[#allocation8 + $0x1d64] ss:$52 sps:$4 sm:$0xff]  }
 0x4f6   :  { %10925 = vmatprep.subr.bf16.mxu0 %v16444_v44  ;;  %v16492_v44 = vld [vmem:[#allocation8 + $0x23e4] ss:$52 sps:$4 sm:$0xff]  }
 0x4f8   :  { %10885 = vmatpush1.bf16.msra.mxu1 %v16439_v45  ;;  %v16487_v45 = vld [vmem:[#allocation8 + $0x1d60] ss:$52 sps:$4 sm:$0xff]  }
 0x4f9   :  { %10926 = vmatpush1.bf16.msra.mxu0 %v16442_v48  ;;  %10886 = vmatprep.subr.bf16.mxu1 %v16447_v43  ;;  %v16490_v48 = vld [vmem:[#allocation8 + $0x23e0] ss:$52 sps:$4 sm:$0xff]   ;;  %v16495_v43 = vld [vmem:[#allocation8 + $0x29fc] ss:$52 sps:$4 sm:$0xff]  }
 0x4fa   :  { %10927 = vmatprep.subr.bf16.mxu0 %v16450_v60  ;;  %v16498_v60 = vld [vmem:[#allocation8 + $0x304] ss:$52 sps:$4 sm:$0xff]  }
 0x4fc   :  { %v10617_v31 = vpop.f32.mrf.mxu0  ;;  %10887 = vmatpush2.bf16.msra.mxu1 %v16445_v61  ;;  %v16493_v61 = vld [vmem:[#allocation8 + $0x29f8] ss:$52 sps:$4 sm:$0xff]  }
 0x4fd   :  { %v17652_v50 = vadd.f32 %v10617_v31, %v17643_v51  ;;  %10928 = vmatpush2.bf16.msra.mxu0 %v16448_v62  ;;  %10888 = vmatprep.subr.bf16.mxu1 %v16453_v46  ;;  %v16468_v51 = vld [vmem:[#allocation8 + $0x2584] ss:$52 sps:$4 sm:$0xff]   ;;  %v16496_v62 = vld [vmem:[#allocation8 + $0x300] ss:$52 sps:$4 sm:$0xff]  }
 0x4fe   :  { %v10619_v8 = vpop.f32.mrf.mxu0  ;;  %10929 = vmatprep.subr.bf16.mxu0 %v16456_v58  ;;  %v16501_v46 = vld [vmem:[#allocation8 + $0x2994] ss:$52 sps:$4 sm:$0xff]   ;;  %v16504_v58 = vld [vmem:[#allocation8 + $0x29c] ss:$52 sps:$4 sm:$0xff]  }
 0x4ff   :  { %v17655_v42 = vadd.f32 %v10619_v8, %v17649_v59  ;;  %v16469_v59 = vld [vmem:[#allocation8 + $0x1e98] ss:$52 sps:$4 sm:$0xff]  }
 0x500   :  { %v10621_v3 = vpop.f32.mrf.mxu0  ;;  %10889 = vmatpush2.bf16.msra.mxu1 %v16451_v19 }
 0x501   :  { %10930 = vmatpush2.bf16.msra.mxu0 %v16454_v5  ;;  %10890 = vmatprep.subr.bf16.mxu1 %v16459_v6  ;;  %v16499_v6 = vld [vmem:[#allocation8 + $0x2990] ss:$52 sps:$4 sm:$0xff]   ;;  %v16507_v3 = vld [vmem:[#allocation8 + $0x292c] ss:$52 sps:$4 sm:$0xff]  }
 0x502   :  { %v10622_v20 = vpop.f32.mrf.mxu0  ;;  %10931 = vmatprep.subr.bf16.mxu0 %v16462_v11  ;;  %v16502_v11 = vld [vmem:[#allocation8 + $0x298] ss:$52 sps:$4 sm:$0xff]  }
 0x503   :  { %v16510_v20 = vld [vmem:[#allocation8 + $0x234] ss:$52 sps:$4 sm:$0xff]  }
 0x504   :  { %10891 = vmatpush2.bf16.msra.mxu1 %v16457_v27 }
 0x505   :  { %10932 = vmatpush2.bf16.msra.mxu0 %v16460_v2  ;;  %10892 = vmatprep.subr.bf16.mxu1 %v16465_v9 }
 0x506   :  { %10933 = vmatprep.subr.bf16.mxu0 %v16468_v51 }
 0x508   :  { %10893 = vmatpush2.bf16.msra.mxu1 %v16463_v7 }
 0x509   :  { %10934 = vmatpush2.bf16.msra.mxu0 %v16466_v40  ;;  %10894 = vmatprep.subr.bf16.mxu1 %v16471_v24  ;;  %v16505_v40 = vld [vmem:[#allocation8 + $0x2928] ss:$52 sps:$4 sm:$0xff]  }
 0x50a   :  { %10935 = vmatprep.subr.bf16.mxu0 %v16474_v4  ;;  %v16508_v4 = vld [vmem:[#allocation8 + $0x230] ss:$52 sps:$4 sm:$0xff]  }
 0x50c   :  { %10895 = vmatpush2.bf16.msra.mxu1 %v16469_v59  ;;  %v16513_v59 = vld [vmem:[#allocation8 + $0x28c4] ss:$52 sps:$4 sm:$0xff]  }
 0x50d   :  { %10936 = vmatpush2.bf16.msra.mxu0 %v16472_v22  ;;  %10896 = vmatprep.subr.bf16.mxu1 %v16477_v33  ;;  %v16511_v33 = vld [vmem:[#allocation8 + $0x28c0] ss:$52 sps:$4 sm:$0xff]  }
 0x50e   :  { %10937 = vmatprep.subr.bf16.mxu0 %v16480_v35  ;;  %v16514_v35 = vld [vmem:[#allocation8 + $0x1c8] ss:$52 sps:$4 sm:$0xff]  }
 0x510   :  { %10897 = vmatpush2.bf16.msra.mxu1 %v16475_v25  ;;  %v16519_v25 = vld [vmem:[#allocation8 + $0x285c] ss:$52 sps:$4 sm:$0xff]  }
 0x511   :  { %10938 = vmatpush2.bf16.msra.mxu0 %v16478_v23  ;;  %10898 = vmatprep.subr.bf16.mxu1 %v16483_v30  ;;  %v16522_v23 = vld [vmem:[#allocation8 + $0x164] ss:$52 sps:$4 sm:$0xff]  }
 0x512   :  { %10939 = vmatprep.subr.bf16.mxu0 %v16486_v37  ;;  %v16517_v30 = vld [vmem:[#allocation8 + $0x2858] ss:$52 sps:$4 sm:$0xff]   ;;  %v16520_v37 = vld [vmem:[#allocation8 + $0x160] ss:$52 sps:$4 sm:$0xff]  }
 0x514   :  { %10899 = vmatpush2.bf16.msra.mxu1 %v16481_v41  ;;  %v16525_v41 = vld [vmem:[#allocation8 + $0x27f4] ss:$52 sps:$4 sm:$0xff]  }
 0x515   :  { %10940 = vmatpush2.bf16.msra.mxu0 %v16484_v38  ;;  %10900 = vmatprep.subr.bf16.mxu1 %v16489_v32  ;;  %v16528_v38 = vld [vmem:[#allocation8 + $0xfc] ss:$52 sps:$4 sm:$0xff]  }
 0x516   :  { %10941 = vmatprep.subr.bf16.mxu0 %v16492_v44  ;;  %v16523_v32 = vld [vmem:[#allocation8 + $0x27f0] ss:$52 sps:$4 sm:$0xff]   ;;  %v16526_v44 = vld [vmem:[#allocation8 + $0xf8] ss:$52 sps:$4 sm:$0xff]  }
 0x518   :  { %10901 = vmatpush2.bf16.msra.mxu1 %v16487_v45  ;;  %v16531_v45 = vld [vmem:[#allocation8 + $0x278c] ss:$52 sps:$4 sm:$0xff]  }
 0x519   :  { %10942 = vmatpush2.bf16.msra.mxu0 %v16490_v48  ;;  %10952 = vmatprep.subr.bf16.mxu1 %v16495_v43  ;;  %v16534_v48 = vld [vmem:[#allocation8 + $0x94] ss:$52 sps:$4 sm:$0xff]  }
 0x51a   :  { %10993 = vmatprep.subr.bf16.mxu0 %v16498_v60  ;;  %v16529_v43 = vld [vmem:[#allocation8 + $0x2788] ss:$52 sps:$4 sm:$0xff]   ;;  %v16532_v60 = vld [vmem:[#allocation8 + $0x90] ss:$52 sps:$4 sm:$0xff]  }
 0x51b   :  { %v10658_v31 = vpop.f32.mrf.mxu1  ;;  %10903 = vmatmul.mubr.bf16.vlgmr.msra.gmra.mxu1 %v17479_v63 }
 0x51c   :  { %v10659_v19 = vadd.f32 %v10658_v31, %v17652_v50  ;;  %v10699_v5 = vpop.f32.mrf.mxu0  ;;  %10944 = vmatmul.mubr.bf16.vlgmr.msra.gmra.mxu0 %v17477_v13  ;;  %10953 = vmatpush1.bf16.msra.mxu1 %v16493_v61  ;;  %v16537_v61 = vld [vmem:[#allocation8 + $0x2724] ss:$52 sps:$4 sm:$0xff]  }
 0x51d   :  { %10994 = vmatpush1.bf16.msra.mxu0 %v16496_v62  ;;  %11025 = vmatprep.mubr.bf16.mxu0 %v17406_v16  ;;  %v10660_v8 = vpop.f32.mrf.mxu1  ;;  %v16540_v62 = vld [vmem:[#allocation8 + $0x2c] ss:$52 sps:$4 sm:$0xff]   ;;  %v16546_v31 = vld [vmem:[#allocation8 + $0x984] ss:$52 sps:$4 sm:$0xff]  }
 0x51e   :  { %v17661_v27 = vadd.f32 %v10699_v5, %v10659_v19  ;;  %v10661_v2 = vadd.f32 %v10660_v8, %v17655_v42  ;;  %v10701_v9 = vpop.f32.mrf.mxu0  ;;  %10954 = vmatprep.subr.bf16.mxu1 %v16501_v46  ;;  %10995 = vmatprep.subr.bf16.mxu0 %v16504_v58  ;;  %v16516_v42 = vld [vmem:[#allocation8 + $0x1cc] ss:$52 sps:$4 sm:$0xff]   ;;  %v16538_v58 = vld [vmem:[#allocation8 + $0x28] ss:$52 sps:$4 sm:$0xff]   ;;  %v16543_v19 = vld [vmem:[#allocation8 + $0x644] ss:$52 sps:$4 sm:$0xff]  }
 0x51f   :  { %v10662_v50 = vpop.f32.mrf.mxu1  ;;  %10984 = vmatprep.mubr.bf16.mxu1 %v17274_v0  ;;  %v16535_v46 = vld [vmem:[#allocation8 + $0x2720] ss:$52 sps:$4 sm:$0xff]   ;;  %v16552_v8 = vld [vmem:[#allocation8 + $0x91c] ss:$52 sps:$4 sm:$0xff]  }
 0x520   :  { %v17665_v51 = vadd.f32 %v10701_v9, %v10661_v2  ;;  %v10703_v7 = vpop.f32.mrf.mxu0  ;;  %10955 = vmatpush1.bf16.msra.mxu1 %v16499_v6  ;;  %v16544_v5 = vld [vmem:[#allocation8 + $0x980] ss:$52 sps:$4 sm:$0xff]   ;;  %v16547_v2 = vld [vmem:[#allocation8 + $0x5d8] ss:$52 sps:$4 sm:$0xff]   ;;  %v16556_v50 = vld [vmem:[#allocation8 + $0x8b0] ss:$52 sps:$4 sm:$0xff]  }
 0x521   :  { %10996 = vmatpush1.bf16.msra.mxu0 %v16502_v11  ;;  %v10663_v24 = vpop.f32.mrf.mxu1  ;;  %10956 = vmatprep.subr.bf16.mxu1 %v16507_v3  ;;  %v16541_v6 = vld [vmem:[#allocation8 + $0x640] ss:$52 sps:$4 sm:$0xff]   ;;  %v16549_v11 = vld [vmem:[#allocation8 + $0x5dc] ss:$52 sps:$4 sm:$0xff]   ;;  %v16550_v3 = vld [vmem:[#allocation8 + $0x918] ss:$52 sps:$4 sm:$0xff]  }
 0x522   :  { %v10704_v22 = vpop.f32.mrf.mxu0  ;;  %10997 = vmatprep.subr.bf16.mxu0 %v16510_v20  ;;  %v16558_v9 = vld [vmem:[#allocation8 + $0x8b4] ss:$52 sps:$4 sm:$0xff]   ;;  %v16553_v7 = vld [vmem:[#allocation8 + $0x570] ss:$52 sps:$4 sm:$0xff]   ;;  %v16561_v24 = vld [vmem:[#allocation8 + $0x50c] ss:$52 sps:$4 sm:$0xff]  }
 0x523   :  { %v16555_v20 = vld [vmem:[#allocation8 + $0x574] ss:$52 sps:$4 sm:$0xff]   ;;  %v16570_v22 = vld [vmem:[#allocation8 + $0x7e4] ss:$52 sps:$4 sm:$0xff]  }
 0x524   :  { %10957 = vmatpush1.bf16.msra.mxu1 %v16505_v40  ;;  %v16564_v40 = vld [vmem:[#allocation8 + $0x84c] ss:$52 sps:$4 sm:$0xff]  }
 0x525   :  { %10998 = vmatpush1.bf16.msra.mxu0 %v16508_v4  ;;  %10958 = vmatprep.subr.bf16.mxu1 %v16513_v59  ;;  %v16562_v4 = vld [vmem:[#allocation8 + $0x848] ss:$52 sps:$4 sm:$0xff]  }
 0x526   :  { %10999 = vmatprep.subr.bf16.mxu0 %v16516_v42  ;;  %v16559_v59 = vld [vmem:[#allocation8 + $0x508] ss:$52 sps:$4 sm:$0xff]   ;;  %v16567_v42 = vld [vmem:[#allocation8 + $0x4a4] ss:$52 sps:$4 sm:$0xff]  }
 0x528   :  { %10959 = vmatpush1.bf16.msra.mxu1 %v16511_v33  ;;  %v16568_v33 = vld [vmem:[#allocation8 + $0x7e0] ss:$52 sps:$4 sm:$0xff]  }
 0x529   :  { %11000 = vmatpush1.bf16.msra.mxu0 %v16514_v35  ;;  %10960 = vmatprep.subr.bf16.mxu1 %v16519_v25  ;;  %v16565_v35 = vld [vmem:[#allocation8 + $0x4a0] ss:$52 sps:$4 sm:$0xff]   ;;  %v16576_v25 = vld [vmem:[#allocation8 + $0x77c] ss:$52 sps:$4 sm:$0xff]  }
 0x52a   :  { %11001 = vmatprep.subr.bf16.mxu0 %v16522_v23  ;;  %v16573_v23 = vld [vmem:[#allocation8 + $0x43c] ss:$52 sps:$4 sm:$0xff]  }
 0x52c   :  { %10961 = vmatpush1.bf16.msra.mxu1 %v16517_v30  ;;  %v16574_v30 = vld [vmem:[#allocation8 + $0x778] ss:$52 sps:$4 sm:$0xff]  }
 0x52d   :  { %11002 = vmatpush1.bf16.msra.mxu0 %v16520_v37  ;;  %10962 = vmatprep.subr.bf16.mxu1 %v16525_v41  ;;  %v16571_v37 = vld [vmem:[#allocation8 + $0x438] ss:$52 sps:$4 sm:$0xff]   ;;  %v16582_v41 = vld [vmem:[#allocation8 + $0x714] ss:$52 sps:$4 sm:$0xff]  }
 0x52e   :  { %11003 = vmatprep.subr.bf16.mxu0 %v16528_v38  ;;  %v16579_v38 = vld [vmem:[#allocation8 + $0x3d4] ss:$52 sps:$4 sm:$0xff]  }
 0x530   :  { %10963 = vmatpush1.bf16.msra.mxu1 %v16523_v32  ;;  %v16580_v32 = vld [vmem:[#allocation8 + $0x710] ss:$52 sps:$4 sm:$0xff]  }
 0x531   :  { %11004 = vmatpush1.bf16.msra.mxu0 %v16526_v44  ;;  %10964 = vmatprep.subr.bf16.mxu1 %v16531_v45  ;;  %v16577_v44 = vld [vmem:[#allocation8 + $0x3d0] ss:$52 sps:$4 sm:$0xff]   ;;  %v16588_v45 = vld [vmem:[#allocation8 + $0x6ac] ss:$52 sps:$4 sm:$0xff]  }
 0x532   :  { %11005 = vmatprep.subr.bf16.mxu0 %v16534_v48  ;;  %v16585_v48 = vld [vmem:[#allocation8 + $0x36c] ss:$52 sps:$4 sm:$0xff]  }
 0x534   :  { %10965 = vmatpush1.bf16.msra.mxu1 %v16529_v43  ;;  %v16586_v43 = vld [vmem:[#allocation8 + $0x6a8] ss:$52 sps:$4 sm:$0xff]  }
 0x535   :  { %11006 = vmatpush1.bf16.msra.mxu0 %v16532_v60  ;;  %10966 = vmatprep.subr.bf16.mxu1 %v16537_v61  ;;  %v16583_v60 = vld [vmem:[#allocation8 + $0x368] ss:$52 sps:$4 sm:$0xff]  }
 0x536   :  { %11007 = vmatprep.subr.bf16.mxu0 %v16540_v62  ;;  %v2626_v61 = vld [vmem:[#allocation10 + $0x8] sm:$0x1f]  ;;  %v16591_v62 = vld [vmem:[#allocation8 + $0xcc4] ss:$52 sps:$4 sm:$0xff]  }
 0x538   :  { %10967 = vmatpush1.bf16.msra.mxu1 %v16535_v46  ;;  %v16594_v46 = vld [vmem:[#allocation8 + $0x1004] ss:$52 sps:$4 sm:$0xff]  }
 0x539   :  { %11008 = vmatpush1.bf16.msra.mxu0 %v16538_v58  ;;  %11034 = vmatprep.subr.bf16.mxu1 %v16546_v31  ;;  %v2664_v58 = vrot.slane %v2626_v61, %v17385_v53  ;;  %v16589_v31 = vld [vmem:[#allocation8 + $0xcc0] ss:$52 sps:$4 sm:$0xff]  }
 0x53a   :  { %11009 = vmatprep.subr.bf16.mxu0 %v16543_v19  ;;  %v16592_v19 = vld [vmem:[#allocation8 + $0x1000] ss:$52 sps:$4 sm:$0xff]  }
 0x53b   :  { %10985 = vmatmul.mubr.bf16.vlgmr.msra.gmra.mxu1 %v17486_v47 }
 0x53c   :  { %11035 = vmatpush1.bf16.msra.mxu1 %v16544_v5  ;;  %11066 = vmatprep.mubr.bf16.mxu1 %v17408_v17  ;;  %v2668_v5 = vrot.slane %v2626_v61, %v17391_v55  ;;  %v16606_v55 = vld [vmem:[#allocation8 + $0xf34] ss:$52 sps:$4 sm:$0xff]   ;;  %v16622_v61 = vld [vmem:[#allocation8 + $0xdf8] ss:$52 sps:$4 sm:$0xff]  }
 0x53d   :  { %11010 = vmatpush2.bf16.msra.mxu0 %v16541_v6  ;;  %11036 = vmatprep.subr.bf16.mxu1 %v16552_v8  ;;  %v16597_v6 = vld [vmem:[#allocation8 + $0xc5c] ss:$52 sps:$4 sm:$0xff]  }
 0x53e   :  { %11011 = vmatprep.subr.bf16.mxu0 %v16549_v11  ;;  %v16600_v8 = vld [vmem:[#allocation8 + $0xf9c] ss:$52 sps:$4 sm:$0xff]  }
 0x540   :  { %11037 = vmatpush1.bf16.msra.mxu1 %v16550_v3 }
 0x541   :  { %11012 = vmatpush2.bf16.msra.mxu0 %v16547_v2  ;;  %11038 = vmatprep.subr.bf16.mxu1 %v16558_v9  ;;  %v16595_v9 = vld [vmem:[#allocation8 + $0xc58] ss:$52 sps:$4 sm:$0xff]  }
 0x542   :  { %11013 = vmatprep.subr.bf16.mxu0 %v16555_v20  ;;  %v16598_v20 = vld [vmem:[#allocation8 + $0xf98] ss:$52 sps:$4 sm:$0xff]  }
 0x544   :  { %11039 = vmatpush1.bf16.msra.mxu1 %v16556_v50  ;;  %v16603_v50 = vld [vmem:[#allocation8 + $0xbf4] ss:$52 sps:$4 sm:$0xff]  }
 0x545   :  { %11014 = vmatpush2.bf16.msra.mxu0 %v16553_v7  ;;  %11040 = vmatprep.subr.bf16.mxu1 %v16564_v40 }
 0x546   :  { %11015 = vmatprep.subr.bf16.mxu0 %v16561_v24 }
 0x548   :  { %11041 = vmatpush1.bf16.msra.mxu1 %v16562_v4 }
 0x549   :  { %11016 = vmatpush2.bf16.msra.mxu0 %v16559_v59  ;;  %11042 = vmatprep.subr.bf16.mxu1 %v16570_v22 }
 0x54a   :  { %11017 = vmatprep.subr.bf16.mxu0 %v16567_v42  ;;  %v16601_v42 = vld [vmem:[#allocation8 + $0xbf0] ss:$52 sps:$4 sm:$0xff]  }
 0x54c   :  { %11043 = vmatpush1.bf16.msra.mxu1 %v16568_v33 }
 0x54d   :  { %11018 = vmatpush2.bf16.msra.mxu0 %v16565_v35  ;;  %11044 = vmatprep.subr.bf16.mxu1 %v16576_v25  ;;  %v16604_v35 = vld [vmem:[#allocation8 + $0xf30] ss:$52 sps:$4 sm:$0xff]   ;;  %v16609_v25 = vld [vmem:[#allocation8 + $0xb8c] ss:$52 sps:$4 sm:$0xff]  }
 0x54e   :  { %11019 = vmatprep.subr.bf16.mxu0 %v16573_v23 }
 0x550   :  { %11045 = vmatpush1.bf16.msra.mxu1 %v16574_v30  ;;  %v16612_v30 = vld [vmem:[#allocation8 + $0xecc] ss:$52 sps:$4 sm:$0xff]  }
 0x551   :  { %11020 = vmatpush2.bf16.msra.mxu0 %v16571_v37  ;;  %11046 = vmatprep.subr.bf16.mxu1 %v16582_v41  ;;  %v16607_v37 = vld [vmem:[#allocation8 + $0xb88] ss:$52 sps:$4 sm:$0xff]  }
 0x552   :  { %11021 = vmatprep.subr.bf16.mxu0 %v16579_v38  ;;  %v16610_v41 = vld [vmem:[#allocation8 + $0xec8] ss:$52 sps:$4 sm:$0xff]   ;;  %v16615_v38 = vld [vmem:[#allocation8 + $0xb24] ss:$52 sps:$4 sm:$0xff]  }
 0x554   :  { %11047 = vmatpush1.bf16.msra.mxu1 %v16580_v32  ;;  %v16618_v32 = vld [vmem:[#allocation8 + $0xe64] ss:$52 sps:$4 sm:$0xff]  }
 0x555   :  { %11022 = vmatpush2.bf16.msra.mxu0 %v16577_v44  ;;  %11048 = vmatprep.subr.bf16.mxu1 %v16588_v45  ;;  %v16613_v44 = vld [vmem:[#allocation8 + $0xb20] ss:$52 sps:$4 sm:$0xff]  }
 0x556   :  { %11023 = vmatprep.subr.bf16.mxu0 %v16585_v48  ;;  %v16616_v45 = vld [vmem:[#allocation8 + $0xe60] ss:$52 sps:$4 sm:$0xff]   ;;  %v16621_v48 = vld [vmem:[#allocation8 + $0xabc] ss:$52 sps:$4 sm:$0xff]  }
 0x558   :  { %11049 = vmatpush1.bf16.msra.mxu1 %v16586_v43  ;;  %v16624_v43 = vld [vmem:[#allocation8 + $0xdfc] ss:$52 sps:$4 sm:$0xff]  }
 0x559   :  { %11024 = vmatpush2.bf16.msra.mxu0 %v16583_v60  ;;  %11050 = vmatprep.subr.bf16.mxu1 %v16591_v62  ;;  %v16619_v60 = vld [vmem:[#allocation8 + $0xab8] ss:$52 sps:$4 sm:$0xff]   ;;  %v16627_v62 = vld [vmem:[#allocation8 + $0xa54] ss:$52 sps:$4 sm:$0xff]  }
 0x55a   :  { %11075 = vmatprep.subr.bf16.mxu0 %v16594_v46  ;;  %v16630_v46 = vld [vmem:[#allocation8 + $0xd94] ss:$52 sps:$4 sm:$0xff]  }
 0x55b   :  { %v10740_v11 = vpop.f32.mrf.mxu1 }
 0x55c   :  { %v10741_v3 = vadd.f32 %v10740_v11, %v2664_v58  ;;  %v10781_v2 = vpop.f32.mrf.mxu0  ;;  %11026 = vmatmul.mubr.bf16.vlgmr.msra.gmra.mxu0 %v17410_v18  ;;  %11051 = vmatpush2.bf16.msra.mxu1 %v16589_v31  ;;  %v16625_v58 = vld [vmem:[#allocation8 + $0xa50] ss:$52 sps:$4 sm:$0xff]  }
 0x55d   :  { %11076 = vmatpush1.bf16.msra.mxu0 %v16592_v19  ;;  %11107 = vmatprep.mubr.bf16.mxu0 %v17428_v15  ;;  %v10742_v53 = vpop.f32.mrf.mxu1  ;;  %v16628_v31 = vld [vmem:[#allocation8 + $0xd90] ss:$52 sps:$4 sm:$0xff]   ;;  %v16633_v19 = vld [vmem:[#allocation8 + $0x9ec] ss:$52 sps:$4 sm:$0xff]  }
 0x55e   :  { %v17673_v7 = vadd.f32 %v10781_v2, %v10741_v3  ;;  %v10743_v40 = vadd.f32 %v10742_v53, %v2668_v5  ;;  %v10783_v24 = vpop.f32.mrf.mxu0  ;;  %11052 = vmatprep.subr.bf16.mxu1 %v16597_v6  ;;  %11077 = vmatprep.subr.bf16.mxu0 %v16600_v8  ;;  %v16636_v5 = vld [vmem:[#allocation8 + $0xd2c] ss:$52 sps:$4 sm:$0xff]   ;;  %v16631_v6 = vld [vmem:[#allocation8 + $0x9e8] ss:$52 sps:$4 sm:$0xff]   ;;  %v16642_v11 = vld [vmem:[#allocation8 + $0x1684] ss:$52 sps:$4 sm:$0xff]  }
 0x55f   :  { %v10744_v4 = vpop.f32.mrf.mxu1  ;;  %v16634_v8 = vld [vmem:[#allocation8 + $0xd28] ss:$52 sps:$4 sm:$0xff]   ;;  %v16639_v3 = vld [vmem:[#allocation8 + $0x1344] ss:$52 sps:$4 sm:$0xff]   ;;  %v16640_v2 = vld [vmem:[#allocation8 + $0x1680] ss:$52 sps:$4 sm:$0xff]  }
 0x560   :  { %v17675_v59 = vadd.f32 %v10783_v24, %v10743_v40  ;;  %v10785_v22 = vpop.f32.mrf.mxu0  ;;  %11053 = vmatpush2.bf16.msra.mxu1 %v16595_v9  ;;  %v16637_v9 = vld [vmem:[#allocation8 + $0x1340] ss:$52 sps:$4 sm:$0xff]   ;;  %v16648_v53 = vld [vmem:[#allocation8 + $0x161c] ss:$52 sps:$4 sm:$0xff]   ;;  %v16643_v40 = vld [vmem:[#allocation8 + $0x12d8] ss:$52 sps:$4 sm:$0xff]  }
 0x561   :  { %11078 = vmatpush1.bf16.msra.mxu0 %v16598_v20  ;;  %v10745_v33 = vpop.f32.mrf.mxu1  ;;  %11054 = vmatprep.subr.bf16.mxu1 %v16603_v50  ;;  %v16645_v20 = vld [vmem:[#allocation8 + $0x12dc] ss:$52 sps:$4 sm:$0xff]   ;;  %v16646_v50 = vld [vmem:[#allocation8 + $0x1618] ss:$52 sps:$4 sm:$0xff]   ;;  %v16654_v24 = vld [vmem:[#allocation8 + $0x15b4] ss:$52 sps:$4 sm:$0xff]  }
 0x562   :  { %v10786_v23 = vpop.f32.mrf.mxu0  ;;  %11079 = vmatprep.subr.bf16.mxu0 %v16606_v55  ;;  %v16651_v55 = vld [vmem:[#allocation8 + $0x1274] ss:$52 sps:$4 sm:$0xff]   ;;  %v16652_v4 = vld [vmem:[#allocation8 + $0x15b0] ss:$52 sps:$4 sm:$0xff]   ;;  %v16657_v33 = vld [vmem:[#allocation8 + $0x120c] ss:$52 sps:$4 sm:$0xff]  }
 0x563   :  { %v16649_v22 = vld [vmem:[#allocation8 + $0x1270] ss:$52 sps:$4 sm:$0xff]  }
 0x564   :  { %11055 = vmatpush2.bf16.msra.mxu1 %v16601_v42  ;;  %v16660_v42 = vld [vmem:[#allocation8 + $0x154c] ss:$52 sps:$4 sm:$0xff]   ;;  %v16666_v23 = vld [vmem:[#allocation8 + $0x14e4] ss:$52 sps:$4 sm:$0xff]  }
 0x565   :  { %11080 = vmatpush1.bf16.msra.mxu0 %v16604_v35  ;;  %11056 = vmatprep.subr.bf16.mxu1 %v16609_v25  ;;  %v16658_v35 = vld [vmem:[#allocation8 + $0x1548] ss:$52 sps:$4 sm:$0xff]  }
 0x566   :  { %11081 = vmatprep.subr.bf16.mxu0 %v16612_v30  ;;  %v16655_v25 = vld [vmem:[#allocation8 + $0x1208] ss:$52 sps:$4 sm:$0xff]   ;;  %v16663_v30 = vld [vmem:[#allocation8 + $0x11a4] ss:$52 sps:$4 sm:$0xff]  }
 0x568   :  { %11057 = vmatpush2.bf16.msra.mxu1 %v16607_v37  ;;  %v16664_v37 = vld [vmem:[#allocation8 + $0x14e0] ss:$52 sps:$4 sm:$0xff]  }
 0x569   :  { %11082 = vmatpush1.bf16.msra.mxu0 %v16610_v41  ;;  %11058 = vmatprep.subr.bf16.mxu1 %v16615_v38  ;;  %v16661_v41 = vld [vmem:[#allocation8 + $0x11a0] ss:$52 sps:$4 sm:$0xff]   ;;  %v16672_v38 = vld [vmem:[#allocation8 + $0x147c] ss:$52 sps:$4 sm:$0xff]  }
 0x56a   :  { %11083 = vmatprep.subr.bf16.mxu0 %v16618_v32  ;;  %v16669_v32 = vld [vmem:[#allocation8 + $0x113c] ss:$52 sps:$4 sm:$0xff]  }
 0x56c   :  { %11059 = vmatpush2.bf16.msra.mxu1 %v16613_v44  ;;  %v16670_v44 = vld [vmem:[#allocation8 + $0x1478] ss:$52 sps:$4 sm:$0xff]  }
 0x56d   :  { %11084 = vmatpush1.bf16.msra.mxu0 %v16616_v45  ;;  %11060 = vmatprep.subr.bf16.mxu1 %v16621_v48  ;;  %v16667_v45 = vld [vmem:[#allocation8 + $0x1138] ss:$52 sps:$4 sm:$0xff]   ;;  %v16678_v48 = vld [vmem:[#allocation8 + $0x1414] ss:$52 sps:$4 sm:$0xff]  }
 0x56e   :  { %11085 = vmatprep.subr.bf16.mxu0 %v16624_v43  ;;  %v16675_v43 = vld [vmem:[#allocation8 + $0x10d4] ss:$52 sps:$4 sm:$0xff]  }
 0x570   :  { %11061 = vmatpush2.bf16.msra.mxu1 %v16619_v60  ;;  %v16676_v60 = vld [vmem:[#allocation8 + $0x1410] ss:$52 sps:$4 sm:$0xff]  }
 0x571   :  { %11086 = vmatpush1.bf16.msra.mxu0 %v16622_v61  ;;  %11062 = vmatprep.subr.bf16.mxu1 %v16627_v62  ;;  %v16673_v61 = vld [vmem:[#allocation8 + $0x10d0] ss:$52 sps:$4 sm:$0xff]   ;;  %v16684_v62 = vld [vmem:[#allocation8 + $0x13ac] ss:$52 sps:$4 sm:$0xff]  }
 0x572   :  { %11087 = vmatprep.subr.bf16.mxu0 %v16630_v46  ;;  %v16681_v46 = vld [vmem:[#allocation8 + $0x106c] ss:$52 sps:$4 sm:$0xff]  }
 0x574   :  { %11063 = vmatpush2.bf16.msra.mxu1 %v16625_v58  ;;  %v16682_v58 = vld [vmem:[#allocation8 + $0x13a8] ss:$52 sps:$4 sm:$0xff]  }
 0x575   :  { %11088 = vmatpush1.bf16.msra.mxu0 %v16628_v31  ;;  %11064 = vmatprep.subr.bf16.mxu1 %v16633_v19  ;;  %v16679_v31 = vld [vmem:[#allocation8 + $0x1068] ss:$52 sps:$4 sm:$0xff]   ;;  %v16687_v19 = vld [vmem:[#allocation8 + $0x19c4] ss:$52 sps:$4 sm:$0xff]  }
 0x576   :  { %11089 = vmatprep.subr.bf16.mxu0 %v16636_v5  ;;  %v16690_v5 = vld [vmem:[#allocation8 + $0x1d04] ss:$52 sps:$4 sm:$0xff]  }
 0x578   :  { %11065 = vmatpush2.bf16.msra.mxu1 %v16631_v6  ;;  %v16685_v6 = vld [vmem:[#allocation8 + $0x19c0] ss:$52 sps:$4 sm:$0xff]  }
 0x579   :  { %11090 = vmatpush1.bf16.msra.mxu0 %v16634_v8  ;;  %11116 = vmatprep.subr.bf16.mxu1 %v16642_v11  ;;  %v16688_v8 = vld [vmem:[#allocation8 + $0x1d00] ss:$52 sps:$4 sm:$0xff]   ;;  %v16693_v11 = vld [vmem:[#allocation8 + $0x195c] ss:$52 sps:$4 sm:$0xff]  }
 0x57a   :  { %11091 = vmatprep.subr.bf16.mxu0 %v16639_v3  ;;  %v16696_v3 = vld [vmem:[#allocation8 + $0x1c9c] ss:$52 sps:$4 sm:$0xff]  }
 0x57b   :  { %11067 = vmatmul.mubr.bf16.vlgmr.msra.gmra.mxu1 %v17404_v14 }
 0x57c   :  { %11117 = vmatpush1.bf16.msra.mxu1 %v16640_v2  ;;  %11148 = vmatprep.mubr.bf16.mxu1 %v17430_v36 }
 0x57d   :  { %11092 = vmatpush2.bf16.msra.mxu0 %v16637_v9  ;;  %11118 = vmatprep.subr.bf16.mxu1 %v16648_v53 }
 0x57e   :  { %11093 = vmatprep.subr.bf16.mxu0 %v16645_v20  ;;  %v16691_v20 = vld [vmem:[#allocation8 + $0x1958] ss:$52 sps:$4 sm:$0xff]  }
 0x580   :  { %11119 = vmatpush1.bf16.msra.mxu1 %v16646_v50 }
 0x581   :  { %11094 = vmatpush2.bf16.msra.mxu0 %v16643_v40  ;;  %11120 = vmatprep.subr.bf16.mxu1 %v16654_v24  ;;  %v16694_v40 = vld [vmem:[#allocation8 + $0x1c98] ss:$52 sps:$4 sm:$0xff]   ;;  %v16699_v24 = vld [vmem:[#allocation8 + $0x18f4] ss:$52 sps:$4 sm:$0xff]  }
 0x582   :  { %11095 = vmatprep.subr.bf16.mxu0 %v16651_v55 }
 0x584   :  { %11121 = vmatpush1.bf16.msra.mxu1 %v16652_v4 }
 0x585   :  { %11096 = vmatpush2.bf16.msra.mxu0 %v16649_v22  ;;  %11122 = vmatprep.subr.bf16.mxu1 %v16660_v42  ;;  %v16702_v42 = vld [vmem:[#allocation8 + $0x1c34] ss:$52 sps:$4 sm:$0xff]  }
 0x586   :  { %11097 = vmatprep.subr.bf16.mxu0 %v16657_v33 }
 0x588   :  { %11123 = vmatpush1.bf16.msra.mxu1 %v16658_v35 }
 0x589   :  { %11098 = vmatpush2.bf16.msra.mxu0 %v16655_v25  ;;  %11124 = vmatprep.subr.bf16.mxu1 %v16666_v23  ;;  %v16697_v25 = vld [vmem:[#allocation8 + $0x18f0] ss:$52 sps:$4 sm:$0xff]  }
 0x58a   :  { %11099 = vmatprep.subr.bf16.mxu0 %v16663_v30  ;;  %v16700_v30 = vld [vmem:[#allocation8 + $0x1c30] ss:$52 sps:$4 sm:$0xff]  }
 0x58c   :  { %11125 = vmatpush1.bf16.msra.mxu1 %v16664_v37  ;;  %v16705_v37 = vld [vmem:[#allocation8 + $0x188c] ss:$52 sps:$4 sm:$0xff]  }
 0x58d   :  { %11100 = vmatpush2.bf16.msra.mxu0 %v16661_v41  ;;  %11126 = vmatprep.subr.bf16.mxu1 %v16672_v38  ;;  %v16708_v38 = vld [vmem:[#allocation8 + $0x1bcc] ss:$52 sps:$4 sm:$0xff]  }
 0x58e   :  { %11101 = vmatprep.subr.bf16.mxu0 %v16669_v32  ;;  %v16706_v32 = vld [vmem:[#allocation8 + $0x1bc8] ss:$52 sps:$4 sm:$0xff]  }
 0x590   :  { %11127 = vmatpush1.bf16.msra.mxu1 %v16670_v44  ;;  %v16711_v44 = vld [vmem:[#allocation8 + $0x1824] ss:$52 sps:$4 sm:$0xff]  }
 0x591   :  { %11102 = vmatpush2.bf16.msra.mxu0 %v16667_v45  ;;  %11128 = vmatprep.subr.bf16.mxu1 %v16678_v48  ;;  %v16714_v45 = vld [vmem:[#allocation8 + $0x1b64] ss:$52 sps:$4 sm:$0xff]   ;;  %v16709_v48 = vld [vmem:[#allocation8 + $0x1820] ss:$52 sps:$4 sm:$0xff]  }
 0x592   :  { %11103 = vmatprep.subr.bf16.mxu0 %v16675_v43  ;;  %v16712_v43 = vld [vmem:[#allocation8 + $0x1b60] ss:$52 sps:$4 sm:$0xff]  }
 0x594   :  { %11129 = vmatpush1.bf16.msra.mxu1 %v16676_v60  ;;  %v16717_v60 = vld [vmem:[#allocation8 + $0x17bc] ss:$52 sps:$4 sm:$0xff]  }
 0x595   :  { %11104 = vmatpush2.bf16.msra.mxu0 %v16673_v61  ;;  %11130 = vmatprep.subr.bf16.mxu1 %v16684_v62  ;;  %v16720_v61 = vld [vmem:[#allocation8 + $0x1afc] ss:$52 sps:$4 sm:$0xff]   ;;  %v16715_v62 = vld [vmem:[#allocation8 + $0x17b8] ss:$52 sps:$4 sm:$0xff]  }
 0x596   :  { %11105 = vmatprep.subr.bf16.mxu0 %v16681_v46  ;;  %v16718_v46 = vld [vmem:[#allocation8 + $0x1af8] ss:$52 sps:$4 sm:$0xff]  }
 0x598   :  { %11131 = vmatpush1.bf16.msra.mxu1 %v16682_v58  ;;  %v16723_v58 = vld [vmem:[#allocation8 + $0x1754] ss:$52 sps:$4 sm:$0xff]  }
 0x599   :  { %11106 = vmatpush2.bf16.msra.mxu0 %v16679_v31  ;;  %11132 = vmatprep.subr.bf16.mxu1 %v16687_v19  ;;  %v16726_v31 = vld [vmem:[#allocation8 + $0x1a94] ss:$52 sps:$4 sm:$0xff]   ;;  %v16721_v19 = vld [vmem:[#allocation8 + $0x1750] ss:$52 sps:$4 sm:$0xff]  }
 0x59a   :  { %11157 = vmatprep.subr.bf16.mxu0 %v16690_v5  ;;  %v16724_v5 = vld [vmem:[#allocation8 + $0x1a90] ss:$52 sps:$4 sm:$0xff]  }
 0x59b   :  { %v10822_v2 = vpop.f32.mrf.mxu1 }
 0x59c   :  { %v10823_v9 = vadd.f32 %v10822_v2, %v17673_v7  ;;  %v10863_v53 = vpop.f32.mrf.mxu0  ;;  %11108 = vmatmul.mubr.bf16.vlgmr.msra.gmra.mxu0 %v17457_v26  ;;  %11133 = vmatpush2.bf16.msra.mxu1 %v16685_v6  ;;  %v16729_v6 = vld [vmem:[#allocation8 + $0x16ec] ss:$52 sps:$4 sm:$0xff]   ;;  %v16738_v2 = vld [vmem:[#allocation8 + $0x2384] ss:$52 sps:$4 sm:$0xff]  }
 0x59d   :  { %11158 = vmatpush1.bf16.msra.mxu0 %v16688_v8  ;;  %11189 = vmatprep.mubr.bf16.mxu0 %v17459_v28  ;;  %v10824_v50 = vpop.f32.mrf.mxu1  ;;  %v16732_v8 = vld [vmem:[#allocation8 + $0x1a2c] ss:$52 sps:$4 sm:$0xff]  }
 0x59e   :  { %v17682_v55 = vadd.f32 %v10863_v53, %v10823_v9  ;;  %v10825_v4 = vadd.f32 %v10824_v50, %v17675_v59  ;;  %v10865_v22 = vpop.f32.mrf.mxu0  ;;  %11134 = vmatprep.subr.bf16.mxu1 %v16693_v11  ;;  %11159 = vmatprep.subr.bf16.mxu0 %v16696_v3  ;;  %v16703_v59 = vld [vmem:[#allocation8 + $0x1888] ss:$52 sps:$4 sm:$0xff]   ;;  %v16735_v9 = vld [vmem:[#allocation8 + $0x2044] ss:$52 sps:$4 sm:$0xff]   ;;  %v16736_v53 = vld [vmem:[#allocation8 + $0x2380] ss:$52 sps:$4 sm:$0xff]  }
 0x59f   :  { %v10826_v7 = vpop.f32.mrf.mxu1  ;;  %v16727_v11 = vld [vmem:[#allocation8 + $0x16e8] ss:$52 sps:$4 sm:$0xff]  }
 0x5a0   :  { %v17685_v33 = vadd.f32 %v10865_v22, %v10825_v4  ;;  %v10867_v35 = vpop.f32.mrf.mxu0  ;;  %11135 = vmatpush2.bf16.msra.mxu1 %v16691_v20  ;;  %v16730_v3 = vld [vmem:[#allocation8 + $0x1a28] ss:$52 sps:$4 sm:$0xff]   ;;  %v16733_v20 = vld [vmem:[#allocation8 + $0x2040] ss:$52 sps:$4 sm:$0xff]   ;;  %v16739_v4 = vld [vmem:[#allocation8 + $0x1fd8] ss:$52 sps:$4 sm:$0xff]  }
 0x5a1   :  { %11160 = vmatpush1.bf16.msra.mxu0 %v16694_v40  ;;  %v10827_v23 = vpop.f32.mrf.mxu1  ;;  %11136 = vmatprep.subr.bf16.mxu1 %v16699_v24  ;;  %v16744_v50 = vld [vmem:[#allocation8 + $0x231c] ss:$52 sps:$4 sm:$0xff]   ;;  %v16742_v24 = vld [vmem:[#allocation8 + $0x2318] ss:$52 sps:$4 sm:$0xff]   ;;  %v16750_v22 = vld [vmem:[#allocation8 + $0x22b4] ss:$52 sps:$4 sm:$0xff]  }
 0x5a2   :  { %v10868_v41 = vpop.f32.mrf.mxu0  ;;  %11161 = vmatprep.subr.bf16.mxu0 %v16702_v42  ;;  %v16741_v40 = vld [vmem:[#allocation8 + $0x1fdc] ss:$52 sps:$4 sm:$0xff]   ;;  %v16747_v42 = vld [vmem:[#allocation8 + $0x1f74] ss:$52 sps:$4 sm:$0xff]   ;;  %v16753_v23 = vld [vmem:[#allocation8 + $0x1f0c] ss:$52 sps:$4 sm:$0xff]  }
 0x5a3   :  { %v16748_v7 = vld [vmem:[#allocation8 + $0x22b0] ss:$52 sps:$4 sm:$0xff]  }
 0x5a4   :  { %11137 = vmatpush2.bf16.msra.mxu1 %v16697_v25  ;;  %v16745_v35 = vld [vmem:[#allocation8 + $0x1f70] ss:$52 sps:$4 sm:$0xff]   ;;  %v16756_v25 = vld [vmem:[#allocation8 + $0x224c] ss:$52 sps:$4 sm:$0xff]  }
 0x5a5   :  { %11162 = vmatpush1.bf16.msra.mxu0 %v16700_v30  ;;  %11138 = vmatprep.subr.bf16.mxu1 %v16705_v37  ;;  %v16754_v30 = vld [vmem:[#allocation8 + $0x2248] ss:$52 sps:$4 sm:$0xff]   ;;  %v16762_v41 = vld [vmem:[#allocation8 + $0x21e4] ss:$52 sps:$4 sm:$0xff]  }
 0x5a6   :  { %11163 = vmatprep.subr.bf16.mxu0 %v16708_v38  ;;  %v16751_v37 = vld [vmem:[#allocation8 + $0x1f08] ss:$52 sps:$4 sm:$0xff]   ;;  %v16759_v38 = vld [vmem:[#allocation8 + $0x1ea4] ss:$52 sps:$4 sm:$0xff]  }
 0x5a8   :  { %11139 = vmatpush2.bf16.msra.mxu1 %v16703_v59  ;;  %v16760_v59 = vld [vmem:[#allocation8 + $0x21e0] ss:$52 sps:$4 sm:$0xff]  }
 0x5a9   :  { %11164 = vmatpush1.bf16.msra.mxu0 %v16706_v32  ;;  %11140 = vmatprep.subr.bf16.mxu1 %v16711_v44  ;;  %v16757_v32 = vld [vmem:[#allocation8 + $0x1ea0] ss:$52 sps:$4 sm:$0xff]   ;;  %v16768_v44 = vld [vmem:[#allocation8 + $0x217c] ss:$52 sps:$4 sm:$0xff]  }
 0x5aa   :  { %11165 = vmatprep.subr.bf16.mxu0 %v16714_v45  ;;  %v16765_v45 = vld [vmem:[#allocation8 + $0x1e3c] ss:$52 sps:$4 sm:$0xff]  }
 0x5ac   :  { %11141 = vmatpush2.bf16.msra.mxu1 %v16709_v48  ;;  %v16766_v48 = vld [vmem:[#allocation8 + $0x2178] ss:$52 sps:$4 sm:$0xff]  }
 0x5ad   :  { %11166 = vmatpush1.bf16.msra.mxu0 %v16712_v43  ;;  %11142 = vmatprep.subr.bf16.mxu1 %v16717_v60  ;;  %v16763_v43 = vld [vmem:[#allocation8 + $0x1e38] ss:$52 sps:$4 sm:$0xff]   ;;  %v16774_v60 = vld [vmem:[#allocation8 + $0x2114] ss:$52 sps:$4 sm:$0xff]  }
 0x5ae   :  { %11167 = vmatprep.subr.bf16.mxu0 %v16720_v61  ;;  %v16771_v61 = vld [vmem:[#allocation8 + $0x1dd4] ss:$52 sps:$4 sm:$0xff]  }
 0x5b0   :  { %11143 = vmatpush2.bf16.msra.mxu1 %v16715_v62  ;;  %v16772_v62 = vld [vmem:[#allocation8 + $0x2110] ss:$52 sps:$4 sm:$0xff]  }
 0x5b1   :  { %11168 = vmatpush1.bf16.msra.mxu0 %v16718_v46  ;;  %11144 = vmatprep.subr.bf16.mxu1 %v16723_v58  ;;  %v16769_v46 = vld [vmem:[#allocation8 + $0x1dd0] ss:$52 sps:$4 sm:$0xff]   ;;  %v16780_v58 = vld [vmem:[#allocation8 + $0x20ac] ss:$52 sps:$4 sm:$0xff]  }
 0x5b2   :  { %11169 = vmatprep.subr.bf16.mxu0 %v16726_v31  ;;  %v16777_v31 = vld [vmem:[#allocation8 + $0x1d6c] ss:$52 sps:$4 sm:$0xff]  }
 0x5b4   :  { %11145 = vmatpush2.bf16.msra.mxu1 %v16721_v19  ;;  %v16778_v19 = vld [vmem:[#allocation8 + $0x20a8] ss:$52 sps:$4 sm:$0xff]  }
 0x5b5   :  { %11170 = vmatpush1.bf16.msra.mxu0 %v16724_v5  ;;  %11146 = vmatprep.subr.bf16.mxu1 %v16729_v6  ;;  %v16775_v5 = vld [vmem:[#allocation8 + $0x1d68] ss:$52 sps:$4 sm:$0xff]   ;;  %v16783_v6 = vld [vmem:[#allocation8 + $0x26c4] ss:$52 sps:$4 sm:$0xff]  }
 0x5b6   :  { %11171 = vmatprep.subr.bf16.mxu0 %v16732_v8  ;;  %v16786_v8 = vld [vmem:[#allocation8 + $0x2a04] ss:$52 sps:$4 sm:$0xff]  }
 0x5b8   :  { %11147 = vmatpush2.bf16.msra.mxu1 %v16727_v11  ;;  %v16781_v11 = vld [vmem:[#allocation8 + $0x26c0] ss:$52 sps:$4 sm:$0xff]  }
 0x5b9   :  { %11172 = vmatpush1.bf16.msra.mxu0 %v16730_v3  ;;  %11198 = vmatprep.subr.bf16.mxu1 %v16738_v2  ;;  %v16784_v3 = vld [vmem:[#allocation8 + $0x2a00] ss:$52 sps:$4 sm:$0xff]   ;;  %v16789_v2 = vld [vmem:[#allocation8 + $0x265c] ss:$52 sps:$4 sm:$0xff]  }
 0x5ba   :  { %11173 = vmatprep.subr.bf16.mxu0 %v16735_v9  ;;  %v16792_v9 = vld [vmem:[#allocation8 + $0x299c] ss:$52 sps:$4 sm:$0xff]  }
 0x5bb   :  { %11149 = vmatmul.mubr.bf16.vlgmr.msra.gmra.mxu1 %v17455_v21 }
 0x5bc   :  { %11199 = vmatpush1.bf16.msra.mxu1 %v16736_v53  ;;  %11230 = vmatprep.mubr.bf16.mxu1 %v17461_v29 }
 0x5bd   :  { %11174 = vmatpush2.bf16.msra.mxu0 %v16733_v20  ;;  %11200 = vmatprep.subr.bf16.mxu1 %v16744_v50 }
 0x5be   :  { %11175 = vmatprep.subr.bf16.mxu0 %v16741_v40  ;;  %v16787_v40 = vld [vmem:[#allocation8 + $0x2658] ss:$52 sps:$4 sm:$0xff]  }
 0x5c0   :  { %11201 = vmatpush1.bf16.msra.mxu1 %v16742_v24 }
 0x5c1   :  { %11176 = vmatpush2.bf16.msra.mxu0 %v16739_v4  ;;  %11202 = vmatprep.subr.bf16.mxu1 %v16750_v22  ;;  %v16790_v4 = vld [vmem:[#allocation8 + $0x2998] ss:$52 sps:$4 sm:$0xff]   ;;  %v16795_v22 = vld [vmem:[#allocation8 + $0x25f4] ss:$52 sps:$4 sm:$0xff]  }
 0x5c2   :  { %11177 = vmatprep.subr.bf16.mxu0 %v16747_v42 }
 0x5c4   :  { %11203 = vmatpush1.bf16.msra.mxu1 %v16748_v7 }
 0x5c5   :  { %11178 = vmatpush2.bf16.msra.mxu0 %v16745_v35  ;;  %11204 = vmatprep.subr.bf16.mxu1 %v16756_v25  ;;  %v16798_v25 = vld [vmem:[#allocation8 + $0x2934] ss:$52 sps:$4 sm:$0xff]  }
 0x5c6   :  { %11179 = vmatprep.subr.bf16.mxu0 %v16753_v23 }
 0x5c8   :  { %11205 = vmatpush1.bf16.msra.mxu1 %v16754_v30 }
 0x5c9   :  { %11180 = vmatpush2.bf16.msra.mxu0 %v16751_v37  ;;  %11206 = vmatprep.subr.bf16.mxu1 %v16762_v41  ;;  %v16793_v37 = vld [vmem:[#allocation8 + $0x25f0] ss:$52 sps:$4 sm:$0xff]  }
 0x5ca   :  { %11181 = vmatprep.subr.bf16.mxu0 %v16759_v38  ;;  %v16796_v38 = vld [vmem:[#allocation8 + $0x2930] ss:$52 sps:$4 sm:$0xff]  }
 0x5cc   :  { %11207 = vmatpush1.bf16.msra.mxu1 %v16760_v59  ;;  %v16801_v59 = vld [vmem:[#allocation8 + $0x258c] ss:$52 sps:$4 sm:$0xff]  }
 0x5cd   :  { %11182 = vmatpush2.bf16.msra.mxu0 %v16757_v32  ;;  %11208 = vmatprep.subr.bf16.mxu1 %v16768_v44  ;;  %v16804_v44 = vld [vmem:[#allocation8 + $0x28cc] ss:$52 sps:$4 sm:$0xff]  }
 0x5ce   :  { %11183 = vmatprep.subr.bf16.mxu0 %v16765_v45  ;;  %v16802_v45 = vld [vmem:[#allocation8 + $0x28c8] ss:$52 sps:$4 sm:$0xff]  }
 0x5d0   :  { %11209 = vmatpush1.bf16.msra.mxu1 %v16766_v48  ;;  %v16810_v48 = vld [vmem:[#allocation8 + $0x2864] ss:$52 sps:$4 sm:$0xff]  }
 0x5d1   :  { %11184 = vmatpush2.bf16.msra.mxu0 %v16763_v43  ;;  %11210 = vmatprep.subr.bf16.mxu1 %v16774_v60  ;;  %v16805_v43 = vld [vmem:[#allocation8 + $0x2520] ss:$52 sps:$4 sm:$0xff]  }
 0x5d2   :  { %11185 = vmatprep.subr.bf16.mxu0 %v16771_v61  ;;  %v16808_v60 = vld [vmem:[#allocation8 + $0x2860] ss:$52 sps:$4 sm:$0xff]   ;;  %v16813_v61 = vld [vmem:[#allocation8 + $0x24bc] ss:$52 sps:$4 sm:$0xff]  }
 0x5d4   :  { %11211 = vmatpush1.bf16.msra.mxu1 %v16772_v62  ;;  %v16816_v62 = vld [vmem:[#allocation8 + $0x27fc] ss:$52 sps:$4 sm:$0xff]  }
 0x5d5   :  { %11186 = vmatpush2.bf16.msra.mxu0 %v16769_v46  ;;  %11212 = vmatprep.subr.bf16.mxu1 %v16780_v58  ;;  %v16811_v46 = vld [vmem:[#allocation8 + $0x24b8] ss:$52 sps:$4 sm:$0xff]  }
 0x5d6   :  { %11187 = vmatprep.subr.bf16.mxu0 %v16777_v31  ;;  %v16814_v58 = vld [vmem:[#allocation8 + $0x27f8] ss:$52 sps:$4 sm:$0xff]   ;;  %v16819_v31 = vld [vmem:[#allocation8 + $0x2454] ss:$52 sps:$4 sm:$0xff]  }
 0x5d8   :  { %11213 = vmatpush1.bf16.msra.mxu1 %v16778_v19  ;;  %v16822_v19 = vld [vmem:[#allocation8 + $0x2794] ss:$52 sps:$4 sm:$0xff]  }
 0x5d9   :  { %11188 = vmatpush2.bf16.msra.mxu0 %v16775_v5  ;;  %11214 = vmatprep.subr.bf16.mxu1 %v16783_v6  ;;  %v16817_v5 = vld [vmem:[#allocation8 + $0x2450] ss:$52 sps:$4 sm:$0xff]  }
 0x5da   :  { %11239 = vmatprep.subr.bf16.mxu0 %v16786_v8  ;;  %v16820_v6 = vld [vmem:[#allocation8 + $0x2790] ss:$52 sps:$4 sm:$0xff]   ;;  %v16825_v8 = vld [vmem:[#allocation8 + $0x23ec] ss:$52 sps:$4 sm:$0xff]  }
 0x5db   :  { %v10904_v53 = vpop.f32.mrf.mxu1 }
 0x5dc   :  { %v10905_v20 = vadd.f32 %v10904_v53, %v17682_v55  ;;  %v10945_v50 = vpop.f32.mrf.mxu0  ;;  %11190 = vmatmul.mubr.bf16.vlgmr.msra.gmra.mxu0 %v17479_v63  ;;  %11215 = vmatpush2.bf16.msra.mxu1 %v16781_v11  ;;  %v16828_v11 = vld [vmem:[#allocation8 + $0x272c] ss:$52 sps:$4 sm:$0xff]   ;;  %v16830_v53 = vld [vmem:[#allocation8 + $0xcc8] ss:$52 sps:$4 sm:$0xff]  }
 0x5dd   :  { %11240 = vmatpush1.bf16.msra.mxu0 %v16784_v3  ;;  %v10906_v24 = vpop.f32.mrf.mxu1  ;;  %11216 = vmatprep.subr.bf16.mxu1 %v16789_v2  ;;  %v16823_v3 = vld [vmem:[#allocation8 + $0x23e8] ss:$52 sps:$4 sm:$0xff]  }
 0x5de   :  { %v17691_v42 = vadd.f32 %v10945_v50, %v10905_v20  ;;  %v10907_v7 = vadd.f32 %v10906_v24, %v17685_v33  ;;  %v10947_v35 = vpop.f32.mrf.mxu0  ;;  %11241 = vmatprep.subr.bf16.mxu0 %v16792_v9  ;;  %11271 = vmatprep.mubr.bf16.mxu0 %v17274_v0  ;;  %v16799_v33 = vld [vmem:[#allocation8 + $0x2588] ss:$52 sps:$4 sm:$0xff]   ;;  %v16807_v0 = vld [vmem:[#allocation8 + $0x2524] ss:$52 sps:$4 sm:$0xff]  }
 0x5df   :  { %v10908_v55 = vpop.f32.mrf.mxu1  ;;  %v16826_v2 = vld [vmem:[#allocation8 + $0x2728] ss:$52 sps:$4 sm:$0xff]  }
 0x5e0   :  { %v17695_v23 = vadd.f32 %v10947_v35, %v10907_v7  ;;  %v10949_v30 = vpop.f32.mrf.mxu0  ;;  %11217 = vmatpush2.bf16.msra.mxu1 %v16787_v40  ;;  %v16829_v9 = vld [vmem:[#allocation8 + $0x648] ss:$52 sps:$4 sm:$0xff]   ;;  %v16833_v40 = vld [vmem:[#allocation8 + $0x5e0] ss:$52 sps:$4 sm:$0xff]   ;;  %v16837_v55 = vld [vmem:[#allocation8 + $0x578] ss:$52 sps:$4 sm:$0xff]  }
 0x5e1   :  { %11242 = vmatpush1.bf16.msra.mxu0 %v16790_v4  ;;  %v10909_v41 = vpop.f32.mrf.mxu1  ;;  %11218 = vmatprep.subr.bf16.mxu1 %v16795_v22  ;;  %v16831_v20 = vld [vmem:[#allocation8 + $0x308] ss:$52 sps:$4 sm:$0xff]   ;;  %v16834_v4 = vld [vmem:[#allocation8 + $0xc60] ss:$52 sps:$4 sm:$0xff]  }
 0x5e2   :  { %v10950_v32 = vpop.f32.mrf.mxu0  ;;  %11243 = vmatprep.subr.bf16.mxu0 %v16798_v25  ;;  %v16832_v50 = vld [vmem:[#allocation8 + $0x988] ss:$52 sps:$4 sm:$0xff]   ;;  %v16835_v7 = vld [vmem:[#allocation8 + $0x2a0] ss:$52 sps:$4 sm:$0xff]  }
 0x5e3   :  { %v16836_v25 = vld [vmem:[#allocation8 + $0x920] ss:$52 sps:$4 sm:$0xff]   ;;  %v16842_v32 = vld [vmem:[#allocation8 + $0xb90] ss:$52 sps:$4 sm:$0xff]  }
 0x5e4   :  { %11219 = vmatpush2.bf16.msra.mxu1 %v16793_v37  ;;  %v16838_v37 = vld [vmem:[#allocation8 + $0xbf8] ss:$52 sps:$4 sm:$0xff]  }
 0x5e5   :  { %11244 = vmatpush1.bf16.msra.mxu0 %v16796_v38  ;;  %11220 = vmatprep.subr.bf16.mxu1 %v16801_v59  ;;  %v16840_v59 = vld [vmem:[#allocation8 + $0x8b8] ss:$52 sps:$4 sm:$0xff]  }
 0x5e6   :  { %11245 = vmatprep.subr.bf16.mxu0 %v16804_v44  ;;  %v16843_v44 = vld [vmem:[#allocation8 + $0x1d0] ss:$52 sps:$4 sm:$0xff]  }
 0x5e8   :  { %11221 = vmatpush2.bf16.msra.mxu1 %v16799_v33  ;;  %v16846_v33 = vld [vmem:[#allocation8 + $0xb28] ss:$52 sps:$4 sm:$0xff]  }
 0x5e9   :  { %11246 = vmatpush1.bf16.msra.mxu0 %v16802_v45  ;;  %11222 = vmatprep.subr.bf16.mxu1 %v16807_v0  ;;  %v16847_v45 = vld [vmem:[#allocation8 + $0x168] ss:$52 sps:$4 sm:$0xff]  }
 0x5ea   :  { %11247 = vmatprep.subr.bf16.mxu0 %v16810_v48  ;;  %v16848_v0 = vld [vmem:[#allocation8 + $0x7e8] ss:$52 sps:$4 sm:$0xff]   ;;  %v16849_v48 = vld [vmem:[#allocation8 + $0x440] ss:$52 sps:$4 sm:$0xff]  }
 0x5ec   :  { %11223 = vmatpush2.bf16.msra.mxu1 %v16805_v43  ;;  %v16850_v43 = vld [vmem:[#allocation8 + $0xac0] ss:$52 sps:$4 sm:$0xff]  }
 0x5ed   :  { %11248 = vmatpush1.bf16.msra.mxu0 %v16808_v60  ;;  %11224 = vmatprep.subr.bf16.mxu1 %v16813_v61  ;;  %v16851_v60 = vld [vmem:[#allocation8 + $0x100] ss:$52 sps:$4 sm:$0xff]  }
 0x5ee   :  { %11249 = vmatprep.subr.bf16.mxu0 %v16816_v62  ;;  %v16852_v61 = vld [vmem:[#allocation8 + $0x780] ss:$52 sps:$4 sm:$0xff]   ;;  %v16853_v62 = vld [vmem:[#allocation8 + $0x3d8] ss:$52 sps:$4 sm:$0xff]  }
 0x5f0   :  { %11225 = vmatpush2.bf16.msra.mxu1 %v16811_v46  ;;  %v16854_v46 = vld [vmem:[#allocation8 + $0xa58] ss:$52 sps:$4 sm:$0xff]  }
 0x5f1   :  { %11250 = vmatpush1.bf16.msra.mxu0 %v16814_v58  ;;  %11226 = vmatprep.subr.bf16.mxu1 %v16819_v31  ;;  %v16855_v58 = vld [vmem:[#allocation8 + $0x98] ss:$52 sps:$4 sm:$0xff]  }
 0x5f2   :  { %11251 = vmatprep.subr.bf16.mxu0 %v16822_v19  ;;  %v16856_v31 = vld [vmem:[#allocation8 + $0x718] ss:$52 sps:$4 sm:$0xff]   ;;  %v16857_v19 = vld [vmem:[#allocation8 + $0x370] ss:$52 sps:$4 sm:$0xff]  }
 0x5f4   :  { %11227 = vmatpush2.bf16.msra.mxu1 %v16817_v5  ;;  %v16858_v5 = vld [vmem:[#allocation8 + $0x9f0] ss:$52 sps:$4 sm:$0xff]  }
 0x5f5   :  { %11252 = vmatpush1.bf16.msra.mxu0 %v16820_v6  ;;  %11228 = vmatprep.subr.bf16.mxu1 %v16825_v8  ;;  %v16859_v6 = vld [vmem:[#allocation8 + $0x30] ss:$52 sps:$4 sm:$0xff]  }
 0x5f6   :  { %11253 = vmatprep.subr.bf16.mxu0 %v16828_v11  ;;  %v16860_v8 = vld [vmem:[#allocation8 + $0x6b0] ss:$52 sps:$4 sm:$0xff]   ;;  %v16861_v11 = vld [vmem:[#allocation8 + $0x1348] ss:$52 sps:$4 sm:$0xff]  }
 0x5f8   :  { %11229 = vmatpush2.bf16.msra.mxu1 %v16823_v3  ;;  %v16862_v3 = vld [vmem:[#allocation8 + $0x19c8] ss:$52 sps:$4 sm:$0xff]  }
 0x5f9   :  { %11254 = vmatpush1.bf16.msra.mxu0 %v16826_v2  ;;  %14417 = vmatprep.subr.bf16.mxu1 %v16829_v9  ;;  %v16863_v2 = vld [vmem:[#allocation8 + $0x1008] ss:$52 sps:$4 sm:$0xff]  }
 0x5fa   :  { %14439 = vmatprep.subr.bf16.mxu0 %v16830_v53  ;;  %v16864_v9 = vld [vmem:[#allocation8 + $0x1688] ss:$52 sps:$4 sm:$0xff]   ;;  %v16865_v53 = vld [vmem:[#allocation8 + $0x12e0] ss:$52 sps:$4 sm:$0xff]  }
 0x5fb   :  { %v10986_v24 = vpop.f32.mrf.mxu1  ;;  %11231 = vmatmul.mubr.bf16.vlgmr.msra.gmra.mxu1 %v17477_v13 }
 0x5fc   :  { %v17699_v22 = vadd.f32 %v10986_v24, %v17691_v42  ;;  %11272 = vmatmul.mubr.bf16.vlgmr.msra.gmra.mxu0 %v17486_v47  ;;  %14418 = vmatpush3.bf16.msra.mxu1 %v16831_v20  ;;  %v16839_v42 = vld [vmem:[#allocation8 + $0x238] ss:$52 sps:$4 sm:$0xff]   ;;  %v16866_v20 = vld [vmem:[#allocation8 + $0x1960] ss:$52 sps:$4 sm:$0xff]  }
 0x5fd   :  { %11312 = vmatprep.mubr.bf16.mxu1 %v17406_v16  ;;  %14440 = vmatpush3.bf16.msra.mxu0 %v16832_v50  ;;  %v10988_v35 = vpop.f32.mrf.mxu1  ;;  %v16841_v16 = vld [vmem:[#allocation8 + $0x510] ss:$52 sps:$4 sm:$0xff]   ;;  %v16868_v24 = vld [vmem:[#allocation8 + $0x1620] ss:$52 sps:$4 sm:$0xff]  }
 0x5fe   :  { %11352 = vmatprep.mubr.bf16.mxu0 %v17408_v17  ;;  %v17705_v30 = vadd.f32 %v10988_v35, %v17695_v23  ;;  %14419 = vmatprep.subr.bf16.mxu1 %v16833_v40  ;;  %v16844_v17 = vld [vmem:[#allocation8 + $0x850] ss:$52 sps:$4 sm:$0xff]   ;;  %v16845_v23 = vld [vmem:[#allocation8 + $0x4a8] ss:$52 sps:$4 sm:$0xff]   ;;  %v16867_v40 = vld [vmem:[#allocation8 + $0xfa0] ss:$52 sps:$4 sm:$0xff]  }
 0x5ff   :  { %v10990_v41 = vpop.f32.mrf.mxu1  ;;  %14441 = vmatprep.subr.bf16.mxu0 %v16834_v4  ;;  %v16869_v4 = vld [vmem:[#allocation8 + $0x1278] ss:$52 sps:$4 sm:$0xff]  }
 0x600   :  { %14420 = vmatpush3.bf16.msra.mxu1 %v16835_v7  ;;  %v16870_v35 = vld [vmem:[#allocation8 + $0x18f8] ss:$52 sps:$4 sm:$0xff]   ;;  %v16875_v41 = vld [vmem:[#allocation8 + $0xed0] ss:$52 sps:$4 sm:$0xff]  }
 0x601   :  { %14442 = vmatpush3.bf16.msra.mxu0 %v16836_v25  ;;  %v10991_v38 = vpop.f32.mrf.mxu1  ;;  %14421 = vmatprep.subr.bf16.mxu1 %v16837_v55  ;;  %v16871_v25 = vld [vmem:[#allocation8 + $0xf38] ss:$52 sps:$4 sm:$0xff]   ;;  %v16873_v55 = vld [vmem:[#allocation8 + $0x1210] ss:$52 sps:$4 sm:$0xff]  }
 0x602   :  { %14443 = vmatprep.subr.bf16.mxu0 %v16838_v37  ;;  %v16878_v38 = vld [vmem:[#allocation8 + $0x1828] ss:$52 sps:$4 sm:$0xff]  }
 0x604   :  { %14422 = vmatpush3.bf16.msra.mxu1 %v16839_v42  ;;  %v16877_v42 = vld [vmem:[#allocation8 + $0x11a8] ss:$52 sps:$4 sm:$0xff]  }
 0x605   :  { %14444 = vmatpush3.bf16.msra.mxu0 %v16840_v59  ;;  %14423 = vmatprep.subr.bf16.mxu1 %v16841_v16  ;;  %v16879_v59 = vld [vmem:[#allocation8 + $0xe68] ss:$52 sps:$4 sm:$0xff]  }
 0x606   :  { %14445 = vmatprep.subr.bf16.mxu0 %v16842_v32  ;;  %v16880_v16 = vld [vmem:[#allocation8 + $0x14e8] ss:$52 sps:$4 sm:$0xff]   ;;  %v16881_v32 = vld [vmem:[#allocation8 + $0x1140] ss:$52 sps:$4 sm:$0xff]  }
 0x608   :  { %14424 = vmatpush3.bf16.msra.mxu1 %v16843_v44  ;;  %v16882_v44 = vld [vmem:[#allocation8 + $0x17c0] ss:$52 sps:$4 sm:$0xff]  }
 0x609   :  { %14446 = vmatpush3.bf16.msra.mxu0 %v16844_v17  ;;  %14425 = vmatprep.subr.bf16.mxu1 %v16845_v23  ;;  %v16883_v17 = vld [vmem:[#allocation8 + $0xe00] ss:$52 sps:$4 sm:$0xff]  }
 0x60a   :  { %14447 = vmatprep.subr.bf16.mxu0 %v16846_v33  ;;  %v16884_v23 = vld [vmem:[#allocation8 + $0x1480] ss:$52 sps:$4 sm:$0xff]   ;;  %v16885_v33 = vld [vmem:[#allocation8 + $0x10d8] ss:$52 sps:$4 sm:$0xff]  }
 0x60c   :  { %14426 = vmatpush3.bf16.msra.mxu1 %v16847_v45  ;;  %v16886_v45 = vld [vmem:[#allocation8 + $0x1758] ss:$52 sps:$4 sm:$0xff]  }
 0x60d   :  { %14448 = vmatpush3.bf16.msra.mxu0 %v16848_v0  ;;  %14427 = vmatprep.subr.bf16.mxu1 %v16849_v48  ;;  %v16887_v0 = vld [vmem:[#allocation8 + $0xd98] ss:$52 sps:$4 sm:$0xff]  }
 0x60e   :  { %14449 = vmatprep.subr.bf16.mxu0 %v16850_v43  ;;  %v16888_v48 = vld [vmem:[#allocation8 + $0x1418] ss:$52 sps:$4 sm:$0xff]   ;;  %v16889_v43 = vld [vmem:[#allocation8 + $0x1070] ss:$52 sps:$4 sm:$0xff]  }
 0x610   :  { %14428 = vmatpush3.bf16.msra.mxu1 %v16851_v60  ;;  %v16890_v60 = vld [vmem:[#allocation8 + $0x16f0] ss:$52 sps:$4 sm:$0xff]  }
 0x611   :  { %14450 = vmatpush3.bf16.msra.mxu0 %v16852_v61  ;;  %14429 = vmatprep.subr.bf16.mxu1 %v16853_v62  ;;  %v16891_v61 = vld [vmem:[#allocation8 + $0xd30] ss:$52 sps:$4 sm:$0xff]  }
 0x612   :  { %14451 = vmatprep.subr.bf16.mxu0 %v16854_v46  ;;  %v16892_v62 = vld [vmem:[#allocation8 + $0x13b0] ss:$52 sps:$4 sm:$0xff]   ;;  %v16893_v46 = vld [vmem:[#allocation8 + $0x2048] ss:$52 sps:$4 sm:$0xff]  }
 0x614   :  { %14430 = vmatpush3.bf16.msra.mxu1 %v16855_v58  ;;  %v17715_v58 = vld [vmem:[#allocation10 + $0x8] sm:$0x1f] }
 0x615   :  { %14452 = vmatpush3.bf16.msra.mxu0 %v16856_v31  ;;  %14431 = vmatprep.subr.bf16.mxu1 %v16857_v19  ;;  %v2672_v31 = vrot.slane %v17715_v58, %v17388_v54  ;;  %v16894_v19 = vld [vmem:[#allocation8 + $0x26c8] ss:$52 sps:$4 sm:$0xff]  }
 0x616   :  { %14453 = vmatprep.subr.bf16.mxu0 %v16858_v5  ;;  %v2676_v5 = vrot.slane %v17715_v58, %v17394_v56  ;;  %v16899_v56 = vld [vmem:[#allocation8 + $0x1ca0] ss:$52 sps:$4 sm:$0xff]  }
 0x618   :  { %14432 = vmatpush3.bf16.msra.mxu1 %v16859_v6  ;;  %v16895_v6 = vld [vmem:[#allocation8 + $0x1d08] ss:$52 sps:$4 sm:$0xff]  }
 0x619   :  { %14454 = vmatpush3.bf16.msra.mxu0 %v16860_v8  ;;  %14461 = vmatprep.subr.bf16.mxu1 %v16861_v11  ;;  %v16896_v8 = vld [vmem:[#allocation8 + $0x2388] ss:$52 sps:$4 sm:$0xff]  }
 0x61a   :  { %14483 = vmatprep.subr.bf16.mxu0 %v16862_v3  ;;  %v16897_v3 = vld [vmem:[#allocation8 + $0x1fe0] ss:$52 sps:$4 sm:$0xff]  }
 0x61b   :  { %11313 = vmatmul.mubr.bf16.vlgmr.msra.gmra.mxu1 %v17410_v18 }
 0x61c   :  { %v17708_v50 = vpop.f32.mrf.mxu0  ;;  %11353 = vmatmul.mubr.bf16.vlgmr.msra.gmra.mxu0 %v17404_v14  ;;  %14462 = vmatpush3.bf16.msra.mxu1 %v16863_v2  ;;  %v16872_v14 = vld [vmem:[#allocation8 + $0x15b8] ss:$52 sps:$4 sm:$0xff]  }
 0x61d   :  { %11392 = vmatprep.mubr.bf16.mxu1 %v17428_v15  ;;  %14484 = vmatpush3.bf16.msra.mxu0 %v16864_v9  ;;  %v16874_v15 = vld [vmem:[#allocation8 + $0x1890] ss:$52 sps:$4 sm:$0xff]   ;;  %v11028_v11 = vadd.f32 %v17708_v50, %v2672_v31  ;;  %v16898_v9 = vld [vmem:[#allocation8 + $0x2660] ss:$52 sps:$4 sm:$0xff]   ;;  %v16901_v50 = vld [vmem:[#allocation8 + $0x1f78] ss:$52 sps:$4 sm:$0xff]  }
 0x61e   :  { %11432 = vmatprep.mubr.bf16.mxu0 %v17430_v36  ;;  %v17713_v7 = vpop.f32.mrf.mxu0  ;;  %14463 = vmatprep.subr.bf16.mxu1 %v16865_v53  ;;  %v16876_v36 = vld [vmem:[#allocation8 + $0x1550] ss:$52 sps:$4 sm:$0xff]   ;;  %v16929_v31 = vld [vmem:[#allocation8 + $0x29a0] ss:$52 sps:$4 sm:$0xff]  }
 0x61f   :  { %14485 = vmatprep.subr.bf16.mxu0 %v16866_v20  ;;  %v11030_v54 = vadd.f32 %v17713_v7, %v2676_v5  ;;  %v16903_v7 = vld [vmem:[#allocation8 + $0x1c38] ss:$52 sps:$4 sm:$0xff]  }
 0x620   :  { %v11031_v18 = vpop.f32.mrf.mxu0  ;;  %14464 = vmatpush3.bf16.msra.mxu1 %v16867_v40  ;;  %v16900_v40 = vld [vmem:[#allocation8 + $0x2320] ss:$52 sps:$4 sm:$0xff]  }
 0x621   :  { %14486 = vmatpush3.bf16.msra.mxu0 %v16868_v24  ;;  %14465 = vmatprep.subr.bf16.mxu1 %v16869_v4  ;;  %v16905_v18 = vld [vmem:[#allocation8 + $0x1f10] ss:$52 sps:$4 sm:$0xff]  }
 0x622   :  { %v11032_v37 = vpop.f32.mrf.mxu0  ;;  %14487 = vmatprep.subr.bf16.mxu0 %v16870_v35  ;;  %v16904_v35 = vld [vmem:[#allocation8 + $0x22b8] ss:$52 sps:$4 sm:$0xff]  }
 0x623   :  { %v16911_v37 = vld [vmem:[#allocation8 + $0x1b68] ss:$52 sps:$4 sm:$0xff]  }
 0x624   :  { %14466 = vmatpush3.bf16.msra.mxu1 %v16871_v25  ;;  %v16907_v25 = vld [vmem:[#allocation8 + $0x1bd0] ss:$52 sps:$4 sm:$0xff]  }
 0x625   :  { %14488 = vmatpush3.bf16.msra.mxu0 %v16872_v14  ;;  %14467 = vmatprep.subr.bf16.mxu1 %v16873_v55  ;;  %v16909_v14 = vld [vmem:[#allocation8 + $0x1ea8] ss:$52 sps:$4 sm:$0xff]  }
 0x626   :  { %14489 = vmatprep.subr.bf16.mxu0 %v16874_v15  ;;  %v16910_v55 = vld [vmem:[#allocation8 + $0x2528] ss:$52 sps:$4 sm:$0xff]  }
 0x627   :  { %v16912_v15 = vld [vmem:[#allocation8 + $0x21e8] ss:$52 sps:$4 sm:$0xff]  }
 0x628   :  { %14468 = vmatpush3.bf16.msra.mxu1 %v16875_v41  ;;  %v16913_v41 = vld [vmem:[#allocation8 + $0x1e40] ss:$52 sps:$4 sm:$0xff]  }
 0x629   :  { %14490 = vmatpush3.bf16.msra.mxu0 %v16876_v36  ;;  %14469 = vmatprep.subr.bf16.mxu1 %v16877_v42  ;;  %v16914_v36 = vld [vmem:[#allocation8 + $0x24c0] ss:$52 sps:$4 sm:$0xff]  }
 0x62a   :  { %14491 = vmatprep.subr.bf16.mxu0 %v16878_v38  ;;  %v16915_v42 = vld [vmem:[#allocation8 + $0x1b00] ss:$52 sps:$4 sm:$0xff]  }
 0x62b   :  { %v16916_v38 = vld [vmem:[#allocation8 + $0x2180] ss:$52 sps:$4 sm:$0xff]  }
 0x62c   :  { %14470 = vmatpush3.bf16.msra.mxu1 %v16879_v59  ;;  %v16917_v59 = vld [vmem:[#allocation8 + $0x1dd8] ss:$52 sps:$4 sm:$0xff]  }
 0x62d   :  { %14492 = vmatpush3.bf16.msra.mxu0 %v16880_v16  ;;  %14471 = vmatprep.subr.bf16.mxu1 %v16881_v32  ;;  %v16918_v16 = vld [vmem:[#allocation8 + $0x2458] ss:$52 sps:$4 sm:$0xff]  }
 0x62e   :  { %14493 = vmatprep.subr.bf16.mxu0 %v16882_v44  ;;  %v16919_v32 = vld [vmem:[#allocation8 + $0x1a98] ss:$52 sps:$4 sm:$0xff]  }
 0x62f   :  { %v16920_v44 = vld [vmem:[#allocation8 + $0x2118] ss:$52 sps:$4 sm:$0xff]  }
 0x630   :  { %14472 = vmatpush3.bf16.msra.mxu1 %v16883_v17  ;;  %v16921_v17 = vld [vmem:[#allocation8 + $0x1d70] ss:$52 sps:$4 sm:$0xff]  }
 0x631   :  { %14494 = vmatpush3.bf16.msra.mxu0 %v16884_v23  ;;  %14473 = vmatprep.subr.bf16.mxu1 %v16885_v33  ;;  %v16922_v23 = vld [vmem:[#allocation8 + $0x23f0] ss:$52 sps:$4 sm:$0xff]  }
 0x632   :  { %14495 = vmatprep.subr.bf16.mxu0 %v16886_v45  ;;  %v16923_v33 = vld [vmem:[#allocation8 + $0x1a30] ss:$52 sps:$4 sm:$0xff]  }
 0x633   :  { %v16924_v45 = vld [vmem:[#allocation8 + $0x20b0] ss:$52 sps:$4 sm:$0xff]  }
 0x634   :  { %14474 = vmatpush3.bf16.msra.mxu1 %v16887_v0  ;;  %v16925_v0 = vld [vmem:[#allocation11 + $0x78] sm:$0xff]  }
 0x635   :  { %14496 = vmatpush3.bf16.msra.mxu0 %v16888_v48  ;;  %14475 = vmatprep.subr.bf16.mxu1 %v16889_v43  ;;  %v11561_v48 = vmax.f32 %v17526_v12, 0.0  ;;  %v16926_v43 = vld [vmem:[#allocation8 + $0x2a08] ss:$52 sps:$4 sm:$0xff]  }
 0x636   :  { %14497 = vmatprep.subr.bf16.mxu0 %v16890_v60  ;;  %v16927_v60 = vld [vmem:[#allocation11 + $0x38] sm:$0xff]   ;;  %v16930_v12 = vld [vmem:[#allocation11 + $0x30] sm:$0xff]  }
 0x638   :  { %14476 = vmatpush3.bf16.msra.mxu1 %v16891_v61  ;;  %v16928_v61 = vld [vmem:[#allocation11 + $0x70] sm:$0xff]  }
 0x639   :  { %14498 = vmatpush3.bf16.msra.mxu0 %v16892_v62  ;;  %14505 = vmatprep.subr.bf16.mxu1 %v16893_v46  ;;  %v11574_v62 = vpack.c.bf16 %v11561_v48, %v11561_v48  ;;  %v16962_v48 = vld [vmem:[#allocation11 + $0x160] sm:$0xff]  }
 0x63a   :  { %14527 = vmatprep.subr.bf16.mxu0 %v16894_v19 }
 0x63b   :  { %v11068_v2 = vpop.f32.mrf.mxu1  ;;  %11393 = vmatmul.mubr.bf16.vlgmr.msra.gmra.mxu1 %v17457_v26  ;;  %v16902_v26 = vld [vmem:[#allocation8 + $0x25f8] ss:$52 sps:$4 sm:$0xff]  }
 0x63c   :  { %v17724_v53 = vadd.f32 %v11068_v2, %v11028_v11  ;;  %11433 = vmatmul.mubr.bf16.vlgmr.msra.gmra.mxu0 %v17455_v21  ;;  %14506 = vmatpush3.bf16.msra.mxu1 %v16895_v6  ;;  %v16931_v6 = vld [vmem:[#allocation11 + $0x68] sm:$0xff]   ;;  %v16934_v2 = vld [vmem:[#allocation11 + $0x60] sm:$0xff]  }
 0x63d   :  { %11472 = vmatprep.mubr.bf16.mxu1 %v17459_v28  ;;  %14528 = vmatpush3.bf16.msra.mxu0 %v16896_v8  ;;  %v11070_v20 = vpop.f32.mrf.mxu1  ;;  %v16906_v28 = vld [vmem:[#allocation8 + $0x2590] ss:$52 sps:$4 sm:$0xff]   ;;  %v16933_v11 = vld [vmem:[#allocation11 + $0x28] sm:$0xff]  }
 0x63e   :  { %11512 = vmatprep.mubr.bf16.mxu0 %v17461_v29  ;;  %v17729_v24 = vadd.f32 %v11070_v20, %v11030_v54  ;;  %14507 = vmatprep.subr.bf16.mxu1 %v16897_v3  ;;  %v16908_v29 = vld [vmem:[#allocation8 + $0x2250] ss:$52 sps:$4 sm:$0xff]  }
 0x63f   :  { %v11072_v4 = vpop.f32.mrf.mxu1  ;;  %14529 = vmatprep.subr.bf16.mxu0 %v16898_v9  ;;  %v16935_v9 = vld [vmem:[#allocation8 + $0x28d0] ss:$52 sps:$4 sm:$0xff]  }
 0x640   :  { %14508 = vmatpush3.bf16.msra.mxu1 %v16899_v56  ;;  %v16936_v54 = vld [vmem:[#allocation11 + $0x20] sm:$0xff]   ;;  %v16938_v56 = vld [vmem:[#allocation8 + $0x2868] ss:$52 sps:$4 sm:$0xff]  }
 0x641   :  { %14530 = vmatpush3.bf16.msra.mxu0 %v16900_v40  ;;  %v11073_v21 = vpop.f32.mrf.mxu1  ;;  %14509 = vmatprep.subr.bf16.mxu1 %v16901_v50  ;;  %v16939_v20 = vld [vmem:[#allocation11 + $0x18] sm:$0xff]   ;;  %v16940_v40 = vld [vmem:[#allocation11 + $0x50] sm:$0xff]  }
 0x642   :  { %14531 = vmatprep.subr.bf16.mxu0 %v16902_v26  ;;  %v16941_v50 = vld [vmem:[#allocation8 + $0x2800] ss:$52 sps:$4 sm:$0xff]   ;;  %v16944_v4 = vld [vmem:[#allocation8 + $0x2798] ss:$52 sps:$4 sm:$0xff]  }
 0x643   :  { %v16943_v26 = vld [vmem:[#allocation11 + $0x48] sm:$0xff]   ;;  %v16946_v21 = vld [vmem:[#allocation11 + $0x40] sm:$0xff]  }
 0x644   :  { %14510 = vmatpush3.bf16.msra.mxu1 %v16903_v7  ;;  %v16945_v7 = vld [vmem:[#allocation11 + $0x8] sm:$0xff]  }
 0x645   :  { %14532 = vmatpush3.bf16.msra.mxu0 %v16904_v35  ;;  %14511 = vmatprep.subr.bf16.mxu1 %v16905_v18  ;;  %v16947_v35 = vld [vmem:[#allocation8 + $0x2730] ss:$52 sps:$4 sm:$0xff]  }
 0x646   :  { %14533 = vmatprep.subr.bf16.mxu0 %v16906_v28  ;;  %v16948_v18 = vld [vmem:[#allocation11] sm:$0xff]   ;;  %v16949_v28 = vld [vmem:[#allocation11 + $0xf8] sm:$0xff]  }
 0x648   :  { %14512 = vmatpush3.bf16.msra.mxu1 %v16907_v25  ;;  %v11560_v25 = vmax.f32 %v17521_v57, 0.0 }
 0x649   :  { %14534 = vmatpush3.bf16.msra.mxu0 %v16908_v29  ;;  %14513 = vmatprep.subr.bf16.mxu1 %v16909_v14  ;;  %v16950_v29 = vld [vmem:[#allocation11 + $0x178] sm:$0xff]   ;;  %v11563_v14 = vmax.f32 %v17574_v1, 0.0  ;;  %v16955_v1 = vld [vmem:[#allocation11 + $0xb0] sm:$0xff]  }
 0x64a   :  { %14535 = vmatprep.subr.bf16.mxu0 %v16910_v55  ;;  %v11565_v55 = vmax.f32 %v17615_v52, 0.0 }
 0x64c   :  { %14514 = vmatpush3.bf16.msra.mxu1 %v16911_v37  ;;  %v16951_v37 = vld [vmem:[#allocation11 + $0xb8] sm:$0xff]   ;;  %v11578_v57 = vpack.c.bf16 %v11565_v55, %v11565_v55  ;;  %v16990_v55 = vld [vmem:[#allocation11 + $0x268] sm:$0xff]  }
 0x64d   :  { %14536 = vmatpush3.bf16.msra.mxu0 %v16912_v15  ;;  %14515 = vmatprep.subr.bf16.mxu1 %v16913_v41  ;;  %v16952_v15 = vld [vmem:[#allocation11 + $0x138] sm:$0xff]   ;;  %v11573_v41 = vpack.c.bf16 %v11560_v25, %v11560_v25 }
 0x64e   :  { %14537 = vmatprep.subr.bf16.mxu0 %v16914_v36  ;;  %v16953_v36 = vld [vmem:[#allocation11 + $0xf0] sm:$0xff]  }
 0x650   :  { %14516 = vmatpush3.bf16.msra.mxu1 %v16915_v42  ;;  %v11576_v42 = vpack.c.bf16 %v11563_v14, %v11563_v14 }
 0x651   :  { %14538 = vmatpush3.bf16.msra.mxu0 %v16916_v38  ;;  %14517 = vmatprep.subr.bf16.mxu1 %v16917_v59  ;;  %v16954_v59 = vld [vmem:[#allocation11 + $0x170] sm:$0xff]  }
 0x652   :  { %14539 = vmatprep.subr.bf16.mxu0 %v16918_v16 }
 0x654   :  { %14518 = vmatpush3.bf16.msra.mxu1 %v16919_v32  ;;  %v16956_v32 = vld [vmem:[#allocation11 + $0x130] sm:$0xff]  }
 0x655   :  { %14540 = vmatpush3.bf16.msra.mxu0 %v16920_v44  ;;  %14519 = vmatprep.subr.bf16.mxu1 %v16921_v17  ;;  %v16957_v44 = vld [vmem:[#allocation11 + $0xe8] sm:$0xff]  }
 0x656   :  { %14541 = vmatprep.subr.bf16.mxu0 %v16922_v23  ;;  %v16958_v17 = vld [vmem:[#allocation11 + $0x168] sm:$0xff]  }
 0x658   :  { %14520 = vmatpush3.bf16.msra.mxu1 %v16923_v33 }
 0x659   :  { %14542 = vmatpush3.bf16.msra.mxu0 %v16924_v45  ;;  %14728 = vmatprep.subr.bf16.mxu1 %v17275_v39  ;;  %v16960_v45 = vld [vmem:[#allocation11 + $0x128] sm:$0xff]  }
 0x65a   :  { %14558 = vmatprep.subr.bf16.mxu0 %v16925_v0  ;;  %v16961_v0 = vld [vmem:[#allocation11 + $0xe0] sm:$0xff]  }
 0x65b   :  { %11473 = vmatmul.mubr.bf16.vlgmr.msra.gmra.mxu1 %v17479_v63  ;;  %v16932_v63 = vld [vmem:[#allocation8 + $0x2938] ss:$52 sps:$4 sm:$0xff]  }
 0x65c   :  { %v11109_v46 = vpop.f32.mrf.mxu0  ;;  %11513 = vmatmul.mubr.bf16.vlgmr.msra.gmra.mxu0 %v17477_v13  ;;  %14729 = vmatpush3.bf16.msra.mxu1 %v16926_v43  ;;  %v16963_v43 = vld [vmem:[#allocation11 + $0xa0] sm:$0xff]  }
 0x65d   :  { %v17736_v19 = vadd.f32 %v11109_v46, %v17724_v53  ;;  %14559 = vmatpush3.bf16.msra.mxu0 %v16927_v60  ;;  %12457 = vmatprep.mubr.bf16.mxu0 %v11574_v62  ;;  %v16937_v53 = vld [vmem:[#allocation11 + $0x58] sm:$0xff]   ;;  %v16964_v60 = vld [vmem:[#allocation11 + $0x120] sm:$0xff]  }
 0x65e   :  { %v11111_v5 = vpop.f32.mrf.mxu0  ;;  %14730 = vmatprep.subr.bf16.mxu1 %v17275_v39  ;;  %14560 = vmatprep.subr.bf16.mxu0 %v16928_v61  ;;  %v16965_v61 = vld [vmem:[#allocation11 + $0xd8] sm:$0xff]  }
 0x65f   :  { %v17740_v8 = vadd.f32 %v11111_v5, %v17729_v24  ;;  %14744 = vmatprep.mubr.msk.bf16.mxu1 %vm17276_vm0, %v17275_v39  ;;  %v16942_v24 = vld [vmem:[#allocation11 + $0x10] sm:$0xff]   ;;  %v16966_v62 = vld [vmem:[#allocation11 + $0x158] sm:$0xff]  }
 0x660   :  { %v11113_v13 = vpop.f32.mrf.mxu0  ;;  %14731 = vmatpush3.bf16.msra.mxu1 %v16929_v31  ;;  %v16967_v46 = vld [vmem:[#allocation11 + $0x98] sm:$0xff]   ;;  %v16971_v5 = vld [vmem:[#allocation11 + $0x90] sm:$0xff]  }
 0x661   :  { %14561 = vmatpush3.bf16.msra.mxu0 %v16930_v12  ;;  %14732 = vmatprep.subr.bf16.mxu1 %v17275_v39  ;;  %v16968_v31 = vld [vmem:[#allocation11 + $0x118] sm:$0xff]   ;;  %v16970_v12 = vld [vmem:[#allocation11 + $0x150] sm:$0xff]   ;;  %v16973_v13 = vld [vmem:[#allocation11 + $0xc8] sm:$0xff]  }
 0x662   :  { %v11114_v3 = vpop.f32.mrf.mxu0  ;;  %14562 = vmatprep.subr.bf16.mxu0 %v16931_v6  ;;  %v16972_v6 = vld [vmem:[#allocation11 + $0x110] sm:$0xff]  }
 0x663   :  { %v16976_v3 = vld [vmem:[#allocation11 + $0x108] sm:$0xff]  }
 0x664   :  { %14733 = vmatpush3.bf16.msra.mxu1 %v16932_v63  ;;  %v16974_v63 = vld [vmem:[#allocation11 + $0x148] sm:$0xff]  }
 0x665   :  { %14563 = vmatpush3.bf16.msra.mxu0 %v16933_v11  ;;  %14734 = vmatprep.subr.bf16.mxu1 %v17275_v39  ;;  %v16975_v11 = vld [vmem:[#allocation11 + $0x88] sm:$0xff]  }
 0x666   :  { %14564 = vmatprep.subr.bf16.mxu0 %v16934_v2  ;;  %v16977_v2 = vld [vmem:[#allocation11 + $0xc0] sm:$0xff]  }
 0x668   :  { %14735 = vmatpush3.bf16.msra.mxu1 %v16935_v9  ;;  %v16978_v9 = vld [vmem:[#allocation11 + $0x140] sm:$0xff]  }
 0x669   :  { %14565 = vmatpush3.bf16.msra.mxu0 %v16936_v54  ;;  %14736 = vmatprep.subr.bf16.mxu1 %v17275_v39  ;;  %v16979_v54 = vld [vmem:[#allocation11 + $0x80] sm:$0xff]  }
 0x66a   :  { %14566 = vmatprep.subr.bf16.mxu0 %v16937_v53  ;;  %v11562_v53 = vmax.f32 %v17570_v10, 0.0  ;;  %v16985_v10 = vld [vmem:[#allocation11 + $0x1f0] sm:$0xff]  }
 0x66c   :  { %14737 = vmatpush3.bf16.msra.mxu1 %v16938_v56  ;;  %v16980_v56 = vld [vmem:[#allocation11 + $0x100] sm:$0xff]  }
 0x66d   :  { %14567 = vmatpush3.bf16.msra.mxu0 %v16939_v20  ;;  %14738 = vmatprep.subr.bf16.mxu1 %v17275_v39  ;;  %v16981_v20 = vld [vmem:[#allocation11 + $0x1f8] sm:$0xff]  }
 0x66e   :  { %14568 = vmatprep.subr.bf16.mxu0 %v16940_v40  ;;  %v11564_v40 = vmax.f32 %v17609_v49, 0.0 }
 0x670   :  { %14739 = vmatpush3.bf16.msra.mxu1 %v16941_v50  ;;  %v16982_v50 = vld [vmem:[#allocation11 + $0x278] sm:$0xff]  }
 0x671   :  { %14569 = vmatpush3.bf16.msra.mxu0 %v16942_v24  ;;  %14740 = vmatprep.subr.bf16.mxu1 %v17275_v39  ;;  %v11567_v24 = vmax.f32 %v17665_v51, 0.0  ;;  %v16987_v51 = vld [vmem:[#allocation11 + $0x1b0] sm:$0xff]  }
 0x672   :  { %14570 = vmatprep.subr.bf16.mxu0 %v16943_v26  ;;  %v11569_v26 = vmax.f32 %v17705_v30, 0.0  ;;  %v16988_v30 = vld [vmem:[#allocation11 + $0x230] sm:$0xff]  }
 0x674   :  { %14741 = vmatpush3.bf16.msra.mxu1 %v16944_v4  ;;  %v16983_v4 = vld [vmem:[#allocation11 + $0x1b8] sm:$0xff]   ;;  %v11582_v25 = vpack.c.bf16 %v11569_v26, %v11569_v26  ;;  %v17018_v26 = vld [vmem:[#allocation11 + $0x2a8] sm:$0xff]  }
 0x675   :  { %14571 = vmatpush3.bf16.msra.mxu0 %v16945_v7  ;;  %14742 = vmatprep.subr.bf16.mxu1 %v17275_v39  ;;  %v11575_v7 = vpack.c.bf16 %v11562_v53, %v11562_v53 }
 0x676   :  { %14572 = vmatprep.subr.bf16.mxu0 %v16946_v21  ;;  %v16984_v21 = vld [vmem:[#allocation11 + $0x238] sm:$0xff]  }
 0x678   :  { %14743 = vmatpush3.bf16.msra.mxu1 %v16947_v35  ;;  %v11577_v35 = vpack.c.bf16 %v11564_v40, %v11564_v40 }
 0x679   :  { %14573 = vmatpush3.bf16.msra.mxu0 %v16948_v18  ;;  %14580 = vmatprep.subr.bf16.mxu1 %v16949_v28  ;;  %v11580_v18 = vpack.c.bf16 %v11567_v24, %v11567_v24  ;;  %v16986_v28 = vld [vmem:[#allocation11 + $0x270] sm:$0xff]  }
 0x67a   :  { %14602 = vmatprep.subr.bf16.mxu0 %v16950_v29  ;;  %v16989_v29 = vld [vmem:[#allocation11 + $0x1e8] sm:$0xff]  }
 0x67b   :  { %v11150_v38 = vpop.f32.mrf.mxu1  ;;  %14745 = vmatmul.mubr.bf16.vlgmr.msra.gmra.mxu1 %v17486_v47  ;;  %v16959_v47 = vld [vmem:[#allocation11 + $0xa8] sm:$0xff]  }
 0x67c   :  { %v17755_v16 = vadd.f32 %v11150_v38, %v17736_v19  ;;  %12458 = vmatmul.mubr.bf16.vlgmr.msra.gmra.mxu0 %v11573_v41  ;;  %14581 = vmatpush3.bf16.msra.mxu1 %v16951_v37  ;;  %v16969_v19 = vld [vmem:[#allocation11 + $0xd0] sm:$0xff]   ;;  %v16992_v41 = vld [vmem:[#allocation11 + $0x228] sm:$0xff]   ;;  %v16994_v38 = vld [vmem:[#allocation11 + $0x260] sm:$0xff]  }
 0x67d   :  { %12497 = vmatprep.mubr.bf16.mxu1 %v11576_v42  ;;  %14603 = vmatpush3.bf16.msra.mxu0 %v16952_v15  ;;  %v17757_v52 = vpop.f32.mrf.mxu1  ;;  %v16991_v15 = vld [vmem:[#allocation11 + $0x1a8] sm:$0xff]  }
 0x67e   :  { %12537 = vmatprep.mubr.bf16.mxu0 %v11578_v57  ;;  %14582 = vmatprep.subr.bf16.mxu1 %v16953_v36  ;;  %v16993_v36 = vld [vmem:[#allocation11 + $0x1e0] sm:$0xff]  }
 0x67f   :  { %v11154_v23 = vpop.f32.mrf.mxu1  ;;  %14604 = vmatprep.subr.bf16.mxu0 %v16954_v59  ;;  %v16995_v59 = vld [vmem:[#allocation11 + $0x1a0] sm:$0xff]  }
 0x680   :  { %14583 = vmatpush3.bf16.msra.mxu1 %v16955_v1  ;;  %v16996_v57 = vld [vmem:[#allocation11 + $0x220] sm:$0xff]   ;;  %v16997_v1 = vld [vmem:[#allocation11 + $0x1d8] sm:$0xff]   ;;  %v17001_v23 = vld [vmem:[#allocation11 + $0x1d0] sm:$0xff]  }
 0x681   :  { %14605 = vmatpush3.bf16.msra.mxu0 %v16956_v32  ;;  %v11155_v33 = vpop.f32.mrf.mxu1  ;;  %14584 = vmatprep.subr.bf16.mxu1 %v16957_v44  ;;  %v16998_v32 = vld [vmem:[#allocation11 + $0x258] sm:$0xff]  }
 0x682   :  { %14606 = vmatprep.subr.bf16.mxu0 %v16958_v17  ;;  %v16999_v44 = vld [vmem:[#allocation11 + $0x198] sm:$0xff]   ;;  %v17003_v33 = vld [vmem:[#allocation11 + $0x190] sm:$0xff]  }
 0x683   :  { %v17000_v17 = vld [vmem:[#allocation11 + $0x218] sm:$0xff]  }
 0x684   :  { %14585 = vmatpush3.bf16.msra.mxu1 %v16959_v47  ;;  %v17002_v47 = vld [vmem:[#allocation11 + $0x250] sm:$0xff]  }
 0x685   :  { %14607 = vmatpush3.bf16.msra.mxu0 %v16960_v45  ;;  %14586 = vmatprep.subr.bf16.mxu1 %v16961_v0  ;;  %v17004_v45 = vld [vmem:[#allocation11 + $0x210] sm:$0xff]   ;;  %v17005_v0 = vld [vmem:[#allocation11 + $0x1c8] sm:$0xff]  }
 0x686   :  { %14608 = vmatprep.subr.bf16.mxu0 %v16962_v48  ;;  %v17006_v48 = vld [vmem:[#allocation11 + $0x248] sm:$0xff]  }
 0x688   :  { %14587 = vmatpush3.bf16.msra.mxu1 %v16963_v43  ;;  %v17007_v43 = vld [vmem:[#allocation11 + $0x188] sm:$0xff]  }
 0x689   :  { %14609 = vmatpush3.bf16.msra.mxu0 %v16964_v60  ;;  %14588 = vmatprep.subr.bf16.mxu1 %v16965_v61  ;;  %v17008_v60 = vld [vmem:[#allocation11 + $0x208] sm:$0xff]   ;;  %v17009_v61 = vld [vmem:[#allocation11 + $0x1c0] sm:$0xff]  }
 0x68a   :  { %14610 = vmatprep.subr.bf16.mxu0 %v16966_v62  ;;  %v17010_v62 = vld [vmem:[#allocation11 + $0x240] sm:$0xff]  }
 0x68c   :  { %14589 = vmatpush3.bf16.msra.mxu1 %v16967_v46  ;;  %v17011_v46 = vld [vmem:[#allocation11 + $0x180] sm:$0xff]  }
 0x68d   :  { %14611 = vmatpush3.bf16.msra.mxu0 %v16968_v31  ;;  %14590 = vmatprep.subr.bf16.mxu1 %v16969_v19  ;;  %v11566_v31 = vmax.f32 %v17661_v27, 0.0  ;;  %v17012_v19 = vld [vmem:[#allocation11 + $0x200] sm:$0xff]  }
 0x68e   :  { %14612 = vmatprep.subr.bf16.mxu0 %v16970_v12  ;;  %v17013_v12 = vld [vmem:[#allocation11 + $0x2f8] sm:$0xff]  }
 0x690   :  { %14591 = vmatpush3.bf16.msra.mxu1 %v16971_v5  ;;  %v11568_v5 = vmax.f32 %v17699_v22, 0.0  ;;  %v17016_v22 = vld [vmem:[#allocation11 + $0x2b0] sm:$0xff]  }
 0x691   :  { %14613 = vmatpush3.bf16.msra.mxu0 %v16972_v6  ;;  %14592 = vmatprep.subr.bf16.mxu1 %v16973_v13  ;;  %v17014_v6 = vld [vmem:[#allocation11 + $0x2b8] sm:$0xff]   ;;  %v11579_v13 = vpack.c.bf16 %v11566_v31, %v11566_v31 }
 0x692   :  { %14614 = vmatprep.subr.bf16.mxu0 %v16974_v63  ;;  %v17015_v63 = vld [vmem:[#allocation11 + $0x2f0] sm:$0xff]  }
 0x694   :  { %14593 = vmatpush3.bf16.msra.mxu1 %v16975_v11  ;;  %v17029_v11 = vld [vmem:[#allocation11 + $0x338] sm:$0xff]  }
 0x695   :  { %14615 = vmatpush3.bf16.msra.mxu0 %v16976_v3  ;;  %14594 = vmatprep.subr.bf16.mxu1 %v16977_v2  ;;  %v11581_v3 = vpack.c.bf16 %v11568_v5, %v11568_v5  ;;  %v11153_v2 = vadd.f32 %v17757_v52, %v17740_v8 }
 0x696   :  { %14616 = vmatprep.subr.bf16.mxu0 %v16978_v9 }
 0x698   :  { %14595 = vmatpush3.bf16.msra.mxu1 %v16979_v54 }
 0x699   :  { %14617 = vmatpush3.bf16.msra.mxu0 %v16980_v56  ;;  %14624 = vmatprep.subr.bf16.mxu1 %v16981_v20  ;;  %v17017_v56 = vld [vmem:[#allocation11 + $0x2e8] sm:$0xff]   ;;  %v17030_v20 = vld [vmem:[#allocation11 + $0x330] sm:$0xff]  }
 0x69a   :  { %14646 = vmatprep.subr.bf16.mxu0 %v16982_v50 }
 0x69b   :  { %12498 = vmatmul.mubr.bf16.vlgmr.msra.gmra.mxu1 %v11575_v7  ;;  %v17019_v7 = vld [vmem:[#allocation11 + $0x2e0] sm:$0xff]  }
 0x69c   :  { %v17763_v49 = vpop.f32.mrf.mxu0  ;;  %12538 = vmatmul.mubr.bf16.vlgmr.msra.gmra.mxu0 %v11577_v35  ;;  %14625 = vmatpush3.bf16.msra.mxu1 %v16983_v4 }
 0x69d   :  { %12577 = vmatprep.mubr.bf16.mxu1 %v11580_v18  ;;  %14647 = vmatpush3.bf16.msra.mxu0 %v16984_v21  ;;  %v17031_v21 = vld [vmem:[#allocation11 + $0x328] sm:$0xff]  }
 0x69e   :  { %12617 = vmatprep.mubr.bf16.mxu0 %v11582_v25  ;;  %v17765_v14 = vpop.f32.mrf.mxu0  ;;  %14626 = vmatprep.subr.bf16.mxu1 %v16985_v10  ;;  %v17021_v25 = vld [vmem:[#allocation11 + $0x2d8] sm:$0xff]  }
 0x69f   :  { %14648 = vmatprep.subr.bf16.mxu0 %v16986_v28  ;;  %v11194_v9 = vadd.f32 %v17765_v14, %v11153_v2  ;;  %v17020_v28 = vld [vmem:[#allocation11 + $0x2a0] sm:$0xff]   ;;  %v17033_v14 = vld [vmem:[#allocation11 + $0x318] sm:$0xff]  }
 0x6a0   :  { %v11195_v37 = vpop.f32.mrf.mxu0  ;;  %14627 = vmatpush3.bf16.msra.mxu1 %v16987_v51  ;;  %v17032_v51 = vld [vmem:[#allocation11 + $0x320] sm:$0xff]  }
 0x6a1   :  { %14649 = vmatpush3.bf16.msra.mxu0 %v16988_v30  ;;  %14628 = vmatprep.subr.bf16.mxu1 %v16989_v29  ;;  %v17022_v30 = vld [vmem:[#allocation11 + $0x298] sm:$0xff]   ;;  %v17023_v29 = vld [vmem:[#allocation11 + $0x2d0] sm:$0xff]  }
 0x6a2   :  { %v11196_v42 = vpop.f32.mrf.mxu0  ;;  %14650 = vmatprep.subr.bf16.mxu0 %v16990_v55  ;;  %v11192_v55 = vadd.f32 %v17763_v49, %v17755_v16  ;;  %v17024_v37 = vld [vmem:[#allocation11 + $0x290] sm:$0xff]   ;;  %v17028_v16 = vld [vmem:[#allocation11 + $0x280] sm:$0xff]  }
 0x6a3   :  { %v17026_v42 = vld [vmem:[#allocation11 + $0x288] sm:$0xff]  }
 0x6a4   :  { %14629 = vmatpush3.bf16.msra.mxu1 %v16991_v15 }
 0x6a5   :  { %14651 = vmatpush3.bf16.msra.mxu0 %v16992_v41  ;;  %14630 = vmatprep.subr.bf16.mxu1 %v16993_v36  ;;  %v17025_v41 = vld [vmem:[#allocation11 + $0x2c8] sm:$0xff]   ;;  %v17034_v36 = vld [vmem:[#allocation11 + $0x310] sm:$0xff]  }
 0x6a6   :  { %14652 = vmatprep.subr.bf16.mxu0 %v16994_v38 }
 0x6a8   :  { %14631 = vmatpush3.bf16.msra.mxu1 %v16995_v59  ;;  %v17027_v59 = vld [vmem:[#allocation11 + $0x2c0] sm:$0xff]  }
 0x6a9   :  { %14653 = vmatpush3.bf16.msra.mxu0 %v16996_v57  ;;  %14632 = vmatprep.subr.bf16.mxu1 %v16997_v1  ;;  %v17035_v57 = vld [vmem:[#allocation11 + $0x308] sm:$0xff]   ;;  %v17036_v1 = vld [vmem:[#allocation11 + $0x300] sm:$0xff]  }
 0x6aa   :  { %14654 = vmatprep.subr.bf16.mxu0 %v16998_v32 }
 0x6ac   :  { %14633 = vmatpush3.bf16.msra.mxu1 %v16999_v44 }
 0x6ad   :  { %14655 = vmatpush3.bf16.msra.mxu0 %v17000_v17  ;;  %14634 = vmatprep.subr.bf16.mxu1 %v17001_v23  ;;  %v2680_v23 = vrot.slane %v17715_v58, %v17436_v34 }
 0x6ae   :  { %14656 = vmatprep.subr.bf16.mxu0 %v17002_v47 }
 0x6b0   :  { %14635 = vmatpush3.bf16.msra.mxu1 %v17003_v33 }
 0x6b1   :  { %14657 = vmatpush3.bf16.msra.mxu0 %v17004_v45  ;;  %14636 = vmatprep.subr.bf16.mxu1 %v17005_v0 }
 0x6b2   :  { %14658 = vmatprep.subr.bf16.mxu0 %v17006_v48 }
 0x6b4   :  { %14637 = vmatpush3.bf16.msra.mxu1 %v17007_v43 }
 0x6b5   :  { %14659 = vmatpush3.bf16.msra.mxu0 %v17008_v60  ;;  %14638 = vmatprep.subr.bf16.mxu1 %v17009_v61 }
 0x6b6   :  { %14660 = vmatprep.subr.bf16.mxu0 %v17010_v62 }
 0x6b8   :  { %14639 = vmatpush3.bf16.msra.mxu1 %v17011_v46 }
 0x6b9   :  { %14661 = vmatpush3.bf16.msra.mxu0 %v17012_v19  ;;  %14668 = vmatprep.subr.bf16.mxu1 %v17013_v12 }
 0x6ba   :  { %14748 = vmatprep.subr.bf16.mxu0 %v17275_v39 }
 0x6bb   :  { %v11232_v27 = vpop.f32.mrf.mxu1  ;;  %12578 = vmatmul.mubr.bf16.vlgmr.msra.gmra.mxu1 %v11579_v13 }
 0x6bc   :  { %v11273_v54 = vpop.f32.mrf.mxu0  ;;  %12618 = vmatmul.mubr.bf16.vlgmr.msra.gmra.mxu0 %v11581_v3  ;;  %14669 = vmatpush3.bf16.msra.mxu1 %v17014_v6  ;;  %v11233_v15 = vadd.f32 %v11232_v27, %v11192_v55 }
 0x6bd   :  { %v11234_v53 = vpop.f32.mrf.mxu1  ;;  %14670 = vmatprep.subr.bf16.mxu1 %v17015_v63  ;;  %14749 = vmatpush3.bf16.msra.mxu0 %v17029_v11 }
 0x6be   :  { %v11235_v40 = vadd.f32 %v11234_v53, %v11194_v9  ;;  %v11275_v50 = vpop.f32.mrf.mxu0  ;;  %14750 = vmatprep.subr.bf16.mxu0 %v17275_v39  ;;  %14764 = vmatprep.mubr.msk.bf16.mxu0 %vm17276_vm0, %v17275_v39  ;;  %v11274_v38 = vadd.f32 %v11273_v54, %v11233_v15 }
 0x6bf   :  { %v11236_v8 = vpop.f32.mrf.mxu1 }
 0x6c0   :  { %v11276_v52 = vadd.f32 %v11275_v50, %v11235_v40  ;;  %v11277_v24 = vpop.f32.mrf.mxu0  ;;  %14671 = vmatpush3.bf16.msra.mxu1 %v17016_v22  ;;  %v11570_v49 = vmax.f32 %v11274_v38, 0.0  ;;  %v17037_v22 = vld [vmem:[#allocation14 + $0x38] sm:$0xff]   ;;  %v17040_v40 = vld [vmem:[#allocation14 + $0x20] sm:$0xff]  }
 0x6c1   :  { %v11237_v4 = vpop.f32.mrf.mxu1  ;;  %14672 = vmatprep.subr.bf16.mxu1 %v17017_v56  ;;  %14751 = vmatpush3.bf16.msra.mxu0 %v17030_v20  ;;  %v17038_v56 = vld [vmem:[#allocation14 + $0x30] sm:$0xff]   ;;  %v17039_v20 = vld [vmem:[#allocation14 + $0x28] sm:$0xff]   ;;  %v17041_v8 = vld [vmem:[#allocation14 + $0x18] sm:$0xff]  }
 0x6c2   :  { %v11571_v35 = vmax.f32 %v11276_v52, 0.0  ;;  %v11278_v10 = vpop.f32.mrf.mxu0  ;;  %14752 = vmatprep.subr.bf16.mxu0 %v17275_v39  ;;  %v11583_v32 = vpack.c.bf16 %v11570_v49, %v11570_v49  ;;  %v17042_v4 = vld [vmem:[#allocation14 + $0x10] sm:$0xff]  }
 0x6c4   :  { %v11584_v18 = vpack.c.bf16 %v11571_v35, %v11571_v35  ;;  %14673 = vmatpush3.bf16.msra.mxu1 %v17018_v26 }
 0x6c5   :  { %14674 = vmatprep.subr.bf16.mxu1 %v17019_v7  ;;  %14753 = vmatpush3.bf16.msra.mxu0 %v17031_v21 }
 0x6c6   :  { %12657 = vmatprep.mubr.bf16.mxu1 %v11584_v18  ;;  %14754 = vmatprep.subr.bf16.mxu0 %v17275_v39 }
 0x6c8   :  { %14675 = vmatpush3.bf16.msra.mxu1 %v17020_v28 }
 0x6c9   :  { %14676 = vmatprep.subr.bf16.mxu1 %v17021_v25  ;;  %14755 = vmatpush3.bf16.msra.mxu0 %v17032_v51 }
 0x6ca   :  { %14756 = vmatprep.subr.bf16.mxu0 %v17275_v39 }
 0x6cc   :  { %14677 = vmatpush3.bf16.msra.mxu1 %v17022_v30 }
 0x6cd   :  { %14678 = vmatprep.subr.bf16.mxu1 %v17023_v29  ;;  %14757 = vmatpush3.bf16.msra.mxu0 %v17033_v14 }
 0x6ce   :  { %14758 = vmatprep.subr.bf16.mxu0 %v17275_v39 }
 0x6d0   :  { %14679 = vmatpush3.bf16.msra.mxu1 %v17024_v37 }
 0x6d1   :  { %14680 = vmatprep.subr.bf16.mxu1 %v17025_v41  ;;  %14759 = vmatpush3.bf16.msra.mxu0 %v17034_v36 }
 0x6d2   :  { %14760 = vmatprep.subr.bf16.mxu0 %v17275_v39 }
 0x6d4   :  { %14681 = vmatpush3.bf16.msra.mxu1 %v17026_v42  ;;  %v14294_v42 = vld [vmem:[#allocation13] ss:$0 sm:$0xff] }
 0x6d5   :  { %14682 = vmatprep.subr.bf16.mxu1 %v17027_v59  ;;  %14761 = vmatpush3.bf16.msra.mxu0 %v17035_v57 }
 0x6d6   :  { %14762 = vmatprep.subr.bf16.mxu0 %v17275_v39 }
 0x6d8   :  { %14683 = vmatpush3.bf16.msra.mxu1 %v17028_v16 }
 0x6d9   :  { %14763 = vmatpush3.bf16.msra.mxu0 %v17036_v1  ;;  %14768 = vmatprep.subr.bf16.mxu1 %v17275_v39 }
 0x6db   :  { %v14433_v44 = vpop.f32.mrf.mxu1  ;;  %12658 = vmatmul.mubr.bf16.vlgmr.msra.gmra.mxu1 %v11583_v32 }
 0x6dc   :  { %v14455_v17 = vpop.f32.mrf.mxu0  ;;  %14784 = vmatprep.mubr.msk.bf16.mxu1 %vm17276_vm0, %v17275_v39  ;;  %14769 = vmatpush3.bf16.msra.mxu1 %v17037_v22 }
 0x6dd   :  { %v14434_v47 = vpop.f32.mrf.mxu1  ;;  %14770 = vmatprep.subr.bf16.mxu1 %v17275_v39 }
 0x6de   :  { %v14435_v33 = vadd.f32 %v14434_v47, %v14433_v44  ;;  %v14456_v45 = vpop.f32.mrf.mxu0 }
 0x6df   :  { %v14457_v0 = vadd.f32 %v14456_v45, %v14455_v17  ;;  %v14436_v48 = vpop.f32.mrf.mxu1 }
 0x6e0   :  { %v11315_v43 = vadd.f32 %v14435_v33, %v2680_v23  ;;  %v14458_v60 = vpop.f32.mrf.mxu0  ;;  %14771 = vmatpush3.bf16.msra.mxu1 %v17038_v56 }
 0x6e1   :  { %v14437_v61 = vpop.f32.mrf.mxu1  ;;  %14772 = vmatprep.subr.bf16.mxu1 %v17275_v39 }
 0x6e2   :  { %v11355_v62 = vadd.f32 %v14457_v0, %v11315_v43  ;;  %v14459_v46 = vpop.f32.mrf.mxu0 }
 0x6e4   :  { %14773 = vmatpush3.bf16.msra.mxu1 %v17039_v20 }
 0x6e5   :  { %14774 = vmatprep.subr.bf16.mxu1 %v17275_v39 }
 0x6e8   :  { %14775 = vmatpush3.bf16.msra.mxu1 %v17040_v40 }
 0x6e9   :  { %14776 = vmatprep.subr.bf16.mxu1 %v17275_v39 }
 0x6ec   :  { %14777 = vmatpush3.bf16.msra.mxu1 %v17041_v8 }
 0x6ed   :  { %14778 = vmatprep.subr.bf16.mxu1 %v17275_v39 }
 0x6f0   :  { %14779 = vmatpush3.bf16.msra.mxu1 %v17042_v4 }
 0x6f1   :  { %14780 = vmatprep.subr.bf16.mxu1 %v17275_v39 }
 0x6fb   :  { %v14477_v31 = vpop.f32.mrf.mxu1 }
 0x6fc   :  { %v14499_v19 = vpop.f32.mrf.mxu0 }
 0x6fd   :  { %v14478_v12 = vpop.f32.mrf.mxu1 }
 0x6fe   :  { %v14500_v5 = vpop.f32.mrf.mxu0  ;;  %v14479_v50 = vadd.f32 %v14478_v12, %v14477_v31 }
 0x6ff   :  { %v14480_v6 = vpop.f32.mrf.mxu1  ;;  %v14501_v24 = vadd.f32 %v14500_v5, %v14499_v19 }
 0x700   :  { %v14502_v13 = vpop.f32.mrf.mxu0  ;;  %v11395_v52 = vadd.f32 %v14479_v50, %v11355_v62  ;;  %v14399_v50 = vld [vmem:[#allocation16] ss:$0 sm:$0xff] }
 0x701   :  { %v14481_v34 = vpop.f32.mrf.mxu1  ;;  %v17043_v13 = vld [vmem:[#allocation14 + $0x8] sm:$0xff]  }
 0x702   :  { %v14503_v58 = vpop.f32.mrf.mxu0  ;;  %v11435_v7 = vadd.f32 %v14501_v24, %v11395_v52  ;;  %14781 = vmatpush3.bf16.msra.mxu1 %v17043_v13  ;;  %v17044_v34 = vld [vmem:[#allocation14] sm:$0xff]  }
 0x703   :  { %14782 = vmatprep.subr.bf16.mxu1 %v17275_v39 }
 0x706   :  { %14783 = vmatpush3.bf16.msra.mxu1 %v17044_v34 }
 0x71b   :  { %v14521_v63 = vpop.f32.mrf.mxu1 }
 0x71c   :  { %v14543_v11 = vpop.f32.mrf.mxu0 }
 0x71d   :  { %v14522_v3 = vpop.f32.mrf.mxu1 }
 0x71e   :  { %v14544_v2 = vpop.f32.mrf.mxu0  ;;  %v14523_v26 = vadd.f32 %v14522_v3, %v14521_v63 }
 0x71f   :  { %v14524_v27 = vpop.f32.mrf.mxu1  ;;  %v14545_v35 = vadd.f32 %v14544_v2, %v14543_v11 }
 0x720   :  { %v14546_v9 = vpop.f32.mrf.mxu0  ;;  %v11475_v21 = vadd.f32 %v14523_v26, %v11435_v7 }
 0x721   :  { %v14525_v54 = vpop.f32.mrf.mxu1 }
 0x722   :  { %v14547_v53 = vpop.f32.mrf.mxu0  ;;  %v11515_v10 = vadd.f32 %v14545_v35, %v11475_v21 }
 0x73b   :  { %v11554_v18 = vpop.f32.mrf.mxu1 }
 0x73c   :  { %v11555_v28 = vadd.f32 %v11554_v18, %v11515_v10  ;;  %v14574_v25 = vpop.f32.mrf.mxu0 }
 0x73d   :  { %v14746_v51 = vpop.f32.mrf.mxu1 }
 0x73e   :  { %v11572_v30 = vmax.f32 %v11555_v28, 0.0  ;;  %v14575_v29 = vpop.f32.mrf.mxu0 }
 0x73f   :  { %v14576_v14 = vadd.f32 %v14575_v29, %v14574_v25  ;;  %v11557_v55 = vpop.f32.mrf.mxu1 }
 0x740   :  { %v11585_v37 = vpack.c.bf16 %v11572_v30, %v11572_v30  ;;  %v14577_v15 = vpop.f32.mrf.mxu0 }
 0x741   :  { %v14747_v41 = vpop.f32.mrf.mxu1  ;;  %v12460_v16 = vadd.f32 %v14576_v14, %v14294_v42 }
 0x742   :  { %v14578_v36 = vpop.f32.mrf.mxu0  ;;  %14765 = vmatmul.mubr.bf16.vlgmr.msra.gmra.mxu0 %v11585_v37 }
 0x75b   :  { %v14596_v38 = vpop.f32.mrf.mxu1 }
 0x75c   :  { %v14618_v59 = vpop.f32.mrf.mxu0 }
 0x75d   :  { %v14597_v57 = vpop.f32.mrf.mxu1 }
 0x75e   :  { %v14598_v49 = vadd.f32 %v14597_v57, %v14596_v38  ;;  %v14619_v1 = vpop.f32.mrf.mxu0 }
 0x75f   :  { %v14620_v32 = vadd.f32 %v14619_v1, %v14618_v59  ;;  %v14599_v44 = vpop.f32.mrf.mxu1 }
 0x760   :  { %v12500_v17 = vadd.f32 %v14598_v49, %v12460_v16  ;;  %v14621_v23 = vpop.f32.mrf.mxu0 }
 0x761   :  { %v14600_v47 = vpop.f32.mrf.mxu1 }
 0x762   :  { %v12540_v33 = vadd.f32 %v14620_v32, %v12500_v17  ;;  %v14622_v45 = vpop.f32.mrf.mxu0 }
 0x77b   :  { %v14640_v0 = vpop.f32.mrf.mxu1 }
 0x77c   :  { %v14662_v48 = vpop.f32.mrf.mxu0 }
 0x77d   :  { %v14641_v43 = vpop.f32.mrf.mxu1 }
 0x77e   :  { %v14642_v60 = vadd.f32 %v14641_v43, %v14640_v0  ;;  %v14663_v61 = vpop.f32.mrf.mxu0 }
 0x77f   :  { %v14664_v62 = vadd.f32 %v14663_v61, %v14662_v48  ;;  %v14643_v46 = vpop.f32.mrf.mxu1 }
 0x780   :  { %v12580_v31 = vadd.f32 %v14642_v60, %v12540_v33  ;;  %v14665_v19 = vpop.f32.mrf.mxu0 }
 0x781   :  { %v14644_v12 = vpop.f32.mrf.mxu1 }
 0x782   :  { %v12620_v5 = vadd.f32 %v14664_v62, %v12580_v31  ;;  %v14666_v6 = vpop.f32.mrf.mxu0 }
 0x79b   :  { %v14684_v58 = vpop.f32.mrf.mxu1 }
 0x79d   :  { %v14685_v63 = vpop.f32.mrf.mxu1 }
 0x79e   :  { %v14686_v11 = vadd.f32 %v14685_v63, %v14684_v58 }
 0x79f   :  { %v14687_v3 = vpop.f32.mrf.mxu1 }
 0x7a0   :  { %v12660_v2 = vadd.f32 %v14686_v11, %v12620_v5 }
 0x7a1   :  { %v14688_v27 = vpop.f32.mrf.mxu1 }
 0x802   :  { %v12699_v9 = vpop.f32.mrf.mxu0 }
 0x803   :  { %v12700_v54 = vadd.f32 %v12699_v9, %v12660_v2 }
 0x804   :  { %v14766_v22 = vpop.f32.mrf.mxu0 }
 0x805   :  { %v12705_v53 = vmax.f32 %v12700_v54, 0.0 }
 0x806   :  { %v12702_v56 = vpop.f32.mrf.mxu0 }
 0x807   :  { %v12706_v20 = vpack.c.bf16 %v12705_v53, %v12705_v53 }
 0x808   :  { %v14767_v40 = vpop.f32.mrf.mxu0 }
 0x809   :  { %14785 = vmatmul.mubr.bf16.vlgmr.msra.gmra.mxu1 %v12706_v20 }
 0x8c9   :  { %v12812_v39 = vpop.f32.mrf.mxu1 }
 0x8ca   :  { %v12813_v8 = vadd.f32 %v14399_v50, %v12812_v39 }
 0x8cb   :  { %v14786_v52 = vpop.f32.mrf.mxu1 }
 0x8cc   :  { %12818 = vst [vmem:[#allocation17] sm:$0xff] %v12813_v8 }
 0x8cd   :  { %v12815_v24 = vpop.f32.mrf.mxu1 }
 0x8ce   :  { %17240 = shalt.err (!%p17237_p7)
}
 0x8cf   :  { %12828 = dma.vmem_to_hbm [thread:$0]  %s12826_s8, 128, %s17808_s9, [#allocation4]   ;;  %v14787_v26 = vpop.f32.mrf.mxu1 }
 0x8d0   :  { %17259 = dma.done.wait [#allocation4], 128  }
 0x8d1   :  { %17260 = vsyncadd [#allocation4], 4294967168 }
 0x8d2   :  { %12832 = vsyncpa [#allocation3], 1 }
 0x8d3   :  { %12833 = vsyncpa [#allocation6], 1 }
 0x8d4   :  { %12834 = vsyncpa [#allocation9], 1 }
 0x8d5   :  { %12835 = vsyncpa [#allocation12], 1 }
 0x8d6   :  { %12836 = vsyncpa [#allocation15], 1 }
 0x8d7   :  { %12837 = vsyncpa [#allocation4], 1 }

</bundles_post_ra>
